<compile_context>
chip_gen: v5e
topology: v5e:2x2
jax: 0.10.0
libtpu: 0.0.40
codegen_flags: <defaults>
</compile_context>

<pallas_src>
import jax
import jax.numpy as jnp
from jax import lax
from jax.experimental import pallas as pl
from jax.experimental.pallas import tpu as pltpu

IN_CHANNELS = 32
OUT_CHANNELS = 64
KERNEL_SIZE = 4
STRIDE = 2
PADDING = 1
NUM_GROUPS = 4
BN_EPS = 1e-5
GN_EPS = 1e-5


def _phase_stacked_weight_t(conv_w):
    """(Cin, Cout, 4, 4) conv-transpose weight -> (4*Cout, 9*Cin) sub-pixel matmul weight.

    Row    : (ph*2 + pw)*Cout + oc   for output pixel (2a+ph, 2b+pw).
    Column : (r*3 + c)*Cin + ci      for the 3x3 window of the pad-1 input around (a, b).
    Phase (ph, pw) uses taps kh = 3-2*dh-ph, kw = 3-2*dw-pw for window offsets dh=r-ph,
    dw=c-pw in {0,1}; all other window positions get zero weight.
    """
    cin, cout, _, _ = conv_w.shape
    cw = jnp.transpose(conv_w, (1, 0, 2, 3))                        # (Cout, Cin, kh, kw)
    zeros = jnp.zeros((cout, cin), conv_w.dtype)
    phase_rows = []
    for ph in range(2):
        for pw in range(2):
            tap_cols = []
            for r in range(3):
                for c in range(3):
                    dh, dw = r - ph, c - pw
                    if dh in (0, 1) and dw in (0, 1):
                        kh = 3 - 2 * dh - ph
                        kw = 3 - 2 * dw - pw
                        tap_cols.append(cw[:, :, kh, kw])
                    else:
                        tap_cols.append(zeros)
            phase_rows.append(jnp.concatenate(tap_cols, axis=1))    # (Cout, 9*Cin)
    return jnp.concatenate(phase_rows, axis=0)                       # (4*Cout, 9*Cin)


def model_forward(x, conv_w, conv_b, bn_w, bn_b, gn_w, gn_b):
    del conv_b  # training-mode BatchNorm cancels the conv bias exactly
    N, Cin, H, W = x.shape
    C = OUT_CHANNELS
    G = NUM_GROUPS
    CPG = C // G
    HW = H * W                      # pooled spatial size == input spatial size (stride 2, pool 2)
    M = N * HW
    K = 9 * Cin
    PADF = W + 1                    # flat-index pad covers every shift dr*W+dc in [-(W+1), W+1]
    HWP = HW + 2 * PADF

    x_flat = x.reshape(N * Cin, HW)                 # row-major NCHW view; no data movement
    w_t = _phase_stacked_weight_t(conv_w)           # (4C, K)

    def kernel(x_ref, w_ref, bnw_ref, bnb_ref, gnw_ref, gnb_ref, o_ref, xp_ref, pt_ref):
        f32 = jnp.float32

        # ---- 1) zero-pad the flattened spatial axis into a VMEM scratch -----------------
        xp_ref[...] = jnp.zeros((N * Cin, HWP), f32)
        xp_ref[:, PADF:PADF + HW] = x_ref[...]

        # lane-position masks for the horizontal (dc = +-1) taps:  b = s % W
        col = lax.broadcasted_iota(jnp.int32, (1, HW), 1)
        b_pos = col & (W - 1)                        # W is a power of two
        mask_l = b_pos >= 1                          # valid when dc == -1
        mask_r = b_pos <= W - 2                      # valid when dc == +1

        # ---- 2) build P^T (9*Cin, N*HW): shifted + masked copies of the flat input ------
        for t in range(9):
            dr, dc = t // 3 - 1, t % 3 - 1
            off = dr * W + dc
            for n in range(N):
                win = xp_ref[n * Cin:(n + 1) * Cin, PADF + off:PADF + off + HW]   # (Cin, HW)
                if dc == -1:
                    win = jnp.where(mask_l, win, 0.0)
                elif dc == 1:
                    win = jnp.where(mask_r, win, 0.0)
                pt_ref[t * Cin:(t + 1) * Cin, n * HW:(n + 1) * HW] = win

        # ---- 3) conv-transpose: one lane-dense matmul (4C, K) @ (K, M) ------------------
        y = jnp.dot(w_ref[...], pt_ref[...], preferred_element_type=f32)          # (4C, M)

        # ---- 4) BatchNorm (training): stats over all N*Ho*Wo = 4*M positions per channel
        s = jnp.sum(y, axis=1, keepdims=True)                                     # (4C, 1)
        ss = jnp.sum(y * y, axis=1, keepdims=True)
        s = s[:2 * C] + s[2 * C:]
        s = s[:C] + s[C:]                                                         # (C, 1)
        ss = ss[:2 * C] + ss[2 * C:]
        ss = ss[:C] + ss[C:]
        inv_cnt = 1.0 / (4 * M)
        mean = s * inv_cnt
        var = ss * inv_cnt - mean * mean
        scale = bnw_ref[...] * lax.rsqrt(var + BN_EPS)                            # (C, 1)
        shift = bnb_ref[...] - mean * scale
        scale4 = jnp.concatenate([scale] * 4, axis=0)                             # (4C, 1)
        shift4 = jnp.concatenate([shift] * 4, axis=0)
        z = y * scale4 + shift4                                                   # (4C, M)

        # ---- 5) 2x2 max-pool == max over the 4 phase row-blocks; tanh after (monotone) --
        zm = jnp.maximum(jnp.maximum(z[:C], z[C:2 * C]),
                         jnp.maximum(z[2 * C:3 * C], z[3 * C:]))                  # (C, M)
        p = jnp.tanh(zm)

        # ---- 6) GroupNorm per (sample, group); 256-lane dense NCHW output stores --------
        gnw = gnw_ref[...]                                                        # (C, 1)
        gnb = gnb_ref[...]
        inv_g = 1.0 / (HW * CPG)
        for n in range(N):
            pn = p[:, n * HW:(n + 1) * HW]                                        # (C, HW)
            for g in range(G):
                blk = pn[g * CPG:(g + 1) * CPG, :]                                # (CPG, HW)
                sg = jnp.sum(jnp.sum(blk, axis=1, keepdims=True), axis=0, keepdims=True)
                ssg = jnp.sum(jnp.sum(blk * blk, axis=1, keepdims=True), axis=0, keepdims=True)
                mg = sg * inv_g
                vg = ssg * inv_g - mg * mg
                ig = lax.rsqrt(vg + GN_EPS)
                wg = gnw[g * CPG:(g + 1) * CPG, :]                                # (CPG, 1)
                bg = gnb[g * CPG:(g + 1) * CPG, :]
                o_ref[n * C + g * CPG:n * C + (g + 1) * CPG, :] = (blk - mg) * (ig * wg) + bg

    out_flat = pl.pallas_call(
        kernel,
        out_shape=jax.ShapeDtypeStruct((N * C, HW), jnp.float32),
        grid=(1,),
        in_specs=[pl.BlockSpec((N * Cin, HW), lambda i: (0, 0)),
                  pl.BlockSpec((4 * C, K), lambda i: (0, 0)),
                  pl.BlockSpec((C, 1), lambda i: (0, 0)),
                  pl.BlockSpec((C, 1), lambda i: (0, 0)),
                  pl.BlockSpec((C, 1), lambda i: (0, 0)),
                  pl.BlockSpec((C, 1), lambda i: (0, 0))],
        out_specs=pl.BlockSpec((N * C, HW), lambda i: (0, 0)),
        scratch_shapes=[pltpu.VMEM((N * Cin, HWP), jnp.float32),
                        pltpu.VMEM((K, M), jnp.float32)],
        compiler_params=pltpu.CompilerParams(dimension_semantics=("arbitrary",)),
    )(x_flat, w_t, bn_w.reshape(C, 1), bn_b.reshape(C, 1),
      gn_w.reshape(C, 1), gn_b.reshape(C, 1))

    # Kernel wrote NCHW layout directly -> metadata-only reshape, no transpose.
    return out_flat.reshape(N, C, H, W)


# ---------------- pure-JAX reference for verification ----------------
def _reference(x, conv_w, conv_b, bn_w, bn_b, gn_w, gn_b):
    k = KERNEL_SIZE
    w_conv = jnp.transpose(conv_w, (1, 0, 2, 3))[:, :, ::-1, ::-1]
    pad = k - 1 - PADDING
    y = lax.conv_general_dilated(
        x, w_conv, window_strides=(1, 1),
        padding=((pad, pad), (pad, pad)),
        lhs_dilation=(STRIDE, STRIDE),
        dimension_numbers=("NCHW", "OIHW", "NCHW"))
    y = y + conv_b[None, :, None, None]
    m = jnp.mean(y, axis=(0, 2, 3), keepdims=True)
    v = jnp.var(y, axis=(0, 2, 3), keepdims=True)
    y = (y - m) / jnp.sqrt(v + BN_EPS) * bn_w[None, :, None, None] + bn_b[None, :, None, None]
    y = jnp.tanh(y)
    Nn, C, Ho, Wo = y.shape
    y = y.reshape(Nn, C, Ho // 2, 2, Wo // 2, 2).max(axis=(3, 5))
    cpg = C // NUM_GROUPS
    yg = y.reshape(Nn, NUM_GROUPS, cpg, Ho // 2, Wo // 2)
    gm = jnp.mean(yg, axis=(2, 3, 4), keepdims=True)
    gv = jnp.var(yg, axis=(2, 3, 4), keepdims=True)
    yg = (yg - gm) / jnp.sqrt(gv + GN_EPS)
    y = yg.reshape(Nn, C, Ho // 2, Wo // 2)
    return y * gn_w[None, :, None, None] + gn_b[None, :, None, None]


if __name__ == "__main__":
    key = jax.random.PRNGKey(0)
    ks = jax.random.split(key, 7)
    N, H, W = 2, 16, 16
    x = jax.random.normal(ks[0], (N, IN_CHANNELS, H, W), jnp.float32)
    conv_w = 0.05 * jax.random.normal(ks[1], (IN_CHANNELS, OUT_CHANNELS, KERNEL_SIZE, KERNEL_SIZE),
                                      jnp.float32)
    conv_b = 0.05 * jax.random.normal(ks[2], (OUT_CHANNELS,), jnp.float32)
    bn_w = 1.0 + 0.1 * jax.random.normal(ks[3], (OUT_CHANNELS,), jnp.float32)
    bn_b = 0.1 * jax.random.normal(ks[4], (OUT_CHANNELS,), jnp.float32)
    gn_w = 1.0 + 0.1 * jax.random.normal(ks[5], (OUT_CHANNELS,), jnp.float32)
    gn_b = 0.1 * jax.random.normal(ks[6], (OUT_CHANNELS,), jnp.float32)
    # BatchNorm running mean/var exist in the module but do not affect training-mode output
    # (their in-place update is a buffer side effect only, not part of the returned tensor).
    bn_running_mean = jnp.zeros((OUT_CHANNELS,), jnp.float32)
    bn_running_var = jnp.ones((OUT_CHANNELS,), jnp.float32)

    out = jax.jit(model_forward)(x, conv_w, conv_b, bn_w, bn_b, gn_w, gn_b)
    out = jax.block_until_ready(out)

    ref = _reference(x, conv_w, conv_b, bn_w, bn_b, gn_w, gn_b)
    assert out.shape == ref.shape == (N, OUT_CHANNELS, H, W)
    max_err = float(jnp.max(jnp.abs(out - ref)))
    assert jnp.allclose(out, ref, rtol=1e-3, atol=1e-3), f"max abs err {max_err}"
    print("KERNEL_OK")
</pallas_src>

<mosaic_0001>
module attributes {stable_mosaic.version = 11 : i64} {
  func.func @kernel(%arg0: i32, %arg1: memref<64x256xf32, #tpu.memory_space<vmem>>, %arg2: memref<256x288xf32, #tpu.memory_space<vmem>>, %arg3: memref<64x1xf32, #tpu.memory_space<vmem>>, %arg4: memref<64x1xf32, #tpu.memory_space<vmem>>, %arg5: memref<64x1xf32, #tpu.memory_space<vmem>>, %arg6: memref<64x1xf32, #tpu.memory_space<vmem>>, %arg7: memref<128x256xf32, #tpu.memory_space<vmem>>, %arg8: memref<64x290xf32, #tpu.memory_space<vmem>>, %arg9: memref<288x512xf32, #tpu.memory_space<vmem>>) attributes {dimension_semantics = [#tpu.dimension_semantics<arbitrary>], iteration_bounds = array<i64: 1>, scalar_prefetch = 0 : i64, scratch_operands = 2 : i64, tpu.core_type = #tpu.core_type<tc>, window_params = [{pipeline_mode = #tpu.pipeline_mode<synchronous>, transform_indices = @transform_0, window_bounds = array<i64: 64, 256>}, {pipeline_mode = #tpu.pipeline_mode<synchronous>, transform_indices = @transform_1, window_bounds = array<i64: 256, 288>}, {pipeline_mode = #tpu.pipeline_mode<synchronous>, transform_indices = @transform_2, window_bounds = array<i64: 64, 1>}, {pipeline_mode = #tpu.pipeline_mode<synchronous>, transform_indices = @transform_3, window_bounds = array<i64: 64, 1>}, {pipeline_mode = #tpu.pipeline_mode<synchronous>, transform_indices = @transform_4, window_bounds = array<i64: 64, 1>}, {pipeline_mode = #tpu.pipeline_mode<synchronous>, transform_indices = @transform_5, window_bounds = array<i64: 64, 1>}, {pipeline_mode = #tpu.pipeline_mode<synchronous>, transform_indices = @transform_6, window_bounds = array<i64: 128, 256>}]} {
    %cst = arith.constant 0.000000e+00 : f32
    %0 = vector.broadcast %cst : f32 to vector<64x290xf32>
    %c0 = arith.constant 0 : index
    %c0_0 = arith.constant 0 : index
    %1 = vector.load %arg8[%c0, %c0_0] : memref<64x290xf32, #tpu.memory_space<vmem>>, vector<64x290xf32>
    tpu.vector_store %arg8[%c0, %c0_0], %0 {strides = array<i32>} : memref<64x290xf32, #tpu.memory_space<vmem>>, vector<64x290xf32>,
    %c0_1 = arith.constant 0 : index
    %c0_2 = arith.constant 0 : index
    %2 = vector.load %arg1[%c0_1, %c0_2] : memref<64x256xf32, #tpu.memory_space<vmem>>, vector<64x256xf32>
    %c0_3 = arith.constant 0 : index
    %c17 = arith.constant 17 : index
    %3 = vector.load %arg8[%c0_3, %c17] : memref<64x290xf32, #tpu.memory_space<vmem>>, vector<64x256xf32>
    tpu.vector_store %arg8[%c0_3, %c17], %2 {strides = array<i32>} : memref<64x290xf32, #tpu.memory_space<vmem>>, vector<64x256xf32>,
    %4 = tpu.iota {dimensions = array<i32: 1>} : vector<1x256xi32>
    %c15_i32 = arith.constant 15 : i32
    %5 = vector.broadcast %c15_i32 : i32 to vector<1x256xi32>
    %6 = arith.andi %4, %5 : vector<1x256xi32>
    %c1_i32 = arith.constant 1 : i32
    %7 = vector.broadcast %c1_i32 : i32 to vector<1x256xi32>
    %8 = arith.cmpi sge, %6, %7 : vector<1x256xi32>
    %c14_i32 = arith.constant 14 : i32
    %9 = vector.broadcast %c14_i32 : i32 to vector<1x256xi32>
    %10 = arith.cmpi sle, %6, %9 : vector<1x256xi32>
    %c0_4 = arith.constant 0 : index
    %c0_5 = arith.constant 0 : index
    %11 = vector.load %arg8[%c0_4, %c0_5] : memref<64x290xf32, #tpu.memory_space<vmem>>, vector<32x256xf32>
    %cst_6 = arith.constant 0.000000e+00 : f32
    %12 = vector.shape_cast %8 : vector<1x256xi1> to vector<1x256xi1>
    %13 = vector.broadcast %12 : vector<1x256xi1> to vector<32x256xi1>
    %14 = vector.broadcast %cst_6 : f32 to vector<32x256xf32>
    %15 = arith.select %13, %11, %14 : vector<32x256xi1>, vector<32x256xf32>
    %c0_7 = arith.constant 0 : index
    %c0_8 = arith.constant 0 : index
    %16 = vector.load %arg9[%c0_7, %c0_8] : memref<288x512xf32, #tpu.memory_space<vmem>>, vector<32x256xf32>
    tpu.vector_store %arg9[%c0_7, %c0_8], %15 {strides = array<i32>} : memref<288x512xf32, #tpu.memory_space<vmem>>, vector<32x256xf32>,
    %c32 = arith.constant 32 : index
    %c0_9 = arith.constant 0 : index
    %17 = vector.load %arg8[%c32, %c0_9] : memref<64x290xf32, #tpu.memory_space<vmem>>, vector<32x256xf32>
    %cst_10 = arith.constant 0.000000e+00 : f32
    %18 = vector.shape_cast %8 : vector<1x256xi1> to vector<1x256xi1>
    %19 = vector.broadcast %18 : vector<1x256xi1> to vector<32x256xi1>
    %20 = vector.broadcast %cst_10 : f32 to vector<32x256xf32>
    %21 = arith.select %19, %17, %20 : vector<32x256xi1>, vector<32x256xf32>
    %c0_11 = arith.constant 0 : index
    %c256 = arith.constant 256 : index
    %22 = vector.load %arg9[%c0_11, %c256] : memref<288x512xf32, #tpu.memory_space<vmem>>, vector<32x256xf32>
    tpu.vector_store %arg9[%c0_11, %c256], %21 {strides = array<i32>} : memref<288x512xf32, #tpu.memory_space<vmem>>, vector<32x256xf32>,
    %c0_12 = arith.constant 0 : index
    %c1 = arith.constant 1 : index
    %23 = vector.load %arg8[%c0_12, %c1] : memref<64x290xf32, #tpu.memory_space<vmem>>, vector<32x256xf32>
    %c32_13 = arith.constant 32 : index
    %c0_14 = arith.constant 0 : index
    %24 = vector.load %arg9[%c32_13, %c0_14] : memref<288x512xf32, #tpu.memory_space<vmem>>, vector<32x256xf32>
    tpu.vector_store %arg9[%c32_13, %c0_14], %23 {strides = array<i32>} : memref<288x512xf32, #tpu.memory_space<vmem>>, vector<32x256xf32>,
    %c32_15 = arith.constant 32 : index
    %c1_16 = arith.constant 1 : index
    %25 = vector.load %arg8[%c32_15, %c1_16] : memref<64x290xf32, #tpu.memory_space<vmem>>, vector<32x256xf32>
    %c32_17 = arith.constant 32 : index
    %c256_18 = arith.constant 256 : index
    %26 = vector.load %arg9[%c32_17, %c256_18] : memref<288x512xf32, #tpu.memory_space<vmem>>, vector<32x256xf32>
    tpu.vector_store %arg9[%c32_17, %c256_18], %25 {strides = array<i32>} : memref<288x512xf32, #tpu.memory_space<vmem>>, vector<32x256xf32>,
    %c0_19 = arith.constant 0 : index
    %c2 = arith.constant 2 : index
    %27 = vector.load %arg8[%c0_19, %c2] : memref<64x290xf32, #tpu.memory_space<vmem>>, vector<32x256xf32>
    %cst_20 = arith.constant 0.000000e+00 : f32
    %28 = vector.shape_cast %10 : vector<1x256xi1> to vector<1x256xi1>
    %29 = vector.broadcast %28 : vector<1x256xi1> to vector<32x256xi1>
    %30 = vector.broadcast %cst_20 : f32 to vector<32x256xf32>
    %31 = arith.select %29, %27, %30 : vector<32x256xi1>, vector<32x256xf32>
    %c64 = arith.constant 64 : index
    %c0_21 = arith.constant 0 : index
    %32 = vector.load %arg9[%c64, %c0_21] : memref<288x512xf32, #tpu.memory_space<vmem>>, vector<32x256xf32>
    tpu.vector_store %arg9[%c64, %c0_21], %31 {strides = array<i32>} : memref<288x512xf32, #tpu.memory_space<vmem>>, vector<32x256xf32>,
    %c32_22 = arith.constant 32 : index
    %c2_23 = arith.constant 2 : index
    %33 = vector.load %arg8[%c32_22, %c2_23] : memref<64x290xf32, #tpu.memory_space<vmem>>, vector<32x256xf32>
    %cst_24 = arith.constant 0.000000e+00 : f32
    %34 = vector.shape_cast %10 : vector<1x256xi1> to vector<1x256xi1>
    %35 = vector.broadcast %34 : vector<1x256xi1> to vector<32x256xi1>
    %36 = vector.broadcast %cst_24 : f32 to vector<32x256xf32>
    %37 = arith.select %35, %33, %36 : vector<32x256xi1>, vector<32x256xf32>
    %c64_25 = arith.constant 64 : index
    %c256_26 = arith.constant 256 : index
    %38 = vector.load %arg9[%c64_25, %c256_26] : memref<288x512xf32, #tpu.memory_space<vmem>>, vector<32x256xf32>
    tpu.vector_store %arg9[%c64_25, %c256_26], %37 {strides = array<i32>} : memref<288x512xf32, #tpu.memory_space<vmem>>, vector<32x256xf32>,
    %c0_27 = arith.constant 0 : index
    %c16 = arith.constant 16 : index
    %39 = vector.load %arg8[%c0_27, %c16] : memref<64x290xf32, #tpu.memory_space<vmem>>, vector<32x256xf32>
    %cst_28 = arith.constant 0.000000e+00 : f32
    %40 = vector.shape_cast %8 : vector<1x256xi1> to vector<1x256xi1>
    %41 = vector.broadcast %40 : vector<1x256xi1> to vector<32x256xi1>
    %42 = vector.broadcast %cst_28 : f32 to vector<32x256xf32>
    %43 = arith.select %41, %39, %42 : vector<32x256xi1>, vector<32x256xf32>
    %c96 = arith.constant 96 : index
    %c0_29 = arith.constant 0 : index
    %44 = vector.load %arg9[%c96, %c0_29] : memref<288x512xf32, #tpu.memory_space<vmem>>, vector<32x256xf32>
    tpu.vector_store %arg9[%c96, %c0_29], %43 {strides = array<i32>} : memref<288x512xf32, #tpu.memory_space<vmem>>, vector<32x256xf32>,
    %c32_30 = arith.constant 32 : index
    %c16_31 = arith.constant 16 : index
    %45 = vector.load %arg8[%c32_30, %c16_31] : memref<64x290xf32, #tpu.memory_space<vmem>>, vector<32x256xf32>
    %cst_32 = arith.constant 0.000000e+00 : f32
    %46 = vector.shape_cast %8 : vector<1x256xi1> to vector<1x256xi1>
    %47 = vector.broadcast %46 : vector<1x256xi1> to vector<32x256xi1>
    %48 = vector.broadcast %cst_32 : f32 to vector<32x256xf32>
    %49 = arith.select %47, %45, %48 : vector<32x256xi1>, vector<32x256xf32>
    %c96_33 = arith.constant 96 : index
    %c256_34 = arith.constant 256 : index
    %50 = vector.load %arg9[%c96_33, %c256_34] : memref<288x512xf32, #tpu.memory_space<vmem>>, vector<32x256xf32>
    tpu.vector_store %arg9[%c96_33, %c256_34], %49 {strides = array<i32>} : memref<288x512xf32, #tpu.memory_space<vmem>>, vector<32x256xf32>,
    %c0_35 = arith.constant 0 : index
    %c17_36 = arith.constant 17 : index
    %51 = vector.load %arg8[%c0_35, %c17_36] : memref<64x290xf32, #tpu.memory_space<vmem>>, vector<32x256xf32>
    %c128 = arith.constant 128 : index
    %c0_37 = arith.constant 0 : index
    %52 = vector.load %arg9[%c128, %c0_37] : memref<288x512xf32, #tpu.memory_space<vmem>>, vector<32x256xf32>
    tpu.vector_store %arg9[%c128, %c0_37], %51 {strides = array<i32>} : memref<288x512xf32, #tpu.memory_space<vmem>>, vector<32x256xf32>,
    %c32_38 = arith.constant 32 : index
    %c17_39 = arith.constant 17 : index
    %53 = vector.load %arg8[%c32_38, %c17_39] : memref<64x290xf32, #tpu.memory_space<vmem>>, vector<32x256xf32>
    %c128_40 = arith.constant 128 : index
    %c256_41 = arith.constant 256 : index
    %54 = vector.load %arg9[%c128_40, %c256_41] : memref<288x512xf32, #tpu.memory_space<vmem>>, vector<32x256xf32>
    tpu.vector_store %arg9[%c128_40, %c256_41], %53 {strides = array<i32>} : memref<288x512xf32, #tpu.memory_space<vmem>>, vector<32x256xf32>,
    %c0_42 = arith.constant 0 : index
    %c18 = arith.constant 18 : index
    %55 = vector.load %arg8[%c0_42, %c18] : memref<64x290xf32, #tpu.memory_space<vmem>>, vector<32x256xf32>
    %cst_43 = arith.constant 0.000000e+00 : f32
    %56 = vector.shape_cast %10 : vector<1x256xi1> to vector<1x256xi1>
    %57 = vector.broadcast %56 : vector<1x256xi1> to vector<32x256xi1>
    %58 = vector.broadcast %cst_43 : f32 to vector<32x256xf32>
    %59 = arith.select %57, %55, %58 : vector<32x256xi1>, vector<32x256xf32>
    %c160 = arith.constant 160 : index
    %c0_44 = arith.constant 0 : index
    %60 = vector.load %arg9[%c160, %c0_44] : memref<288x512xf32, #tpu.memory_space<vmem>>, vector<32x256xf32>
    tpu.vector_store %arg9[%c160, %c0_44], %59 {strides = array<i32>} : memref<288x512xf32, #tpu.memory_space<vmem>>, vector<32x256xf32>,
    %c32_45 = arith.constant 32 : index
    %c18_46 = arith.constant 18 : index
    %61 = vector.load %arg8[%c32_45, %c18_46] : memref<64x290xf32, #tpu.memory_space<vmem>>, vector<32x256xf32>
    %cst_47 = arith.constant 0.000000e+00 : f32
    %62 = vector.shape_cast %10 : vector<1x256xi1> to vector<1x256xi1>
    %63 = vector.broadcast %62 : vector<1x256xi1> to vector<32x256xi1>
    %64 = vector.broadcast %cst_47 : f32 to vector<32x256xf32>
    %65 = arith.select %63, %61, %64 : vector<32x256xi1>, vector<32x256xf32>
    %c160_48 = arith.constant 160 : index
    %c256_49 = arith.constant 256 : index
    %66 = vector.load %arg9[%c160_48, %c256_49] : memref<288x512xf32, #tpu.memory_space<vmem>>, vector<32x256xf32>
    tpu.vector_store %arg9[%c160_48, %c256_49], %65 {strides = array<i32>} : memref<288x512xf32, #tpu.memory_space<vmem>>, vector<32x256xf32>,
    %c0_50 = arith.constant 0 : index
    %c32_51 = arith.constant 32 : index
    %67 = vector.load %arg8[%c0_50, %c32_51] : memref<64x290xf32, #tpu.memory_space<vmem>>, vector<32x256xf32>
    %cst_52 = arith.constant 0.000000e+00 : f32
    %68 = vector.shape_cast %8 : vector<1x256xi1> to vector<1x256xi1>
    %69 = vector.broadcast %68 : vector<1x256xi1> to vector<32x256xi1>
    %70 = vector.broadcast %cst_52 : f32 to vector<32x256xf32>
    %71 = arith.select %69, %67, %70 : vector<32x256xi1>, vector<32x256xf32>
    %c192 = arith.constant 192 : index
    %c0_53 = arith.constant 0 : index
    %72 = vector.load %arg9[%c192, %c0_53] : memref<288x512xf32, #tpu.memory_space<vmem>>, vector<32x256xf32>
    tpu.vector_store %arg9[%c192, %c0_53], %71 {strides = array<i32>} : memref<288x512xf32, #tpu.memory_space<vmem>>, vector<32x256xf32>,
    %c32_54 = arith.constant 32 : index
    %c32_55 = arith.constant 32 : index
    %73 = vector.load %arg8[%c32_54, %c32_55] : memref<64x290xf32, #tpu.memory_space<vmem>>, vector<32x256xf32>
    %cst_56 = arith.constant 0.000000e+00 : f32
    %74 = vector.shape_cast %8 : vector<1x256xi1> to vector<1x256xi1>
    %75 = vector.broadcast %74 : vector<1x256xi1> to vector<32x256xi1>
    %76 = vector.broadcast %cst_56 : f32 to vector<32x256xf32>
    %77 = arith.select %75, %73, %76 : vector<32x256xi1>, vector<32x256xf32>
    %c192_57 = arith.constant 192 : index
    %c256_58 = arith.constant 256 : index
    %78 = vector.load %arg9[%c192_57, %c256_58] : memref<288x512xf32, #tpu.memory_space<vmem>>, vector<32x256xf32>
    tpu.vector_store %arg9[%c192_57, %c256_58], %77 {strides = array<i32>} : memref<288x512xf32, #tpu.memory_space<vmem>>, vector<32x256xf32>,
    %c0_59 = arith.constant 0 : index
    %c33 = arith.constant 33 : index
    %79 = vector.load %arg8[%c0_59, %c33] : memref<64x290xf32, #tpu.memory_space<vmem>>, vector<32x256xf32>
    %c224 = arith.constant 224 : index
    %c0_60 = arith.constant 0 : index
    %80 = vector.load %arg9[%c224, %c0_60] : memref<288x512xf32, #tpu.memory_space<vmem>>, vector<32x256xf32>
    tpu.vector_store %arg9[%c224, %c0_60], %79 {strides = array<i32>} : memref<288x512xf32, #tpu.memory_space<vmem>>, vector<32x256xf32>,
    %c32_61 = arith.constant 32 : index
    %c33_62 = arith.constant 33 : index
    %81 = vector.load %arg8[%c32_61, %c33_62] : memref<64x290xf32, #tpu.memory_space<vmem>>, vector<32x256xf32>
    %c224_63 = arith.constant 224 : index
    %c256_64 = arith.constant 256 : index
    %82 = vector.load %arg9[%c224_63, %c256_64] : memref<288x512xf32, #tpu.memory_space<vmem>>, vector<32x256xf32>
    tpu.vector_store %arg9[%c224_63, %c256_64], %81 {strides = array<i32>} : memref<288x512xf32, #tpu.memory_space<vmem>>, vector<32x256xf32>,
    %c0_65 = arith.constant 0 : index
    %c34 = arith.constant 34 : index
    %83 = vector.load %arg8[%c0_65, %c34] : memref<64x290xf32, #tpu.memory_space<vmem>>, vector<32x256xf32>
    %cst_66 = arith.constant 0.000000e+00 : f32
    %84 = vector.shape_cast %10 : vector<1x256xi1> to vector<1x256xi1>
    %85 = vector.broadcast %84 : vector<1x256xi1> to vector<32x256xi1>
    %86 = vector.broadcast %cst_66 : f32 to vector<32x256xf32>
    %87 = arith.select %85, %83, %86 : vector<32x256xi1>, vector<32x256xf32>
    %c256_67 = arith.constant 256 : index
    %c0_68 = arith.constant 0 : index
    %88 = vector.load %arg9[%c256_67, %c0_68] : memref<288x512xf32, #tpu.memory_space<vmem>>, vector<32x256xf32>
    tpu.vector_store %arg9[%c256_67, %c0_68], %87 {strides = array<i32>} : memref<288x512xf32, #tpu.memory_space<vmem>>, vector<32x256xf32>,
    %c32_69 = arith.constant 32 : index
    %c34_70 = arith.constant 34 : index
    %89 = vector.load %arg8[%c32_69, %c34_70] : memref<64x290xf32, #tpu.memory_space<vmem>>, vector<32x256xf32>
    %cst_71 = arith.constant 0.000000e+00 : f32
    %90 = vector.shape_cast %10 : vector<1x256xi1> to vector<1x256xi1>
    %91 = vector.broadcast %90 : vector<1x256xi1> to vector<32x256xi1>
    %92 = vector.broadcast %cst_71 : f32 to vector<32x256xf32>
    %93 = arith.select %91, %89, %92 : vector<32x256xi1>, vector<32x256xf32>
    %c256_72 = arith.constant 256 : index
    %c256_73 = arith.constant 256 : index
    %94 = vector.load %arg9[%c256_72, %c256_73] : memref<288x512xf32, #tpu.memory_space<vmem>>, vector<32x256xf32>
    tpu.vector_store %arg9[%c256_72, %c256_73], %93 {strides = array<i32>} : memref<288x512xf32, #tpu.memory_space<vmem>>, vector<32x256xf32>,
    %c0_74 = arith.constant 0 : index
    %c0_75 = arith.constant 0 : index
    %95 = vector.load %arg2[%c0_74, %c0_75] : memref<256x288xf32, #tpu.memory_space<vmem>>, vector<256x288xf32>
    %c0_76 = arith.constant 0 : index
    %c0_77 = arith.constant 0 : index
    %96 = vector.load %arg9[%c0_76, %c0_77] : memref<288x512xf32, #tpu.memory_space<vmem>>, vector<288x512xf32>
    %cst_78 = arith.constant dense<0.000000e+00> : vector<256x512xf32>
    %97 = tpu.matmul %95, %96, %cst_78 {dimension_numbers = #tpu.dot_dimension_numbers<[1], [0], [0], [1], [0, 0, 1, 1], [], []>} : vector<256x288xf32>, vector<288x512xf32>, vector<256x512xf32> -> vector<256x512xf32>
    %cst_79 = arith.constant dense<0.000000e+00> : vector<256xf32>
    %98 = vector.multi_reduction <add>, %97, %cst_79 [1] : vector<256x512xf32> to vector<256xf32>
    %99 = vector.shape_cast %98 : vector<256xf32> to vector<256x1xf32>
    %100 = arith.mulf %97, %97 : vector<256x512xf32>
    %cst_80 = arith.constant dense<0.000000e+00> : vector<256xf32>
    %101 = vector.multi_reduction <add>, %100, %cst_80 [1] : vector<256x512xf32> to vector<256xf32>
    %102 = vector.shape_cast %101 : vector<256xf32> to vector<256x1xf32>
    %103 = vector.extract_strided_slice %99 {offsets = [0, 0], sizes = [128, 1], strides = [1, 1]} : vector<256x1xf32> to vector<128x1xf32>
    %104 = vector.extract_strided_slice %99 {offsets = [128, 0], sizes = [128, 1], strides = [1, 1]} : vector<256x1xf32> to vector<128x1xf32>
    %105 = arith.addf %103, %104 : vector<128x1xf32>
    %106 = vector.extract_strided_slice %105 {offsets = [0, 0], sizes = [64, 1], strides = [1, 1]} : vector<128x1xf32> to vector<64x1xf32>
    %107 = vector.extract_strided_slice %105 {offsets = [64, 0], sizes = [64, 1], strides = [1, 1]} : vector<128x1xf32> to vector<64x1xf32>
    %108 = arith.addf %106, %107 : vector<64x1xf32>
    %109 = vector.extract_strided_slice %102 {offsets = [0, 0], sizes = [128, 1], strides = [1, 1]} : vector<256x1xf32> to vector<128x1xf32>
    %110 = vector.extract_strided_slice %102 {offsets = [128, 0], sizes = [128, 1], strides = [1, 1]} : vector<256x1xf32> to vector<128x1xf32>
    %111 = arith.addf %109, %110 : vector<128x1xf32>
    %112 = vector.extract_strided_slice %111 {offsets = [0, 0], sizes = [64, 1], strides = [1, 1]} : vector<128x1xf32> to vector<64x1xf32>
    %113 = vector.extract_strided_slice %111 {offsets = [64, 0], sizes = [64, 1], strides = [1, 1]} : vector<128x1xf32> to vector<64x1xf32>
    %114 = arith.addf %112, %113 : vector<64x1xf32>
    %cst_81 = arith.constant 4.8828125E-4 : f32
    %115 = vector.broadcast %cst_81 : f32 to vector<64x1xf32>
    %116 = arith.mulf %108, %115 : vector<64x1xf32>
    %cst_82 = arith.constant 4.8828125E-4 : f32
    %117 = vector.broadcast %cst_82 : f32 to vector<64x1xf32>
    %118 = arith.mulf %114, %117 : vector<64x1xf32>
    %119 = arith.mulf %116, %116 : vector<64x1xf32>
    %120 = arith.subf %118, %119 : vector<64x1xf32>
    %c0_83 = arith.constant 0 : index
    %c0_84 = arith.constant 0 : index
    %121 = vector.load %arg3[%c0_83, %c0_84] : memref<64x1xf32, #tpu.memory_space<vmem>>, vector<64x1xf32>
    %cst_85 = arith.constant 9.99999974E-6 : f32
    %122 = vector.broadcast %cst_85 : f32 to vector<64x1xf32>
    %123 = arith.addf %120, %122 : vector<64x1xf32>
    %124 = math.rsqrt %123 : vector<64x1xf32>
    %125 = arith.mulf %121, %124 : vector<64x1xf32>
    %c0_86 = arith.constant 0 : index
    %c0_87 = arith.constant 0 : index
    %126 = vector.load %arg4[%c0_86, %c0_87] : memref<64x1xf32, #tpu.memory_space<vmem>>, vector<64x1xf32>
    %127 = arith.mulf %116, %125 : vector<64x1xf32>
    %128 = arith.subf %126, %127 : vector<64x1xf32>
    %129 = tpu.concatenate %125, %125, %125, %125 in 0 : vector<64x1xf32>, vector<64x1xf32>, vector<64x1xf32>, vector<64x1xf32> -> vector<256x1xf32>
    %130 = tpu.concatenate %128, %128, %128, %128 in 0 : vector<64x1xf32>, vector<64x1xf32>, vector<64x1xf32>, vector<64x1xf32> -> vector<256x1xf32>
    %131 = vector.broadcast %129 : vector<256x1xf32> to vector<256x512xf32>
    %132 = arith.mulf %97, %131 : vector<256x512xf32>
    %133 = vector.broadcast %130 : vector<256x1xf32> to vector<256x512xf32>
    %134 = arith.addf %132, %133 : vector<256x512xf32>
    %135 = vector.extract_strided_slice %134 {offsets = [0, 0], sizes = [64, 512], strides = [1, 1]} : vector<256x512xf32> to vector<64x512xf32>
    %136 = vector.extract_strided_slice %134 {offsets = [64, 0], sizes = [64, 512], strides = [1, 1]} : vector<256x512xf32> to vector<64x512xf32>
    %137 = arith.maximumf %135, %136 : vector<64x512xf32>
    %138 = vector.extract_strided_slice %134 {offsets = [128, 0], sizes = [64, 512], strides = [1, 1]} : vector<256x512xf32> to vector<64x512xf32>
    %139 = vector.extract_strided_slice %134 {offsets = [192, 0], sizes = [64, 512], strides = [1, 1]} : vector<256x512xf32> to vector<64x512xf32>
    %140 = arith.maximumf %138, %139 : vector<64x512xf32>
    %141 = arith.maximumf %137, %140 : vector<64x512xf32>
    %142 = math.tanh %141 : vector<64x512xf32>
    %c0_88 = arith.constant 0 : index
    %c0_89 = arith.constant 0 : index
    %143 = vector.load %arg5[%c0_88, %c0_89] : memref<64x1xf32, #tpu.memory_space<vmem>>, vector<64x1xf32>
    %c0_90 = arith.constant 0 : index
    %c0_91 = arith.constant 0 : index
    %144 = vector.load %arg6[%c0_90, %c0_91] : memref<64x1xf32, #tpu.memory_space<vmem>>, vector<64x1xf32>
    %145 = vector.extract_strided_slice %142 {offsets = [0, 0], sizes = [64, 256], strides = [1, 1]} : vector<64x512xf32> to vector<64x256xf32>
    %146 = vector.extract_strided_slice %145 {offsets = [0, 0], sizes = [16, 256], strides = [1, 1]} : vector<64x256xf32> to vector<16x256xf32>
    %cst_92 = arith.constant dense<0.000000e+00> : vector<16xf32>
    %147 = vector.multi_reduction <add>, %146, %cst_92 [1] : vector<16x256xf32> to vector<16xf32>
    %148 = vector.shape_cast %147 : vector<16xf32> to vector<16x1xf32>
    %cst_93 = arith.constant dense<0.000000e+00> : vector<1xf32>
    %149 = vector.multi_reduction <add>, %148, %cst_93 [0] : vector<16x1xf32> to vector<1xf32>
    %150 = vector.shape_cast %149 : vector<1xf32> to vector<1x1xf32>
    %151 = arith.mulf %146, %146 : vector<16x256xf32>
    %cst_94 = arith.constant dense<0.000000e+00> : vector<16xf32>
    %152 = vector.multi_reduction <add>, %151, %cst_94 [1] : vector<16x256xf32> to vector<16xf32>
    %153 = vector.shape_cast %152 : vector<16xf32> to vector<16x1xf32>
    %cst_95 = arith.constant dense<0.000000e+00> : vector<1xf32>
    %154 = vector.multi_reduction <add>, %153, %cst_95 [0] : vector<16x1xf32> to vector<1xf32>
    %155 = vector.shape_cast %154 : vector<1xf32> to vector<1x1xf32>
    %cst_96 = arith.constant 2.44140625E-4 : f32
    %156 = vector.broadcast %cst_96 : f32 to vector<1x1xf32>
    %157 = arith.mulf %150, %156 : vector<1x1xf32>
    %cst_97 = arith.constant 2.44140625E-4 : f32
    %158 = vector.broadcast %cst_97 : f32 to vector<1x1xf32>
    %159 = arith.mulf %155, %158 : vector<1x1xf32>
    %160 = arith.mulf %157, %157 : vector<1x1xf32>
    %161 = arith.subf %159, %160 : vector<1x1xf32>
    %cst_98 = arith.constant 9.99999974E-6 : f32
    %162 = vector.broadcast %cst_98 : f32 to vector<1x1xf32>
    %163 = arith.addf %161, %162 : vector<1x1xf32>
    %164 = math.rsqrt %163 : vector<1x1xf32>
    %165 = vector.extract_strided_slice %143 {offsets = [0, 0], sizes = [16, 1], strides = [1, 1]} : vector<64x1xf32> to vector<16x1xf32>
    %166 = vector.extract_strided_slice %144 {offsets = [0, 0], sizes = [16, 1], strides = [1, 1]} : vector<64x1xf32> to vector<16x1xf32>
    %167 = vector.broadcast %157 : vector<1x1xf32> to vector<16x256xf32>
    %168 = arith.subf %146, %167 : vector<16x256xf32>
    %169 = vector.broadcast %164 : vector<1x1xf32> to vector<16x1xf32>
    %170 = arith.mulf %169, %165 : vector<16x1xf32>
    %171 = vector.broadcast %170 : vector<16x1xf32> to vector<16x256xf32>
    %172 = arith.mulf %168, %171 : vector<16x256xf32>
    %173 = vector.broadcast %166 : vector<16x1xf32> to vector<16x256xf32>
    %174 = arith.addf %172, %173 : vector<16x256xf32>
    %c0_99 = arith.constant 0 : index
    %c0_100 = arith.constant 0 : index
    %175 = vector.load %arg7[%c0_99, %c0_100] : memref<128x256xf32, #tpu.memory_space<vmem>>, vector<16x256xf32>
    tpu.vector_store %arg7[%c0_99, %c0_100], %174 {strides = array<i32>} : memref<128x256xf32, #tpu.memory_space<vmem>>, vector<16x256xf32>,
    %176 = vector.extract_strided_slice %145 {offsets = [16, 0], sizes = [16, 256], strides = [1, 1]} : vector<64x256xf32> to vector<16x256xf32>
    %cst_101 = arith.constant dense<0.000000e+00> : vector<16xf32>
    %177 = vector.multi_reduction <add>, %176, %cst_101 [1] : vector<16x256xf32> to vector<16xf32>
    %178 = vector.shape_cast %177 : vector<16xf32> to vector<16x1xf32>
    %cst_102 = arith.constant dense<0.000000e+00> : vector<1xf32>
    %179 = vector.multi_reduction <add>, %178, %cst_102 [0] : vector<16x1xf32> to vector<1xf32>
    %180 = vector.shape_cast %179 : vector<1xf32> to vector<1x1xf32>
    %181 = arith.mulf %176, %176 : vector<16x256xf32>
    %cst_103 = arith.constant dense<0.000000e+00> : vector<16xf32>
    %182 = vector.multi_reduction <add>, %181, %cst_103 [1] : vector<16x256xf32> to vector<16xf32>
    %183 = vector.shape_cast %182 : vector<16xf32> to vector<16x1xf32>
    %cst_104 = arith.constant dense<0.000000e+00> : vector<1xf32>
    %184 = vector.multi_reduction <add>, %183, %cst_104 [0] : vector<16x1xf32> to vector<1xf32>
    %185 = vector.shape_cast %184 : vector<1xf32> to vector<1x1xf32>
    %cst_105 = arith.constant 2.44140625E-4 : f32
    %186 = vector.broadcast %cst_105 : f32 to vector<1x1xf32>
    %187 = arith.mulf %180, %186 : vector<1x1xf32>
    %cst_106 = arith.constant 2.44140625E-4 : f32
    %188 = vector.broadcast %cst_106 : f32 to vector<1x1xf32>
    %189 = arith.mulf %185, %188 : vector<1x1xf32>
    %190 = arith.mulf %187, %187 : vector<1x1xf32>
    %191 = arith.subf %189, %190 : vector<1x1xf32>
    %cst_107 = arith.constant 9.99999974E-6 : f32
    %192 = vector.broadcast %cst_107 : f32 to vector<1x1xf32>
    %193 = arith.addf %191, %192 : vector<1x1xf32>
    %194 = math.rsqrt %193 : vector<1x1xf32>
    %195 = vector.extract_strided_slice %143 {offsets = [16, 0], sizes = [16, 1], strides = [1, 1]} : vector<64x1xf32> to vector<16x1xf32>
    %196 = vector.extract_strided_slice %144 {offsets = [16, 0], sizes = [16, 1], strides = [1, 1]} : vector<64x1xf32> to vector<16x1xf32>
    %197 = vector.broadcast %187 : vector<1x1xf32> to vector<16x256xf32>
    %198 = arith.subf %176, %197 : vector<16x256xf32>
    %199 = vector.broadcast %194 : vector<1x1xf32> to vector<16x1xf32>
    %200 = arith.mulf %199, %195 : vector<16x1xf32>
    %201 = vector.broadcast %200 : vector<16x1xf32> to vector<16x256xf32>
    %202 = arith.mulf %198, %201 : vector<16x256xf32>
    %203 = vector.broadcast %196 : vector<16x1xf32> to vector<16x256xf32>
    %204 = arith.addf %202, %203 : vector<16x256xf32>
    %c16_108 = arith.constant 16 : index
    %c0_109 = arith.constant 0 : index
    %205 = vector.load %arg7[%c16_108, %c0_109] : memref<128x256xf32, #tpu.memory_space<vmem>>, vector<16x256xf32>
    tpu.vector_store %arg7[%c16_108, %c0_109], %204 {strides = array<i32>} : memref<128x256xf32, #tpu.memory_space<vmem>>, vector<16x256xf32>,
    %206 = vector.extract_strided_slice %145 {offsets = [32, 0], sizes = [16, 256], strides = [1, 1]} : vector<64x256xf32> to vector<16x256xf32>
    %cst_110 = arith.constant dense<0.000000e+00> : vector<16xf32>
    %207 = vector.multi_reduction <add>, %206, %cst_110 [1] : vector<16x256xf32> to vector<16xf32>
    %208 = vector.shape_cast %207 : vector<16xf32> to vector<16x1xf32>
    %cst_111 = arith.constant dense<0.000000e+00> : vector<1xf32>
    %209 = vector.multi_reduction <add>, %208, %cst_111 [0] : vector<16x1xf32> to vector<1xf32>
    %210 = vector.shape_cast %209 : vector<1xf32> to vector<1x1xf32>
    %211 = arith.mulf %206, %206 : vector<16x256xf32>
    %cst_112 = arith.constant dense<0.000000e+00> : vector<16xf32>
    %212 = vector.multi_reduction <add>, %211, %cst_112 [1] : vector<16x256xf32> to vector<16xf32>
    %213 = vector.shape_cast %212 : vector<16xf32> to vector<16x1xf32>
    %cst_113 = arith.constant dense<0.000000e+00> : vector<1xf32>
    %214 = vector.multi_reduction <add>, %213, %cst_113 [0] : vector<16x1xf32> to vector<1xf32>
    %215 = vector.shape_cast %214 : vector<1xf32> to vector<1x1xf32>
    %cst_114 = arith.constant 2.44140625E-4 : f32
    %216 = vector.broadcast %cst_114 : f32 to vector<1x1xf32>
    %217 = arith.mulf %210, %216 : vector<1x1xf32>
    %cst_115 = arith.constant 2.44140625E-4 : f32
    %218 = vector.broadcast %cst_115 : f32 to vector<1x1xf32>
    %219 = arith.mulf %215, %218 : vector<1x1xf32>
    %220 = arith.mulf %217, %217 : vector<1x1xf32>
    %221 = arith.subf %219, %220 : vector<1x1xf32>
    %cst_116 = arith.constant 9.99999974E-6 : f32
    %222 = vector.broadcast %cst_116 : f32 to vector<1x1xf32>
    %223 = arith.addf %221, %222 : vector<1x1xf32>
    %224 = math.rsqrt %223 : vector<1x1xf32>
    %225 = vector.extract_strided_slice %143 {offsets = [32, 0], sizes = [16, 1], strides = [1, 1]} : vector<64x1xf32> to vector<16x1xf32>
    %226 = vector.extract_strided_slice %144 {offsets = [32, 0], sizes = [16, 1], strides = [1, 1]} : vector<64x1xf32> to vector<16x1xf32>
    %227 = vector.broadcast %217 : vector<1x1xf32> to vector<16x256xf32>
    %228 = arith.subf %206, %227 : vector<16x256xf32>
    %229 = vector.broadcast %224 : vector<1x1xf32> to vector<16x1xf32>
    %230 = arith.mulf %229, %225 : vector<16x1xf32>
    %231 = vector.broadcast %230 : vector<16x1xf32> to vector<16x256xf32>
    %232 = arith.mulf %228, %231 : vector<16x256xf32>
    %233 = vector.broadcast %226 : vector<16x1xf32> to vector<16x256xf32>
    %234 = arith.addf %232, %233 : vector<16x256xf32>
    %c32_117 = arith.constant 32 : index
    %c0_118 = arith.constant 0 : index
    %235 = vector.load %arg7[%c32_117, %c0_118] : memref<128x256xf32, #tpu.memory_space<vmem>>, vector<16x256xf32>
    tpu.vector_store %arg7[%c32_117, %c0_118], %234 {strides = array<i32>} : memref<128x256xf32, #tpu.memory_space<vmem>>, vector<16x256xf32>,
    %236 = vector.extract_strided_slice %145 {offsets = [48, 0], sizes = [16, 256], strides = [1, 1]} : vector<64x256xf32> to vector<16x256xf32>
    %cst_119 = arith.constant dense<0.000000e+00> : vector<16xf32>
    %237 = vector.multi_reduction <add>, %236, %cst_119 [1] : vector<16x256xf32> to vector<16xf32>
    %238 = vector.shape_cast %237 : vector<16xf32> to vector<16x1xf32>
    %cst_120 = arith.constant dense<0.000000e+00> : vector<1xf32>
    %239 = vector.multi_reduction <add>, %238, %cst_120 [0] : vector<16x1xf32> to vector<1xf32>
    %240 = vector.shape_cast %239 : vector<1xf32> to vector<1x1xf32>
    %241 = arith.mulf %236, %236 : vector<16x256xf32>
    %cst_121 = arith.constant dense<0.000000e+00> : vector<16xf32>
    %242 = vector.multi_reduction <add>, %241, %cst_121 [1] : vector<16x256xf32> to vector<16xf32>
    %243 = vector.shape_cast %242 : vector<16xf32> to vector<16x1xf32>
    %cst_122 = arith.constant dense<0.000000e+00> : vector<1xf32>
    %244 = vector.multi_reduction <add>, %243, %cst_122 [0] : vector<16x1xf32> to vector<1xf32>
    %245 = vector.shape_cast %244 : vector<1xf32> to vector<1x1xf32>
    %cst_123 = arith.constant 2.44140625E-4 : f32
    %246 = vector.broadcast %cst_123 : f32 to vector<1x1xf32>
    %247 = arith.mulf %240, %246 : vector<1x1xf32>
    %cst_124 = arith.constant 2.44140625E-4 : f32
    %248 = vector.broadcast %cst_124 : f32 to vector<1x1xf32>
    %249 = arith.mulf %245, %248 : vector<1x1xf32>
    %250 = arith.mulf %247, %247 : vector<1x1xf32>
    %251 = arith.subf %249, %250 : vector<1x1xf32>
    %cst_125 = arith.constant 9.99999974E-6 : f32
    %252 = vector.broadcast %cst_125 : f32 to vector<1x1xf32>
    %253 = arith.addf %251, %252 : vector<1x1xf32>
    %254 = math.rsqrt %253 : vector<1x1xf32>
    %255 = vector.extract_strided_slice %143 {offsets = [48, 0], sizes = [16, 1], strides = [1, 1]} : vector<64x1xf32> to vector<16x1xf32>
    %256 = vector.extract_strided_slice %144 {offsets = [48, 0], sizes = [16, 1], strides = [1, 1]} : vector<64x1xf32> to vector<16x1xf32>
    %257 = vector.broadcast %247 : vector<1x1xf32> to vector<16x256xf32>
    %258 = arith.subf %236, %257 : vector<16x256xf32>
    %259 = vector.broadcast %254 : vector<1x1xf32> to vector<16x1xf32>
    %260 = arith.mulf %259, %255 : vector<16x1xf32>
    %261 = vector.broadcast %260 : vector<16x1xf32> to vector<16x256xf32>
    %262 = arith.mulf %258, %261 : vector<16x256xf32>
    %263 = vector.broadcast %256 : vector<16x1xf32> to vector<16x256xf32>
    %264 = arith.addf %262, %263 : vector<16x256xf32>
    %c48 = arith.constant 48 : index
    %c0_126 = arith.constant 0 : index
    %265 = vector.load %arg7[%c48, %c0_126] : memref<128x256xf32, #tpu.memory_space<vmem>>, vector<16x256xf32>
    tpu.vector_store %arg7[%c48, %c0_126], %264 {strides = array<i32>} : memref<128x256xf32, #tpu.memory_space<vmem>>, vector<16x256xf32>,
    %266 = vector.extract_strided_slice %142 {offsets = [0, 256], sizes = [64, 256], strides = [1, 1]} : vector<64x512xf32> to vector<64x256xf32>
    %267 = vector.extract_strided_slice %266 {offsets = [0, 0], sizes = [16, 256], strides = [1, 1]} : vector<64x256xf32> to vector<16x256xf32>
    %cst_127 = arith.constant dense<0.000000e+00> : vector<16xf32>
    %268 = vector.multi_reduction <add>, %267, %cst_127 [1] : vector<16x256xf32> to vector<16xf32>
    %269 = vector.shape_cast %268 : vector<16xf32> to vector<16x1xf32>
    %cst_128 = arith.constant dense<0.000000e+00> : vector<1xf32>
    %270 = vector.multi_reduction <add>, %269, %cst_128 [0] : vector<16x1xf32> to vector<1xf32>
    %271 = vector.shape_cast %270 : vector<1xf32> to vector<1x1xf32>
    %272 = arith.mulf %267, %267 : vector<16x256xf32>
    %cst_129 = arith.constant dense<0.000000e+00> : vector<16xf32>
    %273 = vector.multi_reduction <add>, %272, %cst_129 [1] : vector<16x256xf32> to vector<16xf32>
    %274 = vector.shape_cast %273 : vector<16xf32> to vector<16x1xf32>
    %cst_130 = arith.constant dense<0.000000e+00> : vector<1xf32>
    %275 = vector.multi_reduction <add>, %274, %cst_130 [0] : vector<16x1xf32> to vector<1xf32>
    %276 = vector.shape_cast %275 : vector<1xf32> to vector<1x1xf32>
    %cst_131 = arith.constant 2.44140625E-4 : f32
    %277 = vector.broadcast %cst_131 : f32 to vector<1x1xf32>
    %278 = arith.mulf %271, %277 : vector<1x1xf32>
    %cst_132 = arith.constant 2.44140625E-4 : f32
    %279 = vector.broadcast %cst_132 : f32 to vector<1x1xf32>
    %280 = arith.mulf %276, %279 : vector<1x1xf32>
    %281 = arith.mulf %278, %278 : vector<1x1xf32>
    %282 = arith.subf %280, %281 : vector<1x1xf32>
    %cst_133 = arith.constant 9.99999974E-6 : f32
    %283 = vector.broadcast %cst_133 : f32 to vector<1x1xf32>
    %284 = arith.addf %282, %283 : vector<1x1xf32>
    %285 = math.rsqrt %284 : vector<1x1xf32>
    %286 = vector.extract_strided_slice %143 {offsets = [0, 0], sizes = [16, 1], strides = [1, 1]} : vector<64x1xf32> to vector<16x1xf32>
    %287 = vector.extract_strided_slice %144 {offsets = [0, 0], sizes = [16, 1], strides = [1, 1]} : vector<64x1xf32> to vector<16x1xf32>
    %288 = vector.broadcast %278 : vector<1x1xf32> to vector<16x256xf32>
    %289 = arith.subf %267, %288 : vector<16x256xf32>
    %290 = vector.broadcast %285 : vector<1x1xf32> to vector<16x1xf32>
    %291 = arith.mulf %290, %286 : vector<16x1xf32>
    %292 = vector.broadcast %291 : vector<16x1xf32> to vector<16x256xf32>
    %293 = arith.mulf %289, %292 : vector<16x256xf32>
    %294 = vector.broadcast %287 : vector<16x1xf32> to vector<16x256xf32>
    %295 = arith.addf %293, %294 : vector<16x256xf32>
    %c64_134 = arith.constant 64 : index
    %c0_135 = arith.constant 0 : index
    %296 = vector.load %arg7[%c64_134, %c0_135] : memref<128x256xf32, #tpu.memory_space<vmem>>, vector<16x256xf32>
    tpu.vector_store %arg7[%c64_134, %c0_135], %295 {strides = array<i32>} : memref<128x256xf32, #tpu.memory_space<vmem>>, vector<16x256xf32>,
    %297 = vector.extract_strided_slice %266 {offsets = [16, 0], sizes = [16, 256], strides = [1, 1]} : vector<64x256xf32> to vector<16x256xf32>
    %cst_136 = arith.constant dense<0.000000e+00> : vector<16xf32>
    %298 = vector.multi_reduction <add>, %297, %cst_136 [1] : vector<16x256xf32> to vector<16xf32>
    %299 = vector.shape_cast %298 : vector<16xf32> to vector<16x1xf32>
    %cst_137 = arith.constant dense<0.000000e+00> : vector<1xf32>
    %300 = vector.multi_reduction <add>, %299, %cst_137 [0] : vector<16x1xf32> to vector<1xf32>
    %301 = vector.shape_cast %300 : vector<1xf32> to vector<1x1xf32>
    %302 = arith.mulf %297, %297 : vector<16x256xf32>
    %cst_138 = arith.constant dense<0.000000e+00> : vector<16xf32>
    %303 = vector.multi_reduction <add>, %302, %cst_138 [1] : vector<16x256xf32> to vector<16xf32>
    %304 = vector.shape_cast %303 : vector<16xf32> to vector<16x1xf32>
    %cst_139 = arith.constant dense<0.000000e+00> : vector<1xf32>
    %305 = vector.multi_reduction <add>, %304, %cst_139 [0] : vector<16x1xf32> to vector<1xf32>
    %306 = vector.shape_cast %305 : vector<1xf32> to vector<1x1xf32>
    %cst_140 = arith.constant 2.44140625E-4 : f32
    %307 = vector.broadcast %cst_140 : f32 to vector<1x1xf32>
    %308 = arith.mulf %301, %307 : vector<1x1xf32>
    %cst_141 = arith.constant 2.44140625E-4 : f32
    %309 = vector.broadcast %cst_141 : f32 to vector<1x1xf32>
    %310 = arith.mulf %306, %309 : vector<1x1xf32>
    %311 = arith.mulf %308, %308 : vector<1x1xf32>
    %312 = arith.subf %310, %311 : vector<1x1xf32>
    %cst_142 = arith.constant 9.99999974E-6 : f32
    %313 = vector.broadcast %cst_142 : f32 to vector<1x1xf32>
    %314 = arith.addf %312, %313 : vector<1x1xf32>
    %315 = math.rsqrt %314 : vector<1x1xf32>
    %316 = vector.extract_strided_slice %143 {offsets = [16, 0], sizes = [16, 1], strides = [1, 1]} : vector<64x1xf32> to vector<16x1xf32>
    %317 = vector.extract_strided_slice %144 {offsets = [16, 0], sizes = [16, 1], strides = [1, 1]} : vector<64x1xf32> to vector<16x1xf32>
    %318 = vector.broadcast %308 : vector<1x1xf32> to vector<16x256xf32>
    %319 = arith.subf %297, %318 : vector<16x256xf32>
    %320 = vector.broadcast %315 : vector<1x1xf32> to vector<16x1xf32>
    %321 = arith.mulf %320, %316 : vector<16x1xf32>
    %322 = vector.broadcast %321 : vector<16x1xf32> to vector<16x256xf32>
    %323 = arith.mulf %319, %322 : vector<16x256xf32>
    %324 = vector.broadcast %317 : vector<16x1xf32> to vector<16x256xf32>
    %325 = arith.addf %323, %324 : vector<16x256xf32>
    %c80 = arith.constant 80 : index
    %c0_143 = arith.constant 0 : index
    %326 = vector.load %arg7[%c80, %c0_143] : memref<128x256xf32, #tpu.memory_space<vmem>>, vector<16x256xf32>
    tpu.vector_store %arg7[%c80, %c0_143], %325 {strides = array<i32>} : memref<128x256xf32, #tpu.memory_space<vmem>>, vector<16x256xf32>,
    %327 = vector.extract_strided_slice %266 {offsets = [32, 0], sizes = [16, 256], strides = [1, 1]} : vector<64x256xf32> to vector<16x256xf32>
    %cst_144 = arith.constant dense<0.000000e+00> : vector<16xf32>
    %328 = vector.multi_reduction <add>, %327, %cst_144 [1] : vector<16x256xf32> to vector<16xf32>
    %329 = vector.shape_cast %328 : vector<16xf32> to vector<16x1xf32>
    %cst_145 = arith.constant dense<0.000000e+00> : vector<1xf32>
    %330 = vector.multi_reduction <add>, %329, %cst_145 [0] : vector<16x1xf32> to vector<1xf32>
    %331 = vector.shape_cast %330 : vector<1xf32> to vector<1x1xf32>
    %332 = arith.mulf %327, %327 : vector<16x256xf32>
    %cst_146 = arith.constant dense<0.000000e+00> : vector<16xf32>
    %333 = vector.multi_reduction <add>, %332, %cst_146 [1] : vector<16x256xf32> to vector<16xf32>
    %334 = vector.shape_cast %333 : vector<16xf32> to vector<16x1xf32>
    %cst_147 = arith.constant dense<0.000000e+00> : vector<1xf32>
    %335 = vector.multi_reduction <add>, %334, %cst_147 [0] : vector<16x1xf32> to vector<1xf32>
    %336 = vector.shape_cast %335 : vector<1xf32> to vector<1x1xf32>
    %cst_148 = arith.constant 2.44140625E-4 : f32
    %337 = vector.broadcast %cst_148 : f32 to vector<1x1xf32>
    %338 = arith.mulf %331, %337 : vector<1x1xf32>
    %cst_149 = arith.constant 2.44140625E-4 : f32
    %339 = vector.broadcast %cst_149 : f32 to vector<1x1xf32>
    %340 = arith.mulf %336, %339 : vector<1x1xf32>
    %341 = arith.mulf %338, %338 : vector<1x1xf32>
    %342 = arith.subf %340, %341 : vector<1x1xf32>
    %cst_150 = arith.constant 9.99999974E-6 : f32
    %343 = vector.broadcast %cst_150 : f32 to vector<1x1xf32>
    %344 = arith.addf %342, %343 : vector<1x1xf32>
    %345 = math.rsqrt %344 : vector<1x1xf32>
    %346 = vector.extract_strided_slice %143 {offsets = [32, 0], sizes = [16, 1], strides = [1, 1]} : vector<64x1xf32> to vector<16x1xf32>
    %347 = vector.extract_strided_slice %144 {offsets = [32, 0], sizes = [16, 1], strides = [1, 1]} : vector<64x1xf32> to vector<16x1xf32>
    %348 = vector.broadcast %338 : vector<1x1xf32> to vector<16x256xf32>
    %349 = arith.subf %327, %348 : vector<16x256xf32>
    %350 = vector.broadcast %345 : vector<1x1xf32> to vector<16x1xf32>
    %351 = arith.mulf %350, %346 : vector<16x1xf32>
    %352 = vector.broadcast %351 : vector<16x1xf32> to vector<16x256xf32>
    %353 = arith.mulf %349, %352 : vector<16x256xf32>
    %354 = vector.broadcast %347 : vector<16x1xf32> to vector<16x256xf32>
    %355 = arith.addf %353, %354 : vector<16x256xf32>
    %c96_151 = arith.constant 96 : index
    %c0_152 = arith.constant 0 : index
    %356 = vector.load %arg7[%c96_151, %c0_152] : memref<128x256xf32, #tpu.memory_space<vmem>>, vector<16x256xf32>
    tpu.vector_store %arg7[%c96_151, %c0_152], %355 {strides = array<i32>} : memref<128x256xf32, #tpu.memory_space<vmem>>, vector<16x256xf32>,
    %357 = vector.extract_strided_slice %266 {offsets = [48, 0], sizes = [16, 256], strides = [1, 1]} : vector<64x256xf32> to vector<16x256xf32>
    %cst_153 = arith.constant dense<0.000000e+00> : vector<16xf32>
    %358 = vector.multi_reduction <add>, %357, %cst_153 [1] : vector<16x256xf32> to vector<16xf32>
    %359 = vector.shape_cast %358 : vector<16xf32> to vector<16x1xf32>
    %cst_154 = arith.constant dense<0.000000e+00> : vector<1xf32>
    %360 = vector.multi_reduction <add>, %359, %cst_154 [0] : vector<16x1xf32> to vector<1xf32>
    %361 = vector.shape_cast %360 : vector<1xf32> to vector<1x1xf32>
    %362 = arith.mulf %357, %357 : vector<16x256xf32>
    %cst_155 = arith.constant dense<0.000000e+00> : vector<16xf32>
    %363 = vector.multi_reduction <add>, %362, %cst_155 [1] : vector<16x256xf32> to vector<16xf32>
    %364 = vector.shape_cast %363 : vector<16xf32> to vector<16x1xf32>
    %cst_156 = arith.constant dense<0.000000e+00> : vector<1xf32>
    %365 = vector.multi_reduction <add>, %364, %cst_156 [0] : vector<16x1xf32> to vector<1xf32>
    %366 = vector.shape_cast %365 : vector<1xf32> to vector<1x1xf32>
    %cst_157 = arith.constant 2.44140625E-4 : f32
    %367 = vector.broadcast %cst_157 : f32 to vector<1x1xf32>
    %368 = arith.mulf %361, %367 : vector<1x1xf32>
    %cst_158 = arith.constant 2.44140625E-4 : f32
    %369 = vector.broadcast %cst_158 : f32 to vector<1x1xf32>
    %370 = arith.mulf %366, %369 : vector<1x1xf32>
    %371 = arith.mulf %368, %368 : vector<1x1xf32>
    %372 = arith.subf %370, %371 : vector<1x1xf32>
    %cst_159 = arith.constant 9.99999974E-6 : f32
    %373 = vector.broadcast %cst_159 : f32 to vector<1x1xf32>
    %374 = arith.addf %372, %373 : vector<1x1xf32>
    %375 = math.rsqrt %374 : vector<1x1xf32>
    %376 = vector.extract_strided_slice %143 {offsets = [48, 0], sizes = [16, 1], strides = [1, 1]} : vector<64x1xf32> to vector<16x1xf32>
    %377 = vector.extract_strided_slice %144 {offsets = [48, 0], sizes = [16, 1], strides = [1, 1]} : vector<64x1xf32> to vector<16x1xf32>
    %378 = vector.broadcast %368 : vector<1x1xf32> to vector<16x256xf32>
    %379 = arith.subf %357, %378 : vector<16x256xf32>
    %380 = vector.broadcast %375 : vector<1x1xf32> to vector<16x1xf32>
    %381 = arith.mulf %380, %376 : vector<16x1xf32>
    %382 = vector.broadcast %381 : vector<16x1xf32> to vector<16x256xf32>
    %383 = arith.mulf %379, %382 : vector<16x256xf32>
    %384 = vector.broadcast %377 : vector<16x1xf32> to vector<16x256xf32>
    %385 = arith.addf %383, %384 : vector<16x256xf32>
    %c112 = arith.constant 112 : index
    %c0_160 = arith.constant 0 : index
    %386 = vector.load %arg7[%c112, %c0_160] : memref<128x256xf32, #tpu.memory_space<vmem>>, vector<16x256xf32>
    tpu.vector_store %arg7[%c112, %c0_160], %385 {strides = array<i32>} : memref<128x256xf32, #tpu.memory_space<vmem>>, vector<16x256xf32>,
    return
  }
  func.func @transform_0(%arg0: i32) -> (i32, i32) {
    %c0_i32 = arith.constant 0 : i32
    %c0_i32_0 = arith.constant 0 : i32
    %c0_i32_1 = arith.constant 0 : i32
    return %c0_i32, %c0_i32_0 : i32, i32
  }
  func.func @transform_1(%arg0: i32) -> (i32, i32) {
    %c0_i32 = arith.constant 0 : i32
    %c0_i32_0 = arith.constant 0 : i32
    %c0_i32_1 = arith.constant 0 : i32
    return %c0_i32, %c0_i32_0 : i32, i32
  }
  func.func @transform_2(%arg0: i32) -> (i32, i32) {
    %c0_i32 = arith.constant 0 : i32
    %c0_i32_0 = arith.constant 0 : i32
    %c0_i32_1 = arith.constant 0 : i32
    return %c0_i32, %c0_i32_0 : i32, i32
  }
  func.func @transform_3(%arg0: i32) -> (i32, i32) {
    %c0_i32 = arith.constant 0 : i32
    %c0_i32_0 = arith.constant 0 : i32
    %c0_i32_1 = arith.constant 0 : i32
    return %c0_i32, %c0_i32_0 : i32, i32
  }
  func.func @transform_4(%arg0: i32) -> (i32, i32) {
    %c0_i32 = arith.constant 0 : i32
    %c0_i32_0 = arith.constant 0 : i32
    %c0_i32_1 = arith.constant 0 : i32
    return %c0_i32, %c0_i32_0 : i32, i32
  }
  func.func @transform_5(%arg0: i32) -> (i32, i32) {
    %c0_i32 = arith.constant 0 : i32
    %c0_i32_0 = arith.constant 0 : i32
    %c0_i32_1 = arith.constant 0 : i32
    return %c0_i32, %c0_i32_0 : i32, i32
  }
  func.func @transform_6(%arg0: i32) -> (i32, i32) {
    %c0_i32 = arith.constant 0 : i32
    %c0_i32_0 = arith.constant 0 : i32
    %c0_i32_1 = arith.constant 0 : i32
    return %c0_i32, %c0_i32_0 : i32, i32
  }
}

</mosaic_0001>

<bundles_post_ra>
// kernel: model_forward.1
= control target key start
LH: loop header
LB: loop body
LE: loop exit
PB: predicated region body
PF: predicated region fallthrough
CT: control target
= control target key end

     0   :  { %s5542_s25 = smov 17   ;;  %v5543_v6 = vmov 0.0   ;;  %vm25_vm0 = vcmask 277504   ;;  %vm145_vm1 = vcmask 1047688   ;;  %vm112_vm2 = vcmask 138240   ;;  %s5544_s7 = smov 112   ;;  %s10217_s0 = inlined_call_operand.vmem [shape: f32[64,256], index: 0, kind: input, shape index: {}]   ;;  %s10218_s1 = inlined_call_operand.vmem [shape: f32[256,288], index: 1, kind: input, shape index: {}]   ;;  %s10219_s5 = inlined_call_operand.vmem [shape: f32[64,1], index: 5, kind: input, shape index: {}]   ;;  %s10220_s2 = inlined_call_operand.vmem [shape: f32[64,1], index: 2, kind: input, shape index: {}]   ;;  %s10221_s3 = inlined_call_operand.vmem [shape: f32[64,1], index: 3, kind: input, shape index: {}]   ;;  %s10222_s4 = inlined_call_operand.vmem [shape: f32[64,1], index: 4, kind: input, shape index: {}]   ;;  %s10223_s6 = inlined_call_operand.vmem [shape: f32[128,256], index: 6, kind: output, shape index: {}]  }
   0x1   :  { %v50_v0 = vld [vmem:[%s10217_s0 + $0x10] sm:$0xff]  ;;  %v48_v1 = vld [vmem:[%s10217_s0] sm:$0xff]  ;;  %v51_v3 = vld [vmem:[%s10217_s0 + $0x18] sm:$0xff]  ;;  %30 = vst [vmem:[#allocation2 + $0x30] sm:$0xff] %v5543_v6  ;;  %s5547_s8 = smov 95   ;;  %s5548_s9 = smov 96  }
   0x2   :  { %84 = vrot.lane.b32.xlu1 %v50_v0, %s5542_s25  ;;  %80 = vrot.lane.b32.xlu0 %v48_v1, %s5542_s25  ;;  %v52_v2 = vld [vmem:[%s10217_s0 + $0x20] sm:$0xff]  ;;  %v49_v4 = vld [vmem:[%s10217_s0 + $0x8] sm:$0xff]  ;;  %23 = vst [vmem:[#allocation2] sm:$0xff] %v5543_v6  ;;  %s5549_s10 = smov 110   ;;  %s5550_s11 = smov 94   ;;  %vm1217_vm3 = vcmask 777216  }
   0x3   :  { %88 = vrot.lane.b32.xlu2 %v52_v2, %s5542_s25  ;;  %v53_v5 = vld [vmem:[%s10217_s0 + $0x28] sm:$0xff]  ;;  %27 = vst [vmem:[#allocation2 + $0x18] sm:$0xff] %v5543_v6  ;;  %v55_v7 = vld [vmem:[%s10217_s0 + $0x38] sm:$0xff]  ;;  %v54_v8 = vld [vmem:[%s10217_s0 + $0x30] sm:$0xff]  ;;  %s5551_s12 = smov 111   ;;  %vm589_vm5 = vcmask 916480  }
   0x4   :  { %33 = vst [vmem:[#allocation2 + $0x48] sm:$0xff] %v5543_v6  ;;  %v56_v9 = vld [vmem:[%s10217_s0 + $0x40] sm:$0xff]  ;;  %v58_v10 = vld [vmem:[%s10217_s0 + $0x50] sm:$0xff]  ;;  %v57_v11 = vld [vmem:[%s10217_s0 + $0x48] sm:$0xff]  ;;  %vm428_vm8 = vcmask 1031168   ;;  %vm1056_vm10 = vcmask 785408  }
   0x5   :  { %36 = vst [vmem:[#allocation2 + $0x60] sm:$0xff] %v5543_v6  ;;  %v59_v12 = vld [vmem:[%s10217_s0 + $0x58] sm:$0xff]  ;;  %v61_v13 = vld [vmem:[%s10217_s0 + $0x68] sm:$0xff]  ;;  %v60_v14 = vld [vmem:[%s10217_s0 + $0x60] sm:$0xff]  ;;  %vm279_vm11 = vcmask 1039360   ;;  %vm895_vm12 = vcmask 900096  }
   0x6   :  { %39 = vst [vmem:[#allocation2 + $0x78] sm:$0xff] %v5543_v6  ;;  %v63_v15 = vld [vmem:[%s10217_s0 + $0x78] sm:$0xff]  ;;  %v62_v17 = vld [vmem:[%s10217_s0 + $0x70] sm:$0xff]  ;;  %s5545_s0 = smov 127   ;;  %vm1362_vm13 = vcmask 769024   ;;  %vm750_vm14 = vcmask 908288  }
   0x7   :  { %42 = vst [vmem:[#allocation2 + $0x90] sm:$0xff] %v5543_v6  ;;  %vm1715_vm15 = vcmask 261120  }
   0x8   :  { %45 = vst [vmem:[#allocation2 + $0xa8] sm:$0xff] %v5543_v6 }
   0x9   :  { %32 = vst.msk [vmem:[#allocation2 + $0x40] sm:$0xff] %vm25_vm0, %v5543_v6 }
   0xa   :  { %86 = vrot.lane.b32.xlu1 %v51_v3, %s5542_s25  ;;  %82 = vrot.lane.b32.xlu0 %v49_v4, %s5542_s25  ;;  %26 = vst.msk [vmem:[#allocation2 + $0x10] sm:$0xff] %vm25_vm0, %v5543_v6 }
   0xb   :  { %90 = vrot.lane.b32.xlu2 %v53_v5, %s5542_s25  ;;  %29 = vst.msk [vmem:[#allocation2 + $0x28] sm:$0xff] %vm25_vm0, %v5543_v6 }
   0xc   :  { %35 = vst.msk [vmem:[#allocation2 + $0x58] sm:$0xff] %vm25_vm0, %v5543_v6 }
   0xd   :  { %38 = vst.msk [vmem:[#allocation2 + $0x70] sm:$0xff] %vm25_vm0, %v5543_v6 }
   0xe   :  { %41 = vst.msk [vmem:[#allocation2 + $0x88] sm:$0xff] %vm25_vm0, %v5543_v6 }
   0xf   :  { %44 = vst.msk [vmem:[#allocation2 + $0xa0] sm:$0xff] %vm25_vm0, %v5543_v6 }
  0x10   :  { %47 = vst.msk [vmem:[#allocation2 + $0xb8] sm:$0xff] %vm25_vm0, %v5543_v6 }
  0x12   :  { %94 = vrot.lane.b32.xlu1 %v55_v7, %s5542_s25  ;;  %92 = vrot.lane.b32.xlu0 %v54_v8, %s5542_s25 }
  0x13   :  { %96 = vrot.lane.b32.xlu2 %v56_v9, %s5542_s25 }
  0x1a   :  { %100 = vrot.lane.b32.xlu1 %v58_v10, %s5542_s25  ;;  %98 = vrot.lane.b32.xlu0 %v57_v11, %s5542_s25 }
  0x1b   :  { %102 = vrot.lane.b32.xlu2 %v59_v12, %s5542_s25 }
  0x22   :  { %106 = vrot.lane.b32.xlu1 %v61_v13, %s5542_s25  ;;  %104 = vrot.lane.b32.xlu0 %v60_v14, %s5542_s25 }
  0x23   :  { %108 = vrot.lane.b32.xlu2 %v62_v17, %s5542_s25 }
  0x2a   :  { %110 = vrot.lane.b32.xlu0 %v63_v15, %s5542_s25  ;;  %s5546_s25 = smov 126  }
  0x5d   :  { %v89_v16 = vpop.permute.xlu2 %88 }
  0x5e   :  { %152 = vst.msk [vmem:[#allocation2 + $0x30] sm:$0xff] %vm145_vm1, %v89_v16 }
  0x65   :  { %v91_v18 = vpop.permute.xlu2 %90  ;;  %v5743_v53 = vld [vmem:[#allocation2 + $0x30] sm:$0xff] }
  0x66   :  { %v5654_v19 = vsel %vm112_vm2, %v89_v16, %v91_v18  ;;  %154 = vst.msk [vmem:[#allocation2 + $0x40] sm:$0xff] %vm112_vm2, %v91_v18 }
  0x67   :  { %v5760_v56 = vpack.i.bf16 %v5654_v19, %v5743_v53 }
  0x6d   :  { %v97_v20 = vpop.permute.xlu2 %96  ;;  %v5657_v21 = vld [vmem:[#allocation2 + $0x40] sm:$0xff] }
  0x6e   :  { %158 = vst.msk [vmem:[#allocation2 + $0x60] sm:$0xff] %vm145_vm1, %v97_v20  ;;  %581 = vrot.lane.b32.xlu1 %v5657_v21, %s5544_s7 }
  0x74   :  { %v85_v22 = vpop.permute.xlu1 %84  ;;  %v81_v23 = vpop.permute.xlu0 %80 }
  0x75   :  { %149 = vst.msk [vmem:[#allocation2 + $0x18] sm:$0xff] %vm145_vm1, %v85_v22  ;;  %v103_v24 = vpop.permute.xlu2 %102  ;;  %v5766_v57 = vld [vmem:[#allocation2 + $0x60] sm:$0xff] }
  0x76   :  { %146 = vst.msk [vmem:[#allocation2] sm:$0xff] %vm145_vm1, %v81_v23 }
  0x77   :  { %163 = vst.msk [vmem:[#allocation2 + $0x88] sm:$0xff] %vm112_vm2, %v103_v24 }
  0x7c   :  { %v87_v25 = vpop.permute.xlu1 %86  ;;  %v83_v26 = vpop.permute.xlu0 %82  ;;  %v5684_v34 = vld [vmem:[#allocation2 + $0x18] sm:$0xff] }
  0x7d   :  { %v5666_v27 = vsel %vm112_vm2, %v85_v22, %v87_v25  ;;  %151 = vst.msk [vmem:[#allocation2 + $0x28] sm:$0xff] %vm112_vm2, %v87_v25  ;;  %v5670_v28 = vsel %vm112_vm2, %v81_v23, %v83_v26  ;;  %v5728_v49 = vld [vmem:[#allocation2] sm:$0xff]  ;;  %v109_v59 = vpop.permute.xlu2 %108 }
  0x7e   :  { %148 = vst.msk [vmem:[#allocation2 + $0x10] sm:$0xff] %vm112_vm2, %v83_v26  ;;  %v5741_v52 = vld [vmem:[#allocation2 + $0x88] sm:$0xff]  ;;  %v5751_v55 = vpack.i.bf16 %v5670_v28, %v5728_v49  ;;  %v5801_v63 = vpack.i.bf16 %v5666_v27, %v5684_v34 }
  0x7f   :  { %167 = vst.msk [vmem:[#allocation2 + $0xa8] sm:$0xff] %vm145_vm1, %v109_v59 }
  0x84   :  { %v95_v29 = vpop.permute.xlu1 %94  ;;  %v93_v30 = vpop.permute.xlu0 %92  ;;  %v5673_v31 = vld [vmem:[#allocation2 + $0x28] sm:$0xff] }
  0x85   :  { %157 = vst.msk [vmem:[#allocation2 + $0x58] sm:$0xff] %vm112_vm2, %v95_v29  ;;  %v5677_v32 = vsel %vm112_vm2, %v93_v30, %v95_v29  ;;  %575 = vrot.lane.b32.xlu0 %v5673_v31, %s5544_s7  ;;  %v5682_v33 = vld [vmem:[#allocation2 + $0x10] sm:$0xff]  ;;  %v5187_v48 = vpack.i.bf16 %v5673_v31, %v5666_v27 }
  0x86   :  { %155 = vst.msk [vmem:[#allocation2 + $0x48] sm:$0xff] %vm145_vm1, %v93_v30  ;;  %v5167_v35 = vpack.i.bf16 %v5684_v34, %v5682_v33  ;;  %v170_v30 = vlaneseq }
  0x88   :  { %5168 = vrot.lane.b32.xlu2 %v5167_v35, %s5545_s0 }
  0x8c   :  { %v101_v36 = vpop.permute.xlu1 %100  ;;  %v99_v37 = vpop.permute.xlu0 %98  ;;  %v5732_v50 = vld [vmem:[#allocation2 + $0x58] sm:$0xff] }
  0x8d   :  { %v5690_v38 = vsel %vm112_vm2, %v101_v36, %v103_v24  ;;  %161 = vst.msk [vmem:[#allocation2 + $0x78] sm:$0xff] %vm145_vm1, %v101_v36  ;;  %v5694_v39 = vsel %vm112_vm2, %v97_v20, %v99_v37  ;;  %571 = vrot.lane.b32.xlu0 %v5684_v34, %s5544_s7  ;;  %v5698_v40 = vld [vmem:[#allocation2 + $0x48] sm:$0xff]  ;;  %v5197_v51 = vpack.i.bf16 %v5732_v50, %v5677_v32 }
  0x8e   :  { %162 = vst [vmem:[#allocation2 + $0x80] sm:$0xff] %v5690_v38  ;;  %583 = vrot.lane.b32.xlu1 %v5698_v40, %s5544_s7  ;;  %v5172_v41 = vpack.i.bf16 %v5698_v40, %v5657_v21  ;;  %v5207_v54 = vpack.i.bf16 %v5741_v52, %v5690_v38  ;;  %v5773_v60 = vpack.i.bf16 %v5694_v39, %v5766_v57 }
  0x8f   :  { %159 = vst [vmem:[#allocation2 + $0x68] sm:$0xff] %v5694_v39  ;;  %v5212_v62 = vpack.i.bf16 %v5677_v32, %v5698_v40 }
  0x90   :  { %160 = vst.msk [vmem:[#allocation2 + $0x70] sm:$0xff] %vm112_vm2, %v99_v37  ;;  %5173 = vrot.lane.b32.xlu2 %v5172_v41, %s5545_s0  ;;  %v171_v41 = vand.u32 127, %v170_v30 }
  0x94   :  { %v107_v42 = vpop.permute.xlu1 %106  ;;  %v105_v43 = vpop.permute.xlu0 %104  ;;  %v5714_v45 = vld [vmem:[#allocation2 + $0x78] sm:$0xff] }
  0x95   :  { %166 = vst.msk [vmem:[#allocation2 + $0xa0] sm:$0xff] %vm112_vm2, %v107_v42  ;;  %v5710_v44 = vsel %vm112_vm2, %v105_v43, %v107_v42  ;;  %420 = vrot.lane.b32.xlu0 %v5657_v21, %s5546_s25 }
  0x96   :  { %164 = vst.msk [vmem:[#allocation2 + $0x90] sm:$0xff] %vm145_vm1, %v105_v43  ;;  %569 = vrot.lane.b32.xlu1 %v5682_v33, %s5544_s7 }
  0x97   :  { %165 = vst [vmem:[#allocation2 + $0x98] sm:$0xff] %v5710_v44  ;;  %v5720_v46 = vld [vmem:[#allocation2 + $0x70] sm:$0xff] }
  0x98   :  { %v5177_v47 = vpack.i.bf16 %v5714_v45, %v5720_v46 }
  0x9a   :  { %5178 = vrot.lane.b32.xlu2 %v5177_v47, %s5545_s0  ;;  %v172_v47 = vadd.s32 128, %v171_v41 }
  0x9c   :  { %v111_v58 = vpop.permute.xlu0 %110 }
  0x9d   :  { %5188 = vrot.lane.b32.xlu0 %v5187_v48, %s5545_s0  ;;  %169 = vst.msk [vmem:[#allocation2 + $0xb8] sm:$0xff] %vm112_vm2, %v111_v58  ;;  %v5777_v61 = vsel %vm112_vm2, %v109_v59, %v111_v58  ;;  %v5917_v35 = vld [vmem:[#allocation2 + $0x90] sm:$0xff]  ;;  %v5928_v48 = vld [vmem:[#allocation2 + $0xa0] sm:$0xff] }
  0x9e   :  { %565 = vrot.lane.b32.xlu1 %v5728_v49, %s5544_s7  ;;  %168 = vst [vmem:[#allocation2 + $0xb0] sm:$0xff] %v5777_v61  ;;  %v5252_v36 = vpack.i.bf16 %v5710_v44, %v5917_v35 }
  0xa2   :  { %587 = vrot.lane.b32.xlu2 %v5732_v50, %s5544_s7 }
  0xa4   :  { %v5938_v59 = vld [vmem:[#allocation2 + $0xb8] sm:$0xff] }
  0xa5   :  { %5198 = vrot.lane.b32.xlu0 %v5197_v51, %s5545_s0  ;;  %v5932_v51 = vld [vmem:[#allocation2 + $0xa8] sm:$0xff] }
  0xa6   :  { %414 = vrot.lane.b32.xlu1 %v5673_v31, %s5546_s25  ;;  %v5257_v58 = vpack.i.bf16 %v5932_v51, %v5928_v48 }
  0xaa   :  { %577 = vrot.lane.b32.xlu2 %v5743_v53, %s5544_s7 }
  0xad   :  { %5208 = vrot.lane.b32.xlu0 %v5207_v54, %s5545_s0  ;;  %v173_v54 = vand.u32 15, %v171_v41 }
  0xae   :  { %5183 = vrot.lane.b32.xlu1 %v5751_v55, %s5545_s0 }
  0xaf   :  { %vm5947_vm4 = vcmp.ge.s32.totalorder %v173_v54, 1  ;;  %vm5997_vm7 = vcmp.le.s32.totalorder %v173_v54, 14 }
  0xb2   :  { %426 = vrot.lane.b32.xlu2 %v5732_v50, %s5546_s25 }
  0xb5   :  { %579 = vrot.lane.b32.xlu0 %v5654_v19, %s5544_s7 }
  0xb6   :  { %5193 = vrot.lane.b32.xlu1 %v5760_v56, %s5545_s0 }
  0xba   :  { %422 = vrot.lane.b32.xlu2 %v5698_v40, %s5546_s25 }
  0xbd   :  { %567 = vrot.lane.b32.xlu0 %v5670_v28, %s5544_s7 }
  0xbe   :  { %5203 = vrot.lane.b32.xlu1 %v5773_v60, %s5545_s0 }
  0xc2   :  { %573 = vrot.lane.b32.xlu2 %v5666_v27, %s5544_s7 }
  0xc5   :  { %5218 = vrot.lane.b32.xlu0 %v5760_v56, %s5547_s8 }
  0xc6   :  { %585 = vrot.lane.b32.xlu1 %v5677_v32, %s5544_s7 }
  0xca   :  { %5213 = vrot.lane.b32.xlu2 %v5212_v62, %s5547_s8 }
  0xcd   :  { %412 = vrot.lane.b32.xlu0 %v5666_v27, %s5546_s25 }
  0xce   :  { %424 = vrot.lane.b32.xlu1 %v5677_v32, %s5546_s25 }
  0xd2   :  { %418 = vrot.lane.b32.xlu2 %v5654_v19, %s5546_s25 }
  0xd5   :  { %1050 = vrot.lane.b32.xlu0 %v5698_v40, %s5548_s9 }
  0xd6   :  { %5223 = vrot.lane.b32.xlu1 %v5801_v63, %s5547_s8 }
  0xda   :  { %5228 = vrot.lane.b32.xlu2 %v5751_v55, %s5547_s8 }
  0xdd   :  { %408 = vrot.lane.b32.xlu0 %v5682_v33, %s5546_s25 }
  0xde   :  { %1052 = vrot.lane.b32.xlu1 %v5677_v32, %s5548_s9 }
  0xe0   :  { %v5837_v3 = vpop.permute.xlu1 %581 }
  0xe2   :  { %406 = vrot.lane.b32.xlu2 %v5670_v28, %s5546_s25  ;;  %v5815_v0 = vpop.permute.xlu2 %5168 }
  0xe5   :  { %1046 = vrot.lane.b32.xlu0 %v5654_v19, %s5548_s9 }
  0xe6   :  { %416 = vrot.lane.b32.xlu1 %v5743_v53, %s5546_s25 }
  0xea   :  { %1044 = vrot.lane.b32.xlu2 %v5743_v53, %s5548_s9  ;;  %v5823_v1 = vpop.permute.xlu2 %5173 }
  0xed   :  { %1040 = vrot.lane.b32.xlu0 %v5666_v27, %s5548_s9 }
  0xee   :  { %410 = vrot.lane.b32.xlu1 %v5684_v34, %s5546_s25 }
  0xf2   :  { %1038 = vrot.lane.b32.xlu2 %v5684_v34, %s5548_s9 }
  0xf4   :  { %v5831_v2 = vpop.permute.xlu2 %5178 }
  0xf5   :  { %1034 = vrot.lane.b32.xlu0 %v5670_v28, %s5548_s9 }
  0xf6   :  { %404 = vrot.lane.b32.xlu1 %v5728_v49, %s5546_s25 }
  0xf7   :  { %v5839_v4 = vpop.permute.xlu0 %575 }
  0xfa   :  { %1032 = vrot.lane.b32.xlu2 %v5728_v49, %s5548_s9 }
  0xfc   :  { %v5843_v5 = vpop.permute.xlu2 %587 }
  0xfd   :  { %883 = vrot.lane.b32.xlu0 %v5743_v53, %s5549_s10 }
  0xfe   :  { %889 = vrot.lane.b32.xlu1 %v5698_v40, %s5549_s10 }
  0xff   :  { %v5849_v6 = vpop.permute.xlu0 %571 }
 0x100   :  { %v5851_v7 = vpop.permute.xlu1 %583 }
 0x102   :  { %891 = vrot.lane.b32.xlu2 %v5677_v32, %s5549_s10 }
 0x104   :  { %v5855_v8 = vpop.permute.xlu2 %577 }
 0x105   :  { %1358 = vrot.lane.b32.xlu0 %v5677_v32, %s5550_s11 }
 0x106   :  { %885 = vrot.lane.b32.xlu1 %v5654_v19, %s5549_s10 }
 0x107   :  { %v5861_v9 = vpop.permute.xlu0 %420 }
 0x108   :  { %v5863_v10 = vpop.permute.xlu1 %569 }
 0x10a   :  { %1356 = vrot.lane.b32.xlu2 %v5698_v40, %s5550_s11 }
 0x10c   :  { %v5867_v11 = vpop.permute.xlu2 %426 }
 0x10d   :  { %1350 = vrot.lane.b32.xlu0 %v5743_v53, %s5550_s11 }
 0x10e   :  { %877 = vrot.lane.b32.xlu1 %v5684_v34, %s5549_s10 }
 0x10f   :  { %v5873_v12 = vpop.permute.xlu0 %5188 }
 0x110   :  { %v5875_v13 = vpop.permute.xlu1 %565 }
 0x112   :  { %879 = vrot.lane.b32.xlu2 %v5666_v27, %s5549_s10 }
 0x114   :  { %v5879_v14 = vpop.permute.xlu2 %422 }
 0x115   :  { %873 = vrot.lane.b32.xlu0 %v5670_v28, %s5549_s10 }
 0x116   :  { %1352 = vrot.lane.b32.xlu1 %v5654_v19, %s5550_s11 }
 0x117   :  { %v5885_v15 = vpop.permute.xlu0 %5198 }
 0x118   :  { %v5887_v16 = vpop.permute.xlu1 %414 }
 0x11a   :  { %871 = vrot.lane.b32.xlu2 %v5728_v49, %s5549_s10 }
 0x11c   :  { %v5891_v17 = vpop.permute.xlu2 %573 }
 0x11d   :  { %5233 = vrot.lane.b32.xlu0 %v5212_v62, %s5551_s12  ;;  %v174_v62 = vand.u32 15, %v172_v47 }
 0x11e   :  { %1344 = vrot.lane.b32.xlu1 %v5684_v34, %s5550_s11 }
 0x11f   :  { %v5896_v18 = vpop.permute.xlu0 %5208  ;;  %vm5953_vm6 = vcmp.ge.s32.totalorder %v174_v62, 1  ;;  %vm6005_vm9 = vcmp.le.s32.totalorder %v174_v62, 14 }
 0x120   :  { %v5898_v20 = vpop.permute.xlu1 %5183 }
 0x122   :  { %1346 = vrot.lane.b32.xlu2 %v5666_v27, %s5550_s11 }
 0x124   :  { %v5902_v22 = vpop.permute.xlu2 %5213 }
 0x125   :  { %v10224_v23 = vunpack.i.h.bf16 %v5902_v22  ;;  %v5215_v24 = vunpack.i.l.bf16 %v5902_v22  ;;  %5238 = vrot.lane.b32.xlu0 %v5760_v56, %s5551_s12 }
 0x126   :  { %1338 = vrot.lane.b32.xlu1 %v5728_v49, %s5550_s11 }
 0x127   :  { %v1224_v25 = vsel %vm1217_vm3, %v5215_v24, %v10224_v23  ;;  %v580_v26 = vpop.permute.xlu0 %579  ;;  %v1518_v24 = vld [vmem:[%s10218_s1 + $0x158] sm:$0xff] }
 0x128   :  { %1925 = vmatpush.msra.mxu1 %v1224_v25  ;;  %v5913_v29 = vpop.permute.xlu1 %5193 }
 0x12a   :  { %1340 = vrot.lane.b32.xlu2 %v5670_v28, %s5550_s11 }
 0x12c   :  { %v5921_v37 = vpop.permute.xlu2 %418 }
 0x12d   :  { %5253 = vrot.lane.b32.xlu0 %v5252_v36, %s5545_s0 }
 0x12e   :  { %5243 = vrot.lane.b32.xlu1 %v5801_v63, %s5551_s12  ;;  %v5262_v63 = vpack.i.bf16 %v5938_v59, %v5777_v61 }
 0x12f   :  { %v568_v42 = vpop.permute.xlu0 %567 }
 0x130   :  { %v5926_v43 = vpop.permute.xlu1 %5203 }
 0x131   :  { %10488 = vst [vmem:[#allocation4_spill] sm:$0xff] %v5926_v43  ;;  %v594_v43 = vsel %vm589_vm5, %v5855_v8, %v580_v26  ;;  %v590_v8 = vsel %vm589_vm5, %v5875_v13, %v568_v42 }
 0x132   :  { %5248 = vrot.lane.b32.xlu2 %v5751_v55, %s5551_s12 }
 0x134   :  { %v5934_v56 = vpop.permute.xlu2 %5228 }
 0x135   :  { %485 = vrot.lane.b32.xlu0 %v5766_v57, %s5546_s25  ;;  %v5230_v62 = vunpack.i.l.bf16 %v5934_v56 }
 0x136   :  { %5258 = vrot.lane.b32.xlu1 %v5257_v58, %s5545_s0 }
 0x137   :  { %v5945_v55 = vpop.permute.xlu0 %5218 }
 0x138   :  { %v586_v25 = vpop.permute.xlu1 %585  ;;  %v10232_v30 = vunpack.i.h.bf16 %v5945_v55  ;;  %v5220_v36 = vunpack.i.l.bf16 %v5945_v55 }
 0x139   :  { %v596_v47 = vsel %vm589_vm5, %v5851_v7, %v586_v25  ;;  %v597_v58 = vsel %vm589_vm5, %v586_v25, %v5843_v5  ;;  %v595_v5 = vsel %vm589_vm5, %v580_v26, %v5837_v3  ;;  %v593_v3 = vsel %vm589_vm5, %v5891_v17, %v5839_v4  ;;  %v7514_v4 = vld [vmem:[%s10218_s1 + $0x38] sm:$0xff] }
 0x13a   :  { %5263 = vrot.lane.b32.xlu2 %v5262_v63, %s5545_s0  ;;  %5060 = vmatpush.msk.msra.mxu0 %vm5947_vm4, %v596_v47  ;;  %v1222_v23 = vsel %vm1217_vm3, %v5220_v36, %v10232_v30  ;;  %v592_v63 = vsel %vm589_vm5, %v5849_v6, %v5891_v17  ;;  %v1498_v30 = vld [vmem:[%s10218_s1 + $0xb8] sm:$0xff]  ;;  %10564 = vst [vmem:[#allocation41_spill] sm:$0xff] %v7514_v4 }
 0x13b   :  { %5084 = vmatpush.msk.msra.mxu3 %vm5953_vm6, %v597_v58  ;;  %1926 = vmatpush.msra.mxu1 %v1222_v23 }
 0x13c   :  { %v5971_v7 = vpop.permute.xlu2 %406  ;;  %5061 = vmatpush.msk.msra.mxu0 %vm5947_vm4, %v594_v43  ;;  %v591_v43 = vsel %vm589_vm5, %v568_v42, %v5863_v10  ;;  %v434_v42 = vsel %vm428_vm8, %v5921_v37, %v5861_v9  ;;  %v10230_v9 = vunpack.i.h.bf16 %v5934_v56 }
 0x13d   :  { %5085 = vmatpush.msk.msra.mxu3 %vm5953_vm6, %v595_v5  ;;  %491 = vrot.lane.b32.xlu0 %v5714_v45, %s5546_s25  ;;  %v5201_v5 = vunpack.i.h.bf16 %v5885_v15 }
 0x13e   :  { %487 = vrot.lane.b32.xlu1 %v5694_v39, %s5546_s25  ;;  %5062 = vmatpush.msk.msra.mxu0 %vm5947_vm4, %v592_v63  ;;  %v1218_v58 = vsel %vm1217_vm3, %v5230_v62, %v10230_v9  ;;  %v5200_v63 = vunpack.i.l.bf16 %v5885_v15  ;;  %v1495_v9 = vld [vmem:[%s10218_s1 + $0xa0] sm:$0xff] }
 0x13f   :  { %5086 = vmatpush.msk.msra.mxu3 %vm5953_vm6, %v593_v3  ;;  %v5995_v23 = vpop.permute.xlu0 %412  ;;  %v5196_v3 = vunpack.i.h.bf16 %v5913_v29 }
 0x140   :  { %v425_v26 = vpop.permute.xlu1 %424  ;;  %5063 = vmatpush.msk.msra.mxu0 %vm5947_vm4, %v590_v8 }
 0x141   :  { %5087 = vmatpush.msk.msra.mxu3 %vm5953_vm6, %v591_v43  ;;  %v435_v13 = vsel %vm428_vm8, %v5879_v14, %v425_v26  ;;  %v436_v17 = vsel %vm428_vm8, %v425_v26, %v5867_v11  ;;  %v432_v11 = vsel %vm428_vm8, %v5995_v23, %v5887_v16 }
 0x142   :  { %489 = vrot.lane.b32.xlu2 %v5720_v46, %s5546_s25  ;;  %5064 = vmatpush.msk.msra.mxu0 %vm5997_vm7, %v435_v13  ;;  %v5175_v13 = vunpack.i.l.bf16 %v5823_v1 }
 0x143   :  { %5088 = vmatpush.msk.msra.mxu3 %vm6005_vm9, %v436_v17  ;;  %v5191_v17 = vunpack.i.h.bf16 %v5873_v12 }
 0x144   :  { %v1045_v10 = vpop.permute.xlu2 %1044 }
 0x145   :  { %5089 = vmatpush.msk.msra.mxu3 %vm6005_vm9, %v434_v42  ;;  %497 = vrot.lane.b32.xlu0 %v5917_v35, %s5546_s25  ;;  %v5190_v42 = vunpack.i.l.bf16 %v5873_v12 }
 0x146   :  { %493 = vrot.lane.b32.xlu1 %v5690_v38, %s5546_s25 }
 0x147   :  { %5090 = vmatpush.msk.msra.mxu3 %vm6005_vm9, %v432_v11  ;;  %v1051_v14 = vpop.permute.xlu0 %1050  ;;  %v287_v11 = vsel %vm279_vm11, %v5200_v63, %v5201_v5 }
 0x148   :  { %v6035_v54 = vpop.permute.xlu1 %5223 }
 0x149   :  { %v10231_v25 = vunpack.i.h.bf16 %v6035_v54  ;;  %v5225_v36 = vunpack.i.l.bf16 %v6035_v54 }
 0x14a   :  { %495 = vrot.lane.b32.xlu2 %v5741_v52, %s5546_s25 }
 0x14b   :  { %v1220_v16 = vsel %vm1217_vm3, %v5225_v36, %v10231_v25  ;;  %v285_v36 = vsel %vm279_vm11, %v5196_v3, %v5175_v13 }
 0x14c   :  { %v1039_v47 = vpop.permute.xlu2 %1038  ;;  %1927 = vmatpush.msra.mxu1 %v1220_v16  ;;  %v5170_v16 = vunpack.i.l.bf16 %v5815_v0 }
 0x14d   :  { %503 = vrot.lane.b32.xlu0 %v5932_v51, %s5546_s25 }
 0x14e   :  { %499 = vrot.lane.b32.xlu1 %v5710_v44, %s5546_s25  ;;  %1928 = vmatpush.msra.mxu1 %v1218_v58  ;;  %v283_v58 = vsel %vm279_vm11, %v5190_v42, %v5191_v17 }
 0x14f   :  { %v409_v52 = vpop.permute.xlu0 %408 }
 0x150   :  { %v6056_v8 = vpop.permute.xlu1 %1052  ;;  %v430_v26 = vsel %vm428_vm8, %v5971_v7, %v409_v52 }
 0x151   :  { %v1063_v43 = vsel %vm1056_vm10, %v1051_v14, %v6056_v8  ;;  %5091 = vmatpush.msk.msra.mxu3 %vm6005_vm9, %v430_v26  ;;  %v5186_v14 = vunpack.i.h.bf16 %v5898_v20 }
 0x152   :  { %501 = vrot.lane.b32.xlu2 %v5928_v48, %s5546_s25  ;;  %5072 = vmatpush.msk.msra.mxu1 %vm5947_vm4, %v1063_v43 }
 0x153   :  { %2159 = vmatpush.msra.mxu3 %v287_v11  ;;  %v281_v43 = vsel %vm279_vm11, %v5186_v14, %v5170_v16 }
 0x154   :  { %v1033_v62 = vpop.permute.xlu2 %1032 }
 0x155   :  { %646 = vrot.lane.b32.xlu0 %v5766_v57, %s5544_s7  ;;  %2160 = vmatpush.msra.mxu3 %v285_v36 }
 0x156   :  { %505 = vrot.lane.b32.xlu1 %v5777_v61, %s5546_s25 }
 0x157   :  { %v6086_v5 = vpop.permute.xlu0 %1046  ;;  %2161 = vmatpush.msra.mxu3 %v283_v58  ;;  %v5176_v58 = vunpack.i.h.bf16 %v5823_v1  ;;  %v5287_v1 = vpack.i.bf16 %v5690_v38, %v5714_v45 }
 0x158   :  { %v417_v52 = vpop.permute.xlu1 %416  ;;  %v1061_v26 = vsel %vm1056_vm10, %v1045_v10, %v6086_v5  ;;  %v5267_v10 = vpack.i.bf16 %v5657_v21, %v5732_v50 }
 0x159   :  { %v433_v13 = vsel %vm428_vm8, %v417_v52, %v5921_v37  ;;  %5073 = vmatpush.msk.msra.mxu1 %vm5947_vm4, %v1061_v26  ;;  %2162 = vmatpush.msra.mxu3 %v281_v43  ;;  %v5195_v52 = vunpack.i.l.bf16 %v5913_v29  ;;  %v286_v43 = vsel %vm279_vm11, %v5176_v58, %v5200_v63 }
 0x15a   :  { %507 = vrot.lane.b32.xlu2 %v5938_v59, %s5546_s25  ;;  %5065 = vmatpush.msk.msra.mxu0 %vm5997_vm7, %v433_v13  ;;  %v5185_v13 = vunpack.i.l.bf16 %v5898_v20 }
 0x15b   :  { %5092 = vmatpush.msk.msra.mxu3 %vm5953_vm6, %v5677_v32 }
 0x15c   :  { %v6106_v17 = vpop.permute.xlu2 %891 }
 0x15d   :  { %5268 = vrot.lane.b32.xlu0 %v5267_v10, %s5547_s8  ;;  %5093 = vmatpush.msk.msra.mxu3 %vm5953_vm6, %v5654_v19  ;;  %v5282_v19 = vpack.i.bf16 %v5682_v33, %v5710_v44  ;;  %v284_v10 = vsel %vm279_vm11, %v5195_v52, %v5196_v3 }
 0x15e   :  { %648 = vrot.lane.b32.xlu1 %v5694_v39, %s5544_s7 }
 0x15f   :  { %v6114_v37 = vpop.permute.xlu0 %1040  ;;  %5094 = vmatpush.msk.msra.mxu3 %vm5953_vm6, %v5666_v27 }
 0x160   :  { %v411_v32 = vpop.permute.xlu1 %410  ;;  %v1059_v11 = vsel %vm1056_vm10, %v1039_v47, %v6114_v37 }
 0x161   :  { %v431_v36 = vsel %vm428_vm8, %v411_v32, %v5995_v23  ;;  %5074 = vmatpush.msk.msra.mxu1 %vm5947_vm4, %v1059_v11  ;;  %5095 = vmatpush.msk.msra.mxu3 %vm5953_vm6, %v5670_v28  ;;  %v6136_v23 = vpack.i.bf16 %v5777_v61, %v5932_v51 }
 0x162   :  { %650 = vrot.lane.b32.xlu2 %v5720_v46, %s5544_s7  ;;  %5066 = vmatpush.msk.msra.mxu0 %vm5997_vm7, %v431_v36  ;;  %v5277_v46 = vpack.i.bf16 %v5917_v35, %v5673_v31 }
 0x164   :  { %v1357_v27 = vpop.permute.xlu2 %1356 }
 0x165   :  { %5283 = vrot.lane.b32.xlu0 %v5282_v19, %s5547_s8 }
 0x166   :  { %5273 = vrot.lane.b32.xlu1 %v6136_v23, %s5547_s8 }
 0x167   :  { %v6141_v28 = vpop.permute.xlu0 %1034 }
 0x168   :  { %v405_v47 = vpop.permute.xlu1 %404  ;;  %v1057_v16 = vsel %vm1056_vm10, %v1033_v62, %v6141_v28 }
 0x169   :  { %v429_v26 = vsel %vm428_vm8, %v405_v47, %v5971_v7  ;;  %5075 = vmatpush.msk.msra.mxu1 %vm5947_vm4, %v1057_v16  ;;  %v5171_v7 = vunpack.i.h.bf16 %v5815_v0  ;;  %v280_v0 = vsel %vm279_vm11, %v5185_v13, %v5186_v14 }
 0x16a   :  { %5278 = vrot.lane.b32.xlu2 %v5277_v46, %s5547_s8  ;;  %5067 = vmatpush.msk.msra.mxu0 %vm5997_vm7, %v429_v26 }
 0x16b   :  { %v282_v63 = vsel %vm279_vm11, %v5171_v7, %v5190_v42 }
 0x16c   :  { %v6161_v62 = vpop.permute.xlu2 %879  ;;  %1820 = vmatpush.msra.mxu0 %v286_v43 }
 0x16d   :  { %5288 = vrot.lane.b32.xlu0 %v5287_v1, %s5547_s8 }
 0x16e   :  { %664 = vrot.lane.b32.xlu1 %v5932_v51, %s5544_s7  ;;  %1821 = vmatpush.msra.mxu0 %v284_v10 }
 0x16f   :  { %v884_v15 = vpop.permute.xlu0 %883 }
 0x170   :  { %v890_v32 = vpop.permute.xlu1 %889  ;;  %1822 = vmatpush.msra.mxu0 %v282_v63  ;;  %v1477_v63 = vld [vmem:[%s10218_s1 + $0x10] sm:$0xff] }
 0x171   :  { %v902_v29 = vsel %vm895_vm12, %v890_v32, %v6106_v17 }
 0x172   :  { %666 = vrot.lane.b32.xlu2 %v5777_v61, %s5544_s7  ;;  %1823 = vmatpush.msra.mxu0 %v280_v0 }
 0x173   :  { %5076 = vmatpush.msk.msra.mxu1 %vm5997_vm7, %v902_v29 }
 0x174   :  { %v872_v3 = vpop.permute.xlu2 %871  ;;  %5068 = vmatpush.msk.msra.mxu0 %vm5947_vm4, %v5698_v40 }
 0x175   :  { %1054 = vrot.lane.b32.xlu0 %v5732_v50, %s5548_s9 }
 0x176   :  { %658 = vrot.lane.b32.xlu1 %v5917_v35, %s5544_s7  ;;  %5069 = vmatpush.msk.msra.mxu0 %vm5947_vm4, %v5743_v53 }
 0x177   :  { %v6193_v12 = vpop.permute.xlu0 %1358 }
 0x178   :  { %v6195_v20 = vpop.permute.xlu1 %885  ;;  %5070 = vmatpush.msk.msra.mxu0 %vm5947_vm4, %v5684_v34  ;;  %v1369_v40 = vsel %vm1362_vm13, %v1357_v27, %v6193_v12 }
 0x179   :  { %v900_v42 = vsel %vm895_vm12, %v884_v15, %v6195_v20  ;;  %5080 = vmatpush.msk.msra.mxu2 %vm5997_vm7, %v1369_v40 }
 0x17a   :  { %660 = vrot.lane.b32.xlu2 %v5710_v44, %s5544_s7  ;;  %5071 = vmatpush.msk.msra.mxu0 %vm5947_vm4, %v5728_v49  ;;  %v1475_v49 = vld [vmem:[%s10218_s1] sm:$0xff] }
 0x17b   :  { %5077 = vmatpush.msk.msra.mxu1 %vm5997_vm7, %v900_v42  ;;  %1828 = vmatmul.f32.vlgmr.msra.gmra.mxu0 %v1475_v49 }
 0x17c   :  { %v6213_v34 = vpop.permute.xlu2 %1346  ;;  %2167 = vmatmul.f32.vlgmr.msra.gmra.mxu3 %v1475_v49  ;;  %v1476_v49 = vld [vmem:[%s10218_s1 + $0x8] sm:$0xff] }
 0x17d   :  { %654 = vrot.lane.b32.xlu0 %v5690_v38, %s5544_s7 }
 0x17e   :  { %5293 = vrot.lane.b32.xlu1 %v5773_v60, %s5547_s8 }
 0x17f   :  { %v1351_v53 = vpop.permute.xlu0 %1350 }
 0x180   :  { %v878_v14 = vpop.permute.xlu1 %877 }
 0x181   :  { %v898_v11 = vsel %vm895_vm12, %v878_v14, %v6161_v62 }
 0x182   :  { %652 = vrot.lane.b32.xlu2 %v5714_v45, %s5544_s7  ;;  %5078 = vmatpush.msk.msra.mxu1 %vm5997_vm7, %v898_v11 }
 0x184   :  { %v6228_v36 = vpop.permute.xlu2 %1340 }
 0x185   :  { %1133 = vrot.lane.b32.xlu0 %v5777_v61, %s5548_s9 }
 0x186   :  { %1048 = vrot.lane.b32.xlu1 %v5657_v21, %s5548_s9  ;;  %v1478_v21 = vld [vmem:[%s10218_s1 + $0x18] sm:$0xff] }
 0x187   :  { %v6234_v60 = vpop.permute.xlu0 %873  ;;  %1831 = vmatmul.f32.gmra.mxu0 %v1478_v21  ;;  %2170 = vmatmul.f32.gmra.mxu3 %v1478_v21 }
 0x188   :  { %v6236_v19 = vpop.permute.xlu1 %1352  ;;  %v896_v27 = vsel %vm895_vm12, %v872_v3, %v6234_v60  ;;  %v1480_v3 = vld [vmem:[%s10218_s1 + $0x28] sm:$0xff] }
 0x189   :  { %5079 = vmatpush.msk.msra.mxu1 %vm5997_vm7, %v896_v27  ;;  %v1367_v47 = vsel %vm1362_vm13, %v1351_v53, %v6236_v19 }
 0x18a   :  { %1131 = vrot.lane.b32.xlu2 %v5932_v51, %s5548_s9  ;;  %5081 = vmatpush.msk.msra.mxu2 %vm5997_vm7, %v1367_v47 }
 0x18c   :  { %v6251_v46 = vpop.permute.xlu2 %5248 }
 0x18d   :  { %1127 = vrot.lane.b32.xlu0 %v5710_v44, %s5548_s9  ;;  %v1481_v44 = vld [vmem:[%s10218_s1 + $0x30] sm:$0xff]  ;;  %v10226_v40 = vunpack.i.h.bf16 %v6251_v46  ;;  %v5250_v42 = vunpack.i.l.bf16 %v6251_v46 }
 0x18e   :  { %1042 = vrot.lane.b32.xlu1 %v5673_v31, %s5548_s9 }
 0x18f   :  { %v6257_v16 = vpop.permute.xlu0 %5233  ;;  %1834 = vmatmul.f32.gmra.mxu0 %v1481_v44  ;;  %2173 = vmatmul.f32.gmra.mxu3 %v1481_v44  ;;  %v751_v27 = vsel %vm750_vm14, %v5250_v42, %v10226_v40  ;;  %v6361_v44 = vld [vmem:[#allocation2 + $0x28] sm:$0xff]  ;;  %v6424_v40 = vld [vmem:[#allocation2 + $0x60] sm:$0xff] }
 0x190   :  { %v1345_v58 = vpop.permute.xlu1 %1344  ;;  %v10229_v52 = vunpack.i.h.bf16 %v6257_v16  ;;  %v5235_v26 = vunpack.i.l.bf16 %v6257_v16 }
 0x191   :  { %v1365_v43 = vsel %vm1362_vm13, %v1345_v58, %v6213_v34  ;;  %v1490_v58 = vld [vmem:[%s10218_s1 + $0x78] sm:$0xff] }
 0x192   :  { %1125 = vrot.lane.b32.xlu2 %v5917_v35, %s5548_s9  ;;  %5082 = vmatpush.msk.msra.mxu2 %vm5997_vm7, %v1365_v43  ;;  %v757_v31 = vsel %vm750_vm14, %v5235_v26, %v10229_v52  ;;  %v6354_v43 = vld [vmem:[#allocation2 + $0x98] sm:$0xff]  ;;  %v5307_v52 = vpack.i.bf16 %v5917_v35, %v6361_v44 }
 0x193   :  { %1937 = vmatpush.msra.mxu1 %v757_v31  ;;  %v1479_v31 = vld [vmem:[%s10218_s1 + $0x20] sm:$0xff] }
 0x194   :  { %v6273_v1 = vpop.permute.xlu2 %5263 }
 0x195   :  { %1121 = vrot.lane.b32.xlu0 %v5690_v38, %s5548_s9  ;;  %v1484_v38 = vld [vmem:[%s10218_s1 + $0x48] sm:$0xff] }
 0x196   :  { %1036 = vrot.lane.b32.xlu1 %v5682_v33, %s5548_s9 }
 0x197   :  { %v6279_v7 = vpop.permute.xlu0 %5238  ;;  %1837 = vmatmul.f32.gmra.mxu0 %v1484_v38  ;;  %2176 = vmatmul.f32.gmra.mxu3 %v1484_v38  ;;  %v1482_v38 = vld [vmem:[%s10218_s1 + $0x38] sm:$0xff] }
 0x198   :  { %v1339_v13 = vpop.permute.xlu1 %1338  ;;  %v10228_v10 = vunpack.i.h.bf16 %v6279_v7  ;;  %v5240_v15 = vunpack.i.l.bf16 %v6279_v7 }
 0x199   :  { %v1363_v32 = vsel %vm1362_vm13, %v1339_v13, %v6228_v36 }
 0x19a   :  { %1119 = vrot.lane.b32.xlu2 %v5714_v45, %s5548_s9  ;;  %5083 = vmatpush.msk.msra.mxu2 %vm5997_vm7, %v1363_v32  ;;  %v755_v33 = vsel %vm750_vm14, %v5240_v15, %v10228_v10  ;;  %v1486_v15 = vld [vmem:[%s10218_s1 + $0x58] sm:$0xff] }
 0x19b   :  { %4932 = vmatmul.msk.f32.vlgmr.msra.gmra.mxu2 %vm1715_vm15, %v1477_v63  ;;  %1938 = vmatpush.msra.mxu1 %v755_v33  ;;  %v1493_v63 = vld [vmem:[%s10218_s1 + $0x90] sm:$0xff]  ;;  %v6380_v33 = vld [vmem:[#allocation2 + $0x80] sm:$0xff] }
 0x19c   :  { %v6299_v0 = vpop.permute.xlu2 %489 }
 0x19d   :  { %10497 = vst [vmem:[#allocation5_spill] sm:$0xff] %v6299_v0  ;;  %1115 = vrot.lane.b32.xlu0 %v5694_v39, %s5548_s9  ;;  %v1487_v39 = vld [vmem:[%s10218_s1 + $0x60] sm:$0xff] }
 0x19e   :  { %893 = vrot.lane.b32.xlu1 %v5732_v50, %s5549_s10 }
 0x19f   :  { %v6305_v45 = vpop.permute.xlu0 %5253  ;;  %1840 = vmatmul.f32.gmra.mxu0 %v1487_v39  ;;  %2179 = vmatmul.f32.gmra.mxu3 %v1487_v39  ;;  %v1489_v39 = vld [vmem:[%s10218_s1 + $0x70] sm:$0xff] }
 0x1a0   :  { %v6307_v29 = vpop.permute.xlu1 %5243 }
 0x1a1   :  { %v10227_v53 = vunpack.i.h.bf16 %v6307_v29  ;;  %v5245_v14 = vunpack.i.l.bf16 %v6307_v29 }
 0x1a2   :  { %1113 = vrot.lane.b32.xlu2 %v5766_v57, %s5548_s9  ;;  %v6332_v57 = vld [vmem:[#allocation2 + $0x40] sm:$0xff] }
 0x1a3   :  { %4933 = vmatmul.msk.f32.gmra.mxu2 %vm1715_vm15, %v1480_v3  ;;  %v753_v50 = vsel %vm750_vm14, %v5245_v14, %v10227_v53  ;;  %v6387_v3 = vld [vmem:[#allocation2 + $0x10] sm:$0xff]  ;;  %v1488_v53 = vld [vmem:[%s10218_s1 + $0x68] sm:$0xff] }
 0x1a4   :  { %v6325_v11 = vpop.permute.xlu2 %495  ;;  %1939 = vmatpush.msra.mxu1 %v753_v50  ;;  %v6398_v50 = vld [vmem:[#allocation2 + $0x78] sm:$0xff] }
 0x1a5   :  { %10498 = vst [vmem:[#allocation6_spill] sm:$0xff] %v6325_v11  ;;  %972 = vrot.lane.b32.xlu0 %v5777_v61, %s5549_s10  ;;  %v1483_v61 = vld [vmem:[%s10218_s1 + $0x40] sm:$0xff]  ;;  %v10500_v11 = vunpack.i.h.bf16 %v5902_v22  ;;  %v10501_v22 = vunpack.i.h.bf16 %v5945_v55  ;;  %v1501_v55 = vld [vmem:[%s10218_s1 + $0xd0] sm:$0xff] }
 0x1a6   :  { %887 = vrot.lane.b32.xlu1 %v6332_v57, %s5549_s10  ;;  %1940 = vmatpush.msra.mxu1 %v751_v27  ;;  %v1496_v27 = vld [vmem:[%s10218_s1 + $0xa8] sm:$0xff] }
 0x1a7   :  { %1941 = vmatmul.f32.vlgmr.msra.gmra.mxu1 %v1476_v49  ;;  %v6339_v47 = vpop.permute.xlu0 %485  ;;  %1843 = vmatmul.f32.gmra.mxu0 %v1490_v58  ;;  %v713_v49 = vld [vmem:[#allocation2 + $0x58] sm:$0xff] }
 0x1a8   :  { %v6341_v21 = vpop.permute.xlu1 %5258  ;;  %2182 = vmatmul.f32.gmra.mxu3 %v1490_v58  ;;  %v6408_v58 = vld [vmem:[#allocation2 + $0x68] sm:$0xff] }
 0x1aa   :  { %970 = vrot.lane.b32.xlu2 %v5932_v51, %s5549_s10 }
 0x1ab   :  { %4934 = vmatmul.msk.f32.gmra.mxu2 %vm1715_vm15, %v1483_v61 }
 0x1ac   :  { %v6352_v26 = vpop.permute.xlu2 %501 }
 0x1ad   :  { %10499 = vst [vmem:[#allocation7_spill] sm:$0xff] %v6352_v26  ;;  %966 = vrot.lane.b32.xlu0 %v6354_v43, %s5549_s10 }
 0x1ae   :  { %881 = vrot.lane.b32.xlu1 %v6361_v44, %s5549_s10 }
 0x1af   :  { %1944 = vmatmul.f32.gmra.mxu1 %v1479_v31  ;;  %v6365_v51 = vpop.permute.xlu0 %491  ;;  %1846 = vmatmul.f32.gmra.mxu0 %v1493_v63  ;;  %v5297_v31 = vpack.i.bf16 %v6332_v57, %v713_v49 }
 0x1b0   :  { %v6367_v13 = vpop.permute.xlu1 %487  ;;  %2185 = vmatmul.f32.gmra.mxu3 %v1493_v63 }
 0x1b2   :  { %964 = vrot.lane.b32.xlu2 %v5917_v35, %s5549_s10  ;;  %v5317_v35 = vpack.i.bf16 %v6380_v33, %v6398_v50 }
 0x1b3   :  { %4935 = vmatmul.msk.f32.gmra.mxu2 %vm1715_vm15, %v1486_v15  ;;  %v1485_v15 = vld [vmem:[%s10218_s1 + $0x50] sm:$0xff] }
 0x1b4   :  { %v6378_v32 = vpop.permute.xlu2 %507 }
 0x1b5   :  { %960 = vrot.lane.b32.xlu0 %v6380_v33, %s5549_s10 }
 0x1b6   :  { %875 = vrot.lane.b32.xlu1 %v6387_v3, %s5549_s10 }
 0x1b7   :  { %1947 = vmatmul.f32.gmra.mxu1 %v1482_v38  ;;  %v6391_v42 = vpop.permute.xlu0 %497  ;;  %1849 = vmatmul.f32.gmra.mxu0 %v1496_v27 }
 0x1b8   :  { %v6393_v14 = vpop.permute.xlu1 %493  ;;  %2188 = vmatmul.f32.gmra.mxu3 %v1496_v27  ;;  %v1499_v27 = vld [vmem:[%s10218_s1 + $0xc0] sm:$0xff] }
 0x1ba   :  { %958 = vrot.lane.b32.xlu2 %v6398_v50, %s5549_s10 }
 0x1bb   :  { %4936 = vmatmul.msk.f32.gmra.mxu2 %vm1715_vm15, %v1489_v39  ;;  %v1492_v39 = vld [vmem:[%s10218_s1 + $0x88] sm:$0xff] }
 0x1bc   :  { %v6406_v61 = vpop.permute.xlu2 %650 }
 0x1bd   :  { %954 = vrot.lane.b32.xlu0 %v6408_v58, %s5549_s10 }
 0x1be   :  { %5298 = vrot.lane.b32.xlu1 %v5297_v31, %s5551_s12  ;;  %v5312_v31 = vpack.i.bf16 %v6387_v3, %v6354_v43 }
 0x1bf   :  { %1950 = vmatmul.f32.gmra.mxu1 %v1485_v15  ;;  %v6417_v63 = vpop.permute.xlu0 %503  ;;  %1852 = vmatmul.f32.gmra.mxu0 %v1499_v27 }
 0x1c0   :  { %v6419_v38 = vpop.permute.xlu1 %499  ;;  %2191 = vmatmul.f32.gmra.mxu3 %v1499_v27  ;;  %v1502_v27 = vld [vmem:[%s10218_s1 + $0xd8] sm:$0xff] }
 0x1c2   :  { %952 = vrot.lane.b32.xlu2 %v6424_v40, %s5549_s10 }
 0x1c3   :  { %4937 = vmatmul.msk.f32.gmra.mxu2 %vm1715_vm15, %v1492_v39 }
 0x1c4   :  { %v6434_v15 = vpop.permute.xlu2 %5278 }
 0x1c5   :  { %5313 = vrot.lane.b32.xlu0 %v5312_v31, %s5551_s12  ;;  %v1491_v31 = vld [vmem:[%s10218_s1 + $0x80] sm:$0xff] }
 0x1c6   :  { %5303 = vrot.lane.b32.xlu1 %v6136_v23, %s5551_s12  ;;  %v5322_v23 = vpack.i.bf16 %v6408_v58, %v6424_v40 }
 0x1c7   :  { %1953 = vmatmul.f32.gmra.mxu1 %v1488_v53  ;;  %v6442_v10 = vpop.permute.xlu0 %646  ;;  %1855 = vmatmul.f32.gmra.mxu0 %v1502_v27 }
 0x1c8   :  { %v6444_v39 = vpop.permute.xlu1 %505  ;;  %2194 = vmatmul.f32.gmra.mxu3 %v1502_v27  ;;  %v1505_v27 = vld [vmem:[%s10218_s1 + $0xf0] sm:$0xff] }
 0x1ca   :  { %5308 = vrot.lane.b32.xlu2 %v5307_v52, %s5551_s12 }
 0x1cb   :  { %4938 = vmatmul.msk.f32.gmra.mxu2 %vm1715_vm15, %v1495_v9 }
 0x1cc   :  { %v6458_v53 = vpop.permute.xlu2 %666 }
 0x1cd   :  { %5323 = vrot.lane.b32.xlu0 %v5322_v23, %s5551_s12  ;;  %v5280_v23 = vunpack.i.l.bf16 %v6434_v15 }
 0x1ce   :  { %5318 = vrot.lane.b32.xlu1 %v5317_v35, %s5551_s12 }
 0x1cf   :  { %1956 = vmatmul.f32.gmra.mxu1 %v1491_v31  ;;  %v5269_v9 = vpop.permute.xlu0 %5268  ;;  %v1494_v31 = vld [vmem:[%s10218_s1 + $0x98] sm:$0xff]  ;;  %1858 = vmatmul.f32.gmra.mxu0 %v1505_v27 }
 0x1d0   :  { %v6467_v52 = vpop.permute.xlu1 %648  ;;  %v5270_v25 = vunpack.i.l.bf16 %v5269_v9  ;;  %v5271_v0 = vunpack.i.h.bf16 %v5269_v9  ;;  %2197 = vmatmul.f32.gmra.mxu3 %v1505_v27 }
 0x1d2   :  { %1360 = vrot.lane.b32.xlu2 %v713_v49, %s5550_s11  ;;  %v1225_v26 = vsel %vm1217_vm3, %v10500_v11, %v5270_v25  ;;  %v1223_v25 = vsel %vm1217_vm3, %v10501_v22, %v5271_v0  ;;  %v10502_v11 = vunpack.i.h.bf16 %v6035_v54  ;;  %v10503_v54 = vunpack.i.h.bf16 %v5934_v56  ;;  %v1508_v56 = vld [vmem:[%s10218_s1 + $0x108] sm:$0xff] }
 0x1d3   :  { %4939 = vmatmul.msk.f32.gmra.mxu2 %vm1715_vm15, %v1498_v30 }
 0x1d4   :  { %v6481_v35 = vpop.permute.xlu2 %660  ;;  %2264 = vmatpush.msrb.mxu2 %v1225_v26  ;;  %v1221_v26 = vsel %vm1217_vm3, %v10502_v11, %v5280_v23  ;;  %v5281_v23 = vunpack.i.h.bf16 %v6434_v15 }
 0x1d5   :  { %1342 = vrot.lane.b32.xlu0 %v6387_v3, %s5550_s11 }
 0x1d6   :  { %1354 = vrot.lane.b32.xlu1 %v6332_v57, %s5550_s11  ;;  %2265 = vmatpush.msrb.mxu2 %v1223_v25  ;;  %v1497_v25 = vld [vmem:[%s10218_s1 + $0xb0] sm:$0xff] }
 0x1d7   :  { %1959 = vmatmul.f32.gmra.mxu1 %v1494_v31  ;;  %v6493_v30 = vpop.permute.xlu0 %5283  ;;  %1861 = vmatmul.f32.gmra.mxu0 %v1508_v56 }
 0x1d8   :  { %v6498_v49 = vpop.permute.xlu1 %5273  ;;  %v5286_v3 = vunpack.i.h.bf16 %v6493_v30  ;;  %2266 = vmatpush.msrb.mxu2 %v1221_v26  ;;  %v10235_v9 = vunpack.i.l.bf16 %v6493_v30  ;;  %2200 = vmatmul.f32.gmra.mxu3 %v1508_v56  ;;  %v1500_v56 = vld [vmem:[%s10218_s1 + $0xc8] sm:$0xff] }
 0x1d9   :  { %v10236_v0 = vunpack.i.h.bf16 %v6498_v49  ;;  %v5275_v57 = vunpack.i.l.bf16 %v6498_v49 }
 0x1da   :  { %1348 = vrot.lane.b32.xlu2 %v6361_v44, %s5550_s11  ;;  %v1219_v27 = vsel %vm1217_vm3, %v10503_v54, %v5286_v3  ;;  %v6525_v44 = vld [vmem:[#allocation2 + $0x88] sm:$0xff]  ;;  %v1294_v15 = vsel %vm1217_vm3, %v5281_v23, %v10235_v9 }
 0x1db   :  { %4940 = vmatmul.msk.f32.gmra.mxu2 %vm1715_vm15, %v1501_v55  ;;  %v1296_v31 = vsel %vm1217_vm3, %v5275_v57, %v10236_v0  ;;  %v1504_v57 = vld [vmem:[%s10218_s1 + $0xe8] sm:$0xff] }
 0x1dc   :  { %v653_v22 = vpop.permute.xlu2 %652  ;;  %2267 = vmatpush.msrb.mxu2 %v1219_v27  ;;  %2603 = vmatpush.msrb.mxu3 %v1296_v31  ;;  %v6541_v27 = vld [vmem:[#allocation2 + $0x70] sm:$0xff] }
 0x1dd   :  { %668 = vrot.lane.b32.xlu0 %v5938_v59, %s5544_s7 }
 0x1de   :  { %656 = vrot.lane.b32.xlu1 %v6525_v44, %s5544_s7  ;;  %2604 = vmatpush.msrb.mxu3 %v1294_v15  ;;  %v1511_v15 = vld [vmem:[%s10218_s1 + $0x120] sm:$0xff] }
 0x1df   :  { %1962 = vmatmul.f32.gmra.mxu1 %v1497_v25  ;;  %v6532_v11 = vpop.permute.xlu0 %5288  ;;  %v6553_v25 = vpack.i.bf16 %v6525_v44, %v6541_v27  ;;  %1864 = vmatmul.f32.gmra.mxu0 %v1511_v15 }
 0x1e0   :  { %v665_v26 = vpop.permute.xlu1 %664  ;;  %v10233_v3 = vunpack.i.h.bf16 %v6532_v11  ;;  %v5290_v55 = vunpack.i.l.bf16 %v6532_v11  ;;  %2203 = vmatmul.f32.gmra.mxu3 %v1511_v15  ;;  %v1514_v15 = vld [vmem:[%s10218_s1 + $0x138] sm:$0xff] }
 0x1e1   :  { %v676_v54 = vsel %vm589_vm5, %v665_v26, %v6458_v53 }
 0x1e2   :  { %662 = vrot.lane.b32.xlu2 %v5928_v48, %s5544_s7  ;;  %5108 = vmatpush.msk.msrb.mxu1 %vm5947_vm4, %v676_v54  ;;  %v1292_v23 = vsel %vm1217_vm3, %v5290_v55, %v10233_v3 }
 0x1e3   :  { %4941 = vmatmul.msk.f32.gmra.mxu2 %vm1715_vm15, %v1504_v57  ;;  %2605 = vmatpush.msrb.mxu3 %v1292_v23  ;;  %v5332_v57 = vpack.i.bf16 %v5938_v59, %v5928_v48  ;;  %v1507_v23 = vld [vmem:[%s10218_s1 + $0x100] sm:$0xff] }
 0x1e4   :  { %v1132_v31 = vpop.permute.xlu2 %1131 }
 0x1e5   :  { %956 = vrot.lane.b32.xlu0 %v6541_v27, %s5549_s10 }
 0x1e6   :  { %5328 = vrot.lane.b32.xlu1 %v6553_v25, %s5551_s12 }
 0x1e7   :  { %1965 = vmatmul.f32.gmra.mxu1 %v1500_v56  ;;  %v1055_v26 = vpop.permute.xlu0 %1054  ;;  %1867 = vmatmul.f32.gmra.mxu0 %v1514_v15 }
 0x1e8   :  { %v659_v55 = vpop.permute.xlu1 %658  ;;  %v1064_v54 = vsel %vm1056_vm10, %v6056_v8, %v1055_v26  ;;  %v1503_v8 = vld [vmem:[%s10218_s1 + $0xe0] sm:$0xff]  ;;  %2206 = vmatmul.f32.gmra.mxu3 %v1514_v15  ;;  %v515_v15 = vsel %vm428_vm8, %v6417_v63, %v6444_v39 }
 0x1e9   :  { %5096 = vmatpush.msk.msrb.mxu2 %vm5953_vm6, %v1064_v54  ;;  %v674_v3 = vsel %vm589_vm5, %v659_v55, %v6481_v35 }
 0x1ea   :  { %5333 = vrot.lane.b32.xlu2 %v5332_v57, %s5551_s12  ;;  %5109 = vmatpush.msk.msrb.mxu1 %vm5947_vm4, %v674_v3  ;;  %v1510_v57 = vld [vmem:[%s10218_s1 + $0x118] sm:$0xff] }
 0x1eb   :  { %4942 = vmatmul.msk.f32.gmra.mxu2 %vm1715_vm15, %v1507_v23  ;;  %v670_v23 = vsel %vm589_vm5, %v6442_v10, %v6467_v52  ;;  %v1506_v10 = vld [vmem:[%s10218_s1 + $0xf8] sm:$0xff] }
 0x1ec   :  { %v6580_v56 = vpop.permute.xlu2 %1125 }
 0x1ed   :  { %974 = vrot.lane.b32.xlu0 %v5938_v59, %s5549_s10 }
 0x1ee   :  { %962 = vrot.lane.b32.xlu1 %v6525_v44, %s5549_s10 }
 0x1ef   :  { %1968 = vmatmul.f32.gmra.mxu1 %v1503_v8  ;;  %v6592_v3 = vpop.permute.xlu0 %654 }
 0x1f0   :  { %v6594_v26 = vpop.permute.xlu1 %5293  ;;  %v672_v55 = vsel %vm589_vm5, %v653_v22, %v6592_v3 }
 0x1f1   :  { %v10234_v54 = vunpack.i.h.bf16 %v6594_v26  ;;  %v5295_v59 = vunpack.i.l.bf16 %v6594_v26  ;;  %5110 = vmatpush.msk.msrb.mxu1 %vm5947_vm4, %v672_v55  ;;  %v1517_v55 = vld [vmem:[%s10218_s1 + $0x150] sm:$0xff] }
 0x1f2   :  { %968 = vrot.lane.b32.xlu2 %v5928_v48, %s5549_s10  ;;  %1870 = vmatmul.f32.gmra.mxu0 %v1517_v55 }
 0x1f3   :  { %4943 = vmatmul.msk.f32.gmra.mxu2 %vm1715_vm15, %v1510_v57  ;;  %5111 = vmatpush.msk.msrb.mxu1 %vm5947_vm4, %v670_v23  ;;  %v1290_v22 = vsel %vm1217_vm3, %v5295_v59, %v10234_v54  ;;  %v513_v57 = vsel %vm428_vm8, %v6391_v42, %v6419_v38  ;;  %v1513_v23 = vld [vmem:[%s10218_s1 + $0x130] sm:$0xff]  ;;  %v5261_v42 = vunpack.i.h.bf16 %v6341_v21  ;;  %v5181_v54 = vunpack.i.h.bf16 %v5831_v2 }
 0x1f4   :  { %v6616_v8 = vpop.permute.xlu2 %1119  ;;  %2606 = vmatpush.msrb.mxu3 %v1290_v22  ;;  %v6645_v22 = vld [vmem:[#allocation2 + $0xa0] sm:$0xff] }
 0x1f5   :  { %1129 = vrot.lane.b32.xlu0 %v5928_v48, %s5548_s9  ;;  %5112 = vmatpush.msk.msrb.mxu1 %vm5997_vm7, %v515_v15  ;;  %v6647_v15 = vld [vmem:[#allocation2 + $0xb8] sm:$0xff] }
 0x1f6   :  { %1117 = vrot.lane.b32.xlu1 %v6541_v27, %s5548_s9  ;;  %2209 = vmatmul.f32.gmra.mxu3 %v1517_v55  ;;  %v10240_v55 = vunpack.i.l.bf16 %v6273_v1 }
 0x1f7   :  { %1971 = vmatmul.f32.gmra.mxu1 %v1506_v10  ;;  %v6633_v63 = vpop.permute.xlu0 %1133 }
 0x1f8   :  { %10504 = vst [vmem:[#allocation8_spill] sm:$0xff] %v6633_v63  ;;  %v1049_v59 = vpop.permute.xlu1 %1048  ;;  %5113 = vmatpush.msk.msrb.mxu1 %vm5997_vm7, %v513_v57  ;;  %v1143_v48 = vsel %vm1056_vm10, %v1132_v31, %v6633_v63  ;;  %v511_v31 = vsel %vm428_vm8, %v6365_v51, %v6393_v14  ;;  %v10239_v57 = vunpack.i.h.bf16 %v6305_v45  ;;  %v509_v51 = vsel %vm428_vm8, %v6339_v47, %v6367_v13 }
 0x1f9   :  { %v1062_v10 = vsel %vm1056_vm10, %v6086_v5, %v1049_v59  ;;  %5120 = vmatpush.msk.msrb.mxu3 %vm5947_vm4, %v1143_v48  ;;  %v5342_v5 = vpack.i.bf16 %v6647_v15, %v6645_v22  ;;  %v5255_v59 = vunpack.i.l.bf16 %v6305_v45  ;;  %v358_v47 = vsel %vm279_vm11, %v5261_v42, %v10240_v55 }
 0x1fa   :  { %1123 = vrot.lane.b32.xlu2 %v6525_v44, %s5548_s9  ;;  %5097 = vmatpush.msk.msrb.mxu2 %vm5953_vm6, %v1062_v10  ;;  %v1520_v10 = vld [vmem:[%s10218_s1 + $0x168] sm:$0xff] }
 0x1fb   :  { %5114 = vmatpush.msk.msrb.mxu1 %vm5997_vm7, %v511_v31  ;;  %4944 = vmatmul.msk.f32.gmra.mxu2 %vm1715_vm15, %v1513_v23  ;;  %v1509_v23 = vld [vmem:[%s10218_s1 + $0x110] sm:$0xff]  ;;  %v356_v63 = vsel %vm279_vm11, %v5255_v59, %v10239_v57  ;;  %v10506_v59 = vunpack.i.l.bf16 %v5896_v18 }
 0x1fc   :  { %v6669_v48 = vpop.permute.xlu2 %1113  ;;  %1873 = vmatmul.f32.gmra.mxu0 %v1520_v10 }
 0x1fd   :  { %5115 = vmatpush.msk.msrb.mxu1 %vm5997_vm7, %v509_v51  ;;  %5343 = vrot.lane.b32.xlu0 %v5342_v5, %s5547_s8  ;;  %v10505_v5 = vld [vmem:[#allocation4_spill] sm:$0xff] }
 0x1fe   :  { %1135 = vrot.lane.b32.xlu1 %v6647_v15, %s5548_s9  ;;  %2212 = vmatmul.f32.gmra.mxu3 %v1520_v10  ;;  %v10238_v9 = vunpack.i.h.bf16 %v10505_v5  ;;  %v5205_v0 = vunpack.i.l.bf16 %v10505_v5 }
 0x1ff   :  { %2498 = vmatpush.msrb.mxu1 %v358_v47  ;;  %v6690_v51 = vpop.permute.xlu0 %1127  ;;  %v1516_v47 = vld [vmem:[%s10218_s1 + $0x148] sm:$0xff] }
 0x200   :  { %1974 = vmatmul.f32.gmra.mxu1 %v1509_v23  ;;  %v1043_v31 = vpop.permute.xlu1 %1042  ;;  %v1141_v42 = vsel %vm1056_vm10, %v6580_v56, %v6690_v51  ;;  %v354_v56 = vsel %vm279_vm11, %v5181_v54, %v10506_v59  ;;  %v6714_v23 = vpop.f32.mrf.mxu0  ;;  %v1512_v54 = vld [vmem:[%s10218_s1 + $0x128] sm:$0xff]  ;;  %v1519_v59 = vld [vmem:[%s10218_s1 + $0x160] sm:$0xff] }
 0x201   :  { %2499 = vmatpush.msrb.mxu1 %v356_v63  ;;  %v1060_v10 = vsel %vm1056_vm10, %v6114_v37, %v1043_v31  ;;  %5121 = vmatpush.msk.msrb.mxu3 %vm5947_vm4, %v1141_v42  ;;  %v352_v37 = vsel %vm279_vm11, %v5205_v0, %v10238_v9  ;;  %v213_v31 = vld [vmem:[#allocation2 + $0xa8] sm:$0xff]  ;;  %v6730_v42 = vpop.f32.mrf.mxu3  ;;  %v1538_v9 = vld [vmem:[%s10218_s1 + $0x1f8] sm:$0xff] }
 0x202   :  { %5338 = vrot.lane.b32.xlu2 %v6553_v25, %s5547_s8  ;;  %5098 = vmatpush.msk.msrb.mxu2 %vm5953_vm6, %v1060_v10  ;;  %v1523_v25 = vld [vmem:[%s10218_s1 + $0x180] sm:$0xff] }
 0x203   :  { %2500 = vmatpush.msrb.mxu1 %v354_v56  ;;  %4945 = vmatmul.msk.f32.gmra.mxu2 %vm1715_vm15, %v1516_v47 }
 0x204   :  { %v971_v63 = vpop.permute.xlu2 %970  ;;  %1876 = vmatmul.f32.gmra.mxu0 %v1523_v25 }
 0x205   :  { %2501 = vmatpush.msrb.mxu1 %v352_v37  ;;  %1423 = vrot.lane.b32.xlu0 %v6541_v27, %s5550_s11  ;;  %v211_v27 = vld [vmem:[#allocation2 + $0x90] sm:$0xff] }
 0x206   :  { %1419 = vrot.lane.b32.xlu1 %v6424_v40, %s5550_s11  ;;  %2215 = vmatmul.f32.gmra.mxu3 %v1523_v25 }
 0x207   :  { %5116 = vmatpush.msk.msrb.mxu1 %vm5947_vm4, %v213_v31  ;;  %v6734_v0 = vpop.permute.xlu0 %1121 }
 0x208   :  { %1977 = vmatmul.f32.gmra.mxu1 %v1512_v54  ;;  %v1037_v47 = vpop.permute.xlu1 %1036  ;;  %v1139_v10 = vsel %vm1056_vm10, %v6616_v8, %v6734_v0  ;;  %v6752_v8 = vpop.f32.mrf.mxu0 }
 0x209   :  { %5117 = vmatpush.msk.msrb.mxu1 %vm5947_vm4, %v211_v27  ;;  %v1058_v56 = vsel %vm1056_vm10, %v6141_v28, %v1037_v47  ;;  %5122 = vmatpush.msk.msrb.mxu3 %vm5947_vm4, %v1139_v10  ;;  %v1526_v28 = vld [vmem:[%s10218_s1 + $0x198] sm:$0xff] }
 0x20a   :  { %1421 = vrot.lane.b32.xlu2 %v6408_v58, %s5550_s11  ;;  %5099 = vmatpush.msk.msrb.mxu2 %vm5953_vm6, %v1058_v56  ;;  %v1515_v58 = vld [vmem:[%s10218_s1 + $0x140] sm:$0xff]  ;;  %v6771_v25 = vpop.f32.mrf.mxu3 }
 0x20b   :  { %5118 = vmatpush.msk.msrb.mxu1 %vm5947_vm4, %v6398_v50  ;;  %4946 = vmatmul.msk.f32.gmra.mxu2 %vm1715_vm15, %v1519_v59  ;;  %10507 = vst [vmem:[#allocation4_spill] sm:$0xff] %v6771_v25  ;;  %v1529_v59 = vld [vmem:[%s10218_s1 + $0x1b0] sm:$0xff] }
 0x20c   :  { %v965_v37 = vpop.permute.xlu2 %964  ;;  %1879 = vmatmul.f32.gmra.mxu0 %v1526_v28 }
 0x20d   :  { %5119 = vmatpush.msk.msrb.mxu1 %vm5947_vm4, %v6424_v40  ;;  %1429 = vrot.lane.b32.xlu0 %v6525_v44, %s5550_s11  ;;  %v1522_v44 = vld [vmem:[%s10218_s1 + $0x178] sm:$0xff] }
 0x20e   :  { %1425 = vrot.lane.b32.xlu1 %v6398_v50, %s5550_s11  ;;  %2218 = vmatmul.f32.gmra.mxu3 %v1526_v28 }
 0x20f   :  { %v6773_v54 = vpop.permute.xlu0 %1115 }
 0x210   :  { %1980 = vmatmul.f32.gmra.mxu1 %v1515_v58  ;;  %v894_v47 = vpop.permute.xlu1 %893  ;;  %v1137_v40 = vsel %vm1056_vm10, %v6669_v48, %v6773_v54  ;;  %v6789_v50 = vpop.f32.mrf.mxu0 }
 0x211   :  { %v903_v10 = vsel %vm895_vm12, %v6106_v17, %v894_v47  ;;  %5123 = vmatpush.msk.msrb.mxu3 %vm5947_vm4, %v1137_v40  ;;  %v1532_v47 = vld [vmem:[%s10218_s1 + $0x1c8] sm:$0xff] }
 0x212   :  { %1427 = vrot.lane.b32.xlu2 %v6380_v33, %s5550_s11  ;;  %5100 = vmatpush.msk.msrb.mxu2 %vm6005_vm9, %v903_v10  ;;  %v6803_v33 = vpop.f32.mrf.mxu3 }
 0x213   :  { %4947 = vmatmul.msk.f32.gmra.mxu2 %vm1715_vm15, %v1522_v44  ;;  %10508 = vst [vmem:[#allocation9_spill] sm:$0xff] %v6803_v33  ;;  %v10517_v33 = vunpack.i.h.bf16 %v6307_v29 }
 0x214   :  { %v959_v48 = vpop.permute.xlu2 %958  ;;  %1882 = vmatmul.f32.gmra.mxu0 %v1529_v59 }
 0x215   :  { %1435 = vrot.lane.b32.xlu0 %v6645_v22, %s5550_s11  ;;  %v1525_v22 = vld [vmem:[%s10218_s1 + $0x190] sm:$0xff] }
 0x216   :  { %1431 = vrot.lane.b32.xlu1 %v211_v27, %s5550_s11  ;;  %2221 = vmatmul.f32.gmra.mxu3 %v1529_v59  ;;  %v1528_v59 = vld [vmem:[%s10218_s1 + $0x1a8] sm:$0xff] }
 0x217   :  { %v6801_v17 = vpop.permute.xlu0 %972 }
 0x218   :  { %1983 = vmatmul.f32.gmra.mxu1 %v1518_v24  ;;  %v888_v56 = vpop.permute.xlu1 %887  ;;  %v982_v28 = vsel %vm895_vm12, %v971_v63, %v6801_v17  ;;  %v6818_v27 = vpop.f32.mrf.mxu0  ;;  %v6842_v24 = vld [vmem:[#allocation2 + $0xb0] sm:$0xff] }
 0x219   :  { %v901_v58 = vsel %vm895_vm12, %v6195_v20, %v888_v56  ;;  %5124 = vmatpush.msk.msrb.mxu3 %vm5997_vm7, %v982_v28  ;;  %v6829_v20 = vld [vmem:[%s10218_s1 + $0x170] sm:$0xff] }
 0x21a   :  { %1433 = vrot.lane.b32.xlu2 %v6354_v43, %s5550_s11  ;;  %5101 = vmatpush.msk.msrb.mxu2 %vm6005_vm9, %v901_v58  ;;  %v6834_v44 = vpop.f32.mrf.mxu3  ;;  %v6864_v58 = vld [vmem:[%s10218_s1 + $0x188] sm:$0xff] }
 0x21b   :  { %4948 = vmatmul.msk.f32.gmra.mxu2 %vm1715_vm15, %v1525_v22  ;;  %10509 = vst [vmem:[#allocation10_spill] sm:$0xff] %v6834_v44 }
 0x21c   :  { %v953_v63 = vpop.permute.xlu2 %952  ;;  %1885 = vmatmul.f32.gmra.mxu0 %v1532_v47 }
 0x21d   :  { %1441 = vrot.lane.b32.xlu0 %v6647_v15, %s5550_s11 }
 0x21e   :  { %1437 = vrot.lane.b32.xlu1 %v213_v31, %s5550_s11  ;;  %v2055_v43 = vpop.f32.mrf.mxu2  ;;  %2224 = vmatmul.f32.gmra.mxu3 %v1532_v47 }
 0x21f   :  { %v6832_v40 = vpop.permute.xlu0 %966 }
 0x220   :  { %1986 = vmatmul.f32.gmra.mxu1 %v6829_v20  ;;  %v882_v10 = vpop.permute.xlu1 %881  ;;  %v980_v15 = vsel %vm895_vm12, %v965_v37, %v6832_v40  ;;  %v6852_v56 = vpop.f32.mrf.mxu0 }
 0x221   :  { %v899_v31 = vsel %vm895_vm12, %v6161_v62, %v882_v10  ;;  %5125 = vmatpush.msk.msrb.mxu3 %vm5997_vm7, %v980_v15  ;;  %v1535_v62 = vld [vmem:[%s10218_s1 + $0x1e0] sm:$0xff] }
 0x222   :  { %1439 = vrot.lane.b32.xlu2 %v6842_v24, %s5550_s11  ;;  %5102 = vmatpush.msk.msrb.mxu2 %vm6005_vm9, %v899_v31 }
 0x223   :  { %4949 = vmatmul.msk.f32.gmra.mxu2 %vm1715_vm15, %v1528_v59 }
 0x224   :  { %v6855_v37 = vpop.permute.xlu2 %5308  ;;  %v1942_v28 = vpop.f32.mrf.mxu1  ;;  %1888 = vmatmul.f32.gmra.mxu0 %v1535_v62 }
 0x225   :  { %v1943_v22 = vadd.f32 %v1942_v28, %v6714_v23  ;;  %v6876_v23 = vld [vmem:[%s10218_s1 + $0x1c0] sm:$0xff]  ;;  %v6878_v28 = vpop.f32.mrf.mxu3 }
 0x226   :  { %v2058_v47 = vpop.f32.mrf.mxu2  ;;  %2227 = vmatmul.f32.gmra.mxu3 %v1535_v62  ;;  %10511 = vst [vmem:[#allocation12_spill] sm:$0xff] %v6878_v28  ;;  %v10515_v28 = vunpack.i.h.bf16 %v6279_v7 }
 0x227   :  { %v6866_v10 = vadd.f32 %v2055_v43, %v1943_v22  ;;  %v6868_v15 = vpop.permute.xlu0 %960 }
 0x228   :  { %1989 = vmatmul.f32.gmra.mxu1 %v6864_v58  ;;  %v876_v59 = vpop.permute.xlu1 %875  ;;  %v978_v31 = vsel %vm895_vm12, %v959_v48, %v6868_v15  ;;  %v6886_v62 = vpop.f32.mrf.mxu0 }
 0x229   :  { %10510 = vst [vmem:[#allocation11_spill] sm:$0xff] %v6866_v10  ;;  %v897_v43 = vsel %vm895_vm12, %v6234_v60, %v876_v59  ;;  %5126 = vmatpush.msk.msrb.mxu3 %vm5997_vm7, %v978_v31  ;;  %v6899_v59 = vld [vmem:[%s10218_s1 + $0x1a0] sm:$0xff] }
 0x22a   :  { %5103 = vmatpush.msk.msrb.mxu2 %vm6005_vm9, %v897_v43 }
 0x22b   :  { %4950 = vmatmul.msk.f32.gmra.mxu2 %vm1715_vm15, %v6876_v23 }
 0x22c   :  { %v1361_v48 = vpop.permute.xlu2 %1360  ;;  %v1945_v22 = vpop.f32.mrf.mxu1  ;;  %1891 = vmatmul.f32.gmra.mxu0 %v1538_v9 }
 0x22d   :  { %v1946_v57 = vadd.f32 %v1945_v22, %v6752_v8  ;;  %v1370_v60 = vsel %vm1362_vm13, %v6193_v12, %v1361_v48  ;;  %v6913_v48 = vld [vmem:[%s10218_s1 + $0x1d8] sm:$0xff]  ;;  %v6915_v22 = vpop.f32.mrf.mxu3 }
 0x22e   :  { %5104 = vmatpush.msk.msrb.mxu0 %vm6005_vm9, %v1370_v60  ;;  %v2061_v31 = vpop.f32.mrf.mxu2  ;;  %2230 = vmatmul.f32.gmra.mxu3 %v1538_v9  ;;  %10513 = vst [vmem:[#allocation14_spill] sm:$0xff] %v6915_v22  ;;  %v5310_v9 = vunpack.i.l.bf16 %v6855_v37 }
 0x22f   :  { %v6903_v43 = vadd.f32 %v2058_v47, %v1946_v57  ;;  %v6905_v55 = vpop.permute.xlu0 %954 }
 0x230   :  { %1992 = vmatmul.f32.gmra.mxu1 %v6899_v59  ;;  %v5299_v8 = vpop.permute.xlu1 %5298  ;;  %v976_v12 = vsel %vm895_vm12, %v953_v63, %v6905_v55  ;;  %v6919_v47 = vpop.f32.mrf.mxu0  ;;  %v10514_v63 = vunpack.i.h.bf16 %v6257_v16  ;;  %v6939_v16 = vld [vmem:[%s10218_s1 + $0x1b8] sm:$0xff]  ;;  %v754_v25 = vsel %vm750_vm14, %v10517_v33, %v5310_v9 }
 0x231   :  { %10512 = vst [vmem:[#allocation13_spill] sm:$0xff] %v6903_v43  ;;  %v5301_v60 = vunpack.i.h.bf16 %v5299_v8  ;;  %v5300_v57 = vunpack.i.l.bf16 %v5299_v8  ;;  %5127 = vmatpush.msk.msrb.mxu3 %vm5997_vm7, %v976_v12  ;;  %v1541_v8 = vld [vmem:[%s10218_s1 + $0x210] sm:$0xff] }
 0x233   :  { %4951 = vmatmul.msk.f32.gmra.mxu2 %vm1715_vm15, %v6913_v48  ;;  %v758_v43 = vsel %vm750_vm14, %v10514_v63, %v5300_v57  ;;  %v756_v44 = vsel %vm750_vm14, %v10515_v28, %v5301_v60 }
 0x234   :  { %v1948_v10 = vpop.f32.mrf.mxu1  ;;  %2276 = vmatpush.msrb.mxu2 %v758_v43  ;;  %v6930_v22 = vpop.permute.xlu2 %1348  ;;  %1894 = vmatmul.f32.gmra.mxu0 %v1541_v8 }
 0x235   :  { %v1949_v12 = vadd.f32 %v1948_v10, %v6789_v50  ;;  %v6957_v10 = vpop.f32.mrf.mxu3 }
 0x236   :  { %v2064_v57 = vpop.f32.mrf.mxu2  ;;  %2277 = vmatpush.msrb.mxu2 %v756_v44  ;;  %2233 = vmatmul.f32.gmra.mxu3 %v1541_v8  ;;  %v6955_v44 = vld [vmem:[%s10218_s1 + $0x1f0] sm:$0xff]  ;;  %10519 = vst [vmem:[#allocation17_spill] sm:$0xff] %v6957_v10 }
 0x237   :  { %v6941_v43 = vadd.f32 %v2061_v31, %v1949_v12  ;;  %v6943_v63 = vpop.permute.xlu0 %5313  ;;  %10518 = vst [vmem:[#allocation16_spill] sm:$0xff] %v6955_v44  ;;  %v10520_v31 = vunpack.i.h.bf16 %v6251_v46  ;;  %v1544_v46 = vld [vmem:[%s10218_s1 + $0x228] sm:$0xff] }
 0x238   :  { %1995 = vmatmul.f32.gmra.mxu1 %v6939_v16  ;;  %v6949_v7 = vpop.permute.xlu1 %5303  ;;  %v5316_v50 = vunpack.i.h.bf16 %v6943_v63  ;;  %2278 = vmatpush.msrb.mxu2 %v754_v25  ;;  %v10244_v28 = vunpack.i.l.bf16 %v6943_v63  ;;  %v6965_v9 = vpop.f32.mrf.mxu0  ;;  %v5311_v25 = vunpack.i.h.bf16 %v6855_v37 }
 0x239   :  { %10516 = vst [vmem:[#allocation15_spill] sm:$0xff] %v6941_v43  ;;  %v10245_v29 = vunpack.i.h.bf16 %v6949_v7  ;;  %v5305_v33 = vunpack.i.l.bf16 %v6949_v7 }
 0x23a   :  { %v752_v60 = vsel %vm750_vm14, %v10520_v31, %v5316_v50  ;;  %v827_v37 = vsel %vm750_vm14, %v5311_v25, %v10244_v28  ;;  %v6983_v31 = vld [vmem:[%s10218_s1 + $0x1d0] sm:$0xff]  ;;  %v6995_v25 = vld [vmem:[%s10218_s1 + $0x208] sm:$0xff] }
 0x23b   :  { %4952 = vmatmul.msk.f32.gmra.mxu2 %vm1715_vm15, %v6955_v44  ;;  %v829_v8 = vsel %vm750_vm14, %v5305_v33, %v10245_v29  ;;  %10521 = vst [vmem:[#allocation18_spill] sm:$0xff] %v6983_v31 }
 0x23c   :  { %v1951_v12 = vpop.f32.mrf.mxu1  ;;  %2279 = vmatpush.msrb.mxu2 %v752_v60  ;;  %2615 = vmatpush.msrb.mxu3 %v829_v8  ;;  %v663_v33 = vpop.permute.xlu2 %662  ;;  %10523 = vst [vmem:[#allocation20_spill] sm:$0xff] %v6995_v25 }
 0x23d   :  { %v1952_v50 = vadd.f32 %v1951_v12, %v6818_v27  ;;  %1897 = vmatmul.f32.gmra.mxu0 %v1544_v46  ;;  %v6997_v12 = vpop.f32.mrf.mxu3 }
 0x23e   :  { %v2067_v43 = vpop.f32.mrf.mxu2  ;;  %2616 = vmatpush.msrb.mxu3 %v827_v37  ;;  %10524 = vst [vmem:[#allocation21_spill] sm:$0xff] %v6997_v12  ;;  %v1547_v12 = vld [vmem:[%s10218_s1 + $0x240] sm:$0xff] }
 0x23f   :  { %v6985_v60 = vadd.f32 %v2064_v57, %v1952_v50  ;;  %v6987_v8 = vpop.permute.xlu0 %5323  ;;  %2236 = vmatmul.f32.gmra.mxu3 %v1544_v46 }
 0x240   :  { %1998 = vmatmul.f32.gmra.mxu1 %v6983_v31  ;;  %v6990_v27 = vpop.permute.xlu1 %5318  ;;  %v10252_v50 = vunpack.i.h.bf16 %v6987_v8  ;;  %v5325_v28 = vunpack.i.l.bf16 %v6987_v8  ;;  %v7003_v46 = vpop.f32.mrf.mxu0 }
 0x241   :  { %10522 = vst [vmem:[#allocation19_spill] sm:$0xff] %v6985_v60  ;;  %v10251_v37 = vunpack.i.h.bf16 %v6990_v27  ;;  %v5320_v57 = vunpack.i.l.bf16 %v6990_v27 }
 0x242   :  { %v823_v44 = vsel %vm750_vm14, %v5325_v28, %v10252_v50  ;;  %v7058_v50 = vld [vmem:[%s10218_s1 + $0x200] sm:$0xff] }
 0x243   :  { %4953 = vmatmul.msk.f32.gmra.mxu2 %vm1715_vm15, %v6995_v25  ;;  %v825_v29 = vsel %vm750_vm14, %v5320_v57, %v10251_v37  ;;  %v7020_v25 = vld [vmem:[%s10218_s1 + $0x1e8] sm:$0xff] }
 0x244   :  { %v1954_v60 = vpop.f32.mrf.mxu1  ;;  %2617 = vmatpush.msrb.mxu3 %v825_v29 }
 0x245   :  { %v1955_v10 = vadd.f32 %v1954_v60, %v6852_v56  ;;  %1900 = vmatmul.f32.gmra.mxu0 %v1547_v12  ;;  %v7028_v56 = vld [vmem:[%s10218_s1 + $0x220] sm:$0xff]  ;;  %v7030_v28 = vpop.f32.mrf.mxu3  ;;  %v7032_v60 = vpop.permute.xlu2 %5333 }
 0x246   :  { %v2070_v31 = vpop.f32.mrf.mxu2  ;;  %2618 = vmatpush.msrb.mxu3 %v823_v44  ;;  %10526 = vst [vmem:[#allocation23_spill] sm:$0xff] %v7030_v28 }
 0x247   :  { %v7022_v57 = vadd.f32 %v2067_v43, %v1955_v10  ;;  %v1343_v29 = vpop.permute.xlu0 %1342  ;;  %2239 = vmatmul.f32.gmra.mxu3 %v1547_v12  ;;  %v1366_v10 = vsel %vm1362_vm13, %v6213_v34, %v6930_v22 }
 0x248   :  { %2001 = vmatmul.f32.gmra.mxu1 %v7020_v25  ;;  %v1355_v37 = vpop.permute.xlu1 %1354  ;;  %v7038_v43 = vpop.f32.mrf.mxu0 }
 0x249   :  { %10525 = vst [vmem:[#allocation22_spill] sm:$0xff] %v7022_v57  ;;  %v1368_v44 = vsel %vm1362_vm13, %v6236_v19, %v1355_v37  ;;  %v7050_v19 = vld [vmem:[%s10218_s1 + $0x258] sm:$0xff]  ;;  %v5260_v57 = vunpack.i.l.bf16 %v6341_v21  ;;  %v10538_v21 = vunpack.i.l.bf16 %v6273_v1 }
 0x24a   :  { %5105 = vmatpush.msk.msrb.mxu0 %vm6005_vm9, %v1368_v44  ;;  %10527 = vst [vmem:[#allocation24_spill] sm:$0xff] %v7050_v19  ;;  %v1364_v44 = vsel %vm1362_vm13, %v6228_v36, %v1343_v29  ;;  %v7072_v29 = vld [vmem:[%s10218_s1 + $0x238] sm:$0xff] }
 0x24b   :  { %4954 = vmatmul.msk.f32.gmra.mxu2 %vm1715_vm15, %v7028_v56 }
 0x24c   :  { %v1957_v12 = vpop.f32.mrf.mxu1  ;;  %5106 = vmatpush.msk.msrb.mxu0 %vm6005_vm9, %v1366_v10 }
 0x24d   :  { %v1958_v37 = vadd.f32 %v1957_v12, %v6886_v62  ;;  %1903 = vmatmul.f32.gmra.mxu0 %v7050_v19  ;;  %v7074_v12 = vpop.f32.mrf.mxu3 }
 0x24e   :  { %v2073_v34 = vpop.f32.mrf.mxu2  ;;  %5107 = vmatpush.msk.msrb.mxu0 %vm6005_vm9, %v1364_v44  ;;  %10529 = vst [vmem:[#allocation26_spill] sm:$0xff] %v7074_v12  ;;  %v7082_v44 = vpop.permute.xlu2 %968 }
 0x24f   :  { %v7062_v22 = vadd.f32 %v2070_v31, %v1958_v37  ;;  %v669_v10 = vpop.permute.xlu0 %668  ;;  %2242 = vmatmul.f32.gmra.mxu3 %v7050_v19  ;;  %v675_v31 = vsel %vm589_vm5, %v6481_v35, %v663_v33  ;;  %v7101_v33 = vld [vmem:[%s10218_s1 + $0x218] sm:$0xff] }
 0x250   :  { %2004 = vmatmul.f32.gmra.mxu1 %v7058_v50  ;;  %v657_v62 = vpop.permute.xlu1 %656  ;;  %v677_v36 = vsel %vm589_vm5, %v6458_v53, %v669_v10  ;;  %v7080_v37 = vpop.f32.mrf.mxu0 }
 0x251   :  { %10528 = vst [vmem:[#allocation25_spill] sm:$0xff] %v7062_v22  ;;  %5132 = vmatpush.msk.msra.mxu0 %vm5953_vm6, %v677_v36  ;;  %v673_v53 = vsel %vm589_vm5, %v6592_v3, %v657_v62  ;;  %v7093_v36 = vld [vmem:[%s10218_s1 + $0x270] sm:$0xff]  ;;  %v671_v3 = vsel %vm589_vm5, %v6467_v52, %v6406_v61 }
 0x252   :  { %10530 = vst [vmem:[#allocation27_spill] sm:$0xff] %v7093_v36  ;;  %v7122_v61 = vld [vmem:[%s10218_s1 + $0x250] sm:$0xff] }
 0x253   :  { %4955 = vmatmul.msk.f32.gmra.mxu2 %vm1715_vm15, %v7072_v29  ;;  %5133 = vmatpush.msk.msra.mxu0 %vm5953_vm6, %v675_v31 }
 0x254   :  { %v1960_v10 = vpop.f32.mrf.mxu1 }
 0x255   :  { %v1961_v35 = vadd.f32 %v1960_v10, %v6919_v47  ;;  %5134 = vmatpush.msk.msra.mxu0 %vm5953_vm6, %v673_v53  ;;  %v516_v53 = vsel %vm428_vm8, %v6444_v39, %v6378_v32  ;;  %v7125_v52 = vpop.f32.mrf.mxu3  ;;  %v5266_v32 = vunpack.i.h.bf16 %v6273_v1  ;;  %v5180_v1 = vunpack.i.l.bf16 %v5831_v2 }
 0x256   :  { %v2076_v31 = vpop.f32.mrf.mxu2  ;;  %1906 = vmatmul.f32.gmra.mxu0 %v7093_v36  ;;  %10532 = vst [vmem:[#allocation29_spill] sm:$0xff] %v7125_v52  ;;  %v10543_v2 = vunpack.i.h.bf16 %v10505_v5  ;;  %v212_v5 = vld [vmem:[#allocation2 + $0x98] sm:$0xff] }
 0x257   :  { %v7106_v62 = vadd.f32 %v2073_v34, %v1961_v35  ;;  %v7108_v22 = vpop.permute.xlu0 %956  ;;  %5135 = vmatpush.msk.msra.mxu0 %vm5953_vm6, %v671_v3  ;;  %2245 = vmatmul.f32.gmra.mxu3 %v7093_v36  ;;  %v10533_v34 = vld [vmem:[#allocation7_spill] sm:$0xff]  ;;  %v10534_v3 = vld [vmem:[#allocation6_spill] sm:$0xff] }
 0x258   :  { %2007 = vmatmul.f32.gmra.mxu1 %v7101_v33  ;;  %v7114_v47 = vpop.permute.xlu1 %5328  ;;  %v514_v10 = vsel %vm428_vm8, %v6419_v38, %v10533_v34  ;;  %v7132_v35 = vpop.f32.mrf.mxu0 }
 0x259   :  { %10531 = vst [vmem:[#allocation28_spill] sm:$0xff] %v7106_v62  ;;  %5136 = vmatpush.msk.msra.mxu0 %vm6005_vm9, %v516_v53  ;;  %v512_v62 = vsel %vm428_vm8, %v6393_v14, %v10534_v3  ;;  %v7145_v53 = vld [vmem:[%s10218_s1 + $0x288] sm:$0xff]  ;;  %v7147_v38 = vpop.permute.xlu2 %1123 }
 0x25a   :  { %10535 = vst [vmem:[#allocation7_spill] sm:$0xff] %v7145_v53  ;;  %v10536_v3 = vld [vmem:[#allocation5_spill] sm:$0xff] }
 0x25b   :  { %4956 = vmatmul.msk.f32.gmra.mxu2 %vm1715_vm15, %v7122_v61  ;;  %5137 = vmatpush.msk.msra.mxu0 %vm6005_vm9, %v514_v10  ;;  %v7155_v10 = vld [vmem:[%s10218_s1 + $0x230] sm:$0xff]  ;;  %v510_v36 = vsel %vm428_vm8, %v6367_v13, %v10536_v3  ;;  %v7178_v13 = vld [vmem:[%s10218_s1 + $0x268] sm:$0xff] }
 0x25c   :  { %v1963_v39 = vpop.f32.mrf.mxu1 }
 0x25d   :  { %v1964_v34 = vadd.f32 %v1963_v39, %v6965_v9  ;;  %5138 = vmatpush.msk.msra.mxu0 %vm6005_vm9, %v512_v62  ;;  %v5211_v9 = vunpack.i.h.bf16 %v5896_v18  ;;  %v359_v39 = vsel %vm279_vm11, %v10538_v21, %v5266_v32  ;;  %v10541_v21 = vunpack.i.l.bf16 %v5896_v18 }
 0x25e   :  { %v2079_v14 = vpop.f32.mrf.mxu2  ;;  %1909 = vmatmul.f32.gmra.mxu0 %v7145_v53  ;;  %v353_v18 = vsel %vm279_vm11, %v10543_v2, %v5180_v1  ;;  %v7236_v2 = vld [vmem:[%s10218_s1 + $0x2b8] sm:$0xff] }
 0x25f   :  { %v7161_v19 = vadd.f32 %v2076_v31, %v1964_v34  ;;  %v7163_v52 = vpop.permute.xlu0 %974  ;;  %5139 = vmatpush.msk.msra.mxu0 %vm6005_vm9, %v510_v36  ;;  %2248 = vmatmul.f32.gmra.mxu3 %v7145_v53  ;;  %v10539_v36 = vunpack.i.h.bf16 %v6305_v45  ;;  %v7184_v34 = vpop.f32.mrf.mxu3  ;;  %v7197_v45 = vld [vmem:[%s10218_s1 + $0x2a0] sm:$0xff]  ;;  %10547 = vst [vmem:[#allocation34_spill] sm:$0xff] %v7236_v2 }
 0x260   :  { %2010 = vmatmul.f32.gmra.mxu1 %v7155_v10  ;;  %v7170_v62 = vpop.permute.xlu1 %962  ;;  %10540 = vst [vmem:[#allocation5_spill] sm:$0xff] %v7184_v34  ;;  %v7186_v3 = vpop.f32.mrf.mxu0 }
 0x261   :  { %10537 = vst [vmem:[#allocation6_spill] sm:$0xff] %v7161_v19  ;;  %2837 = vmatpush.msra.mxu0 %v359_v39  ;;  %v357_v31 = vsel %vm279_vm11, %v10539_v36, %v5260_v57  ;;  %v355_v19 = vsel %vm279_vm11, %v10541_v21, %v5211_v9  ;;  %v7203_v39 = vld [vmem:[%s10218_s1 + $0x248] sm:$0xff] }
 0x262   :  { %10542 = vst [vmem:[#allocation30_spill] sm:$0xff] %v7197_v45 }
 0x263   :  { %4957 = vmatmul.msk.f32.gmra.mxu2 %vm1715_vm15, %v7178_v13  ;;  %2838 = vmatpush.msra.mxu0 %v357_v31  ;;  %v5339_v31 = vpop.permute.xlu2 %5338 }
 0x264   :  { %v1966_v32 = vpop.f32.mrf.mxu1  ;;  %v5340_v12 = vunpack.i.l.bf16 %v5339_v31 }
 0x265   :  { %v1967_v57 = vadd.f32 %v1966_v32, %v7003_v46  ;;  %2839 = vmatpush.msra.mxu0 %v355_v19  ;;  %v7219_v19 = vld [vmem:[%s10218_s1 + $0x280] sm:$0xff] }
 0x266   :  { %v2082_v36 = vpop.f32.mrf.mxu2  ;;  %10545 = vst [vmem:[#allocation32_spill] sm:$0xff] %v7219_v19  ;;  %1912 = vmatmul.f32.gmra.mxu0 %v7197_v45 }
 0x267   :  { %v7208_v9 = vadd.f32 %v2079_v14, %v1967_v57  ;;  %v7210_v21 = vpop.permute.xlu0 %1129  ;;  %2840 = vmatpush.msra.mxu0 %v353_v18  ;;  %2251 = vmatmul.f32.gmra.mxu3 %v7197_v45  ;;  %v7225_v14 = vpop.f32.mrf.mxu3  ;;  %v210_v57 = vld [vmem:[#allocation2 + $0x80] sm:$0xff]  ;;  %v208_v45 = vld [vmem:[#allocation2 + $0x68] sm:$0xff] }
 0x268   :  { %2013 = vmatmul.f32.gmra.mxu1 %v7203_v39  ;;  %v7214_v46 = vpop.permute.xlu1 %1117  ;;  %10546 = vst [vmem:[#allocation33_spill] sm:$0xff] %v7225_v14  ;;  %v7227_v1 = vpop.f32.mrf.mxu0  ;;  %v7244_v18 = vld [vmem:[%s10218_s1 + $0x260] sm:$0xff]  ;;  %v7255_v14 = vld [vmem:[%s10218_s1 + $0x298] sm:$0xff] }
 0x269   :  { %10544 = vst [vmem:[#allocation31_spill] sm:$0xff] %v7208_v9  ;;  %5140 = vmatpush.msk.msra.mxu0 %vm5953_vm6, %v6842_v24 }
 0x26b   :  { %4958 = vmatmul.msk.f32.gmra.mxu2 %vm1715_vm15, %v7219_v19  ;;  %5141 = vmatpush.msk.msra.mxu0 %vm5953_vm6, %v212_v5  ;;  %v10551_v19 = vunpack.i.l.bf16 %v6493_v30 }
 0x26c   :  { %v1969_v32 = vpop.f32.mrf.mxu1 }
 0x26d   :  { %v1970_v24 = vadd.f32 %v1969_v32, %v7038_v43  ;;  %5142 = vmatpush.msk.msra.mxu0 %vm5953_vm6, %v210_v57 }
 0x26e   :  { %v2085_v9 = vpop.f32.mrf.mxu2  ;;  %1915 = vmatmul.f32.gmra.mxu0 %v7236_v2 }
 0x26f   :  { %v7246_v5 = vadd.f32 %v2082_v36, %v1970_v24  ;;  %v5344_v53 = vpop.permute.xlu0 %5343  ;;  %5143 = vmatpush.msk.msra.mxu0 %vm5953_vm6, %v208_v45  ;;  %2254 = vmatmul.f32.gmra.mxu3 %v7236_v2  ;;  %v7258_v36 = vpop.permute.xlu2 %1421  ;;  %v5341_v24 = vunpack.i.h.bf16 %v5339_v31  ;;  %v10552_v31 = vunpack.i.h.bf16 %v6532_v11  ;;  %v7300_v11 = vld [vmem:[%s10218_s1 + $0x2b0] sm:$0xff] }
 0x270   :  { %2016 = vmatmul.f32.gmra.mxu1 %v7244_v18  ;;  %v1136_v43 = vpop.permute.xlu1 %1135  ;;  %v5346_v32 = vunpack.i.h.bf16 %v5344_v53  ;;  %v5345_v57 = vunpack.i.l.bf16 %v5344_v53  ;;  %v7263_v34 = vpop.f32.mrf.mxu3 }
 0x271   :  { %10548 = vst [vmem:[#allocation35_spill] sm:$0xff] %v7246_v5  ;;  %v10549_v5 = vunpack.i.h.bf16 %v6498_v49  ;;  %v7267_v53 = vpop.f32.mrf.mxu0  ;;  %v7275_v49 = vld [vmem:[%s10218_s1 + $0x2d0] sm:$0xff]  ;;  %v1293_v30 = vsel %vm1217_vm3, %v10552_v31, %v5341_v24 }
 0x272   :  { %10550 = vst [vmem:[#allocation36_spill] sm:$0xff] %v7263_v34  ;;  %v1295_v2 = vsel %vm1217_vm3, %v10551_v19, %v5345_v57 }
 0x273   :  { %v1297_v45 = vsel %vm1217_vm3, %v10549_v5, %v5346_v32  ;;  %4959 = vmatmul.msk.f32.gmra.mxu2 %vm1715_vm15, %v7255_v14  ;;  %v7281_v32 = vld [vmem:[%s10218_s1 + $0x278] sm:$0xff] }
 0x274   :  { %2942 = vmatpush.msra.mxu1 %v1297_v45  ;;  %v1972_v28 = vpop.f32.mrf.mxu1 }
 0x275   :  { %v1973_v5 = vadd.f32 %v1972_v28, %v7080_v37  ;;  %v10554_v37 = vunpack.i.h.bf16 %v6594_v26 }
 0x276   :  { %2943 = vmatpush.msra.mxu1 %v1295_v2  ;;  %v2088_v45 = vpop.f32.mrf.mxu2  ;;  %1918 = vmatmul.f32.gmra.mxu0 %v7275_v49 }
 0x277   :  { %v7286_v34 = vadd.f32 %v2085_v9, %v1973_v5  ;;  %v7288_v19 = vpop.permute.xlu0 %1423  ;;  %2257 = vmatmul.f32.gmra.mxu3 %v7275_v49  ;;  %v1291_v2 = vsel %vm1217_vm3, %v10554_v37, %v5340_v12  ;;  %v10555_v9 = vld [vmem:[#allocation8_spill] sm:$0xff]  ;;  %v7307_v5 = vpop.permute.xlu2 %1427  ;;  %v1142_v12 = vsel %vm1056_vm10, %v6690_v51, %v7210_v21  ;;  %v1140_v37 = vsel %vm1056_vm10, %v6734_v0, %v7147_v38  ;;  %v7350_v0 = vld [vmem:[%s10218_s1 + $0x2c8] sm:$0xff] }
 0x278   :  { %2944 = vmatpush.msra.mxu1 %v1293_v30  ;;  %v7292_v28 = vpop.permute.xlu1 %1419  ;;  %v1144_v57 = vsel %vm1056_vm10, %v10555_v9, %v1136_v43  ;;  %v7321_v43 = vld [vmem:[%s10218_s1 + $0x2e8] sm:$0xff]  ;;  %v7328_v30 = vld [vmem:[%s10218_s1 + $0x290] sm:$0xff]  ;;  %v1138_v9 = vsel %vm1056_vm10, %v6773_v54, %v7214_v46  ;;  %v983_v54 = vsel %vm895_vm12, %v6801_v17, %v7163_v52  ;;  %v981_v46 = vsel %vm895_vm12, %v6832_v40, %v7082_v44 }
 0x279   :  { %10553 = vst [vmem:[#allocation37_spill] sm:$0xff] %v7286_v34  ;;  %2019 = vmatmul.f32.gmra.mxu1 %v7281_v32  ;;  %v7305_v24 = vpop.f32.mrf.mxu3  ;;  %v7313_v26 = vpop.f32.mrf.mxu0  ;;  %v7374_v17 = vld [vmem:[%s10218_s1 + $0x2a8] sm:$0xff]  ;;  %v5336_v52 = vunpack.i.h.bf16 %v7032_v60 }
 0x27a   :  { %2945 = vmatpush.msra.mxu1 %v1291_v2  ;;  %v7386_v44 = vld [vmem:[%s10218_s1 + $0x8] sm:$0xff] }
 0x27b   :  { %4960 = vmatmul.msk.f32.gmra.mxu2 %vm1715_vm15, %v7300_v11 }
 0x27c   :  { %5144 = vmatpush.msk.msra.mxu1 %vm5953_vm6, %v1144_v57 }
 0x27d   :  { %v1975_v31 = vpop.f32.mrf.mxu1 }
 0x27e   :  { %5145 = vmatpush.msk.msra.mxu1 %vm5953_vm6, %v1142_v12  ;;  %v1976_v51 = vadd.f32 %v1975_v31, %v7132_v35  ;;  %v2091_v21 = vpop.f32.mrf.mxu2  ;;  %1921 = vmatmul.f32.gmra.mxu0 %v7321_v43  ;;  %v979_v31 = vsel %vm895_vm12, %v6868_v15, %v7170_v62  ;;  %v977_v15 = vsel %vm895_vm12, %v6905_v55, %v7108_v22  ;;  %v5331_v55 = vunpack.i.h.bf16 %v7114_v47 }
 0x27f   :  { %v7334_v2 = vpop.permute.xlu0 %1429  ;;  %2260 = vmatmul.f32.gmra.mxu3 %v7321_v43  ;;  %v1434_v41 = vpop.permute.xlu2 %1433 }
 0x280   :  { %5146 = vmatpush.msk.msra.mxu1 %vm5953_vm6, %v1140_v37  ;;  %v7342_v57 = vadd.f32 %v2088_v45, %v1976_v51  ;;  %v7345_v12 = vpop.permute.xlu1 %1425 }
 0x281   :  { %2022 = vmatmul.f32.gmra.mxu1 %v7328_v30  ;;  %v7358_v35 = vpop.f32.mrf.mxu3  ;;  %v7364_v38 = vpop.f32.mrf.mxu0 }
 0x282   :  { %10556 = vst [vmem:[#allocation8_spill] sm:$0xff] %v7342_v57  ;;  %5147 = vmatpush.msk.msra.mxu1 %vm5953_vm6, %v1138_v9  ;;  %v5335_v9 = vunpack.i.l.bf16 %v7032_v60  ;;  %v10558_v60 = vunpack.i.h.bf16 %v6949_v7  ;;  %v7427_v7 = vld [vmem:[%s10218_s1 + $0x2c0] sm:$0xff] }
 0x283   :  { %4961 = vmatmul.msk.f32.gmra.mxu2 %vm1715_vm15, %v7350_v0 }
 0x284   :  { %5148 = vmatpush.msk.msra.mxu1 %vm6005_vm9, %v983_v54  ;;  %v7399_v54 = vld [vmem:[%s10218_s1 + $0x2e0] sm:$0xff]  ;;  %v830_v22 = vsel %vm750_vm14, %v10558_v60, %v5336_v52 }
 0x285   :  { %v1978_v45 = vpop.f32.mrf.mxu1 }
 0x286   :  { %5149 = vmatpush.msk.msra.mxu1 %vm6005_vm9, %v981_v46  ;;  %v1979_v37 = vadd.f32 %v1978_v45, %v7186_v3  ;;  %v2094_v51 = vpop.f32.mrf.mxu2  ;;  %v7404_v46 = vld [vmem:[%s10218_s1 + $0x10] sm:$0xff] }
 0x287   :  { %v1436_v40 = vpop.permute.xlu0 %1435  ;;  %2619 = vmatmul.f32.vlgmr.msrb.gmra.mxu3 %v7386_v44  ;;  %4964 = vmatmul.msk.f32.vlgmr.msrb.gmra.mxu0 %vm1715_vm15, %v7404_v46  ;;  %v1440_v34 = vpop.permute.xlu2 %1439 }
 0x288   :  { %5150 = vmatpush.msk.msra.mxu1 %vm6005_vm9, %v979_v31  ;;  %v7393_v62 = vadd.f32 %v2091_v21, %v1979_v37  ;;  %v1432_v3 = vpop.permute.xlu1 %1431  ;;  %v5330_v31 = vunpack.i.l.bf16 %v7114_v47  ;;  %v10559_v37 = vunpack.i.l.bf16 %v6943_v63  ;;  %v7436_v63 = vld [vmem:[%s10218_s1 + $0x20] sm:$0xff] }
 0x289   :  { %2025 = vmatmul.f32.gmra.mxu1 %v7374_v17  ;;  %v7414_v21 = vpop.f32.mrf.mxu3  ;;  %v7418_v45 = vpop.f32.mrf.mxu0 }
 0x28a   :  { %10557 = vst [vmem:[#allocation38_spill] sm:$0xff] %v7393_v62  ;;  %5151 = vmatpush.msk.msra.mxu1 %vm6005_vm9, %v977_v15  ;;  %v828_v15 = vsel %vm750_vm14, %v10559_v37, %v5335_v9  ;;  %v7454_v37 = vld [vmem:[%s10218_s1 + $0x28] sm:$0xff] }
 0x28b   :  { %4962 = vmatmul.msk.f32.gmra.mxu2 %vm1715_vm15, %v7399_v54 }
 0x28c   :  { %2954 = vmatpush.msra.mxu1 %v830_v22  ;;  %v10560_v22 = vunpack.i.h.bf16 %v6990_v27  ;;  %v10562_v27 = vunpack.i.h.bf16 %v6987_v8  ;;  %v1448_v8 = vsel %vm1362_vm13, %v1434_v41, %v1436_v40  ;;  %v1445_v40 = vsel %vm1362_vm13, %v7345_v12, %v7307_v5 }
 0x28d   :  { %v1981_v62 = vpop.f32.mrf.mxu1 }
 0x28e   :  { %2955 = vmatpush.msra.mxu1 %v828_v15  ;;  %v1982_v52 = vadd.f32 %v1981_v62, %v7227_v1  ;;  %v2097_v60 = vpop.f32.mrf.mxu2  ;;  %v826_v57 = vsel %vm750_vm14, %v10560_v22, %v5331_v55  ;;  %v824_v55 = vsel %vm750_vm14, %v10562_v27, %v5330_v31  ;;  %v1447_v15 = vsel %vm1362_vm13, %v1432_v3, %v1434_v41  ;;  %v7486_v3 = vld [vmem:[%s10218_s1 + $0x2d8] sm:$0xff] }
 0x28f   :  { %v1442_v47 = vpop.permute.xlu0 %1441  ;;  %2622 = vmatmul.f32.gmra.mxu3 %v7436_v63  ;;  %4965 = vmatmul.msk.f32.gmra.mxu0 %vm1715_vm15, %v7454_v37  ;;  %v7532_v27 = vld [vmem:[%s10218_s1 + $0x58] sm:$0xff] }
 0x290   :  { %2956 = vmatpush.msra.mxu1 %v826_v57  ;;  %v7439_v9 = vadd.f32 %v2094_v51, %v1982_v52  ;;  %v1438_v1 = vpop.permute.xlu1 %1437  ;;  %v1450_v62 = vsel %vm1362_vm13, %v1440_v34, %v1442_v47  ;;  %v7449_v57 = vld [vmem:[%s10218_s1 + $0x2f8] sm:$0xff]  ;;  %v1446_v52 = vsel %vm1362_vm13, %v7307_v5, %v7334_v2  ;;  %v1444_v2 = vsel %vm1362_vm13, %v7258_v36, %v7288_v19 }
 0x291   :  { %2028 = vmatmul.f32.gmra.mxu1 %v7427_v7  ;;  %v1449_v51 = vsel %vm1362_vm13, %v1438_v1, %v1440_v34  ;;  %5152 = vmatpush.msk.msra.mxu3 %vm6005_vm9, %v1450_v62  ;;  %v7464_v31 = vpop.f32.mrf.mxu3  ;;  %v7471_v34 = vpop.f32.mrf.mxu0  ;;  %v1443_v5 = vsel %vm1362_vm13, %v7292_v28, %v7258_v36  ;;  %v7523_v28 = vld [vmem:[%s10218_s1 + $0x2f0] sm:$0xff] }
 0x292   :  { %10561 = vst [vmem:[#allocation39_spill] sm:$0xff] %v7439_v9  ;;  %2957 = vmatpush.msra.mxu1 %v824_v55  ;;  %5128 = vmatpush.msk.msra.mxu2 %vm5997_vm7, %v1449_v51  ;;  %v7539_v55 = vld [vmem:[%s10218_s1 + $0x50] sm:$0xff]  ;;  %v7607_v9 = vld [vmem:[%s10218_s1 + $0xa0] sm:$0xff] }
 0x293   :  { %4963 = vmatmul.msk.f32.gmra.mxu2 %vm1715_vm15, %v7449_v57  ;;  %5153 = vmatpush.msk.msra.mxu3 %vm6005_vm9, %v1448_v8  ;;  %10566 = vst [vmem:[#allocation43_spill] sm:$0xff] %v7539_v55 }
 0x294   :  { %5129 = vmatpush.msk.msra.mxu2 %vm5997_vm7, %v1447_v15  ;;  %10575 = vst [vmem:[#allocation52_spill] sm:$0xff] %v7607_v9 }
 0x295   :  { %v1984_v41 = vpop.f32.mrf.mxu1  ;;  %5154 = vmatpush.msk.msra.mxu3 %vm6005_vm9, %v1446_v52 }
 0x296   :  { %v1985_v22 = vadd.f32 %v1984_v41, %v7267_v53  ;;  %v2100_v47 = vpop.f32.mrf.mxu2  ;;  %5130 = vmatpush.msk.msra.mxu2 %vm5997_vm7, %v1445_v40  ;;  %v7507_v53 = vld [vmem:[%s10218_s1 + $0x40] sm:$0xff] }
 0x297   :  { %5155 = vmatpush.msk.msra.mxu3 %vm6005_vm9, %v1444_v2  ;;  %4966 = vmatmul.msk.f32.gmra.mxu0 %vm1715_vm15, %v7507_v53  ;;  %v7551_v41 = vld [vmem:[%s10218_s1] sm:$0xff]  ;;  %v7557_v2 = vld [vmem:[%s10218_s1 + $0x70] sm:$0xff] }
 0x298   :  { %v7499_v12 = vadd.f32 %v2097_v60, %v1985_v22  ;;  %5131 = vmatpush.msk.msra.mxu2 %vm5997_vm7, %v1443_v5  ;;  %2625 = vmatmul.f32.gmra.mxu3 %v7514_v4 }
 0x299   :  { %2031 = vmatmul.f32.gmra.mxu1 %v7486_v3  ;;  %v7517_v36 = vpop.f32.mrf.mxu3  ;;  %v1886_v6 = vpop.f32.mrf.mxu0 }
 0x29a   :  { %10563 = vst [vmem:[#allocation40_spill] sm:$0xff] %v7499_v12  ;;  %v7601_v12 = vld [vmem:[%s10218_s1 + $0x30] sm:$0xff] }
 0x29b   :  { %2280 = vmatmul.f32.vlgmr.msrb.gmra.mxu2 %v7386_v44 }
 0x29d   :  { %v1987_v19 = vpop.f32.mrf.mxu1 }
 0x29e   :  { %v1988_v60 = vadd.f32 %v1987_v19, %v7313_v26  ;;  %v2103_v1 = vpop.f32.mrf.mxu2 }
 0x29f   :  { %4967 = vmatmul.msk.f32.gmra.mxu0 %vm1715_vm15, %v7532_v27 }
 0x2a0   :  { %v7526_v62 = vadd.f32 %v2100_v47, %v1988_v60  ;;  %2628 = vmatmul.f32.gmra.mxu3 %v7539_v55 }
 0x2a1   :  { %2034 = vmatmul.f32.gmra.mxu1 %v7523_v28  ;;  %v7542_v26 = vpop.f32.mrf.mxu3  ;;  %v1889_v51 = vpop.f32.mrf.mxu0 }
 0x2a2   :  { %10565 = vst [vmem:[#allocation42_spill] sm:$0xff] %v7526_v62 }
 0x2a3   :  { %10567 = vst [vmem:[#allocation44_spill] sm:$0xff] %v7542_v26  ;;  %2283 = vmatmul.f32.gmra.mxu2 %v7436_v63  ;;  %v7679_v26 = vld [vmem:[%s10218_s1 + $0xe8] sm:$0xff] }
 0x2a4   :  { %10588 = vst [vmem:[#allocation65_spill] sm:$0xff] %v7679_v26 }
 0x2a5   :  { %v1990_v8 = vpop.f32.mrf.mxu1 }
 0x2a6   :  { %v1991_v15 = vadd.f32 %v1990_v8, %v7364_v38  ;;  %v2106_v52 = vpop.f32.mrf.mxu2  ;;  %v7564_v38 = vld [vmem:[%s10218_s1 + $0x68] sm:$0xff]  ;;  %v7576_v8 = vld [vmem:[%s10218_s1 + $0x18] sm:$0xff] }
 0x2a7   :  { %4968 = vmatmul.msk.f32.gmra.mxu0 %vm1715_vm15, %v7557_v2  ;;  %10569 = vst [vmem:[#allocation46_spill] sm:$0xff] %v7564_v38 }
 0x2a8   :  { %v7546_v40 = vadd.f32 %v2103_v1, %v1991_v15  ;;  %2631 = vmatmul.f32.gmra.mxu3 %v7564_v38  ;;  %v7582_v15 = vld [vmem:[%s10218_s1 + $0x88] sm:$0xff] }
 0x2a9   :  { %2506 = vmatmul.f32.vlgmr.msrb.gmra.mxu1 %v7551_v41  ;;  %v7567_v22 = vpop.f32.mrf.mxu3  ;;  %v1892_v47 = vpop.f32.mrf.mxu0 }
 0x2aa   :  { %10568 = vst [vmem:[#allocation45_spill] sm:$0xff] %v7546_v40 }
 0x2ab   :  { %10570 = vst [vmem:[#allocation47_spill] sm:$0xff] %v7567_v22  ;;  %2286 = vmatmul.f32.gmra.mxu2 %v7514_v4  ;;  %v7625_v22 = vld [vmem:[%s10218_s1 + $0x48] sm:$0xff]  ;;  %v7655_v4 = vld [vmem:[%s10218_s1 + $0xd0] sm:$0xff] }
 0x2ac   :  { %10583 = vst [vmem:[#allocation60_spill] sm:$0xff] %v7655_v4 }
 0x2ad   :  { %v1993_v5 = vpop.f32.mrf.mxu1 }
 0x2ae   :  { %v1994_v19 = vadd.f32 %v1993_v5, %v7418_v45  ;;  %v2109_v60 = vpop.f32.mrf.mxu2  ;;  %v7589_v45 = vld [vmem:[%s10218_s1 + $0x80] sm:$0xff] }
 0x2af   :  { %4969 = vmatmul.msk.f32.gmra.mxu0 %vm1715_vm15, %v7582_v15  ;;  %10572 = vst [vmem:[#allocation49_spill] sm:$0xff] %v7589_v45 }
 0x2b0   :  { %v7571_v1 = vadd.f32 %v2106_v52, %v1994_v19  ;;  %2634 = vmatmul.f32.gmra.mxu3 %v7589_v45 }
 0x2b1   :  { %2509 = vmatmul.f32.gmra.mxu1 %v7576_v8  ;;  %v7592_v52 = vpop.f32.mrf.mxu3  ;;  %v1895_v5 = vpop.f32.mrf.mxu0 }
 0x2b2   :  { %10571 = vst [vmem:[#allocation48_spill] sm:$0xff] %v7571_v1 }
 0x2b3   :  { %10573 = vst [vmem:[#allocation50_spill] sm:$0xff] %v7592_v52  ;;  %2289 = vmatmul.f32.gmra.mxu2 %v7539_v55 }
 0x2b5   :  { %v1996_v19 = vpop.f32.mrf.mxu1 }
 0x2b6   :  { %v1997_v1 = vadd.f32 %v1996_v19, %v7471_v34  ;;  %v2112_v40 = vpop.f32.mrf.mxu2  ;;  %v7614_v34 = vld [vmem:[%s10218_s1 + $0x98] sm:$0xff] }
 0x2b7   :  { %4970 = vmatmul.msk.f32.gmra.mxu0 %vm1715_vm15, %v7607_v9  ;;  %10576 = vst [vmem:[#allocation53_spill] sm:$0xff] %v7614_v34  ;;  %v7631_v9 = vld [vmem:[%s10218_s1 + $0xb8] sm:$0xff] }
 0x2b8   :  { %v7596_v62 = vadd.f32 %v2109_v60, %v1997_v1  ;;  %2637 = vmatmul.f32.gmra.mxu3 %v7614_v34  ;;  %10579 = vst [vmem:[#allocation56_spill] sm:$0xff] %v7631_v9 }
 0x2b9   :  { %2512 = vmatmul.f32.gmra.mxu1 %v7601_v12  ;;  %v7617_v60 = vpop.f32.mrf.mxu3 }
 0x2ba   :  { %10574 = vst [vmem:[#allocation51_spill] sm:$0xff] %v7596_v62  ;;  %v1898_v1 = vpop.f32.mrf.mxu0 }
 0x2bb   :  { %10577 = vst [vmem:[#allocation54_spill] sm:$0xff] %v7617_v60  ;;  %2292 = vmatmul.f32.gmra.mxu2 %v7564_v38 }
 0x2bd   :  { %v1999_v19 = vpop.f32.mrf.mxu1 }
 0x2be   :  { %v2000_v62 = vadd.f32 %v1999_v19, %v1886_v6  ;;  %v2115_v52 = vpop.f32.mrf.mxu2  ;;  %v7638_v6 = vld [vmem:[%s10218_s1 + $0xb0] sm:$0xff] }
 0x2bf   :  { %4971 = vmatmul.msk.f32.gmra.mxu0 %vm1715_vm15, %v7631_v9  ;;  %10580 = vst [vmem:[#allocation57_spill] sm:$0xff] %v7638_v6  ;;  %v7649_v9 = vld [vmem:[%s10218_s1 + $0x60] sm:$0xff] }
 0x2c0   :  { %v7620_v55 = vadd.f32 %v2112_v40, %v2000_v62  ;;  %2640 = vmatmul.f32.gmra.mxu3 %v7638_v6 }
 0x2c1   :  { %2515 = vmatmul.f32.gmra.mxu1 %v7625_v22 }
 0x2c2   :  { %10578 = vst [vmem:[#allocation55_spill] sm:$0xff] %v7620_v55  ;;  %v7641_v62 = vpop.f32.mrf.mxu3  ;;  %v1901_v40 = vpop.f32.mrf.mxu0 }
 0x2c3   :  { %10581 = vst [vmem:[#allocation58_spill] sm:$0xff] %v7641_v62  ;;  %2295 = vmatmul.f32.gmra.mxu2 %v7589_v45 }
 0x2c5   :  { %v2002_v19 = vpop.f32.mrf.mxu1 }
 0x2c6   :  { %v2003_v55 = vadd.f32 %v2002_v19, %v1889_v51  ;;  %v2118_v60 = vpop.f32.mrf.mxu2 }
 0x2c7   :  { %4972 = vmatmul.msk.f32.gmra.mxu0 %vm1715_vm15, %v7655_v4  ;;  %v7673_v4 = vld [vmem:[%s10218_s1 + $0x78] sm:$0xff] }
 0x2c8   :  { %v7644_v38 = vadd.f32 %v2115_v52, %v2003_v55  ;;  %v7662_v55 = vld [vmem:[%s10218_s1 + $0xc8] sm:$0xff]  ;;  %10587 = vst [vmem:[#allocation64_spill] sm:$0xff] %v7673_v4 }
 0x2c9   :  { %2518 = vmatmul.f32.gmra.mxu1 %v7649_v9  ;;  %10584 = vst [vmem:[#allocation61_spill] sm:$0xff] %v7662_v55  ;;  %2643 = vmatmul.f32.gmra.mxu3 %v7662_v55 }
 0x2ca   :  { %10582 = vst [vmem:[#allocation59_spill] sm:$0xff] %v7644_v38  ;;  %v7665_v51 = vpop.f32.mrf.mxu3  ;;  %v1904_v52 = vpop.f32.mrf.mxu0 }
 0x2cb   :  { %10585 = vst [vmem:[#allocation62_spill] sm:$0xff] %v7665_v51  ;;  %2298 = vmatmul.f32.gmra.mxu2 %v7614_v34 }
 0x2cd   :  { %v2005_v19 = vpop.f32.mrf.mxu1 }
 0x2ce   :  { %v2006_v38 = vadd.f32 %v2005_v19, %v1892_v47  ;;  %v2121_v62 = vpop.f32.mrf.mxu2 }
 0x2cf   :  { %4973 = vmatmul.msk.f32.gmra.mxu0 %vm1715_vm15, %v7679_v26  ;;  %v7697_v26 = vld [vmem:[%s10218_s1 + $0x90] sm:$0xff] }
 0x2d0   :  { %v7668_v45 = vadd.f32 %v2118_v60, %v2006_v38  ;;  %v7686_v38 = vld [vmem:[%s10218_s1 + $0xe0] sm:$0xff]  ;;  %10592 = vst [vmem:[#allocation69_spill] sm:$0xff] %v7697_v26 }
 0x2d1   :  { %2521 = vmatmul.f32.gmra.mxu1 %v7673_v4  ;;  %10589 = vst [vmem:[#allocation66_spill] sm:$0xff] %v7686_v38  ;;  %2646 = vmatmul.f32.gmra.mxu3 %v7686_v38  ;;  %v7703_v4 = vld [vmem:[%s10218_s1 + $0x100] sm:$0xff] }
 0x2d2   :  { %10586 = vst [vmem:[#allocation63_spill] sm:$0xff] %v7668_v45  ;;  %v7689_v47 = vpop.f32.mrf.mxu3 }
 0x2d3   :  { %10590 = vst [vmem:[#allocation67_spill] sm:$0xff] %v7689_v47  ;;  %2301 = vmatmul.f32.gmra.mxu2 %v7638_v6  ;;  %v1907_v19 = vpop.f32.mrf.mxu0 }
 0x2d4   :  { %10593 = vst [vmem:[#allocation70_spill] sm:$0xff] %v7703_v4 }
 0x2d5   :  { %v2008_v60 = vpop.f32.mrf.mxu1 }
 0x2d6   :  { %v2009_v45 = vadd.f32 %v2008_v60, %v1895_v5  ;;  %v2124_v51 = vpop.f32.mrf.mxu2 }
 0x2d7   :  { %4974 = vmatmul.msk.f32.gmra.mxu0 %vm1715_vm15, %v7703_v4  ;;  %v7721_v4 = vld [vmem:[%s10218_s1 + $0xa8] sm:$0xff] }
 0x2d8   :  { %v7692_v34 = vadd.f32 %v2121_v62, %v2009_v45  ;;  %v7710_v45 = vld [vmem:[%s10218_s1 + $0xf8] sm:$0xff]  ;;  %10597 = vst [vmem:[#allocation74_spill] sm:$0xff] %v7721_v4 }
 0x2d9   :  { %2524 = vmatmul.f32.gmra.mxu1 %v7697_v26  ;;  %10594 = vst [vmem:[#allocation71_spill] sm:$0xff] %v7710_v45  ;;  %2649 = vmatmul.f32.gmra.mxu3 %v7710_v45  ;;  %v7727_v26 = vld [vmem:[%s10218_s1 + $0x118] sm:$0xff] }
 0x2da   :  { %10591 = vst [vmem:[#allocation68_spill] sm:$0xff] %v7692_v34  ;;  %v7713_v5 = vpop.f32.mrf.mxu3 }
 0x2db   :  { %10595 = vst [vmem:[#allocation72_spill] sm:$0xff] %v7713_v5  ;;  %2304 = vmatmul.f32.gmra.mxu2 %v7662_v55  ;;  %v1910_v60 = vpop.f32.mrf.mxu0 }
 0x2dc   :  { %10598 = vst [vmem:[#allocation75_spill] sm:$0xff] %v7727_v26 }
 0x2dd   :  { %v2011_v62 = vpop.f32.mrf.mxu1 }
 0x2de   :  { %v2012_v34 = vadd.f32 %v2011_v62, %v1898_v1  ;;  %v2127_v47 = vpop.f32.mrf.mxu2 }
 0x2df   :  { %4975 = vmatmul.msk.f32.gmra.mxu0 %vm1715_vm15, %v7727_v26  ;;  %v7745_v26 = vld [vmem:[%s10218_s1 + $0xc0] sm:$0xff] }
 0x2e0   :  { %v7716_v6 = vadd.f32 %v2124_v51, %v2012_v34  ;;  %v7734_v34 = vld [vmem:[%s10218_s1 + $0x110] sm:$0xff]  ;;  %10602 = vst [vmem:[#allocation79_spill] sm:$0xff] %v7745_v26 }
 0x2e1   :  { %2527 = vmatmul.f32.gmra.mxu1 %v7721_v4  ;;  %10599 = vst [vmem:[#allocation76_spill] sm:$0xff] %v7734_v34  ;;  %2652 = vmatmul.f32.gmra.mxu3 %v7734_v34  ;;  %v7751_v4 = vld [vmem:[%s10218_s1 + $0x130] sm:$0xff] }
 0x2e2   :  { %10596 = vst [vmem:[#allocation73_spill] sm:$0xff] %v7716_v6  ;;  %v7737_v1 = vpop.f32.mrf.mxu3 }
 0x2e3   :  { %10600 = vst [vmem:[#allocation77_spill] sm:$0xff] %v7737_v1  ;;  %2307 = vmatmul.f32.gmra.mxu2 %v7686_v38  ;;  %v1913_v62 = vpop.f32.mrf.mxu0 }
 0x2e4   :  { %10603 = vst [vmem:[#allocation80_spill] sm:$0xff] %v7751_v4 }
 0x2e5   :  { %v2014_v51 = vpop.f32.mrf.mxu1 }
 0x2e6   :  { %v2015_v6 = vadd.f32 %v2014_v51, %v1901_v40  ;;  %v2130_v5 = vpop.f32.mrf.mxu2 }
 0x2e7   :  { %4976 = vmatmul.msk.f32.gmra.mxu0 %vm1715_vm15, %v7751_v4  ;;  %v7769_v4 = vld [vmem:[%s10218_s1 + $0xd8] sm:$0xff] }
 0x2e8   :  { %v7740_v55 = vadd.f32 %v2127_v47, %v2015_v6  ;;  %v7758_v6 = vld [vmem:[%s10218_s1 + $0x128] sm:$0xff]  ;;  %10607 = vst [vmem:[#allocation84_spill] sm:$0xff] %v7769_v4 }
 0x2e9   :  { %2530 = vmatmul.f32.gmra.mxu1 %v7745_v26  ;;  %10604 = vst [vmem:[#allocation81_spill] sm:$0xff] %v7758_v6  ;;  %2655 = vmatmul.f32.gmra.mxu3 %v7758_v6  ;;  %v7775_v26 = vld [vmem:[%s10218_s1 + $0x148] sm:$0xff] }
 0x2ea   :  { %10601 = vst [vmem:[#allocation78_spill] sm:$0xff] %v7740_v55  ;;  %v7761_v40 = vpop.f32.mrf.mxu3 }
 0x2eb   :  { %10605 = vst [vmem:[#allocation82_spill] sm:$0xff] %v7761_v40  ;;  %2310 = vmatmul.f32.gmra.mxu2 %v7710_v45  ;;  %v1916_v51 = vpop.f32.mrf.mxu0 }
 0x2ec   :  { %10608 = vst [vmem:[#allocation85_spill] sm:$0xff] %v7775_v26 }
 0x2ed   :  { %v2017_v47 = vpop.f32.mrf.mxu1 }
 0x2ee   :  { %v2018_v55 = vadd.f32 %v2017_v47, %v1904_v52  ;;  %v2133_v1 = vpop.f32.mrf.mxu2 }
 0x2ef   :  { %4977 = vmatmul.msk.f32.gmra.mxu0 %vm1715_vm15, %v7775_v26  ;;  %v7793_v26 = vld [vmem:[%s10218_s1 + $0xf0] sm:$0xff] }
 0x2f0   :  { %v7764_v38 = vadd.f32 %v2130_v5, %v2018_v55  ;;  %v7782_v55 = vld [vmem:[%s10218_s1 + $0x140] sm:$0xff]  ;;  %10612 = vst [vmem:[#allocation89_spill] sm:$0xff] %v7793_v26 }
 0x2f1   :  { %2533 = vmatmul.f32.gmra.mxu1 %v7769_v4  ;;  %10609 = vst [vmem:[#allocation86_spill] sm:$0xff] %v7782_v55  ;;  %2658 = vmatmul.f32.gmra.mxu3 %v7782_v55  ;;  %v7799_v4 = vld [vmem:[%s10218_s1 + $0x160] sm:$0xff] }
 0x2f2   :  { %10606 = vst [vmem:[#allocation83_spill] sm:$0xff] %v7764_v38  ;;  %v7785_v52 = vpop.f32.mrf.mxu3 }
 0x2f3   :  { %10610 = vst [vmem:[#allocation87_spill] sm:$0xff] %v7785_v52  ;;  %2313 = vmatmul.f32.gmra.mxu2 %v7734_v34  ;;  %v1919_v47 = vpop.f32.mrf.mxu0 }
 0x2f4   :  { %10613 = vst [vmem:[#allocation90_spill] sm:$0xff] %v7799_v4 }
 0x2f6   :  { %v2020_v5 = vpop.f32.mrf.mxu1  ;;  %v2136_v40 = vpop.f32.mrf.mxu2 }
 0x2f7   :  { %v2021_v38 = vadd.f32 %v2020_v5, %v1907_v19  ;;  %4978 = vmatmul.msk.f32.gmra.mxu0 %vm1715_vm15, %v7799_v4  ;;  %v7817_v4 = vld [vmem:[%s10218_s1 + $0x108] sm:$0xff] }
 0x2f9   :  { %v7788_v45 = vadd.f32 %v2133_v1, %v2021_v38  ;;  %2536 = vmatmul.f32.gmra.mxu1 %v7793_v26  ;;  %v7806_v38 = vld [vmem:[%s10218_s1 + $0x158] sm:$0xff] }
 0x2fa   :  { %10614 = vst [vmem:[#allocation91_spill] sm:$0xff] %v7806_v38  ;;  %2661 = vmatmul.f32.gmra.mxu3 %v7806_v38  ;;  %v7809_v19 = vpop.f32.mrf.mxu3  ;;  %v7823_v26 = vld [vmem:[%s10218_s1 + $0x178] sm:$0xff] }
 0x2fb   :  { %10611 = vst [vmem:[#allocation88_spill] sm:$0xff] %v7788_v45  ;;  %2316 = vmatmul.f32.gmra.mxu2 %v7758_v6  ;;  %v1922_v5 = vpop.f32.mrf.mxu0  ;;  %v7836_v6 = vld [vmem:[%s10218_s1 + $0x120] sm:$0xff] }
 0x2fc   :  { %10615 = vst [vmem:[#allocation92_spill] sm:$0xff] %v7809_v19 }
 0x2fd   :  { %10617 = vst [vmem:[#allocation94_spill] sm:$0xff] %v7823_v26 }
 0x2fe   :  { %v2023_v1 = vpop.f32.mrf.mxu1  ;;  %v2139_v52 = vpop.f32.mrf.mxu2 }
 0x2ff   :  { %v2024_v45 = vadd.f32 %v2023_v1, %v1910_v60  ;;  %4979 = vmatmul.msk.f32.gmra.mxu0 %vm1715_vm15, %v7823_v26 }
 0x301   :  { %v7812_v34 = vadd.f32 %v2136_v40, %v2024_v45  ;;  %2539 = vmatmul.f32.gmra.mxu1 %v7817_v4 }
 0x302   :  { %2664 = vmatmul.f32.gmra.mxu3 %v6829_v20  ;;  %v7828_v60 = vpop.f32.mrf.mxu3  ;;  %v7842_v20 = vld [vmem:[%s10218_s1 + $0x190] sm:$0xff] }
 0x303   :  { %10616 = vst [vmem:[#allocation93_spill] sm:$0xff] %v7812_v34  ;;  %2319 = vmatmul.f32.gmra.mxu2 %v7782_v55  ;;  %v7855_v55 = vld [vmem:[%s10218_s1 + $0x138] sm:$0xff] }
 0x304   :  { %10618 = vst [vmem:[#allocation95_spill] sm:$0xff] %v7828_v60  ;;  %v2394_v40 = vpop.f32.mrf.mxu0 }
 0x305   :  { %10620 = vst [vmem:[#allocation97_spill] sm:$0xff] %v7842_v20 }
 0x306   :  { %v2026_v45 = vpop.f32.mrf.mxu1  ;;  %v2142_v34 = vpop.f32.mrf.mxu2 }
 0x307   :  { %v2027_v1 = vadd.f32 %v2026_v45, %v1913_v62  ;;  %4980 = vmatmul.msk.f32.gmra.mxu0 %vm1715_vm15, %v7842_v20 }
 0x309   :  { %v7831_v19 = vadd.f32 %v2139_v52, %v2027_v1  ;;  %2542 = vmatmul.f32.gmra.mxu1 %v7836_v6 }
 0x30a   :  { %2667 = vmatmul.f32.gmra.mxu3 %v6864_v58  ;;  %v7847_v62 = vpop.f32.mrf.mxu3  ;;  %v7861_v58 = vld [vmem:[%s10218_s1 + $0x1a8] sm:$0xff] }
 0x30b   :  { %10619 = vst [vmem:[#allocation96_spill] sm:$0xff] %v7831_v19  ;;  %2322 = vmatmul.f32.gmra.mxu2 %v7806_v38 }
 0x30c   :  { %10621 = vst [vmem:[#allocation98_spill] sm:$0xff] %v7847_v62  ;;  %v2397_v45 = vpop.f32.mrf.mxu0 }
 0x30d   :  { %10623 = vst [vmem:[#allocation100_spill] sm:$0xff] %v7861_v58 }
 0x30e   :  { %v2029_v52 = vpop.f32.mrf.mxu1  ;;  %v2145_v19 = vpop.f32.mrf.mxu2 }
 0x30f   :  { %v2030_v1 = vadd.f32 %v2029_v52, %v1916_v51  ;;  %4981 = vmatmul.msk.f32.gmra.mxu0 %vm1715_vm15, %v7861_v58  ;;  %v7879_v58 = vld [vmem:[%s10218_s1 + $0x150] sm:$0xff] }
 0x311   :  { %v7850_v60 = vadd.f32 %v2142_v34, %v2030_v1  ;;  %2545 = vmatmul.f32.gmra.mxu1 %v7855_v55  ;;  %v7871_v34 = vld [vmem:[%s10218_s1 + $0x170] sm:$0xff] }
 0x312   :  { %2670 = vmatmul.f32.gmra.mxu3 %v6899_v59  ;;  %v7866_v51 = vpop.f32.mrf.mxu3  ;;  %10625 = vst [vmem:[#allocation102_spill] sm:$0xff] %v7871_v34 }
 0x313   :  { %10622 = vst [vmem:[#allocation99_spill] sm:$0xff] %v7850_v60  ;;  %2325 = vmatmul.f32.gmra.mxu2 %v7871_v34 }
 0x314   :  { %10624 = vst [vmem:[#allocation101_spill] sm:$0xff] %v7866_v51  ;;  %v2400_v62 = vpop.f32.mrf.mxu0 }
 0x316   :  { %v2032_v52 = vpop.f32.mrf.mxu1  ;;  %v2148_v60 = vpop.f32.mrf.mxu2 }
 0x317   :  { %v2033_v1 = vadd.f32 %v2032_v52, %v1919_v47  ;;  %4982 = vmatmul.msk.f32.gmra.mxu0 %vm1715_vm15, %v6876_v23  ;;  %v7888_v47 = vld [vmem:[%s10218_s1 + $0x188] sm:$0xff] }
 0x318   :  { %10627 = vst [vmem:[#allocation104_spill] sm:$0xff] %v7888_v47  ;;  %v7899_v23 = vld [vmem:[%s10218_s1 + $0x168] sm:$0xff] }
 0x319   :  { %v7874_v38 = vadd.f32 %v2145_v19, %v2033_v1  ;;  %2548 = vmatmul.f32.gmra.mxu1 %v7879_v58 }
 0x31a   :  { %2673 = vmatmul.f32.gmra.mxu3 %v6939_v16 }
 0x31b   :  { %10626 = vst [vmem:[#allocation103_spill] sm:$0xff] %v7874_v38  ;;  %2328 = vmatmul.f32.gmra.mxu2 %v7888_v47  ;;  %v7891_v19 = vpop.f32.mrf.mxu3 }
 0x31c   :  { %10628 = vst [vmem:[#allocation105_spill] sm:$0xff] %v7891_v19  ;;  %v2403_v51 = vpop.f32.mrf.mxu0  ;;  %v10631_v19 = vld [vmem:[#allocation18_spill] sm:$0xff] }
 0x31e   :  { %v2035_v52 = vpop.f32.mrf.mxu1  ;;  %v2281_v38 = vpop.f32.mrf.mxu2 }
 0x31f   :  { %v2036_v1 = vadd.f32 %v2035_v52, %v1922_v5  ;;  %v2282_v34 = vadd.f32 %v2281_v38, %v6730_v42  ;;  %4983 = vmatmul.msk.f32.gmra.mxu0 %vm1715_vm15, %v6913_v48  ;;  %v10633_v52 = vld [vmem:[#allocation4_spill] sm:$0xff] }
 0x321   :  { %v7894_v20 = vadd.f32 %v2148_v60, %v2036_v1  ;;  %2551 = vmatmul.f32.gmra.mxu1 %v7899_v23  ;;  %v7902_v26 = vadd.f32 %v2394_v40, %v2282_v34  ;;  %v7916_v40 = vld [vmem:[%s10218_s1 + $0x180] sm:$0xff] }
 0x322   :  { %2676 = vmatmul.f32.gmra.mxu3 %v10631_v19  ;;  %v10635_v34 = vld [vmem:[#allocation16_spill] sm:$0xff] }
 0x323   :  { %10629 = vst [vmem:[#allocation106_spill] sm:$0xff] %v7894_v20  ;;  %2331 = vmatmul.f32.gmra.mxu2 %v6899_v59  ;;  %v7908_v5 = vpop.f32.mrf.mxu3 }
 0x324   :  { %10630 = vst [vmem:[#allocation107_spill] sm:$0xff] %v7902_v26  ;;  %v2406_v60 = vpop.f32.mrf.mxu0 }
 0x325   :  { %10632 = vst [vmem:[#allocation18_spill] sm:$0xff] %v7908_v5  ;;  %v10638_v5 = vld [vmem:[#allocation9_spill] sm:$0xff] }
 0x326   :  { %v7910_v42 = vpop.f32.mrf.mxu1  ;;  %v2284_v38 = vpop.f32.mrf.mxu2 }
 0x327   :  { %v2285_v1 = vadd.f32 %v2284_v38, %v10633_v52  ;;  %4984 = vmatmul.msk.f32.gmra.mxu0 %vm1715_vm15, %v10635_v34  ;;  %v10640_v34 = vld [vmem:[#allocation20_spill] sm:$0xff] }
 0x329   :  { %2554 = vmatmul.f32.gmra.mxu1 %v7916_v40  ;;  %v7919_v48 = vadd.f32 %v2397_v45, %v2285_v1  ;;  %v7933_v45 = vld [vmem:[%s10218_s1 + $0x198] sm:$0xff] }
 0x32a   :  { %2679 = vmatmul.f32.gmra.mxu3 %v7020_v25 }
 0x32b   :  { %10634 = vst [vmem:[#allocation4_spill] sm:$0xff] %v7919_v48  ;;  %2334 = vmatmul.f32.gmra.mxu2 %v6939_v16  ;;  %v7925_v59 = vpop.f32.mrf.mxu3  ;;  %v10642_v48 = vld [vmem:[#allocation10_spill] sm:$0xff] }
 0x32c   :  { %10636 = vst [vmem:[#allocation16_spill] sm:$0xff] %v7925_v59  ;;  %v2409_v52 = vpop.f32.mrf.mxu0 }
 0x32e   :  { %v7927_v20 = vpop.f32.mrf.mxu1  ;;  %v2287_v38 = vpop.f32.mrf.mxu2 }
 0x32f   :  { %10637 = vst [vmem:[#allocation108_spill] sm:$0xff] %v7927_v20  ;;  %v2288_v47 = vadd.f32 %v2287_v38, %v10638_v5  ;;  %4985 = vmatmul.msk.f32.gmra.mxu0 %vm1715_vm15, %v10640_v34 }
 0x331   :  { %2557 = vmatmul.f32.gmra.mxu1 %v7933_v45  ;;  %v7936_v1 = vadd.f32 %v2400_v62, %v2288_v47  ;;  %v7950_v62 = vld [vmem:[%s10218_s1 + $0x1b0] sm:$0xff] }
 0x332   :  { %2682 = vmatmul.f32.gmra.mxu3 %v7058_v50 }
 0x333   :  { %10639 = vst [vmem:[#allocation9_spill] sm:$0xff] %v7936_v1  ;;  %2337 = vmatmul.f32.gmra.mxu2 %v10631_v19  ;;  %v7942_v16 = vpop.f32.mrf.mxu3 }
 0x334   :  { %10641 = vst [vmem:[#allocation20_spill] sm:$0xff] %v7942_v16  ;;  %v2412_v38 = vpop.f32.mrf.mxu0  ;;  %v10645_v16 = vld [vmem:[#allocation12_spill] sm:$0xff] }
 0x336   :  { %v7944_v59 = vpop.f32.mrf.mxu1  ;;  %v2290_v5 = vpop.f32.mrf.mxu2 }
 0x337   :  { %v2291_v20 = vadd.f32 %v2290_v5, %v10642_v48  ;;  %4986 = vmatmul.msk.f32.gmra.mxu0 %vm1715_vm15, %v7028_v56 }
 0x339   :  { %2560 = vmatmul.f32.gmra.mxu1 %v7950_v62  ;;  %v7953_v47 = vadd.f32 %v2403_v51, %v2291_v20  ;;  %v7967_v20 = vld [vmem:[%s10218_s1 + $0x1c8] sm:$0xff] }
 0x33a   :  { %2685 = vmatmul.f32.gmra.mxu3 %v7101_v33 }
 0x33b   :  { %10643 = vst [vmem:[#allocation10_spill] sm:$0xff] %v7953_v47  ;;  %2340 = vmatmul.f32.gmra.mxu2 %v7020_v25  ;;  %v7959_v19 = vpop.f32.mrf.mxu3 }
 0x33c   :  { %10644 = vst [vmem:[#allocation109_spill] sm:$0xff] %v7959_v19  ;;  %v2415_v5 = vpop.f32.mrf.mxu0  ;;  %v10648_v19 = vld [vmem:[#allocation14_spill] sm:$0xff] }
 0x33e   :  { %v7961_v34 = vpop.f32.mrf.mxu1  ;;  %v2293_v48 = vpop.f32.mrf.mxu2 }
 0x33f   :  { %v2294_v1 = vadd.f32 %v2293_v48, %v10645_v16  ;;  %4987 = vmatmul.msk.f32.gmra.mxu0 %vm1715_vm15, %v7072_v29 }
 0x341   :  { %2563 = vmatmul.f32.gmra.mxu1 %v7967_v20  ;;  %v7970_v56 = vadd.f32 %v2406_v60, %v2294_v1  ;;  %v7984_v60 = vld [vmem:[%s10218_s1 + $0x1e0] sm:$0xff] }
 0x342   :  { %2688 = vmatmul.f32.gmra.mxu3 %v7155_v10 }
 0x343   :  { %10646 = vst [vmem:[#allocation12_spill] sm:$0xff] %v7970_v56  ;;  %2343 = vmatmul.f32.gmra.mxu2 %v7058_v50  ;;  %v7976_v25 = vpop.f32.mrf.mxu3 }
 0x344   :  { %10647 = vst [vmem:[#allocation110_spill] sm:$0xff] %v7976_v25  ;;  %v2418_v48 = vpop.f32.mrf.mxu0  ;;  %v10651_v25 = vld [vmem:[#allocation17_spill] sm:$0xff] }
 0x346   :  { %v7978_v51 = vpop.f32.mrf.mxu1  ;;  %v2296_v16 = vpop.f32.mrf.mxu2 }
 0x347   :  { %v2297_v47 = vadd.f32 %v2296_v16, %v10648_v19  ;;  %4988 = vmatmul.msk.f32.gmra.mxu0 %vm1715_vm15, %v7122_v61 }
 0x349   :  { %2566 = vmatmul.f32.gmra.mxu1 %v7984_v60  ;;  %v7987_v29 = vadd.f32 %v2409_v52, %v2297_v47  ;;  %v8001_v52 = vld [vmem:[%s10218_s1 + $0x1f8] sm:$0xff] }
 0x34a   :  { %2691 = vmatmul.f32.gmra.mxu3 %v7203_v39 }
 0x34b   :  { %10649 = vst [vmem:[#allocation14_spill] sm:$0xff] %v7987_v29  ;;  %2346 = vmatmul.f32.gmra.mxu2 %v7101_v33 }
 0x34c   :  { %v7993_v50 = vpop.f32.mrf.mxu3  ;;  %v2421_v16 = vpop.f32.mrf.mxu0 }
 0x34d   :  { %10650 = vst [vmem:[#allocation111_spill] sm:$0xff] %v7993_v50  ;;  %v10655_v50 = vld [vmem:[#allocation21_spill] sm:$0xff] }
 0x34e   :  { %v7995_v1 = vpop.f32.mrf.mxu1  ;;  %v2299_v19 = vpop.f32.mrf.mxu2 }
 0x34f   :  { %v2300_v56 = vadd.f32 %v2299_v19, %v10651_v25  ;;  %4989 = vmatmul.msk.f32.gmra.mxu0 %vm1715_vm15, %v7178_v13 }
 0x351   :  { %2569 = vmatmul.f32.gmra.mxu1 %v8001_v52  ;;  %v8004_v61 = vadd.f32 %v2412_v38, %v2300_v56  ;;  %v8018_v38 = vld [vmem:[%s10218_s1 + $0x210] sm:$0xff]  ;;  %v10657_v56 = vld [vmem:[#allocation32_spill] sm:$0xff] }
 0x352   :  { %2694 = vmatmul.f32.gmra.mxu3 %v7244_v18 }
 0x353   :  { %10652 = vst [vmem:[#allocation17_spill] sm:$0xff] %v8004_v61  ;;  %2349 = vmatmul.f32.gmra.mxu2 %v7155_v10  ;;  %v10660_v61 = vld [vmem:[#allocation23_spill] sm:$0xff] }
 0x354   :  { %v8010_v33 = vpop.f32.mrf.mxu3  ;;  %v2424_v19 = vpop.f32.mrf.mxu0 }
 0x355   :  { %10653 = vst [vmem:[#allocation112_spill] sm:$0xff] %v8010_v33 }
 0x356   :  { %v8012_v47 = vpop.f32.mrf.mxu1  ;;  %v2302_v25 = vpop.f32.mrf.mxu2 }
 0x357   :  { %10654 = vst [vmem:[#allocation113_spill] sm:$0xff] %v8012_v47  ;;  %v2303_v29 = vadd.f32 %v2302_v25, %v10655_v50  ;;  %4990 = vmatmul.msk.f32.gmra.mxu0 %vm1715_vm15, %v10657_v56 }
 0x359   :  { %2572 = vmatmul.f32.gmra.mxu1 %v8018_v38  ;;  %v8021_v13 = vadd.f32 %v2415_v5, %v2303_v29  ;;  %v8035_v5 = vld [vmem:[%s10218_s1 + $0x228] sm:$0xff] }
 0x35a   :  { %2697 = vmatmul.f32.gmra.mxu3 %v7281_v32 }
 0x35b   :  { %10656 = vst [vmem:[#allocation21_spill] sm:$0xff] %v8021_v13  ;;  %2352 = vmatmul.f32.gmra.mxu2 %v7203_v39 }
 0x35c   :  { %v8027_v10 = vpop.f32.mrf.mxu3  ;;  %v2427_v25 = vpop.f32.mrf.mxu0 }
 0x35d   :  { %10658 = vst [vmem:[#allocation32_spill] sm:$0xff] %v8027_v10  ;;  %v10664_v10 = vld [vmem:[#allocation26_spill] sm:$0xff] }
 0x35e   :  { %v8029_v33 = vpop.f32.mrf.mxu1  ;;  %v2305_v50 = vpop.f32.mrf.mxu2 }
 0x35f   :  { %10659 = vst [vmem:[#allocation114_spill] sm:$0xff] %v8029_v33  ;;  %v2306_v47 = vadd.f32 %v2305_v50, %v10660_v61  ;;  %4991 = vmatmul.msk.f32.gmra.mxu0 %vm1715_vm15, %v7255_v14 }
 0x361   :  { %2575 = vmatmul.f32.gmra.mxu1 %v8035_v5  ;;  %v8038_v29 = vadd.f32 %v2418_v48, %v2306_v47  ;;  %v8052_v48 = vld [vmem:[%s10218_s1 + $0x240] sm:$0xff] }
 0x362   :  { %2700 = vmatmul.f32.gmra.mxu3 %v7328_v30 }
 0x363   :  { %10661 = vst [vmem:[#allocation23_spill] sm:$0xff] %v8038_v29  ;;  %2355 = vmatmul.f32.gmra.mxu2 %v7244_v18 }
 0x364   :  { %v8044_v39 = vpop.f32.mrf.mxu3  ;;  %v2430_v50 = vpop.f32.mrf.mxu0 }
 0x365   :  { %10662 = vst [vmem:[#allocation115_spill] sm:$0xff] %v8044_v39  ;;  %v10667_v39 = vld [vmem:[#allocation29_spill] sm:$0xff] }
 0x366   :  { %v8046_v56 = vpop.f32.mrf.mxu1  ;;  %v2308_v61 = vpop.f32.mrf.mxu2 }
 0x367   :  { %10663 = vst [vmem:[#allocation116_spill] sm:$0xff] %v8046_v56  ;;  %v2309_v13 = vadd.f32 %v2308_v61, %v10664_v10  ;;  %4992 = vmatmul.msk.f32.gmra.mxu0 %vm1715_vm15, %v7300_v11  ;;  %v10668_v56 = vld [vmem:[#allocation24_spill] sm:$0xff] }
 0x369   :  { %2578 = vmatmul.f32.gmra.mxu1 %v8052_v48  ;;  %v8055_v14 = vadd.f32 %v2421_v16, %v2309_v13 }
 0x36a   :  { %2703 = vmatmul.f32.gmra.mxu3 %v7374_v17 }
 0x36b   :  { %10665 = vst [vmem:[#allocation26_spill] sm:$0xff] %v8055_v14  ;;  %2358 = vmatmul.f32.gmra.mxu2 %v7281_v32 }
 0x36c   :  { %v8061_v18 = vpop.f32.mrf.mxu3  ;;  %v2433_v61 = vpop.f32.mrf.mxu0 }
 0x36d   :  { %10666 = vst [vmem:[#allocation117_spill] sm:$0xff] %v8061_v18  ;;  %v10671_v18 = vld [vmem:[#allocation5_spill] sm:$0xff] }
 0x36e   :  { %v8063_v47 = vpop.f32.mrf.mxu1  ;;  %v2311_v10 = vpop.f32.mrf.mxu2 }
 0x36f   :  { %v2312_v29 = vadd.f32 %v2311_v10, %v10667_v39  ;;  %4993 = vmatmul.msk.f32.gmra.mxu0 %vm1715_vm15, %v7350_v0  ;;  %v10672_v39 = vld [vmem:[#allocation27_spill] sm:$0xff]  ;;  %v10675_v10 = vld [vmem:[#allocation33_spill] sm:$0xff] }
 0x371   :  { %2581 = vmatmul.f32.gmra.mxu1 %v10668_v56  ;;  %v8067_v33 = vadd.f32 %v2424_v19, %v2312_v29 }
 0x372   :  { %2706 = vmatmul.f32.gmra.mxu3 %v7427_v7 }
 0x373   :  { %10669 = vst [vmem:[#allocation29_spill] sm:$0xff] %v8067_v33  ;;  %2361 = vmatmul.f32.gmra.mxu2 %v7328_v30 }
 0x374   :  { %v8073_v32 = vpop.f32.mrf.mxu3  ;;  %v2436_v13 = vpop.f32.mrf.mxu0 }
 0x375   :  { %10670 = vst [vmem:[#allocation24_spill] sm:$0xff] %v8073_v32 }
 0x376   :  { %v8075_v11 = vpop.f32.mrf.mxu1  ;;  %v2314_v16 = vpop.f32.mrf.mxu2 }
 0x377   :  { %v2315_v14 = vadd.f32 %v2314_v16, %v10671_v18  ;;  %4994 = vmatmul.msk.f32.gmra.mxu0 %vm1715_vm15, %v7399_v54  ;;  %v10676_v18 = vld [vmem:[#allocation7_spill] sm:$0xff] }
 0x379   :  { %2584 = vmatmul.f32.gmra.mxu1 %v10672_v39  ;;  %v8079_v56 = vadd.f32 %v2427_v25, %v2315_v14  ;;  %v10678_v39 = vld [vmem:[#allocation36_spill] sm:$0xff] }
 0x37a   :  { %2709 = vmatmul.f32.gmra.mxu3 %v7486_v3 }
 0x37b   :  { %10673 = vst [vmem:[#allocation5_spill] sm:$0xff] %v8079_v56  ;;  %2364 = vmatmul.f32.gmra.mxu2 %v7374_v17 }
 0x37c   :  { %v2439_v29 = vpop.f32.mrf.mxu0 }
 0x37d   :  { %v8085_v30 = vpop.f32.mrf.mxu3 }
 0x37e   :  { %10674 = vst [vmem:[#allocation27_spill] sm:$0xff] %v8085_v30  ;;  %v8087_v0 = vpop.f32.mrf.mxu1  ;;  %v2317_v19 = vpop.f32.mrf.mxu2 }
 0x37f   :  { %v2318_v32 = vadd.f32 %v2317_v19, %v10675_v10  ;;  %4995 = vmatmul.msk.f32.gmra.mxu0 %vm1715_vm15, %v7449_v57  ;;  %v10679_v19 = vld [vmem:[#allocation30_spill] sm:$0xff] }
 0x381   :  { %2587 = vmatmul.f32.gmra.mxu1 %v10676_v18  ;;  %v8091_v16 = vadd.f32 %v2430_v50, %v2318_v32 }
 0x382   :  { %2712 = vmatmul.f32.gmra.mxu3 %v7523_v28 }
 0x383   :  { %10677 = vst [vmem:[#allocation33_spill] sm:$0xff] %v8091_v16  ;;  %2367 = vmatmul.f32.gmra.mxu2 %v7427_v7 }
 0x384   :  { %v2442_v14 = vpop.f32.mrf.mxu0 }
 0x385   :  { %v8097_v17 = vpop.f32.mrf.mxu3 }
 0x386   :  { %v8099_v54 = vpop.f32.mrf.mxu1  ;;  %v2320_v25 = vpop.f32.mrf.mxu2 }
 0x387   :  { %v2321_v30 = vadd.f32 %v2320_v25, %v10678_v39  ;;  %2845 = vmatmul.f32.vlgmr.msra.gmra.mxu0 %v7551_v41  ;;  %v10681_v25 = vld [vmem:[#allocation34_spill] sm:$0xff] }
 0x389   :  { %2590 = vmatmul.f32.gmra.mxu1 %v10679_v19  ;;  %v8103_v10 = vadd.f32 %v2433_v61, %v2321_v30 }
 0x38a   :  { %5028 = vmatmul.msk.f32.vlgmr.msra.gmra.mxu3 %vm1715_vm15, %v7404_v46 }
 0x38b   :  { %10680 = vst [vmem:[#allocation7_spill] sm:$0xff] %v8103_v10  ;;  %2370 = vmatmul.f32.gmra.mxu2 %v7486_v3 }
 0x38c   :  { %v2445_v32 = vpop.f32.mrf.mxu0 }
 0x38d   :  { %v8109_v7 = vpop.f32.mrf.mxu3 }
 0x38e   :  { %v8111_v57 = vpop.f32.mrf.mxu1  ;;  %v2323_v50 = vpop.f32.mrf.mxu2 }
 0x38f   :  { %v2324_v18 = vadd.f32 %v2323_v50, %v7305_v24  ;;  %2848 = vmatmul.f32.gmra.mxu0 %v7576_v8 }
 0x391   :  { %2593 = vmatmul.f32.gmra.mxu1 %v10681_v25  ;;  %v8115_v39 = vadd.f32 %v2436_v13, %v2324_v18 }
 0x392   :  { %5029 = vmatmul.msk.f32.gmra.mxu3 %vm1715_vm15, %v7454_v37 }
 0x393   :  { %10682 = vst [vmem:[#allocation36_spill] sm:$0xff] %v8115_v39  ;;  %2373 = vmatmul.f32.gmra.mxu2 %v7523_v28 }
 0x394   :  { %v2448_v30 = vpop.f32.mrf.mxu0 }
 0x395   :  { %v8121_v3 = vpop.f32.mrf.mxu3 }
 0x396   :  { %v8123_v41 = vpop.f32.mrf.mxu1  ;;  %v2326_v61 = vpop.f32.mrf.mxu2 }
 0x397   :  { %v2327_v19 = vadd.f32 %v2326_v61, %v7358_v35  ;;  %2851 = vmatmul.f32.gmra.mxu0 %v7601_v12 }
 0x399   :  { %2596 = vmatmul.f32.gmra.mxu1 %v7275_v49  ;;  %v8127_v24 = vadd.f32 %v2439_v29, %v2327_v19 }
 0x39a   :  { %5030 = vmatmul.msk.f32.gmra.mxu3 %vm1715_vm15, %v7507_v53 }
 0x39b   :  { %10683 = vst [vmem:[#allocation30_spill] sm:$0xff] %v8127_v24  ;;  %4996 = vmatmul.msk.f32.vlgmr.msra.gmra.mxu2 %vm1715_vm15, %v7404_v46 }
 0x39c   :  { %v2451_v50 = vpop.f32.mrf.mxu0 }
 0x39d   :  { %v8134_v28 = vpop.f32.mrf.mxu3 }
 0x39e   :  { %v8136_v8 = vpop.f32.mrf.mxu1  ;;  %v2329_v13 = vpop.f32.mrf.mxu2 }
 0x39f   :  { %v2330_v35 = vadd.f32 %v2329_v13, %v7414_v21  ;;  %2854 = vmatmul.f32.gmra.mxu0 %v7625_v22  ;;  %v10690_v13 = vld [vmem:[#allocation44_spill] sm:$0xff] }
 0x3a1   :  { %2599 = vmatmul.f32.gmra.mxu1 %v7321_v43  ;;  %v8140_v49 = vadd.f32 %v2442_v14, %v2330_v35  ;;  %v10691_v35 = vld [vmem:[#allocation41_spill] sm:$0xff] }
 0x3a2   :  { %5031 = vmatmul.msk.f32.gmra.mxu3 %vm1715_vm15, %v7532_v27 }
 0x3a3   :  { %10684 = vst [vmem:[#allocation34_spill] sm:$0xff] %v8140_v49  ;;  %4997 = vmatmul.msk.f32.gmra.mxu2 %vm1715_vm15, %v7454_v37 }
 0x3a4   :  { %v2454_v18 = vpop.f32.mrf.mxu0 }
 0x3a5   :  { %v8147_v46 = vpop.f32.mrf.mxu3 }
 0x3a6   :  { %v8149_v12 = vpop.f32.mrf.mxu1  ;;  %v2332_v29 = vpop.f32.mrf.mxu2 }
 0x3a7   :  { %v2333_v21 = vadd.f32 %v2332_v29, %v7464_v31  ;;  %2857 = vmatmul.f32.gmra.mxu0 %v7649_v9  ;;  %v10694_v29 = vld [vmem:[#allocation69_spill] sm:$0xff] }
 0x3a9   :  { %2958 = vmatmul.f32.vlgmr.msra.gmra.mxu1 %v7386_v44  ;;  %v8153_v43 = vadd.f32 %v2445_v32, %v2333_v21  ;;  %v10688_v32 = vld [vmem:[#allocation64_spill] sm:$0xff] }
 0x3aa   :  { %5032 = vmatmul.msk.f32.gmra.mxu3 %vm1715_vm15, %v7557_v2 }
 0x3ab   :  { %10685 = vst [vmem:[#allocation118_spill] sm:$0xff] %v8153_v43  ;;  %4998 = vmatmul.msk.f32.gmra.mxu2 %vm1715_vm15, %v7507_v53 }
 0x3ac   :  { %v2457_v25 = vpop.f32.mrf.mxu0 }
 0x3ad   :  { %v8160_v37 = vpop.f32.mrf.mxu3 }
 0x3ae   :  { %10686 = vst [vmem:[#allocation119_spill] sm:$0xff] %v8160_v37  ;;  %v8162_v22 = vpop.f32.mrf.mxu1  ;;  %v2335_v14 = vpop.f32.mrf.mxu2  ;;  %v10703_v37 = vld [vmem:[#allocation50_spill] sm:$0xff] }
 0x3af   :  { %v2336_v31 = vadd.f32 %v2335_v14, %v7517_v36  ;;  %2860 = vmatmul.f32.gmra.mxu0 %v10688_v32  ;;  %v10696_v32 = vld [vmem:[#allocation47_spill] sm:$0xff] }
 0x3b1   :  { %2961 = vmatmul.f32.gmra.mxu1 %v7436_v63  ;;  %v8166_v44 = vadd.f32 %v2448_v30, %v2336_v31  ;;  %v10693_v30 = vld [vmem:[#allocation52_spill] sm:$0xff] }
 0x3b2   :  { %5033 = vmatmul.msk.f32.gmra.mxu3 %vm1715_vm15, %v7582_v15 }
 0x3b3   :  { %10687 = vst [vmem:[#allocation120_spill] sm:$0xff] %v8166_v44  ;;  %4999 = vmatmul.msk.f32.gmra.mxu2 %vm1715_vm15, %v7532_v27 }
 0x3b4   :  { %v2460_v19 = vpop.f32.mrf.mxu0 }
 0x3b5   :  { %v8173_v9 = vpop.f32.mrf.mxu3 }
 0x3b6   :  { %10689 = vst [vmem:[#allocation64_spill] sm:$0xff] %v8173_v9  ;;  %v8175_v53 = vpop.f32.mrf.mxu1  ;;  %v2338_v61 = vpop.f32.mrf.mxu2 }
 0x3b7   :  { %v2339_v36 = vadd.f32 %v2338_v61, %v10690_v13  ;;  %2863 = vmatmul.f32.gmra.mxu0 %v10694_v29  ;;  %v10697_v13 = vld [vmem:[#allocation43_spill] sm:$0xff] }
 0x3b9   :  { %2964 = vmatmul.f32.gmra.mxu1 %v10691_v35  ;;  %v8179_v63 = vadd.f32 %v2451_v50, %v2339_v36  ;;  %v10699_v36 = vld [vmem:[#allocation56_spill] sm:$0xff]  ;;  %v10700_v35 = vld [vmem:[#allocation74_spill] sm:$0xff] }
 0x3ba   :  { %5034 = vmatmul.msk.f32.gmra.mxu3 %vm1715_vm15, %v10693_v30 }
 0x3bb   :  { %10692 = vst [vmem:[#allocation44_spill] sm:$0xff] %v8179_v63  ;;  %5000 = vmatmul.msk.f32.gmra.mxu2 %vm1715_vm15, %v7557_v2 }
 0x3bc   :  { %v2463_v31 = vpop.f32.mrf.mxu0 }
 0x3bd   :  { %v8186_v27 = vpop.f32.mrf.mxu3 }
 0x3be   :  { %10695 = vst [vmem:[#allocation41_spill] sm:$0xff] %v8186_v27  ;;  %v8188_v21 = vpop.f32.mrf.mxu1  ;;  %v2341_v14 = vpop.f32.mrf.mxu2 }
 0x3bf   :  { %v2342_v61 = vadd.f32 %v2341_v14, %v10696_v32  ;;  %2866 = vmatmul.f32.gmra.mxu0 %v10700_v35  ;;  %v10704_v32 = vld [vmem:[#allocation46_spill] sm:$0xff] }
 0x3c1   :  { %2967 = vmatmul.f32.gmra.mxu1 %v10697_v13  ;;  %v8192_v50 = vadd.f32 %v2454_v18, %v2342_v61  ;;  %v10706_v61 = vld [vmem:[#allocation60_spill] sm:$0xff]  ;;  %v10707_v13 = vld [vmem:[#allocation79_spill] sm:$0xff] }
 0x3c2   :  { %5035 = vmatmul.msk.f32.gmra.mxu3 %vm1715_vm15, %v10699_v36 }
 0x3c3   :  { %10698 = vst [vmem:[#allocation52_spill] sm:$0xff] %v8192_v50  ;;  %5001 = vmatmul.msk.f32.gmra.mxu2 %vm1715_vm15, %v7582_v15 }
 0x3c4   :  { %v2466_v9 = vpop.f32.mrf.mxu0 }
 0x3c5   :  { %v8199_v2 = vpop.f32.mrf.mxu3 }
 0x3c6   :  { %10701 = vst [vmem:[#allocation69_spill] sm:$0xff] %v8199_v2  ;;  %v8201_v29 = vpop.f32.mrf.mxu1  ;;  %v2344_v27 = vpop.f32.mrf.mxu2 }
 0x3c7   :  { %10702 = vst [vmem:[#allocation47_spill] sm:$0xff] %v8201_v29  ;;  %v2345_v14 = vadd.f32 %v2344_v27, %v10703_v37  ;;  %2869 = vmatmul.f32.gmra.mxu0 %v10707_v13  ;;  %v10710_v29 = vld [vmem:[#allocation54_spill] sm:$0xff]  ;;  %v10711_v27 = vld [vmem:[#allocation49_spill] sm:$0xff] }
 0x3c9   :  { %2970 = vmatmul.f32.gmra.mxu1 %v10704_v32  ;;  %v8205_v18 = vadd.f32 %v2457_v25, %v2345_v14  ;;  %v10713_v14 = vld [vmem:[#allocation65_spill] sm:$0xff]  ;;  %v10714_v32 = vld [vmem:[#allocation84_spill] sm:$0xff] }
 0x3ca   :  { %5036 = vmatmul.msk.f32.gmra.mxu3 %vm1715_vm15, %v10706_v61 }
 0x3cb   :  { %10705 = vst [vmem:[#allocation43_spill] sm:$0xff] %v8205_v18  ;;  %5002 = vmatmul.msk.f32.gmra.mxu2 %vm1715_vm15, %v10693_v30 }
 0x3cc   :  { %v2469_v50 = vpop.f32.mrf.mxu0 }
 0x3cd   :  { %v8212_v15 = vpop.f32.mrf.mxu3 }
 0x3ce   :  { %10708 = vst [vmem:[#allocation56_spill] sm:$0xff] %v8212_v15  ;;  %v8214_v35 = vpop.f32.mrf.mxu1  ;;  %v2347_v2 = vpop.f32.mrf.mxu2 }
 0x3cf   :  { %10709 = vst [vmem:[#allocation74_spill] sm:$0xff] %v8214_v35  ;;  %v2348_v37 = vadd.f32 %v2347_v2, %v10710_v29  ;;  %2872 = vmatmul.f32.gmra.mxu0 %v10714_v32  ;;  %v10717_v35 = vld [vmem:[#allocation58_spill] sm:$0xff]  ;;  %v10718_v29 = vld [vmem:[#allocation53_spill] sm:$0xff] }
 0x3d1   :  { %2973 = vmatmul.f32.gmra.mxu1 %v10711_v27  ;;  %v8218_v25 = vadd.f32 %v2460_v19, %v2348_v37  ;;  %v10720_v37 = vld [vmem:[#allocation70_spill] sm:$0xff]  ;;  %v10721_v27 = vld [vmem:[#allocation89_spill] sm:$0xff] }
 0x3d2   :  { %5037 = vmatmul.msk.f32.gmra.mxu3 %vm1715_vm15, %v10713_v14 }
 0x3d3   :  { %10712 = vst [vmem:[#allocation50_spill] sm:$0xff] %v8218_v25  ;;  %5003 = vmatmul.msk.f32.gmra.mxu2 %vm1715_vm15, %v10699_v36 }
 0x3d4   :  { %v2472_v18 = vpop.f32.mrf.mxu0 }
 0x3d5   :  { %v8225_v30 = vpop.f32.mrf.mxu3 }
 0x3d6   :  { %10715 = vst [vmem:[#allocation46_spill] sm:$0xff] %v8225_v30  ;;  %v8227_v13 = vpop.f32.mrf.mxu1  ;;  %v2350_v15 = vpop.f32.mrf.mxu2 }
 0x3d7   :  { %10716 = vst [vmem:[#allocation60_spill] sm:$0xff] %v8227_v13  ;;  %v2351_v2 = vadd.f32 %v2350_v15, %v10717_v35  ;;  %2875 = vmatmul.f32.gmra.mxu0 %v10721_v27  ;;  %v10723_v13 = vld [vmem:[#allocation62_spill] sm:$0xff]  ;;  %v10724_v35 = vld [vmem:[#allocation57_spill] sm:$0xff] }
 0x3d9   :  { %2976 = vmatmul.f32.gmra.mxu1 %v10718_v29  ;;  %v8231_v19 = vadd.f32 %v2463_v31, %v2351_v2  ;;  %v10726_v2 = vld [vmem:[#allocation75_spill] sm:$0xff]  ;;  %v5552_v29 = vmov 0  }
 0x3da   :  { %5038 = vmatmul.msk.f32.gmra.mxu3 %vm1715_vm15, %v10720_v37  ;;  %5347 = vset.pattern.permute.xlu1 %v5552_v29 }
 0x3db   :  { %10719 = vst [vmem:[#allocation79_spill] sm:$0xff] %v8231_v19  ;;  %5004 = vmatmul.msk.f32.gmra.mxu2 %vm1715_vm15, %v10706_v61  ;;  %v4296_v61 = vld [vmem:[%s10219_s5] sm:$0xff]  ;;  %5348 = vset.pattern.permute.xlu2 %v5552_v29 }
 0x3dc   :  { %v2475_v25 = vpop.f32.mrf.mxu0  ;;  %4371 = vperm.xlu1 %5347, %v4296_v61   ;;  %5349 = vset.pattern.permute.xlu0 %v5552_v29 }
 0x3dd   :  { %v8238_v36 = vpop.f32.mrf.mxu3 }
 0x3de   :  { %10722 = vst [vmem:[#allocation54_spill] sm:$0xff] %v8238_v36  ;;  %v8240_v32 = vpop.f32.mrf.mxu1  ;;  %v2353_v30 = vpop.f32.mrf.mxu2 }
 0x3df   :  { %v2354_v15 = vadd.f32 %v2353_v30, %v10723_v13  ;;  %2878 = vmatmul.f32.gmra.mxu0 %v7817_v4 }
 0x3e1   :  { %2979 = vmatmul.f32.gmra.mxu1 %v10724_v35  ;;  %v8244_v31 = vadd.f32 %v2466_v9, %v2354_v15  ;;  %v10729_v15 = vld [vmem:[#allocation67_spill] sm:$0xff]  ;;  %v10730_v35 = vld [vmem:[#allocation61_spill] sm:$0xff] }
 0x3e2   :  { %5039 = vmatmul.msk.f32.gmra.mxu3 %vm1715_vm15, %v10726_v2 }
 0x3e3   :  { %10725 = vst [vmem:[#allocation49_spill] sm:$0xff] %v8244_v31  ;;  %5005 = vmatmul.msk.f32.gmra.mxu2 %vm1715_vm15, %v10713_v14  ;;  %v10732_v31 = vld [vmem:[#allocation80_spill] sm:$0xff] }
 0x3e4   :  { %v2478_v27 = vpop.f32.mrf.mxu0 }
 0x3e5   :  { %v8254_v30 = vpop.f32.mrf.mxu3 }
 0x3e6   :  { %10727 = vst [vmem:[#allocation65_spill] sm:$0xff] %v8254_v30  ;;  %v8256_v9 = vpop.f32.mrf.mxu1  ;;  %v2356_v13 = vpop.f32.mrf.mxu2 }
 0x3e7   :  { %10728 = vst [vmem:[#allocation84_spill] sm:$0xff] %v8256_v9  ;;  %v2357_v4 = vadd.f32 %v2356_v13, %v10729_v15  ;;  %2881 = vmatmul.f32.gmra.mxu0 %v7836_v6  ;;  %v10735_v9 = vld [vmem:[#allocation72_spill] sm:$0xff]  ;;  %v10736_v15 = vld [vmem:[#allocation66_spill] sm:$0xff] }
 0x3e9   :  { %2982 = vmatmul.f32.gmra.mxu1 %v10730_v35  ;;  %v8260_v36 = vadd.f32 %v2469_v50, %v2357_v4  ;;  %v10738_v4 = vld [vmem:[#allocation85_spill] sm:$0xff] }
 0x3ea   :  { %5040 = vmatmul.msk.f32.gmra.mxu3 %vm1715_vm15, %v10732_v31 }
 0x3eb   :  { %10731 = vst [vmem:[#allocation58_spill] sm:$0xff] %v8260_v36  ;;  %5006 = vmatmul.msk.f32.gmra.mxu2 %vm1715_vm15, %v10720_v37  ;;  %v10741_v36 = vld [vmem:[#allocation77_spill] sm:$0xff] }
 0x3ec   :  { %v2481_v30 = vpop.f32.mrf.mxu0 }
 0x3ed   :  { %v8267_v14 = vpop.f32.mrf.mxu3 }
 0x3ee   :  { %10733 = vst [vmem:[#allocation53_spill] sm:$0xff] %v8267_v14  ;;  %v8269_v29 = vpop.f32.mrf.mxu1  ;;  %v2359_v61 = vpop.f32.mrf.mxu2 }
 0x3ef   :  { %10734 = vst [vmem:[#allocation70_spill] sm:$0xff] %v8269_v29  ;;  %v2360_v13 = vadd.f32 %v2359_v61, %v10735_v9  ;;  %2884 = vmatmul.f32.gmra.mxu0 %v7855_v55  ;;  %v10742_v61 = vld [vmem:[#allocation71_spill] sm:$0xff] }
 0x3f1   :  { %2985 = vmatmul.f32.gmra.mxu1 %v10736_v15  ;;  %v8273_v50 = vadd.f32 %v2472_v18, %v2360_v13  ;;  %v10744_v13 = vld [vmem:[#allocation90_spill] sm:$0xff] }
 0x3f2   :  { %5041 = vmatmul.msk.f32.gmra.mxu3 %vm1715_vm15, %v10738_v4 }
 0x3f3   :  { %10737 = vst [vmem:[#allocation89_spill] sm:$0xff] %v8273_v50  ;;  %5007 = vmatmul.msk.f32.gmra.mxu2 %vm1715_vm15, %v10726_v2  ;;  %v10747_v50 = vld [vmem:[#allocation82_spill] sm:$0xff] }
 0x3f4   :  { %v2484_v14 = vpop.f32.mrf.mxu0 }
 0x3f5   :  { %v8280_v6 = vpop.f32.mrf.mxu3 }
 0x3f6   :  { %10739 = vst [vmem:[#allocation62_spill] sm:$0xff] %v8280_v6  ;;  %v8282_v37 = vpop.f32.mrf.mxu1  ;;  %v2362_v35 = vpop.f32.mrf.mxu2 }
 0x3f7   :  { %10740 = vst [vmem:[#allocation57_spill] sm:$0xff] %v8282_v37  ;;  %v2363_v9 = vadd.f32 %v2362_v35, %v10741_v36  ;;  %2887 = vmatmul.f32.gmra.mxu0 %v7879_v58  ;;  %v10748_v35 = vld [vmem:[#allocation76_spill] sm:$0xff] }
 0x3f8   :  { %v10774_v37 = vld [vmem:[#allocation104_spill] sm:$0xff] }
 0x3f9   :  { %2988 = vmatmul.f32.gmra.mxu1 %v10742_v61  ;;  %v8286_v18 = vadd.f32 %v2475_v25, %v2363_v9  ;;  %v10750_v9 = vld [vmem:[#allocation94_spill] sm:$0xff] }
 0x3fa   :  { %5042 = vmatmul.msk.f32.gmra.mxu3 %vm1715_vm15, %v10744_v13 }
 0x3fb   :  { %10743 = vst [vmem:[#allocation75_spill] sm:$0xff] %v8286_v18  ;;  %5008 = vmatmul.msk.f32.gmra.mxu2 %vm1715_vm15, %v10732_v31  ;;  %v10753_v18 = vld [vmem:[#allocation87_spill] sm:$0xff] }
 0x3fc   :  { %v2487_v6 = vpop.f32.mrf.mxu0 }
 0x3fd   :  { %v8293_v55 = vpop.f32.mrf.mxu3 }
 0x3fe   :  { %10745 = vst [vmem:[#allocation67_spill] sm:$0xff] %v8293_v55  ;;  %v8295_v2 = vpop.f32.mrf.mxu1  ;;  %v2365_v15 = vpop.f32.mrf.mxu2 }
 0x3ff   :  { %10746 = vst [vmem:[#allocation61_spill] sm:$0xff] %v8295_v2  ;;  %v2366_v36 = vadd.f32 %v2365_v15, %v10747_v50  ;;  %2890 = vmatmul.f32.gmra.mxu0 %v7899_v23  ;;  %v10754_v15 = vld [vmem:[#allocation81_spill] sm:$0xff] }
 0x401   :  { %2991 = vmatmul.f32.gmra.mxu1 %v10748_v35  ;;  %v8299_v25 = vadd.f32 %v2478_v27, %v2366_v36  ;;  %v10756_v36 = vld [vmem:[#allocation97_spill] sm:$0xff] }
 0x402   :  { %5043 = vmatmul.msk.f32.gmra.mxu3 %vm1715_vm15, %v10750_v9 }
 0x403   :  { %10749 = vst [vmem:[#allocation80_spill] sm:$0xff] %v8299_v25  ;;  %5009 = vmatmul.msk.f32.gmra.mxu2 %vm1715_vm15, %v10738_v4  ;;  %v10758_v25 = vld [vmem:[#allocation92_spill] sm:$0xff] }
 0x404   :  { %v2846_v55 = vpop.f32.mrf.mxu0 }
 0x405   :  { %v8306_v58 = vpop.f32.mrf.mxu3 }
 0x406   :  { %10751 = vst [vmem:[#allocation72_spill] sm:$0xff] %v8306_v58  ;;  %v8308_v31 = vpop.f32.mrf.mxu1  ;;  %v2368_v61 = vpop.f32.mrf.mxu2 }
 0x407   :  { %10752 = vst [vmem:[#allocation66_spill] sm:$0xff] %v8308_v31  ;;  %v2369_v50 = vadd.f32 %v2368_v61, %v10753_v18  ;;  %2893 = vmatmul.f32.gmra.mxu0 %v7916_v40  ;;  %v10759_v18 = vld [vmem:[#allocation86_spill] sm:$0xff] }
 0x409   :  { %2994 = vmatmul.f32.gmra.mxu1 %v10754_v15  ;;  %v8312_v27 = vadd.f32 %v2481_v30, %v2369_v50  ;;  %v10761_v30 = vld [vmem:[#allocation100_spill] sm:$0xff] }
 0x40a   :  { %5044 = vmatmul.msk.f32.gmra.mxu3 %vm1715_vm15, %v10756_v36 }
 0x40b   :  { %10755 = vst [vmem:[#allocation85_spill] sm:$0xff] %v8312_v27  ;;  %5010 = vmatmul.msk.f32.gmra.mxu2 %vm1715_vm15, %v10744_v13  ;;  %v10763_v27 = vld [vmem:[#allocation95_spill] sm:$0xff] }
 0x40c   :  { %v2849_v58 = vpop.f32.mrf.mxu0 }
 0x40d   :  { %v3072_v23 = vpop.f32.mrf.mxu3 }
 0x40e   :  { %v8319_v4 = vpop.f32.mrf.mxu1  ;;  %v2371_v35 = vpop.f32.mrf.mxu2 }
 0x40f   :  { %10757 = vst [vmem:[#allocation77_spill] sm:$0xff] %v8319_v4  ;;  %v2372_v31 = vadd.f32 %v2371_v35, %v10758_v25  ;;  %2896 = vmatmul.f32.gmra.mxu0 %v7933_v45  ;;  %v10764_v35 = vld [vmem:[#allocation91_spill] sm:$0xff] }
 0x411   :  { %2997 = vmatmul.f32.gmra.mxu1 %v10759_v18  ;;  %v8323_v61 = vadd.f32 %v2484_v14, %v2372_v31  ;;  %v5506_v31 = vld [vmem:[%s10218_s1 + $0x1c0] sm:$0xff] }
 0x412   :  { %5045 = vmatmul.msk.f32.gmra.mxu3 %vm1715_vm15, %v10761_v30 }
 0x413   :  { %10760 = vst [vmem:[#allocation71_spill] sm:$0xff] %v8323_v61  ;;  %5011 = vmatmul.msk.f32.gmra.mxu2 %vm1715_vm15, %v10750_v9 }
 0x414   :  { %v8332_v15 = vpop.f32.mrf.mxu0 }
 0x415   :  { %v3075_v40 = vpop.f32.mrf.mxu3 }
 0x416   :  { %v8330_v13 = vpop.f32.mrf.mxu1  ;;  %v2374_v50 = vpop.f32.mrf.mxu2 }
 0x417   :  { %10762 = vst [vmem:[#allocation90_spill] sm:$0xff] %v8330_v13  ;;  %v2375_v25 = vadd.f32 %v2374_v50, %v10763_v27  ;;  %2899 = vmatmul.f32.gmra.mxu0 %v7950_v62  ;;  %v10772_v13 = vld [vmem:[#allocation101_spill] sm:$0xff] }
 0x419   :  { %3000 = vmatmul.f32.gmra.mxu1 %v10764_v35  ;;  %v8336_v14 = vadd.f32 %v2487_v6, %v2375_v25  ;;  %v10767_v6 = vld [vmem:[#allocation98_spill] sm:$0xff]  ;;  %v5507_v35 = vld [vmem:[%s10218_s1 + $0x1d8] sm:$0xff] }
 0x41a   :  { %5046 = vmatmul.msk.f32.gmra.mxu3 %vm1715_vm15, %v5506_v31  ;;  %v2621_v50 = vadd.f32 %v10767_v6, %v7910_v42  ;;  %v10768_v25 = vld [vmem:[#allocation102_spill] sm:$0xff]  ;;  %v10770_v6 = vld [vmem:[#allocation11_spill] sm:$0xff] }
 0x41b   :  { %10765 = vst [vmem:[#allocation82_spill] sm:$0xff] %v8336_v14  ;;  %5012 = vmatmul.msk.f32.gmra.mxu2 %vm1715_vm15, %v10756_v36  ;;  %v3329_v36 = vmul.f32 %v7902_v26, %v7902_v26 }
 0x41c   :  { %v8349_v18 = vpop.f32.mrf.mxu0 }
 0x41d   :  { %v8345_v45 = vpop.f32.mrf.mxu3 }
 0x41e   :  { %v8347_v9 = vpop.f32.mrf.mxu1  ;;  %v2733_v27 = vpop.f32.mrf.mxu2 }
 0x41f   :  { %10766 = vst [vmem:[#allocation76_spill] sm:$0xff] %v8347_v9  ;;  %2902 = vmatmul.f32.gmra.mxu0 %v7967_v20  ;;  %v8359_v62 = vadd.f32 %v2733_v27, %v2621_v50  ;;  %v3168_v9 = vadd.f32 %v7902_v26, %v10770_v6  ;;  %v5508_v26 = vld [vmem:[%s10218_s1 + $0x1f0] sm:$0xff] }
 0x421   :  { %3003 = vmatmul.f32.gmra.mxu1 %v10768_v25  ;;  %10769 = vst [vmem:[#allocation94_spill] sm:$0xff] %v8359_v62  ;;  %v3328_v25 = vmul.f32 %v10770_v6, %v10770_v6  ;;  %v3330_v20 = vmul.f32 %v8359_v62, %v8359_v62  ;;  %v3169_v29 = vadd.f32 %v3168_v9, %v8359_v62  ;;  %v10787_v62 = vld [vmem:[#allocation10_spill] sm:$0xff] }
 0x422   :  { %5047 = vmatmul.msk.f32.gmra.mxu3 %vm1715_vm15, %v5507_v35 }
 0x423   :  { %5013 = vmatmul.msk.f32.gmra.mxu2 %vm1715_vm15, %v10761_v30  ;;  %v10771_v30 = vld [vmem:[#allocation108_spill] sm:$0xff]  ;;  %v3456_v19 = vadd.f32 %v3329_v36, %v3328_v25 }
 0x424   :  { %v8373_v61 = vpop.f32.mrf.mxu0  ;;  %v2624_v4 = vadd.f32 %v10772_v13, %v10771_v30  ;;  %v10777_v30 = vld [vmem:[#allocation13_spill] sm:$0xff] }
 0x425   :  { %v8365_v14 = vpop.f32.mrf.mxu3  ;;  %v3457_v13 = vadd.f32 %v3456_v19, %v3330_v20  ;;  %v10778_v20 = vld [vmem:[#allocation105_spill] sm:$0xff] }
 0x426   :  { %v2959_v42 = vpop.f32.mrf.mxu1  ;;  %v2736_v50 = vpop.f32.mrf.mxu2 }
 0x427   :  { %v2960_v27 = vadd.f32 %v2959_v42, %v2846_v55  ;;  %2905 = vmatmul.f32.gmra.mxu0 %v7984_v60  ;;  %v8386_v55 = vadd.f32 %v2736_v50, %v2624_v4  ;;  %v3332_v60 = vmul.f32 %v10777_v30, %v10777_v30 }
 0x429   :  { %v8377_v2 = vadd.f32 %v3072_v23, %v2960_v27  ;;  %3006 = vmatmul.f32.gmra.mxu1 %v10774_v37  ;;  %10775 = vst [vmem:[#allocation81_spill] sm:$0xff] %v8386_v55  ;;  %v10776_v37 = vld [vmem:[#allocation4_spill] sm:$0xff] }
 0x42a   :  { %5048 = vmatmul.msk.f32.gmra.mxu3 %vm1715_vm15, %v5508_v26  ;;  %v3333_v9 = vmul.f32 %v10776_v37, %v10776_v37 }
 0x42b   :  { %10773 = vst [vmem:[#allocation87_spill] sm:$0xff] %v8377_v2  ;;  %v3170_v42 = vadd.f32 %v3169_v29, %v8377_v2  ;;  %v3331_v23 = vmul.f32 %v8377_v2, %v8377_v2  ;;  %5014 = vmatmul.msk.f32.gmra.mxu2 %vm1715_vm15, %v5506_v31  ;;  %v3334_v29 = vmul.f32 %v8386_v55, %v8386_v55 }
 0x42c   :  { %v8400_v19 = vpop.f32.mrf.mxu0  ;;  %v3173_v31 = vadd.f32 %v10776_v37, %v10777_v30  ;;  %v3461_v6 = vadd.f32 %v3333_v9, %v3332_v60 }
 0x42d   :  { %3171 = vadd.xlane.f32.xlu1 %v3170_v42  ;;  %v3458_v36 = vadd.f32 %v3457_v13, %v3331_v23  ;;  %v8394_v25 = vpop.f32.mrf.mxu3  ;;  %v2627_v42 = vadd.f32 %v10778_v20, %v7944_v59  ;;  %v5509_v13 = vld [vmem:[%s10218_s1 + $0x1a0] sm:$0xff] }
 0x42e   :  { %v2962_v27 = vpop.f32.mrf.mxu1  ;;  %v2739_v50 = vpop.f32.mrf.mxu2 }
 0x42f   :  { %v2963_v4 = vadd.f32 %v2962_v27, %v2849_v58  ;;  %3459 = vadd.xlane.f32.xlu2 %v3458_v36  ;;  %v5510_v58 = vld [vmem:[%s10218_s1 + $0x208] sm:$0xff]  ;;  %2908 = vmatmul.f32.gmra.mxu0 %v8001_v52  ;;  %v8416_v36 = vadd.f32 %v2739_v50, %v2627_v42  ;;  %v3174_v27 = vadd.f32 %v3173_v31, %v8386_v55  ;;  %v10782_v52 = vld [vmem:[#allocation15_spill] sm:$0xff] }
 0x430   :  { %v3336_v50 = vmul.f32 %v10782_v52, %v10782_v52 }
 0x431   :  { %v8406_v23 = vadd.f32 %v3075_v40, %v2963_v4  ;;  %3009 = vmatmul.f32.gmra.mxu1 %v5509_v13  ;;  %10780 = vst [vmem:[#allocation92_spill] sm:$0xff] %v8416_v36  ;;  %v3462_v40 = vadd.f32 %v3461_v6, %v3334_v29  ;;  %v10781_v4 = vld [vmem:[#allocation9_spill] sm:$0xff]  ;;  %v3338_v42 = vmul.f32 %v8416_v36, %v8416_v36 }
 0x432   :  { %5049 = vmatmul.msk.f32.gmra.mxu3 %vm1715_vm15, %v5510_v58  ;;  %v3337_v9 = vmul.f32 %v10781_v4, %v10781_v4  ;;  %v3178_v31 = vadd.f32 %v10781_v4, %v10782_v52 }
 0x433   :  { %10779 = vst [vmem:[#allocation97_spill] sm:$0xff] %v8406_v23  ;;  %v3335_v59 = vmul.f32 %v8406_v23, %v8406_v23  ;;  %5015 = vmatmul.msk.f32.gmra.mxu2 %vm1715_vm15, %v5507_v35  ;;  %v3175_v20 = vadd.f32 %v3174_v27, %v8406_v23 }
 0x434   :  { %v8432_v29 = vpop.f32.mrf.mxu0  ;;  %v3466_v27 = vadd.f32 %v3337_v9, %v3336_v50 }
 0x435   :  { %v3463_v60 = vadd.f32 %v3462_v40, %v3335_v59  ;;  %v8425_v13 = vpop.f32.mrf.mxu3  ;;  %v5511_v40 = vld [vmem:[%s10218_s1 + $0x1b8] sm:$0xff] }
 0x436   :  { %v2965_v2 = vpop.f32.mrf.mxu1  ;;  %v2742_v35 = vpop.f32.mrf.mxu2 }
 0x437   :  { %v2966_v6 = vadd.f32 %v2965_v2, %v8332_v15  ;;  %3464 = vadd.xlane.f32.xlu0 %v3463_v60  ;;  %3176 = vadd.xlane.f32.xlu2 %v3175_v20  ;;  %v5512_v2 = vld [vmem:[%s10218_s1 + $0x220] sm:$0xff]  ;;  %v10784_v15 = vld [vmem:[#allocation18_spill] sm:$0xff] }
 0x438   :  { %2911 = vmatmul.f32.gmra.mxu0 %v8018_v38  ;;  %v2630_v60 = vadd.f32 %v10784_v15, %v7961_v34  ;;  %v10786_v38 = vld [vmem:[#allocation19_spill] sm:$0xff] }
 0x439   :  { %v8437_v59 = vadd.f32 %v8345_v45, %v2966_v6  ;;  %3012 = vmatmul.f32.gmra.mxu1 %v5511_v40  ;;  %v3179_v45 = vadd.f32 %v3178_v31, %v8416_v36  ;;  %v3467_v6 = vadd.f32 %v3466_v27, %v3338_v42  ;;  %v3183_v23 = vadd.f32 %v10787_v62, %v10786_v38  ;;  %v5513_v27 = vld [vmem:[%s10218_s1 + $0x1d0] sm:$0xff] }
 0x43a   :  { %5050 = vmatmul.msk.f32.gmra.mxu3 %vm1715_vm15, %v5512_v2  ;;  %v8453_v9 = vadd.f32 %v2742_v35, %v2630_v60 }
 0x43b   :  { %10783 = vst [vmem:[#allocation86_spill] sm:$0xff] %v8437_v59  ;;  %v3339_v20 = vmul.f32 %v8437_v59, %v8437_v59  ;;  %5016 = vmatmul.msk.f32.gmra.mxu2 %vm1715_vm15, %v5508_v26  ;;  %v3180_v50 = vadd.f32 %v3179_v45, %v8437_v59  ;;  %v10788_v26 = vld [vmem:[#allocation16_spill] sm:$0xff] }
 0x43c   :  { %10785 = vst [vmem:[#allocation100_spill] sm:$0xff] %v8453_v9  ;;  %v8461_v15 = vpop.f32.mrf.mxu0  ;;  %v2633_v42 = vadd.f32 %v10788_v26, %v7978_v51  ;;  %v3184_v60 = vadd.f32 %v3183_v23, %v8453_v9  ;;  %v3341_v51 = vmul.f32 %v10787_v62, %v10787_v62  ;;  %v10793_v59 = vld [vmem:[#allocation20_spill] sm:$0xff] }
 0x43d   :  { %v3468_v40 = vadd.f32 %v3467_v6, %v3339_v20  ;;  %v8456_v4 = vpop.f32.mrf.mxu3  ;;  %v3340_v20 = vmul.f32 %v10786_v38, %v10786_v38  ;;  %v3342_v6 = vmul.f32 %v8453_v9, %v8453_v9  ;;  %v2636_v62 = vadd.f32 %v10793_v59, %v7995_v1 }
 0x43e   :  { %v2968_v52 = vpop.f32.mrf.mxu1  ;;  %v2745_v31 = vpop.f32.mrf.mxu2 }
 0x43f   :  { %v2969_v34 = vadd.f32 %v2968_v52, %v8349_v18  ;;  %3181 = vadd.xlane.f32.xlu0 %v3180_v50  ;;  %3469 = vadd.xlane.f32.xlu1 %v3468_v40  ;;  %v8472_v45 = vadd.f32 %v2745_v31, %v2633_v42  ;;  %v8477_v18 = vld [vmem:[%s10218_s1 + $0x238] sm:$0xff]  ;;  %v10791_v52 = vld [vmem:[#allocation12_spill] sm:$0xff] }
 0x440   :  { %2914 = vmatmul.f32.gmra.mxu0 %v8035_v5  ;;  %v3345_v23 = vmul.f32 %v10791_v52, %v10791_v52  ;;  %v10792_v5 = vld [vmem:[#allocation22_spill] sm:$0xff] }
 0x441   :  { %v8466_v35 = vadd.f32 %v8365_v14, %v2969_v34  ;;  %3015 = vmatmul.f32.gmra.mxu1 %v5513_v27  ;;  %10790 = vst [vmem:[#allocation91_spill] sm:$0xff] %v8472_v45  ;;  %v3344_v40 = vmul.f32 %v10792_v5, %v10792_v5  ;;  %v3346_v34 = vmul.f32 %v8472_v45, %v8472_v45 }
 0x442   :  { %5051 = vmatmul.msk.f32.gmra.mxu3 %vm1715_vm15, %v8477_v18  ;;  %v3188_v26 = vadd.f32 %v10791_v52, %v10792_v5  ;;  %v5515_v52 = vld [vmem:[%s10218_s1 + $0x1e8] sm:$0xff] }
 0x443   :  { %10789 = vst [vmem:[#allocation95_spill] sm:$0xff] %v8466_v35  ;;  %v3185_v14 = vadd.f32 %v3184_v60, %v8466_v35  ;;  %5017 = vmatmul.msk.f32.gmra.mxu2 %vm1715_vm15, %v5510_v58  ;;  %v3343_v27 = vmul.f32 %v8466_v35, %v8466_v35  ;;  %v3471_v60 = vadd.f32 %v3341_v51, %v3340_v20  ;;  %v5516_v51 = vld [vmem:[%s10218_s1 + $0x250] sm:$0xff]  ;;  %v10820_v35 = vld [vmem:[#allocation35_spill] sm:$0xff] }
 0x444   :  { %v3476_v9 = vadd.f32 %v3345_v23, %v3344_v40  ;;  %v10796_v23 = vld [vmem:[#allocation14_spill] sm:$0xff] }
 0x445   :  { %3186 = vadd.xlane.f32.xlu2 %v3185_v14  ;;  %v8492_v50 = vpop.f32.mrf.mxu3  ;;  %v8503_v14 = vpop.f32.mrf.mxu0 }
 0x446   :  { %v2971_v31 = vpop.f32.mrf.mxu1  ;;  %v2748_v42 = vpop.f32.mrf.mxu2  ;;  %v3477_v5 = vadd.f32 %v3476_v9, %v3346_v34  ;;  %v3349_v9 = vmul.f32 %v10796_v23, %v10796_v23 }
 0x447   :  { %v2972_v58 = vadd.f32 %v2971_v31, %v8373_v61  ;;  %v3472_v61 = vadd.f32 %v3471_v60, %v3342_v6  ;;  %v3189_v31 = vadd.f32 %v3188_v26, %v8472_v45  ;;  %v8519_v1 = vadd.f32 %v2748_v42, %v2636_v62 }
 0x448   :  { %2917 = vmatmul.f32.gmra.mxu0 %v8052_v48  ;;  %v10797_v48 = vld [vmem:[#allocation25_spill] sm:$0xff] }
 0x449   :  { %v8508_v38 = vadd.f32 %v8394_v25, %v2972_v58  ;;  %3018 = vmatmul.f32.gmra.mxu1 %v5515_v52  ;;  %10795 = vst [vmem:[#allocation102_spill] sm:$0xff] %v8519_v1  ;;  %v3473_v25 = vadd.f32 %v3472_v61, %v3343_v27  ;;  %v3348_v62 = vmul.f32 %v10797_v48, %v10797_v48  ;;  %v10798_v27 = vld [vmem:[#allocation113_spill] sm:$0xff] }
 0x44a   :  { %5052 = vmatmul.msk.f32.gmra.mxu3 %vm1715_vm15, %v5516_v51  ;;  %v3193_v34 = vadd.f32 %v10796_v23, %v10797_v48  ;;  %v3350_v26 = vmul.f32 %v8519_v1, %v8519_v1  ;;  %v5529_v23 = vld [vmem:[%s10218_s1 + $0x260] sm:$0xff] }
 0x44b   :  { %10794 = vst [vmem:[#allocation98_spill] sm:$0xff] %v8508_v38  ;;  %v3190_v59 = vadd.f32 %v3189_v31, %v8508_v38  ;;  %v3347_v52 = vmul.f32 %v8508_v38, %v8508_v38  ;;  %5018 = vmatmul.msk.f32.gmra.mxu2 %vm1715_vm15, %v5512_v2  ;;  %v5517_v31 = vld [vmem:[%s10218_s1 + $0x200] sm:$0xff]  ;;  %v5520_v38 = vld [vmem:[%s10218_s1 + $0x218] sm:$0xff] }
 0x44d   :  { %3474 = vadd.xlane.f32.xlu2 %v3473_v25  ;;  %3191 = vadd.xlane.f32.xlu1 %v3190_v59  ;;  %v3478_v20 = vadd.f32 %v3477_v5, %v3347_v52  ;;  %v8527_v6 = vpop.f32.mrf.mxu3  ;;  %v8536_v42 = vpop.f32.mrf.mxu0  ;;  %v10799_v5 = vld [vmem:[#allocation109_spill] sm:$0xff]  ;;  %v3194_v25 = vadd.f32 %v3193_v34, %v8519_v1  ;;  %v3481_v59 = vadd.f32 %v3349_v9, %v3348_v62  ;;  %v5519_v52 = vld [vmem:[%s10218_s1 + $0x258] sm:$0xff] }
 0x44e   :  { %v2974_v40 = vpop.f32.mrf.mxu1  ;;  %v2751_v58 = vpop.f32.mrf.mxu2  ;;  %v2639_v60 = vadd.f32 %v10799_v5, %v10798_v27  ;;  %v10802_v9 = vld [vmem:[#allocation17_spill] sm:$0xff] }
 0x44f   :  { %v2975_v2 = vadd.f32 %v2974_v40, %v8400_v19  ;;  %3479 = vadd.xlane.f32.xlu0 %v3478_v20  ;;  %v5518_v19 = vld [vmem:[%s10218_s1 + $0x268] sm:$0xff]  ;;  %v3482_v34 = vadd.f32 %v3481_v59, %v3350_v26  ;;  %v3353_v62 = vmul.f32 %v10802_v9, %v10802_v9 }
 0x450   :  { %2920 = vmatmul.f32.gmra.mxu0 %v5519_v52  ;;  %v10804_v52 = vld [vmem:[#allocation114_spill] sm:$0xff] }
 0x451   :  { %v8541_v61 = vadd.f32 %v8425_v13, %v2975_v2  ;;  %3021 = vmatmul.f32.gmra.mxu1 %v5517_v31  ;;  %v8554_v13 = vadd.f32 %v2751_v58, %v2639_v60  ;;  %v10803_v31 = vld [vmem:[#allocation28_spill] sm:$0xff] }
 0x452   :  { %5053 = vmatmul.msk.f32.gmra.mxu3 %vm1715_vm15, %v5518_v19  ;;  %v3352_v58 = vmul.f32 %v10803_v31, %v10803_v31  ;;  %v3198_v60 = vadd.f32 %v10802_v9, %v10803_v31  ;;  %v10809_v31 = vld [vmem:[#allocation6_spill] sm:$0xff] }
 0x453   :  { %10800 = vst [vmem:[#allocation108_spill] sm:$0xff] %v8541_v61  ;;  %v3195_v20 = vadd.f32 %v3194_v25, %v8541_v61  ;;  %v3351_v40 = vmul.f32 %v8541_v61, %v8541_v61  ;;  %5019 = vmatmul.msk.f32.gmra.mxu2 %vm1715_vm15, %v8477_v18  ;;  %v3354_v26 = vmul.f32 %v8554_v13, %v8554_v13  ;;  %v5532_v61 = vld [vmem:[%s10218_s1 + $0x278] sm:$0xff] }
 0x454   :  { %10801 = vst [vmem:[#allocation101_spill] sm:$0xff] %v8554_v13  ;;  %v3199_v45 = vadd.f32 %v3198_v60, %v8554_v13  ;;  %v3486_v9 = vadd.f32 %v3353_v62, %v3352_v58  ;;  %v10808_v62 = vld [vmem:[#allocation21_spill] sm:$0xff] }
 0x455   :  { %3196 = vadd.xlane.f32.xlu2 %v3195_v20  ;;  %v3483_v2 = vadd.f32 %v3482_v34, %v3351_v40  ;;  %v8563_v27 = vpop.f32.mrf.mxu3  ;;  %v8572_v59 = vpop.f32.mrf.mxu0  ;;  %v10805_v20 = vld [vmem:[#allocation110_spill] sm:$0xff]  ;;  %v3357_v58 = vmul.f32 %v10808_v62, %v10808_v62 }
 0x456   :  { %v2977_v5 = vpop.f32.mrf.mxu1  ;;  %v2754_v18 = vpop.f32.mrf.mxu2  ;;  %v2642_v40 = vadd.f32 %v10805_v20, %v10804_v52  ;;  %v3487_v60 = vadd.f32 %v3486_v9, %v3354_v26 }
 0x457   :  { %v2978_v25 = vadd.f32 %v2977_v5, %v8432_v29  ;;  %3484 = vadd.xlane.f32.xlu1 %v3483_v2  ;;  %v5521_v29 = vld [vmem:[%s10218_s1 + $0x280] sm:$0xff]  ;;  %v5522_v2 = vld [vmem:[%s10218_s1 + $0x270] sm:$0xff] }
 0x458   :  { %2923 = vmatmul.f32.gmra.mxu0 %v5522_v2  ;;  %v10810_v2 = vld [vmem:[#allocation116_spill] sm:$0xff] }
 0x459   :  { %v8577_v34 = vadd.f32 %v8456_v4, %v2978_v25  ;;  %3024 = vmatmul.f32.gmra.mxu1 %v5520_v38  ;;  %v8590_v4 = vadd.f32 %v2754_v18, %v2642_v40  ;;  %v3356_v18 = vmul.f32 %v10809_v31, %v10809_v31 }
 0x45a   :  { %5054 = vmatmul.msk.f32.gmra.mxu3 %vm1715_vm15, %v5521_v29 }
 0x45b   :  { %10806 = vst [vmem:[#allocation104_spill] sm:$0xff] %v8577_v34  ;;  %v3200_v5 = vadd.f32 %v3199_v45, %v8577_v34  ;;  %v3355_v38 = vmul.f32 %v8577_v34, %v8577_v34  ;;  %5020 = vmatmul.msk.f32.gmra.mxu2 %vm1715_vm15, %v5516_v51  ;;  %v3203_v45 = vadd.f32 %v10808_v62, %v10809_v31  ;;  %v5523_v34 = vld [vmem:[%s10218_s1 + $0x230] sm:$0xff] }
 0x45c   :  { %10807 = vst [vmem:[#allocation4_spill] sm:$0xff] %v8590_v4  ;;  %v3358_v40 = vmul.f32 %v8590_v4, %v8590_v4  ;;  %v3491_v31 = vadd.f32 %v3357_v58, %v3356_v18  ;;  %v10814_v58 = vld [vmem:[#allocation23_spill] sm:$0xff] }
 0x45d   :  { %3201 = vadd.xlane.f32.xlu0 %v3200_v5  ;;  %v3488_v25 = vadd.f32 %v3487_v60, %v3355_v38  ;;  %v8598_v52 = vpop.f32.mrf.mxu3  ;;  %v8607_v26 = vpop.f32.mrf.mxu0  ;;  %v10811_v5 = vld [vmem:[#allocation111_spill] sm:$0xff]  ;;  %v3204_v62 = vadd.f32 %v3203_v45, %v8590_v4  ;;  %v3361_v18 = vmul.f32 %v10814_v58, %v10814_v58 }
 0x45e   :  { %v2980_v20 = vpop.f32.mrf.mxu1  ;;  %v2757_v51 = vpop.f32.mrf.mxu2  ;;  %v2645_v38 = vadd.f32 %v10811_v5, %v10810_v2  ;;  %v3492_v45 = vadd.f32 %v3491_v31, %v3358_v40  ;;  %v10815_v4 = vld [vmem:[#allocation31_spill] sm:$0xff] }
 0x45f   :  { %v2981_v9 = vadd.f32 %v2980_v20, %v8461_v15  ;;  %3489 = vadd.xlane.f32.xlu2 %v3488_v25  ;;  %v5524_v15 = vld [vmem:[%s10218_s1 + $0x298] sm:$0xff]  ;;  %v5525_v25 = vld [vmem:[%s10218_s1 + $0x288] sm:$0xff] }
 0x460   :  { %2926 = vmatmul.f32.gmra.mxu0 %v5525_v25  ;;  %v10816_v25 = vld [vmem:[#allocation112_spill] sm:$0xff] }
 0x461   :  { %v8612_v60 = vadd.f32 %v8492_v50, %v2981_v9  ;;  %3027 = vmatmul.f32.gmra.mxu1 %v5523_v34  ;;  %v8625_v50 = vadd.f32 %v2757_v51, %v2645_v38  ;;  %v3360_v51 = vmul.f32 %v10815_v4, %v10815_v4 }
 0x462   :  { %5055 = vmatmul.msk.f32.gmra.mxu3 %vm1715_vm15, %v5524_v15 }
 0x463   :  { %10812 = vst [vmem:[#allocation13_spill] sm:$0xff] %v8612_v60  ;;  %v3205_v20 = vadd.f32 %v3204_v62, %v8612_v60  ;;  %v3359_v34 = vmul.f32 %v8612_v60, %v8612_v60  ;;  %5021 = vmatmul.msk.f32.gmra.mxu2 %vm1715_vm15, %v5518_v19  ;;  %v3208_v62 = vadd.f32 %v10814_v58, %v10815_v4  ;;  %v5526_v60 = vld [vmem:[%s10218_s1 + $0x248] sm:$0xff] }
 0x464   :  { %10813 = vst [vmem:[#allocation105_spill] sm:$0xff] %v8625_v50  ;;  %v3362_v38 = vmul.f32 %v8625_v50, %v8625_v50  ;;  %v3496_v13 = vadd.f32 %v3361_v18, %v3360_v51  ;;  %v10819_v18 = vld [vmem:[#allocation26_spill] sm:$0xff] }
 0x465   :  { %3206 = vadd.xlane.f32.xlu1 %v3205_v20  ;;  %v3493_v9 = vadd.f32 %v3492_v45, %v3359_v34  ;;  %v8633_v2 = vpop.f32.mrf.mxu3  ;;  %v8642_v40 = vpop.f32.mrf.mxu0  ;;  %v2648_v20 = vadd.f32 %v10816_v25, %v8063_v47  ;;  %v3209_v34 = vadd.f32 %v3208_v62, %v8625_v50  ;;  %v5528_v47 = vld [vmem:[%s10218_s1 + $0x2a0] sm:$0xff]  ;;  %v3365_v51 = vmul.f32 %v10819_v18, %v10819_v18 }
 0x466   :  { %v2983_v5 = vpop.f32.mrf.mxu1  ;;  %v2760_v19 = vpop.f32.mrf.mxu2 }
 0x467   :  { %v2984_v31 = vadd.f32 %v2983_v5, %v8503_v14  ;;  %3494 = vadd.xlane.f32.xlu0 %v3493_v9  ;;  %v5527_v14 = vld [vmem:[%s10218_s1 + $0x2b0] sm:$0xff]  ;;  %v8660_v9 = vadd.f32 %v2760_v19, %v2648_v20  ;;  %v3364_v19 = vmul.f32 %v10820_v35, %v10820_v35  ;;  %v3213_v20 = vadd.f32 %v10819_v18, %v10820_v35 }
 0x468   :  { %2929 = vmatmul.f32.gmra.mxu0 %v5528_v47  ;;  %v10821_v47 = vld [vmem:[#allocation32_spill] sm:$0xff] }
 0x469   :  { %v8648_v45 = vadd.f32 %v8527_v6, %v2984_v31  ;;  %3030 = vmatmul.f32.gmra.mxu1 %v5526_v60  ;;  %10818 = vst [vmem:[#allocation16_spill] sm:$0xff] %v8660_v9  ;;  %v3497_v60 = vadd.f32 %v3496_v13, %v3362_v38  ;;  %v3501_v48 = vadd.f32 %v3365_v51, %v3364_v19 }
 0x46a   :  { %5056 = vmatmul.msk.f32.gmra.mxu3 %vm1715_vm15, %v5527_v14  ;;  %v3369_v51 = vmul.f32 %v8067_v33, %v8067_v33 }
 0x46b   :  { %10817 = vst [vmem:[#allocation18_spill] sm:$0xff] %v8648_v45  ;;  %v3363_v6 = vmul.f32 %v8648_v45, %v8648_v45  ;;  %v3210_v5 = vadd.f32 %v3209_v34, %v8648_v45  ;;  %5022 = vmatmul.msk.f32.gmra.mxu2 %vm1715_vm15, %v5521_v29  ;;  %v3366_v34 = vmul.f32 %v8660_v9, %v8660_v9 }
 0x46d   :  { %3211 = vadd.xlane.f32.xlu2 %v3210_v5  ;;  %v3498_v62 = vadd.f32 %v3497_v60, %v3363_v6  ;;  %v8668_v31 = vpop.f32.mrf.mxu3  ;;  %v8677_v38 = vpop.f32.mrf.mxu0  ;;  %v2651_v6 = vadd.f32 %v10821_v47, %v8075_v11  ;;  %v3214_v5 = vadd.f32 %v3213_v20, %v8660_v9  ;;  %v5531_v11 = vld [vmem:[%s10218_s1 + $0x2b8] sm:$0xff]  ;;  %v10824_v47 = vld [vmem:[#allocation37_spill] sm:$0xff] }
 0x46e   :  { %v2986_v25 = vpop.f32.mrf.mxu1  ;;  %v2763_v29 = vpop.f32.mrf.mxu2 }
 0x46f   :  { %v2987_v13 = vadd.f32 %v2986_v25, %v8536_v42  ;;  %3499 = vadd.xlane.f32.xlu1 %v3498_v62  ;;  %v5530_v42 = vld [vmem:[%s10218_s1 + $0x2c8] sm:$0xff]  ;;  %v8695_v62 = vadd.f32 %v2763_v29, %v2651_v6  ;;  %v3368_v29 = vmul.f32 %v10824_v47, %v10824_v47  ;;  %v3218_v6 = vadd.f32 %v8067_v33, %v10824_v47 }
 0x470   :  { %2932 = vmatmul.f32.gmra.mxu0 %v5531_v11  ;;  %v10825_v11 = vld [vmem:[#allocation115_spill] sm:$0xff] }
 0x471   :  { %v8683_v60 = vadd.f32 %v8563_v27, %v2987_v13  ;;  %3033 = vmatmul.f32.gmra.mxu1 %v5529_v23  ;;  %10823 = vst [vmem:[#allocation113_spill] sm:$0xff] %v8695_v62  ;;  %v3502_v23 = vadd.f32 %v3501_v48, %v3366_v34  ;;  %v3506_v1 = vadd.f32 %v3369_v51, %v3368_v29 }
 0x472   :  { %5057 = vmatmul.msk.f32.gmra.mxu3 %vm1715_vm15, %v5530_v42  ;;  %v3373_v51 = vmul.f32 %v8079_v56, %v8079_v56 }
 0x473   :  { %10822 = vst [vmem:[#allocation20_spill] sm:$0xff] %v8683_v60  ;;  %v3367_v27 = vmul.f32 %v8683_v60, %v8683_v60  ;;  %v3215_v25 = vadd.f32 %v3214_v5, %v8683_v60  ;;  %5023 = vmatmul.msk.f32.gmra.mxu2 %vm1715_vm15, %v5524_v15  ;;  %v3370_v5 = vmul.f32 %v8695_v62, %v8695_v62 }
 0x475   :  { %3216 = vadd.xlane.f32.xlu0 %v3215_v25  ;;  %v3503_v19 = vadd.f32 %v3502_v23, %v3367_v27  ;;  %v8703_v20 = vpop.f32.mrf.mxu3  ;;  %v8712_v34 = vpop.f32.mrf.mxu0  ;;  %v2654_v27 = vadd.f32 %v10825_v11, %v8087_v0  ;;  %v3219_v25 = vadd.f32 %v3218_v6, %v8695_v62  ;;  %v5534_v0 = vld [vmem:[%s10218_s1 + $0x2d0] sm:$0xff]  ;;  %v10828_v11 = vld [vmem:[#allocation8_spill] sm:$0xff] }
 0x476   :  { %v2989_v13 = vpop.f32.mrf.mxu1  ;;  %v2766_v15 = vpop.f32.mrf.mxu2 }
 0x477   :  { %v2990_v48 = vadd.f32 %v2989_v13, %v8572_v59  ;;  %3504 = vadd.xlane.f32.xlu2 %v3503_v19  ;;  %v5533_v59 = vld [vmem:[%s10218_s1 + $0x2e0] sm:$0xff]  ;;  %v8730_v19 = vadd.f32 %v2766_v15, %v2654_v27  ;;  %v3372_v15 = vmul.f32 %v10828_v11, %v10828_v11  ;;  %v3223_v27 = vadd.f32 %v8079_v56, %v10828_v11 }
 0x478   :  { %2935 = vmatmul.f32.gmra.mxu0 %v5534_v0  ;;  %v10829_v0 = vld [vmem:[#allocation117_spill] sm:$0xff] }
 0x479   :  { %v8718_v23 = vadd.f32 %v8598_v52, %v2990_v48  ;;  %3036 = vmatmul.f32.gmra.mxu1 %v5532_v61  ;;  %10827 = vst [vmem:[#allocation114_spill] sm:$0xff] %v8730_v19  ;;  %v3507_v61 = vadd.f32 %v3506_v1, %v3370_v5  ;;  %v3511_v62 = vadd.f32 %v3373_v51, %v3372_v15 }
 0x47a   :  { %5058 = vmatmul.msk.f32.gmra.mxu3 %vm1715_vm15, %v5533_v59  ;;  %v3377_v51 = vmul.f32 %v8091_v16, %v8091_v16 }
 0x47b   :  { %10826 = vst [vmem:[#allocation109_spill] sm:$0xff] %v8718_v23  ;;  %v3371_v52 = vmul.f32 %v8718_v23, %v8718_v23  ;;  %v3220_v13 = vadd.f32 %v3219_v25, %v8718_v23  ;;  %5024 = vmatmul.msk.f32.gmra.mxu2 %vm1715_vm15, %v5527_v14  ;;  %v3374_v25 = vmul.f32 %v8730_v19, %v8730_v19  ;;  %v5535_v23 = vld [vmem:[%s10218_s1 + $0x290] sm:$0xff] }
 0x47d   :  { %3221 = vadd.xlane.f32.xlu1 %v3220_v13  ;;  %v3508_v29 = vadd.f32 %v3507_v61, %v3371_v52  ;;  %v8738_v6 = vpop.f32.mrf.mxu3  ;;  %v8747_v5 = vpop.f32.mrf.mxu0  ;;  %v2657_v52 = vadd.f32 %v10829_v0, %v8099_v54  ;;  %v3224_v13 = vadd.f32 %v3223_v27, %v8730_v19  ;;  %v5537_v54 = vld [vmem:[%s10218_s1 + $0x2e8] sm:$0xff]  ;;  %v10832_v0 = vld [vmem:[#allocation38_spill] sm:$0xff] }
 0x47e   :  { %v2992_v48 = vpop.f32.mrf.mxu1  ;;  %v2769_v14 = vpop.f32.mrf.mxu2 }
 0x47f   :  { %v2993_v1 = vadd.f32 %v2992_v48, %v8607_v26  ;;  %3509 = vadd.xlane.f32.xlu0 %v3508_v29  ;;  %v5536_v26 = vld [vmem:[%s10218_s1 + $0x2f8] sm:$0xff]  ;;  %v8765_v29 = vadd.f32 %v2769_v14, %v2657_v52  ;;  %v3376_v14 = vmul.f32 %v10832_v0, %v10832_v0  ;;  %v3228_v52 = vadd.f32 %v8091_v16, %v10832_v0 }
 0x480   :  { %2938 = vmatmul.f32.gmra.mxu0 %v5537_v54  ;;  %v10833_v54 = vld [vmem:[#allocation24_spill] sm:$0xff] }
 0x481   :  { %v8753_v61 = vadd.f32 %v8633_v2, %v2993_v1  ;;  %3039 = vmatmul.f32.gmra.mxu1 %v5535_v23  ;;  %10831 = vst [vmem:[#allocation116_spill] sm:$0xff] %v8765_v29  ;;  %v3512_v23 = vadd.f32 %v3511_v62, %v3374_v25  ;;  %v3516_v19 = vadd.f32 %v3377_v51, %v3376_v14 }
 0x482   :  { %5059 = vmatmul.msk.f32.gmra.mxu3 %vm1715_vm15, %v5536_v26 }
 0x483   :  { %10830 = vst [vmem:[#allocation110_spill] sm:$0xff] %v8753_v61  ;;  %v3375_v2 = vmul.f32 %v8753_v61, %v8753_v61  ;;  %v3225_v48 = vadd.f32 %v3224_v13, %v8753_v61  ;;  %5025 = vmatmul.msk.f32.gmra.mxu2 %vm1715_vm15, %v5530_v42  ;;  %v3378_v13 = vmul.f32 %v8765_v29, %v8765_v29  ;;  %v5538_v61 = vld [vmem:[%s10218_s1 + $0x2a8] sm:$0xff] }
 0x485   :  { %3226 = vadd.xlane.f32.xlu2 %v3225_v48  ;;  %v3513_v15 = vadd.f32 %v3512_v23, %v3375_v2  ;;  %v8773_v27 = vpop.f32.mrf.mxu3  ;;  %v8782_v25 = vpop.f32.mrf.mxu0  ;;  %v2660_v2 = vadd.f32 %v10833_v54, %v8111_v57  ;;  %v3229_v48 = vadd.f32 %v3228_v52, %v8765_v29  ;;  %v3381_v57 = vmul.f32 %v8103_v10, %v8103_v10  ;;  %v10837_v54 = vld [vmem:[#allocation27_spill] sm:$0xff] }
 0x486   :  { %v2995_v1 = vpop.f32.mrf.mxu1  ;;  %v2772_v42 = vpop.f32.mrf.mxu2 }
 0x487   :  { %v2996_v62 = vadd.f32 %v2995_v1, %v8642_v40  ;;  %3514 = vadd.xlane.f32.xlu1 %v3513_v15  ;;  %v8793_v16 = vadd.f32 %v2772_v42, %v2660_v2  ;;  %v3517_v1 = vadd.f32 %v3516_v19, %v3378_v13  ;;  %v2663_v2 = vadd.f32 %v10837_v54, %v8123_v41  ;;  %v10840_v54 = vld [vmem:[#allocation40_spill] sm:$0xff] }
 0x488   :  { %v3385_v41 = vmul.f32 %v8115_v39, %v8115_v39 }
 0x489   :  { %v8788_v23 = vadd.f32 %v8668_v31, %v2996_v62  ;;  %3042 = vmatmul.f32.gmra.mxu1 %v5538_v61  ;;  %10835 = vst [vmem:[#allocation112_spill] sm:$0xff] %v8793_v16  ;;  %v10836_v61 = vld [vmem:[#allocation39_spill] sm:$0xff]  ;;  %v3382_v42 = vmul.f32 %v8793_v16, %v8793_v16 }
 0x48a   :  { %v3380_v51 = vmul.f32 %v10836_v61, %v10836_v61  ;;  %v3233_v14 = vadd.f32 %v8103_v10, %v10836_v61 }
 0x48b   :  { %10834 = vst [vmem:[#allocation111_spill] sm:$0xff] %v8788_v23  ;;  %v3379_v40 = vmul.f32 %v8788_v23, %v8788_v23  ;;  %v3230_v15 = vadd.f32 %v3229_v48, %v8788_v23  ;;  %5026 = vmatmul.msk.f32.gmra.mxu2 %vm1715_vm15, %v5533_v59 }
 0x48c   :  { %v3234_v48 = vadd.f32 %v3233_v14, %v8793_v16 }
 0x48d   :  { %3231 = vadd.xlane.f32.xlu0 %v3230_v15  ;;  %v3518_v31 = vadd.f32 %v3517_v1, %v3379_v40  ;;  %v8801_v52 = vpop.f32.mrf.mxu3  ;;  %v8810_v13 = vpop.f32.mrf.mxu0  ;;  %v5539_v15 = vld [vmem:[%s10218_s1 + $0x2c0] sm:$0xff]  ;;  %v3521_v1 = vadd.f32 %v3381_v57, %v3380_v51  ;;  %v3384_v57 = vmul.f32 %v10840_v54, %v10840_v54  ;;  %v3238_v51 = vadd.f32 %v8115_v39, %v10840_v54 }
 0x48e   :  { %v2998_v62 = vpop.f32.mrf.mxu1  ;;  %v2775_v59 = vpop.f32.mrf.mxu2 }
 0x48f   :  { %v2999_v19 = vadd.f32 %v2998_v62, %v8677_v38  ;;  %3519 = vadd.xlane.f32.xlu2 %v3518_v31  ;;  %v8821_v23 = vadd.f32 %v2775_v59, %v2663_v2  ;;  %v3522_v62 = vadd.f32 %v3521_v1, %v3382_v42  ;;  %v2666_v2 = vadd.f32 %v8097_v17, %v8136_v8  ;;  %v5540_v1 = vld [vmem:[%s10218_s1 + $0x2d8] sm:$0xff] }
 0x491   :  { %v8816_v40 = vadd.f32 %v8703_v20, %v2999_v19  ;;  %3045 = vmatmul.f32.gmra.mxu1 %v5539_v15  ;;  %10839 = vst [vmem:[#allocation115_spill] sm:$0xff] %v8821_v23  ;;  %v3386_v59 = vmul.f32 %v8821_v23, %v8821_v23 }
 0x493   :  { %10838 = vst [vmem:[#allocation32_spill] sm:$0xff] %v8816_v40  ;;  %v3383_v38 = vmul.f32 %v8816_v40, %v8816_v40  ;;  %v3235_v31 = vadd.f32 %v3234_v48, %v8816_v40  ;;  %5027 = vmatmul.msk.f32.gmra.mxu2 %vm1715_vm15, %v5536_v26  ;;  %v3239_v48 = vadd.f32 %v3238_v51, %v8821_v23 }
 0x495   :  { %3236 = vadd.xlane.f32.xlu1 %v3235_v31  ;;  %v3523_v20 = vadd.f32 %v3522_v62, %v3383_v38  ;;  %v8829_v14 = vpop.f32.mrf.mxu3  ;;  %v3526_v38 = vadd.f32 %v3385_v41, %v3384_v57  ;;  %v8847_v31 = vpop.f32.mrf.mxu0 }
 0x496   :  { %v3001_v19 = vpop.f32.mrf.mxu1  ;;  %v2778_v26 = vpop.f32.mrf.mxu2 }
 0x497   :  { %v3002_v42 = vadd.f32 %v3001_v19, %v8712_v34  ;;  %3524 = vadd.xlane.f32.xlu0 %v3523_v20  ;;  %v8849_v62 = vadd.f32 %v2778_v26, %v2666_v2  ;;  %v3527_v8 = vadd.f32 %v3526_v38, %v3386_v59 }
 0x499   :  { %v8842_v15 = vadd.f32 %v8738_v6, %v3002_v42  ;;  %3048 = vmatmul.f32.gmra.mxu1 %v5540_v1  ;;  %10842 = vst [vmem:[#allocation24_spill] sm:$0xff] %v8849_v62  ;;  %v3389_v6 = vmul.f32 %v8127_v24, %v8127_v24  ;;  %v10843_v42 = vld [vmem:[#allocation42_spill] sm:$0xff]  ;;  %v3390_v26 = vmul.f32 %v8849_v62, %v8849_v62 }
 0x49a   :  { %v3388_v41 = vmul.f32 %v10843_v42, %v10843_v42  ;;  %v3243_v57 = vadd.f32 %v8127_v24, %v10843_v42 }
 0x49b   :  { %10841 = vst [vmem:[#allocation117_spill] sm:$0xff] %v8842_v15  ;;  %v3387_v34 = vmul.f32 %v8842_v15, %v8842_v15  ;;  %v3240_v17 = vadd.f32 %v3239_v48, %v8842_v15  ;;  %v2669_v48 = vadd.f32 %v8109_v7, %v8149_v12  ;;  %v3393_v12 = vmul.f32 %v8140_v49, %v8140_v49 }
 0x49c   :  { %v3244_v1 = vadd.f32 %v3243_v57, %v8849_v62 }
 0x49d   :  { %3241 = vadd.xlane.f32.xlu2 %v3240_v17  ;;  %v3528_v20 = vadd.f32 %v3527_v8, %v3387_v34  ;;  %v8856_v19 = vpop.f32.mrf.mxu3  ;;  %v5541_v34 = vld [vmem:[%s10218_s1 + $0x2f0] sm:$0xff]  ;;  %v3531_v17 = vadd.f32 %v3389_v6, %v3388_v41  ;;  %v8879_v7 = vpop.f32.mrf.mxu0 }
 0x49e   :  { %v3004_v51 = vpop.f32.mrf.mxu1  ;;  %v2781_v59 = vpop.f32.mrf.mxu2 }
 0x49f   :  { %v3005_v2 = vadd.f32 %v3004_v51, %v8747_v5  ;;  %3529 = vadd.xlane.f32.xlu1 %v3528_v20  ;;  %v8874_v8 = vadd.f32 %v2781_v59, %v2669_v48  ;;  %v3532_v51 = vadd.f32 %v3531_v17, %v3390_v26 }
 0x4a1   :  { %v8869_v38 = vadd.f32 %v8773_v27, %v3005_v2  ;;  %3051 = vmatmul.f32.gmra.mxu1 %v5541_v34  ;;  %10845 = vst [vmem:[#allocation121_spill] sm:$0xff] %v8874_v8  ;;  %v10846_v34 = vld [vmem:[#allocation45_spill] sm:$0xff]  ;;  %v3394_v59 = vmul.f32 %v8874_v8, %v8874_v8 }
 0x4a2   :  { %v3392_v6 = vmul.f32 %v10846_v34, %v10846_v34  ;;  %v3248_v41 = vadd.f32 %v8140_v49, %v10846_v34 }
 0x4a3   :  { %10844 = vst [vmem:[#allocation27_spill] sm:$0xff] %v8869_v38  ;;  %v3391_v5 = vmul.f32 %v8869_v38, %v8869_v38  ;;  %v3245_v20 = vadd.f32 %v3244_v1, %v8869_v38  ;;  %v2672_v1 = vadd.f32 %v8121_v3, %v8162_v22 }
 0x4a4   :  { %v3249_v17 = vadd.f32 %v3248_v41, %v8874_v8 }
 0x4a5   :  { %3246 = vadd.xlane.f32.xlu0 %v3245_v20  ;;  %v3533_v27 = vadd.f32 %v3532_v51, %v3391_v5  ;;  %v8883_v2 = vpop.f32.mrf.mxu3  ;;  %v3536_v20 = vadd.f32 %v3393_v12, %v3392_v6  ;;  %v8905_v22 = vpop.f32.mrf.mxu0 }
 0x4a6   :  { %v3007_v57 = vpop.f32.mrf.mxu1  ;;  %v2784_v48 = vpop.f32.mrf.mxu2 }
 0x4a7   :  { %v3008_v26 = vadd.f32 %v3007_v57, %v8782_v25  ;;  %3534 = vadd.xlane.f32.xlu2 %v3533_v27  ;;  %v8898_v51 = vadd.f32 %v2784_v48, %v2672_v1  ;;  %v3537_v62 = vadd.f32 %v3536_v20, %v3394_v59  ;;  %v3397_v25 = vmul.f32 %v8153_v43, %v8153_v43  ;;  %v10849_v57 = vld [vmem:[#allocation48_spill] sm:$0xff] }
 0x4a8   :  { %v3253_v12 = vadd.f32 %v8153_v43, %v10849_v57 }
 0x4a9   :  { %v8896_v5 = vadd.f32 %v8801_v52, %v3008_v26  ;;  %10848 = vst [vmem:[#allocation123_spill] sm:$0xff] %v8898_v51  ;;  %v3396_v52 = vmul.f32 %v10849_v57, %v10849_v57  ;;  %v3398_v6 = vmul.f32 %v8898_v51, %v8898_v51 }
 0x4aa   :  { %v9046_v61 = vpop.xlane.xlu0 %3464 }
 0x4ab   :  { %10847 = vst [vmem:[#allocation122_spill] sm:$0xff] %v8896_v5  ;;  %v3395_v29 = vmul.f32 %v8896_v5, %v8896_v5  ;;  %v3250_v38 = vadd.f32 %v3249_v17, %v8896_v5  ;;  %v3541_v48 = vadd.f32 %v3397_v25, %v3396_v52 }
 0x4ad   :  { %3251 = vadd.xlane.f32.xlu1 %v3250_v38  ;;  %v3538_v27 = vadd.f32 %v3537_v62, %v3395_v29  ;;  %v3132_v26 = vpop.f32.mrf.mxu3  ;;  %v2675_v29 = vadd.f32 %v8134_v28, %v8175_v53  ;;  %v3254_v62 = vadd.f32 %v3253_v12, %v8898_v51  ;;  %v10852_v53 = vld [vmem:[#allocation51_spill] sm:$0xff] }
 0x4ae   :  { %v3010_v3 = vpop.f32.mrf.mxu1  ;;  %v2787_v59 = vpop.f32.mrf.mxu2  ;;  %v3400_v12 = vmul.f32 %v10852_v53, %v10852_v53  ;;  %v10920_v51 = vld [vmem:[#allocation71_spill] sm:$0xff] }
 0x4af   :  { %v3011_v41 = vadd.f32 %v3010_v3, %v8810_v13  ;;  %3539 = vadd.xlane.f32.xlu0 %v3538_v27  ;;  %v8920_v1 = vadd.f32 %v2787_v59, %v2675_v29  ;;  %v3542_v13 = vadd.f32 %v3541_v48, %v3398_v6  ;;  %v3401_v27 = vmul.f32 %v8166_v44, %v8166_v44  ;;  %v2909_v6 = vpop.f32.mrf.mxu0 }
 0x4b0   :  { %v2678_v59 = vadd.f32 %v8147_v46, %v8188_v21 }
 0x4b1   :  { %v8918_v38 = vadd.f32 %v8829_v14, %v3011_v41  ;;  %10851 = vst [vmem:[#allocation125_spill] sm:$0xff] %v8920_v1  ;;  %v3258_v14 = vadd.f32 %v8166_v44, %v10852_v53  ;;  %v3402_v25 = vmul.f32 %v8920_v1, %v8920_v1  ;;  %v3546_v48 = vadd.f32 %v3401_v27, %v3400_v12  ;;  %v10908_v53 = vld [vmem:[#allocation80_spill] sm:$0xff] }
 0x4b2   :  { %v3441_v33 = vmul.f32 %v10908_v53, %v10908_v53 }
 0x4b3   :  { %10850 = vst [vmem:[#allocation124_spill] sm:$0xff] %v8918_v38  ;;  %v3399_v17 = vmul.f32 %v8918_v38, %v8918_v38  ;;  %v3255_v20 = vadd.f32 %v3254_v62, %v8918_v38  ;;  %v3259_v29 = vadd.f32 %v3258_v14, %v8920_v1  ;;  %v10855_v14 = vld [vmem:[#allocation55_spill] sm:$0xff]  ;;  %v10896_v1 = vld [vmem:[#allocation89_spill] sm:$0xff] }
 0x4b4   :  { %v3263_v27 = vadd.f32 %v8179_v63, %v10855_v14 }
 0x4b5   :  { %3256 = vadd.xlane.f32.xlu2 %v3255_v20  ;;  %v3543_v3 = vadd.f32 %v3542_v13, %v3399_v17  ;;  %v3135_v17 = vpop.f32.mrf.mxu3 }
 0x4b6   :  { %v3013_v28 = vpop.f32.mrf.mxu1  ;;  %v2790_v41 = vpop.f32.mrf.mxu2 }
 0x4b7   :  { %v3014_v52 = vadd.f32 %v3013_v28, %v8847_v31  ;;  %3544 = vadd.xlane.f32.xlu1 %v3543_v3  ;;  %v8940_v20 = vadd.f32 %v2790_v41, %v2678_v59  ;;  %v3547_v3 = vadd.f32 %v3546_v48, %v3402_v25  ;;  %v3405_v28 = vmul.f32 %v8179_v63, %v8179_v63  ;;  %v10856_v25 = vld [vmem:[#allocation47_spill] sm:$0xff] }
 0x4b8   :  { %v10857_v59 = vld [vmem:[#allocation119_spill] sm:$0xff]  ;;  %v3433_v63 = vmul.f32 %v10896_v1, %v10896_v1 }
 0x4b9   :  { %v8938_v62 = vadd.f32 %v8856_v19, %v3014_v52  ;;  %10854 = vst [vmem:[#allocation127_spill] sm:$0xff] %v8940_v20  ;;  %v3404_v19 = vmul.f32 %v10855_v14, %v10855_v14  ;;  %v3406_v12 = vmul.f32 %v8940_v20, %v8940_v20  ;;  %v3264_v48 = vadd.f32 %v3263_v27, %v8940_v20 }
 0x4bb   :  { %10853 = vst [vmem:[#allocation126_spill] sm:$0xff] %v8938_v62  ;;  %v3403_v13 = vmul.f32 %v8938_v62, %v8938_v62  ;;  %v3260_v31 = vadd.f32 %v3259_v29, %v8938_v62  ;;  %v2681_v29 = vadd.f32 %v10857_v59, %v10856_v25  ;;  %v10861_v59 = vld [vmem:[#allocation59_spill] sm:$0xff] }
 0x4bd   :  { %3261 = vadd.xlane.f32.xlu0 %v3260_v31  ;;  %v3548_v46 = vadd.f32 %v3547_v3, %v3403_v13  ;;  %v3551_v31 = vadd.f32 %v3405_v28, %v3404_v19  ;;  %v2912_v3 = vpop.f32.mrf.mxu0 }
 0x4be   :  { %v3016_v21 = vpop.f32.mrf.mxu1  ;;  %v2793_v41 = vpop.f32.mrf.mxu2 }
 0x4bf   :  { %v3017_v52 = vadd.f32 %v3016_v21, %v8879_v7  ;;  %3549 = vadd.xlane.f32.xlu2 %v3548_v46  ;;  %v8960_v39 = vadd.f32 %v2793_v41, %v2681_v29  ;;  %v3552_v7 = vadd.f32 %v3551_v31, %v3406_v12  ;;  %v3138_v46 = vpop.f32.mrf.mxu3  ;;  %v10860_v21 = vld [vmem:[#allocation52_spill] sm:$0xff]  ;;  %v10862_v41 = vld [vmem:[#allocation74_spill] sm:$0xff] }
 0x4c0   :  { %v3409_v42 = vmul.f32 %v10860_v21, %v10860_v21  ;;  %v3268_v28 = vadd.f32 %v10860_v21, %v10861_v59  ;;  %v10863_v29 = vld [vmem:[#allocation64_spill] sm:$0xff] }
 0x4c1   :  { %v8958_v13 = vadd.f32 %v8883_v2, %v3017_v52  ;;  %10859 = vst [vmem:[#allocation119_spill] sm:$0xff] %v8960_v39  ;;  %v3408_v2 = vmul.f32 %v10861_v59, %v10861_v59  ;;  %v3410_v19 = vmul.f32 %v8960_v39, %v8960_v39 }
 0x4c3   :  { %10858 = vst [vmem:[#allocation47_spill] sm:$0xff] %v8958_v13  ;;  %v3407_v54 = vmul.f32 %v8958_v13, %v8958_v13  ;;  %v3265_v24 = vadd.f32 %v3264_v48, %v8958_v13  ;;  %v2684_v48 = vadd.f32 %v10863_v29, %v10862_v41  ;;  %v3556_v31 = vadd.f32 %v3409_v42, %v3408_v2 }
 0x4c5   :  { %3266 = vadd.xlane.f32.xlu1 %v3265_v24  ;;  %v3553_v25 = vadd.f32 %v3552_v7, %v3407_v54  ;;  %v3269_v24 = vadd.f32 %v3268_v28, %v8960_v39  ;;  %v3557_v13 = vadd.f32 %v3556_v31, %v3410_v19  ;;  %v2915_v20 = vpop.f32.mrf.mxu0  ;;  %v10867_v28 = vld [vmem:[#allocation63_spill] sm:$0xff] }
 0x4c6   :  { %v3019_v27 = vpop.f32.mrf.mxu1  ;;  %v2796_v12 = vpop.f32.mrf.mxu2 }
 0x4c7   :  { %v3020_v52 = vadd.f32 %v3019_v27, %v8905_v22  ;;  %3554 = vadd.xlane.f32.xlu0 %v3553_v25  ;;  %v8979_v7 = vadd.f32 %v2796_v12, %v2684_v48  ;;  %v10866_v22 = vld [vmem:[#allocation43_spill] sm:$0xff]  ;;  %v3141_v29 = vpop.f32.mrf.mxu3  ;;  %v10868_v12 = vld [vmem:[#allocation60_spill] sm:$0xff]  ;;  %v10869_v48 = vld [vmem:[#allocation41_spill] sm:$0xff] }
 0x4c8   :  { %v3413_v25 = vmul.f32 %v10866_v22, %v10866_v22  ;;  %v3273_v42 = vadd.f32 %v10866_v22, %v10867_v28 }
 0x4c9   :  { %v8977_v54 = vadd.f32 %v3132_v26, %v3020_v52  ;;  %10865 = vst [vmem:[#allocation64_spill] sm:$0xff] %v8979_v7  ;;  %v3412_v26 = vmul.f32 %v10867_v28, %v10867_v28  ;;  %v3414_v2 = vmul.f32 %v8979_v7, %v8979_v7  ;;  %v9002_v28 = vpop.xlane.xlu2 %3459 }
 0x4cb   :  { %10864 = vst [vmem:[#allocation74_spill] sm:$0xff] %v8977_v54  ;;  %v3411_v15 = vmul.f32 %v8977_v54, %v8977_v54  ;;  %v3270_v23 = vadd.f32 %v3269_v24, %v8977_v54  ;;  %v2687_v24 = vadd.f32 %v10869_v48, %v10868_v12 }
 0x4cd   :  { %3271 = vadd.xlane.f32.xlu2 %v3270_v23  ;;  %v3558_v27 = vadd.f32 %v3557_v13, %v3411_v15  ;;  %v3274_v23 = vadd.f32 %v3273_v42, %v8979_v7  ;;  %v3561_v13 = vadd.f32 %v3413_v25, %v3412_v26  ;;  %v2918_v42 = vpop.f32.mrf.mxu0 }
 0x4ce   :  { %v3022_v41 = vpop.f32.mrf.mxu1  ;;  %v2799_v19 = vpop.f32.mrf.mxu2 }
 0x4cf   :  { %v3023_v52 = vadd.f32 %v3022_v41, %v2909_v6  ;;  %3559 = vadd.xlane.f32.xlu1 %v3558_v27  ;;  %v8997_v31 = vadd.f32 %v2799_v19, %v2687_v24  ;;  %v3562_v22 = vadd.f32 %v3561_v13, %v3414_v2  ;;  %v10872_v6 = vld [vmem:[#allocation50_spill] sm:$0xff]  ;;  %v3144_v48 = vpop.f32.mrf.mxu3  ;;  %v10874_v24 = vld [vmem:[#allocation69_spill] sm:$0xff] }
 0x4d0   :  { %v3417_v27 = vmul.f32 %v10872_v6, %v10872_v6 }
 0x4d1   :  { %v8995_v15 = vadd.f32 %v3135_v17, %v3023_v52  ;;  %10871 = vst [vmem:[#allocation41_spill] sm:$0xff] %v8997_v31  ;;  %v10873_v17 = vld [vmem:[#allocation68_spill] sm:$0xff]  ;;  %v3418_v52 = vmul.f32 %v8997_v31, %v8997_v31 }
 0x4d2   :  { %v3416_v25 = vmul.f32 %v10873_v17, %v10873_v17  ;;  %v3278_v26 = vadd.f32 %v10872_v6, %v10873_v17 }
 0x4d3   :  { %10870 = vst [vmem:[#allocation60_spill] sm:$0xff] %v8995_v15  ;;  %v3415_v54 = vmul.f32 %v8995_v15, %v8995_v15  ;;  %v3275_v39 = vadd.f32 %v3274_v23, %v8995_v15  ;;  %v2690_v23 = vadd.f32 %v10874_v24, %v8240_v32  ;;  %v9026_v24 = vpop.xlane.xlu2 %3176 }
 0x4d5   :  { %3276 = vadd.xlane.f32.xlu0 %v3275_v39  ;;  %v3563_v41 = vadd.f32 %v3562_v22, %v3415_v54  ;;  %v3279_v39 = vadd.f32 %v3278_v26, %v8997_v31  ;;  %v3566_v22 = vadd.f32 %v3417_v27, %v3416_v25  ;;  %v10879_v26 = vld [vmem:[#allocation73_spill] sm:$0xff] }
 0x4d6   :  { %v3025_v12 = vpop.f32.mrf.mxu1  ;;  %v2802_v2 = vpop.f32.mrf.mxu2  ;;  %v3420_v27 = vmul.f32 %v10879_v26, %v10879_v26 }
 0x4d7   :  { %v3026_v19 = vadd.f32 %v3025_v12, %v2912_v3  ;;  %3564 = vadd.xlane.f32.xlu2 %v3563_v41  ;;  %v9017_v13 = vadd.f32 %v2802_v2, %v2690_v23  ;;  %v3567_v10 = vadd.f32 %v3566_v22, %v3418_v52  ;;  %v10877_v3 = vld [vmem:[#allocation79_spill] sm:$0xff]  ;;  %v9024_v12 = vpop.permute.xlu1 %4371  ;;  %v2921_v23 = vpop.f32.mrf.mxu0  ;;  %v10881_v22 = vld [vmem:[#allocation56_spill] sm:$0xff] }
 0x4d8   :  { %v3421_v41 = vmul.f32 %v10877_v3, %v10877_v3  ;;  %10878 = vst [vmem:[#allocation129_spill] sm:$0xff] %v9024_v12  ;;  %v3283_v25 = vadd.f32 %v10877_v3, %v10879_v26 }
 0x4d9   :  { %v9015_v54 = vadd.f32 %v3138_v46, %v3026_v19  ;;  %10876 = vst [vmem:[#allocation128_spill] sm:$0xff] %v9017_v13  ;;  %v3422_v19 = vmul.f32 %v9017_v13, %v9017_v13 }
 0x4da   :  { %v3571_v12 = vadd.f32 %v3421_v41, %v3420_v27  ;;  %v10885_v41 = vld [vmem:[#allocation78_spill] sm:$0xff] }
 0x4db   :  { %10875 = vst [vmem:[#allocation69_spill] sm:$0xff] %v9015_v54  ;;  %v3419_v6 = vmul.f32 %v9015_v54, %v9015_v54  ;;  %v3280_v17 = vadd.f32 %v3279_v39, %v9015_v54  ;;  %v10880_v39 = vld [vmem:[#allocation84_spill] sm:$0xff]  ;;  %v3147_v54 = vpop.f32.mrf.mxu3  ;;  %v3424_v27 = vmul.f32 %v10885_v41, %v10885_v41 }
 0x4dd   :  { %3281 = vadd.xlane.f32.xlu1 %v3280_v17  ;;  %v3568_v32 = vadd.f32 %v3567_v10, %v3419_v6  ;;  %v2693_v17 = vadd.f32 %v10881_v22, %v10880_v39  ;;  %v3284_v10 = vadd.f32 %v3283_v25, %v9017_v13  ;;  %v9048_v25 = vpop.xlane.xlu2 %3186 }
 0x4de   :  { %v3028_v46 = vpop.f32.mrf.mxu1  ;;  %v2805_v2 = vpop.f32.mrf.mxu2 }
 0x4df   :  { %v3029_v52 = vadd.f32 %v3028_v46, %v2915_v20  ;;  %3569 = vadd.xlane.f32.xlu0 %v3568_v32  ;;  %v9039_v31 = vadd.f32 %v2805_v2, %v2693_v17  ;;  %v3572_v20 = vadd.f32 %v3571_v12, %v3422_v19  ;;  %v10884_v32 = vld [vmem:[#allocation49_spill] sm:$0xff]  ;;  %v9054_v2 = vpop.xlane.xlu1 %3171  ;;  %v10886_v17 = vld [vmem:[#allocation70_spill] sm:$0xff]  ;;  %v2924_v13 = vpop.f32.mrf.mxu0 }
 0x4e0   :  { %v3425_v46 = vmul.f32 %v10884_v32, %v10884_v32 }
 0x4e1   :  { %v9037_v6 = vadd.f32 %v3141_v29, %v3029_v52  ;;  %10883 = vst [vmem:[#allocation56_spill] sm:$0xff] %v9039_v31  ;;  %v3288_v52 = vadd.f32 %v10884_v32, %v10885_v41  ;;  %v3426_v12 = vmul.f32 %v9039_v31, %v9039_v31  ;;  %v10926_v41 = vld [vmem:[#allocation82_spill] sm:$0xff] }
 0x4e2   :  { %v3453_v49 = vmul.f32 %v10926_v41, %v10926_v41 }
 0x4e3   :  { %10882 = vst [vmem:[#allocation84_spill] sm:$0xff] %v9037_v6  ;;  %v3423_v3 = vmul.f32 %v9037_v6, %v9037_v6  ;;  %v3285_v26 = vadd.f32 %v3284_v10, %v9037_v6  ;;  %v3289_v10 = vadd.f32 %v3288_v52, %v9039_v31  ;;  %v3576_v6 = vadd.f32 %v3425_v46, %v3424_v27  ;;  %v10891_v52 = vld [vmem:[#allocation83_spill] sm:$0xff] }
 0x4e5   :  { %3286 = vadd.xlane.f32.xlu2 %v3285_v26  ;;  %v3573_v39 = vadd.f32 %v3572_v20, %v3423_v3  ;;  %v10887_v26 = vld [vmem:[#allocation46_spill] sm:$0xff]  ;;  %v3577_v16 = vadd.f32 %v3576_v6, %v3426_v12  ;;  %v9078_v12 = vpop.xlane.xlu0 %3181 }
 0x4e6   :  { %v3031_v29 = vpop.f32.mrf.mxu1  ;;  %v2808_v22 = vpop.f32.mrf.mxu2  ;;  %v2696_v3 = vadd.f32 %v10887_v26, %v10886_v17 }
 0x4e7   :  { %v3032_v19 = vadd.f32 %v3031_v29, %v2918_v42  ;;  %3574 = vadd.xlane.f32.xlu1 %v3573_v39  ;;  %v3150_v42 = vpop.f32.mrf.mxu3  ;;  %v10890_v39 = vld [vmem:[#allocation58_spill] sm:$0xff]  ;;  %v9074_v27 = vpop.xlane.xlu1 %3469 }
 0x4e8   :  { %v9063_v15 = vadd.f32 %v2808_v22, %v2696_v3  ;;  %v3429_v29 = vmul.f32 %v10890_v39, %v10890_v39  ;;  %v3293_v46 = vadd.f32 %v10890_v39, %v10891_v52  ;;  %v9080_v3 = vpop.xlane.xlu2 %3474 }
 0x4e9   :  { %v9061_v20 = vadd.f32 %v3144_v48, %v3032_v19  ;;  %v3428_v48 = vmul.f32 %v10891_v52, %v10891_v52 }
 0x4ea   :  { %10889 = vst [vmem:[#allocation46_spill] sm:$0xff] %v9063_v15  ;;  %v3430_v19 = vmul.f32 %v9063_v15, %v9063_v15 }
 0x4eb   :  { %10888 = vst [vmem:[#allocation70_spill] sm:$0xff] %v9061_v20  ;;  %v3427_v7 = vmul.f32 %v9061_v20, %v9061_v20  ;;  %v3290_v40 = vadd.f32 %v3289_v10, %v9061_v20  ;;  %v3294_v10 = vadd.f32 %v3293_v46, %v9063_v15  ;;  %v3581_v59 = vadd.f32 %v3429_v29, %v3428_v48  ;;  %v10897_v46 = vld [vmem:[#allocation88_spill] sm:$0xff] }
 0x4ec   :  { %v3298_v29 = vadd.f32 %v10896_v1, %v10897_v46 }
 0x4ed   :  { %3291 = vadd.xlane.f32.xlu0 %v3290_v40  ;;  %v3578_v17 = vadd.f32 %v3577_v16, %v3427_v7  ;;  %v10892_v16 = vld [vmem:[#allocation57_spill] sm:$0xff]  ;;  %v10893_v40 = vld [vmem:[#allocation54_spill] sm:$0xff] }
 0x4ee   :  { %v3034_v26 = vpop.f32.mrf.mxu1  ;;  %v2811_v6 = vpop.f32.mrf.mxu2  ;;  %v2699_v7 = vadd.f32 %v10893_v40, %v10892_v16 }
 0x4ef   :  { %v3035_v22 = vadd.f32 %v3034_v26, %v2921_v23  ;;  %3579 = vadd.xlane.f32.xlu2 %v3578_v17  ;;  %v3582_v17 = vadd.f32 %v3581_v59, %v3430_v19  ;;  %v2927_v26 = vpop.f32.mrf.mxu0  ;;  %v3153_v40 = vpop.f32.mrf.mxu3 }
 0x4f0   :  { %v9087_v0 = vadd.f32 %v2811_v6, %v2699_v7  ;;  %v9098_v48 = vpop.xlane.xlu1 %3191  ;;  %v9102_v6 = vpop.xlane.xlu0 %3479  ;;  %v10898_v7 = vld [vmem:[#allocation61_spill] sm:$0xff] }
 0x4f1   :  { %v9085_v21 = vadd.f32 %v3147_v54, %v3035_v22  ;;  %v3432_v54 = vmul.f32 %v10897_v46, %v10897_v46  ;;  %v9109_v11 = vpop.xlane.xlu2 %3196 }
 0x4f2   :  { %10895 = vst [vmem:[#allocation54_spill] sm:$0xff] %v9087_v0  ;;  %v3434_v22 = vmul.f32 %v9087_v0, %v9087_v0 }
 0x4f3   :  { %10894 = vst [vmem:[#allocation57_spill] sm:$0xff] %v9085_v21  ;;  %v3431_v62 = vmul.f32 %v9085_v21, %v9085_v21  ;;  %v3295_v23 = vadd.f32 %v3294_v10, %v9085_v21  ;;  %v3586_v56 = vadd.f32 %v3433_v63, %v3432_v54  ;;  %v10914_v21 = vld [vmem:[#allocation85_spill] sm:$0xff] }
 0x4f4   :  { %v3445_v15 = vmul.f32 %v10914_v21, %v10914_v21 }
 0x4f5   :  { %3296 = vadd.xlane.f32.xlu1 %v3295_v23  ;;  %v3583_v14 = vadd.f32 %v3582_v17, %v3431_v62  ;;  %v10899_v62 = vld [vmem:[#allocation65_spill] sm:$0xff]  ;;  %v3299_v23 = vadd.f32 %v3298_v29, %v9087_v0 }
 0x4f6   :  { %v3037_v16 = vpop.f32.mrf.mxu1  ;;  %v2814_v19 = vpop.f32.mrf.mxu2  ;;  %v2702_v10 = vadd.f32 %v10899_v62, %v10898_v7 }
 0x4f7   :  { %v3038_v59 = vadd.f32 %v3037_v16, %v2924_v13  ;;  %3584 = vadd.xlane.f32.xlu0 %v3583_v14  ;;  %v3587_v13 = vadd.f32 %v3586_v56, %v3434_v22  ;;  %v10902_v16 = vld [vmem:[#allocation75_spill] sm:$0xff]  ;;  %v2930_v29 = vpop.f32.mrf.mxu0 }
 0x4f8   :  { %v9111_v36 = vadd.f32 %v2814_v19, %v2702_v10  ;;  %v3437_v46 = vmul.f32 %v10902_v16, %v10902_v16  ;;  %v9126_v22 = vpop.xlane.xlu0 %3201 }
 0x4f9   :  { %v9107_v17 = vadd.f32 %v3150_v42, %v3038_v59  ;;  %v10903_v42 = vld [vmem:[#allocation93_spill] sm:$0xff]  ;;  %v9122_v59 = vpop.xlane.xlu1 %3484 }
 0x4fa   :  { %10901 = vst [vmem:[#allocation65_spill] sm:$0xff] %v9111_v36  ;;  %v3436_v63 = vmul.f32 %v10903_v42, %v10903_v42  ;;  %v3303_v54 = vadd.f32 %v10902_v16, %v10903_v42  ;;  %v3438_v19 = vmul.f32 %v9111_v36, %v9111_v36  ;;  %v9133_v16 = vpop.xlane.xlu2 %3489 }
 0x4fb   :  { %10900 = vst [vmem:[#allocation61_spill] sm:$0xff] %v9107_v17  ;;  %v3435_v1 = vmul.f32 %v9107_v17, %v9107_v17  ;;  %v3300_v14 = vadd.f32 %v3299_v23, %v9107_v17  ;;  %v3156_v23 = vpop.f32.mrf.mxu3 }
 0x4fc   :  { %v3304_v17 = vadd.f32 %v3303_v54, %v9111_v36  ;;  %v3591_v44 = vadd.f32 %v3437_v46, %v3436_v63  ;;  %v10909_v54 = vld [vmem:[#allocation96_spill] sm:$0xff] }
 0x4fd   :  { %3301 = vadd.xlane.f32.xlu2 %v3300_v14  ;;  %v3588_v7 = vadd.f32 %v3587_v13, %v3435_v1  ;;  %v10904_v1 = vld [vmem:[#allocation66_spill] sm:$0xff]  ;;  %v10905_v14 = vld [vmem:[#allocation53_spill] sm:$0xff]  ;;  %v3308_v46 = vadd.f32 %v10908_v53, %v10909_v54 }
 0x4fe   :  { %v3040_v62 = vpop.f32.mrf.mxu1  ;;  %v2817_v56 = vpop.f32.mrf.mxu2  ;;  %v2705_v13 = vadd.f32 %v10905_v14, %v10904_v1 }
 0x4ff   :  { %v3041_v10 = vadd.f32 %v3040_v62, %v2927_v26  ;;  %3589 = vadd.xlane.f32.xlu1 %v3588_v7  ;;  %v3592_v62 = vadd.f32 %v3591_v44, %v3438_v19  ;;  %v2933_v19 = vpop.f32.mrf.mxu0 }
 0x500   :  { %v9135_v42 = vadd.f32 %v2817_v56, %v2705_v13  ;;  %v10910_v13 = vld [vmem:[#allocation77_spill] sm:$0xff] }
 0x501   :  { %v9131_v0 = vadd.f32 %v3153_v40, %v3041_v10  ;;  %v3440_v40 = vmul.f32 %v10909_v54, %v10909_v54  ;;  %v9146_v63 = vpop.xlane.xlu1 %3206 }
 0x502   :  { %10907 = vst [vmem:[#allocation53_spill] sm:$0xff] %v9135_v42  ;;  %v3442_v10 = vmul.f32 %v9135_v42, %v9135_v42  ;;  %v9157_v53 = vpop.xlane.xlu2 %3211 }
 0x503   :  { %10906 = vst [vmem:[#allocation66_spill] sm:$0xff] %v9131_v0  ;;  %v3439_v26 = vmul.f32 %v9131_v0, %v9131_v0  ;;  %v3305_v7 = vadd.f32 %v3304_v17, %v9131_v0  ;;  %v9150_v17 = vpop.xlane.xlu0 %3494  ;;  %v3596_v36 = vadd.f32 %v3441_v33, %v3440_v40  ;;  %v3159_v54 = vpop.f32.mrf.mxu3 }
 0x505   :  { %3306 = vadd.xlane.f32.xlu0 %v3305_v7  ;;  %v3593_v1 = vadd.f32 %v3592_v62, %v3439_v26  ;;  %v10911_v26 = vld [vmem:[#allocation62_spill] sm:$0xff]  ;;  %v3309_v62 = vadd.f32 %v3308_v46, %v9135_v42 }
 0x506   :  { %v3043_v14 = vpop.f32.mrf.mxu1  ;;  %v2820_v44 = vpop.f32.mrf.mxu2  ;;  %v2708_v7 = vadd.f32 %v10911_v26, %v10910_v13 }
 0x507   :  { %v3044_v56 = vadd.f32 %v3043_v14, %v2930_v29  ;;  %3594 = vadd.xlane.f32.xlu2 %v3593_v1  ;;  %v3597_v14 = vadd.f32 %v3596_v36, %v3442_v10 }
 0x508   :  { %v9159_v47 = vadd.f32 %v2820_v44, %v2708_v7  ;;  %v10916_v7 = vld [vmem:[#allocation90_spill] sm:$0xff] }
 0x509   :  { %v9155_v0 = vadd.f32 %v3156_v23, %v3044_v56  ;;  %v10915_v23 = vld [vmem:[#allocation99_spill] sm:$0xff]  ;;  %v9170_v56 = vpop.xlane.xlu1 %3499 }
 0x50a   :  { %10913 = vst [vmem:[#allocation62_spill] sm:$0xff] %v9159_v47  ;;  %v3444_v33 = vmul.f32 %v10915_v23, %v10915_v23  ;;  %v3313_v40 = vadd.f32 %v10914_v21, %v10915_v23  ;;  %v3446_v44 = vmul.f32 %v9159_v47, %v9159_v47  ;;  %v9181_v42 = vpop.xlane.xlu2 %3504  ;;  %v2936_v21 = vpop.f32.mrf.mxu0 }
 0x50b   :  { %10912 = vst [vmem:[#allocation77_spill] sm:$0xff] %v9155_v0  ;;  %v3443_v29 = vmul.f32 %v9155_v0, %v9155_v0  ;;  %v3310_v1 = vadd.f32 %v3309_v62, %v9155_v0  ;;  %v9174_v10 = vpop.xlane.xlu0 %3216  ;;  %v10917_v62 = vld [vmem:[#allocation67_spill] sm:$0xff]  ;;  %v3162_v38 = vpop.f32.mrf.mxu3 }
 0x50c   :  { %v3601_v0 = vadd.f32 %v3445_v15, %v3444_v33 }
 0x50d   :  { %3311 = vadd.xlane.f32.xlu1 %v3310_v1  ;;  %v3598_v13 = vadd.f32 %v3597_v14, %v3443_v29  ;;  %v2711_v29 = vadd.f32 %v10917_v62, %v10916_v7  ;;  %v3314_v1 = vadd.f32 %v3313_v40, %v9159_v47  ;;  %v3449_v7 = vmul.f32 %v10920_v51, %v10920_v51 }
 0x50e   :  { %v3046_v46 = vpop.f32.mrf.mxu1  ;;  %v2823_v36 = vpop.f32.mrf.mxu2 }
 0x50f   :  { %v3047_v26 = vadd.f32 %v3046_v46, %v2933_v19  ;;  %3599 = vadd.xlane.f32.xlu0 %v3598_v13  ;;  %v9183_v23 = vadd.f32 %v2823_v36, %v2711_v29  ;;  %v3602_v46 = vadd.f32 %v3601_v0, %v3446_v44 }
 0x511   :  { %v9179_v14 = vadd.f32 %v3159_v54, %v3047_v26  ;;  %10919 = vst [vmem:[#allocation67_spill] sm:$0xff] %v9183_v23  ;;  %v10921_v26 = vld [vmem:[#allocation103_spill] sm:$0xff]  ;;  %v9194_v36 = vpop.xlane.xlu1 %3221  ;;  %v3450_v62 = vmul.f32 %v9183_v23, %v9183_v23 }
 0x512   :  { %v3448_v15 = vmul.f32 %v10921_v26, %v10921_v26  ;;  %v3318_v33 = vadd.f32 %v10920_v51, %v10921_v26  ;;  %v9205_v32 = vpop.xlane.xlu2 %3226 }
 0x513   :  { %10918 = vst [vmem:[#allocation90_spill] sm:$0xff] %v9179_v14  ;;  %v3447_v19 = vmul.f32 %v9179_v14, %v9179_v14  ;;  %v3315_v13 = vadd.f32 %v3314_v1, %v9179_v14  ;;  %v9198_v0 = vpop.xlane.xlu0 %3509  ;;  %v10922_v1 = vld [vmem:[#allocation76_spill] sm:$0xff] }
 0x514   :  { %v3606_v47 = vadd.f32 %v3449_v7, %v3448_v15 }
 0x515   :  { %3316 = vadd.xlane.f32.xlu2 %v3315_v13  ;;  %v3603_v40 = vadd.f32 %v3602_v46, %v3447_v19  ;;  %v10923_v13 = vld [vmem:[#allocation72_spill] sm:$0xff]  ;;  %v3319_v46 = vadd.f32 %v3318_v33, %v9183_v23 }
 0x516   :  { %v3049_v54 = vpop.f32.mrf.mxu1  ;;  %v2826_v44 = vpop.f32.mrf.mxu2  ;;  %v2714_v19 = vadd.f32 %v10923_v13, %v10922_v1 }
 0x517   :  { %v3050_v29 = vadd.f32 %v3049_v54, %v2936_v21  ;;  %3604 = vadd.xlane.f32.xlu1 %v3603_v40  ;;  %v3607_v40 = vadd.f32 %v3606_v47, %v3450_v62  ;;  %v2939_v54 = vpop.f32.mrf.mxu0 }
 0x518   :  { %v9207_v51 = vadd.f32 %v2826_v44, %v2714_v19 }
 0x519   :  { %v9203_v14 = vadd.f32 %v3162_v38, %v3050_v29  ;;  %v3165_v38 = vpop.f32.mrf.mxu3  ;;  %v10927_v29 = vld [vmem:[#allocation106_spill] sm:$0xff]  ;;  %v9220_v47 = vpop.xlane.xlu1 %3514 }
 0x51a   :  { %10925 = vst [vmem:[#allocation72_spill] sm:$0xff] %v9207_v51  ;;  %v3452_v7 = vmul.f32 %v10927_v29, %v10927_v29  ;;  %v3323_v15 = vadd.f32 %v10926_v41, %v10927_v29  ;;  %v3454_v44 = vmul.f32 %v9207_v51, %v9207_v51 }
 0x51b   :  { %10924 = vst [vmem:[#allocation76_spill] sm:$0xff] %v9203_v14  ;;  %v3451_v26 = vmul.f32 %v9203_v14, %v9203_v14  ;;  %v3320_v21 = vadd.f32 %v3319_v46, %v9203_v14  ;;  %v9222_v62 = vpop.xlane.xlu0 %3231 }
 0x51c   :  { %v3324_v19 = vadd.f32 %v3323_v15, %v9207_v51  ;;  %v3611_v46 = vadd.f32 %v3453_v49, %v3452_v7 }
 0x51d   :  { %3321 = vadd.xlane.f32.xlu0 %v3320_v21  ;;  %v3608_v1 = vadd.f32 %v3607_v40, %v3451_v26  ;;  %v9227_v21 = vpop.xlane.xlu2 %3519 }
 0x51e   :  { %v3052_v33 = vpop.f32.mrf.mxu1  ;;  %v3612_v29 = vadd.f32 %v3611_v46, %v3454_v44 }
 0x51f   :  { %v3053_v13 = vadd.f32 %v3052_v33, %v2939_v54  ;;  %3609 = vadd.xlane.f32.xlu2 %v3608_v1 }
 0x521   :  { %v9225_v26 = vadd.f32 %v3165_v38, %v3053_v13  ;;  %v9232_v1 = vpop.xlane.xlu1 %3236 }
 0x523   :  { %10928 = vst [vmem:[#allocation130_spill] sm:$0xff] %v9225_v26  ;;  %v3455_v40 = vmul.f32 %v9225_v26, %v9225_v26  ;;  %v3325_v41 = vadd.f32 %v3324_v19, %v9225_v26  ;;  %v9234_v33 = vpop.xlane.xlu0 %3524 }
 0x525   :  { %3326 = vadd.xlane.f32.xlu1 %v3325_v41  ;;  %v3613_v54 = vadd.f32 %v3612_v29, %v3455_v40  ;;  %v9236_v14 = vpop.xlane.xlu2 %3241 }
 0x527   :  { %3614 = vadd.xlane.f32.xlu0 %v3613_v54 }
 0x529   :  { %v9238_v38 = vpop.xlane.xlu1 %3529 }
 0x52b   :  { %v9240_v49 = vpop.xlane.xlu0 %3246 }
 0x52d   :  { %v9242_v7 = vpop.xlane.xlu2 %3534 }
 0x531   :  { %v3252_v15 = vpop.xlane.xlu1 %3251 }
 0x532   :  { %v3616_v5 = vadd.f32 %v3252_v15, %v9054_v2 }
 0x533   :  { %v3540_v13 = vpop.xlane.xlu0 %3539 }
 0x534   :  { %v3640_v50 = vadd.f32 %v3540_v13, %v9002_v28 }
 0x535   :  { %v3257_v51 = vpop.xlane.xlu2 %3256 }
 0x536   :  { %v3617_v18 = vadd.f32 %v3257_v51, %v9026_v24 }
 0x539   :  { %v3545_v19 = vpop.xlane.xlu1 %3544 }
 0x53b   :  { %v3262_v44 = vpop.xlane.xlu0 %3261 }
 0x53d   :  { %v3550_v41 = vpop.xlane.xlu2 %3549 }
 0x541   :  { %v3267_v29 = vpop.xlane.xlu1 %3266 }
 0x543   :  { %v3555_v46 = vpop.xlane.xlu0 %3554 }
 0x545   :  { %v9244_v40 = vpop.xlane.xlu2 %3271 }
 0x549   :  { %v9246_v54 = vpop.xlane.xlu1 %3559 }
 0x54b   :  { %v9248_v26 = vpop.xlane.xlu0 %3276 }
 0x54d   :  { %v9250_v23 = vpop.xlane.xlu2 %3564 }
 0x551   :  { %v9252_v34 = vpop.xlane.xlu1 %3281 }
 0x553   :  { %v9254_v58 = vpop.xlane.xlu0 %3569 }
 0x558   :  { %v9256_v4 = vpop.xlane.xlu2 %3286 }
 0x55a   :  { %v9258_v20 = vpop.xlane.xlu1 %3574 }
 0x560   :  { %v3292_v31 = vpop.xlane.xlu0 %3291 }
 0x561   :  { %v3624_v8 = vadd.f32 %v3292_v31, %v9157_v53  ;;  %v3641_v31 = vadd.f32 %v3545_v19, %v9046_v61 }
 0x562   :  { %v3580_v45 = vpop.xlane.xlu2 %3579 }
 0x563   :  { %v3632_v60 = vadd.f32 %v3624_v8, %v3616_v5  ;;  %v3648_v9 = vadd.f32 %v3580_v45, %v9170_v56 }
 0x565   :  { %v9264_v55 = vmul.f32 0.00048828125, %v3632_v60  ;;  %v3656_v39 = vadd.f32 %v3648_v9, %v3640_v50 }
 0x567   :  { %v3680_v52 = vmul.f32 %v9264_v55, %v9264_v55  ;;  %v3672_v43 = vmul.f32 0.00048828125, %v3656_v39 }
 0x568   :  { %v3297_v57 = vpop.xlane.xlu1 %3296 }
 0x569   :  { %v3688_v35 = vsub.f32 %v3672_v43, %v3680_v52  ;;  %v3625_v2 = vadd.f32 %v3297_v57, %v9174_v10  ;;  %v3618_v43 = vadd.f32 %v3262_v44, %v9078_v12 }
 0x56a   :  { %v3585_v53 = vpop.xlane.xlu0 %3584 }
 0x56b   :  { %v3704_v28 = vadd.f32 1e-05, %v3688_v35  ;;  %v3633_v8 = vadd.f32 %v3625_v2, %v3617_v18  ;;  %v3649_v45 = vadd.f32 %v3585_v53, %v9181_v42  ;;  %v3642_v35 = vadd.f32 %v3550_v41, %v9074_v27 }
 0x56c   :  { %v3619_v27 = vadd.f32 %v3267_v29, %v9048_v25  ;;  %v3696_v25 = vld [vmem:[%s10220_s2] sm:$0xff] }
 0x56d   :  { %5350 = vrsqrt.f32 %v3704_v28  ;;  %v9272_v60 = vmul.f32 0.00048828125, %v3633_v8  ;;  %v3657_v50 = vadd.f32 %v3649_v45, %v3641_v31  ;;  %v3643_v8 = vadd.f32 %v3555_v46, %v9080_v3 }
 0x56e   :  { %vm3718_vm1 = vweird.f32 %v3704_v28 }
 0x56f   :  { %v3681_v9 = vmul.f32 %v9272_v60, %v9272_v60  ;;  %v3673_v5 = vmul.f32 0.00048828125, %v3657_v50 }
 0x570   :  { %v3302_v39 = vpop.xlane.xlu2 %3301 }
 0x571   :  { %v3689_v51 = vsub.f32 %v3673_v5, %v3681_v9  ;;  %v3626_v57 = vadd.f32 %v3302_v39, %v9194_v36 }
 0x572   :  { %v3590_v24 = vpop.xlane.xlu1 %3589 }
 0x573   :  { %v5351_v61 = vpop.eup %5350  ;;  %v9279_v18 = vadd.f32 1e-05, %v3689_v51  ;;  %v3634_v52 = vadd.f32 %v3626_v57, %v3618_v43  ;;  %v3650_v42 = vadd.f32 %v3590_v24, %v9198_v0  ;;  %v3800_v24 = vld [vmem:[%s10221_s3] sm:$0xff] }
 0x574   :  { %v3713_v56 = vmul.f32 %v5351_v61, %v3704_v28  ;;  %vm3719_vm0 = vweird.f32 %v5351_v61 }
 0x575   :  { %5352 = vrsqrt.f32 %v9279_v18  ;;  %v9283_v10 = vmul.f32 0.00048828125, %v3634_v52  ;;  %v3658_v15 = vadd.f32 %v3650_v42, %v3642_v35  ;;  %vm3720_vm2 = vmor %vm3718_vm1, %vm3719_vm0  ;;  %v3620_v35 = vadd.f32 %v9244_v40, %v9098_v48 }
 0x576   :  { %v3714_v13 = vmul.f32 %v5351_v61, %v3713_v56  ;;  %v3644_v56 = vadd.f32 %v9246_v54, %v9102_v6  ;;  %vm3728_vm4 = vweird.f32 %v9279_v18 }
 0x577   :  { %v3682_v12 = vmul.f32 %v9283_v10, %v9283_v10  ;;  %v3674_v36 = vmul.f32 0.00048828125, %v3658_v15 }
 0x578   :  { %v3715_v19 = vmul.f32 0.5, %v3714_v13  ;;  %v3307_v44 = vpop.xlane.xlu0 %3306 }
 0x579   :  { %v3690_v41 = vsub.f32 %v3674_v36, %v3682_v12  ;;  %v3627_v2 = vadd.f32 %v3307_v44, %v9205_v32 }
 0x57a   :  { %v3716_v53 = vsub.f32 1.5, %v3715_v19  ;;  %v3595_v0 = vpop.xlane.xlu2 %3594 }
 0x57b   :  { %v5353_v31 = vpop.eup %5352  ;;  %v9290_v45 = vadd.f32 1e-05, %v3690_v41  ;;  %v3635_v50 = vadd.f32 %v3627_v2, %v3619_v27  ;;  %v3651_v9 = vadd.f32 %v3595_v0, %v9220_v47 }
 0x57c   :  { %v3723_v5 = vmul.f32 %v5353_v31, %v9279_v18  ;;  %v3717_v29 = vmul.f32 %v5351_v61, %v3716_v53  ;;  %vm3729_vm3 = vweird.f32 %v5353_v31 }
 0x57d   :  { %5354 = vrsqrt.f32 %v9290_v45  ;;  %v9298_v32 = vmul.f32 0.00048828125, %v3635_v50  ;;  %v3659_v39 = vadd.f32 %v3651_v9, %v3643_v8  ;;  %vm3730_vm5 = vmor %vm3728_vm4, %vm3729_vm3  ;;  %v3801_v8 = vld [vmem:[%s10221_s3 + $0x8] sm:$0xff]  ;;  %v3621_v50 = vadd.f32 %v9248_v26, %v9109_v11  ;;  %v3698_v26 = vld [vmem:[%s10220_s2 + $0x10] sm:$0xff] }
 0x57e   :  { %v3724_v3 = vmul.f32 %v5353_v31, %v3723_v5  ;;  %v3721_v46 = vsel %vm3720_vm2, %v5351_v61, %v3717_v29  ;;  %vm3738_vm7 = vweird.f32 %v9290_v45 }
 0x57f   :  { %v3683_v43 = vmul.f32 %v9298_v32, %v9298_v32  ;;  %v3675_v47 = vmul.f32 0.00048828125, %v3659_v39  ;;  %v3792_v28 = vmul.f32 %v3721_v46, %v3696_v25 }
 0x580   :  { %v3725_v51 = vmul.f32 0.5, %v3724_v3  ;;  %v3312_v57 = vpop.xlane.xlu1 %3311 }
 0x581   :  { %v3691_v52 = vsub.f32 %v3675_v47, %v3683_v43  ;;  %v3628_v42 = vadd.f32 %v3312_v57, %v9222_v62  ;;  %3826 = vperm.xlu1 %5347, %v3792_v28   ;;  %v3808_v61 = vmul.f32 %v3792_v28, %v9264_v55  ;;  %v3697_v55 = vld [vmem:[%s10220_s2 + $0x8] sm:$0xff] }
 0x582   :  { %v3726_v15 = vsub.f32 1.5, %v3725_v51  ;;  %v3600_v13 = vpop.xlane.xlu0 %3599 }
 0x583   :  { %v5355_v12 = vpop.eup %5354  ;;  %v9311_v36 = vadd.f32 1e-05, %v3691_v52  ;;  %v3636_v19 = vadd.f32 %v3628_v42, %v3620_v35  ;;  %v3652_v44 = vadd.f32 %v3600_v13, %v9227_v21  ;;  %v3816_v27 = vsub.f32 %v3800_v24, %v3808_v61  ;;  %v3802_v52 = vld [vmem:[%s10221_s3 + $0x10] sm:$0xff] }
 0x584   :  { %v3733_v48 = vmul.f32 %v5355_v12, %v9290_v45  ;;  %v3727_v62 = vmul.f32 %v5353_v31, %v3726_v15  ;;  %vm3739_vm6 = vweird.f32 %v5355_v12  ;;  %v3622_v42 = vadd.f32 %v9252_v34, %v9126_v22  ;;  %v3699_v22 = vld [vmem:[%s10220_s2 + $0x18] sm:$0xff] }
 0x585   :  { %5356 = vrsqrt.f32 %v9311_v36  ;;  %v9320_v6 = vmul.f32 0.00048828125, %v3636_v19  ;;  %v3660_v40 = vadd.f32 %v3652_v44, %v3644_v56  ;;  %3994 = vperm.xlu2 %5348, %v3816_v27   ;;  %vm3740_vm8 = vmor %vm3738_vm7, %vm3739_vm6  ;;  %v3646_v13 = vadd.f32 %v9254_v58, %v9133_v16 }
 0x586   :  { %v3734_v54 = vmul.f32 %v5355_v12, %v3733_v48  ;;  %v3731_v41 = vsel %vm3730_vm5, %v5353_v31, %v3727_v62  ;;  %v3645_v31 = vadd.f32 %v9250_v23, %v9122_v59  ;;  %vm3748_vm10 = vweird.f32 %v9311_v36 }
 0x587   :  { %v3684_v21 = vmul.f32 %v9320_v6, %v9320_v6  ;;  %v3676_v18 = vmul.f32 0.00048828125, %v3660_v40  ;;  %v3793_v2 = vmul.f32 %v3731_v41, %v3697_v55 }
 0x588   :  { %v3735_v53 = vmul.f32 0.5, %v3734_v54  ;;  %v3317_v0 = vpop.xlane.xlu2 %3316 }
 0x589   :  { %v3692_v9 = vsub.f32 %v3676_v18, %v3684_v21  ;;  %v3629_v5 = vadd.f32 %v3317_v0, %v9232_v1  ;;  %v3809_v25 = vmul.f32 %v3793_v2, %v9272_v60  ;;  %v3803_v18 = vld [vmem:[%s10221_s3 + $0x18] sm:$0xff] }
 0x58a   :  { %v3736_v29 = vsub.f32 1.5, %v3735_v53  ;;  %v3605_v39 = vpop.xlane.xlu1 %3604 }
 0x58b   :  { %v5357_v3 = vpop.eup %5356  ;;  %v9333_v46 = vadd.f32 1e-05, %v3692_v9  ;;  %v3637_v43 = vadd.f32 %v3629_v5, %v3621_v50  ;;  %v3653_v47 = vadd.f32 %v3605_v39, %v9234_v33  ;;  %v3817_v28 = vsub.f32 %v3801_v8, %v3809_v25 }
 0x58c   :  { %v3743_v11 = vmul.f32 %v5357_v3, %v9311_v36  ;;  %v3737_v1 = vmul.f32 %v5355_v12, %v3736_v29  ;;  %vm3749_vm9 = vweird.f32 %v5357_v3  ;;  %v3647_v50 = vadd.f32 %v9258_v20, %v9150_v17 }
 0x58d   :  { %5358 = vrsqrt.f32 %v9333_v46  ;;  %v9342_v59 = vmul.f32 0.00048828125, %v3637_v43  ;;  %v3661_v23 = vadd.f32 %v3653_v47, %v3645_v31  ;;  %3831 = vperm.xlu2 %5348, %v3793_v2   ;;  %3999 = vperm.xlu0 %5349, %v3817_v28   ;;  %vm3750_vm11 = vmor %vm3748_vm10, %vm3749_vm9  ;;  %v3623_v2 = vadd.f32 %v9256_v4, %v9146_v63  ;;  %v3700_v63 = vld [vmem:[%s10220_s2 + $0x20] sm:$0xff] }
 0x58e   :  { %v3744_v33 = vmul.f32 %v5357_v3, %v3743_v11  ;;  %v3741_v60 = vsel %vm3740_vm8, %v5355_v12, %v3737_v1  ;;  %vm3758_vm13 = vweird.f32 %v9333_v46  ;;  %v3804_v11 = vld [vmem:[%s10221_s3 + $0x20] sm:$0xff] }
 0x58f   :  { %v3685_v45 = vmul.f32 %v9342_v59, %v9342_v59  ;;  %v3677_v51 = vmul.f32 0.00048828125, %v3661_v23  ;;  %v3794_v57 = vmul.f32 %v3741_v60, %v3698_v26 }
 0x590   :  { %v3745_v24 = vmul.f32 0.5, %v3744_v33  ;;  %v3322_v35 = vpop.xlane.xlu0 %3321 }
 0x591   :  { %v3693_v61 = vsub.f32 %v3677_v51, %v3685_v45  ;;  %v3630_v56 = vadd.f32 %v3322_v35, %v9236_v14  ;;  %v3810_v15 = vmul.f32 %v3794_v57, %v9283_v10 }
 0x592   :  { %v3746_v12 = vsub.f32 1.5, %v3745_v24  ;;  %v3610_v19 = vpop.xlane.xlu2 %3609 }
 0x593   :  { %v5359_v44 = vpop.eup %5358  ;;  %v9356_v27 = vadd.f32 1e-05, %v3693_v61  ;;  %v3638_v48 = vadd.f32 %v3630_v56, %v3622_v42  ;;  %v3654_v55 = vadd.f32 %v3610_v19, %v9238_v38  ;;  %v3818_v62 = vsub.f32 %v3802_v52, %v3810_v15 }
 0x594   :  { %v3747_v40 = vmul.f32 %v5357_v3, %v3746_v12  ;;  %v3753_v34 = vmul.f32 %v5359_v44, %v9333_v46  ;;  %vm3759_vm12 = vweird.f32 %v5359_v44  ;;  %v3702_v12 = vld [vmem:[%s10220_s2 + $0x30] sm:$0xff] }
 0x595   :  { %5360 = vrsqrt.f32 %v9356_v27  ;;  %v9365_v58 = vmul.f32 0.00048828125, %v3638_v48  ;;  %v3662_v16 = vadd.f32 %v3654_v55, %v3646_v13  ;;  %3836 = vperm.xlu0 %5349, %v3794_v57   ;;  %4004 = vperm.xlu1 %5347, %v3818_v62   ;;  %vm3760_vm14 = vmor %vm3758_vm13, %vm3759_vm12  ;;  %vm3768_vm0 = vweird.f32 %v9356_v27  ;;  %v3701_v57 = vld [vmem:[%s10220_s2 + $0x28] sm:$0xff] }
 0x596   :  { %v3754_v14 = vmul.f32 %v5359_v44, %v3753_v34  ;;  %v3751_v38 = vsel %vm3750_vm11, %v5357_v3, %v3747_v40 }
 0x597   :  { %v3686_v10 = vmul.f32 %v9365_v58, %v9365_v58  ;;  %v3678_v36 = vmul.f32 0.00048828125, %v3662_v16  ;;  %v3795_v54 = vmul.f32 %v3751_v38, %v3699_v22  ;;  %v3806_v22 = vld [vmem:[%s10221_s3 + $0x30] sm:$0xff]  ;;  %v3703_v16 = vld [vmem:[%s10220_s2 + $0x38] sm:$0xff] }
 0x598   :  { %v3755_v41 = vmul.f32 0.5, %v3754_v14  ;;  %v3327_v21 = vpop.xlane.xlu1 %3326 }
 0x599   :  { %v3694_v53 = vsub.f32 %v3678_v36, %v3686_v10  ;;  %v3631_v0 = vadd.f32 %v3327_v21, %v9240_v49  ;;  %v3811_v8 = vmul.f32 %v3795_v54, %v9298_v32 }
 0x59a   :  { %v3756_v9 = vsub.f32 1.5, %v3755_v41  ;;  %v3615_v5 = vpop.xlane.xlu0 %3614 }
 0x59b   :  { %v5361_v25 = vpop.eup %5360  ;;  %v3710_v31 = vadd.f32 1e-05, %v3694_v53  ;;  %v3639_v29 = vadd.f32 %v3631_v0, %v3623_v2  ;;  %v3655_v39 = vadd.f32 %v3615_v5, %v9242_v7  ;;  %v3819_v3 = vsub.f32 %v3803_v18, %v3811_v8  ;;  %v10929_v0 = vld [vmem:[#allocation35_spill] sm:$0xff]  ;;  %v10931_v5 = vld [vmem:[#allocation48_spill] sm:$0xff] }
 0x59c   :  { %v3763_v4 = vmul.f32 %v5361_v25, %v9356_v27  ;;  %v3757_v49 = vmul.f32 %v5359_v44, %v3756_v9  ;;  %vm3769_vm15 = vweird.f32 %v5361_v25 }
 0x59d   :  { %5362 = vrsqrt.f32 %v3710_v31  ;;  %v9384_v20 = vmul.f32 0.00048828125, %v3639_v29  ;;  %v3663_v17 = vadd.f32 %v3655_v39, %v3647_v50  ;;  %4009 = vperm.xlu2 %5348, %v3819_v3   ;;  %3841 = vperm.xlu1 %5347, %v3795_v54   ;;  %vm3770_vm1 = vmor %vm3768_vm0, %vm3769_vm15  ;;  %vm3778_vm3 = vweird.f32 %v3710_v31  ;;  %v3807_v54 = vld [vmem:[%s10221_s3 + $0x38] sm:$0xff]  ;;  %v10930_v50 = vld [vmem:[#allocation26_spill] sm:$0xff] }
 0x59e   :  { %v3764_v32 = vmul.f32 %v5361_v25, %v3763_v4  ;;  %v3761_v7 = vsel %vm3760_vm14, %v5359_v44, %v3757_v49  ;;  %v3805_v44 = vld [vmem:[%s10221_s3 + $0x28] sm:$0xff]  ;;  %v10933_v39 = vld [vmem:[#allocation83_spill] sm:$0xff]  ;;  %v10934_v4 = vld [vmem:[#allocation58_spill] sm:$0xff] }
 0x59f   :  { %v3687_v46 = vmul.f32 %v9384_v20, %v9384_v20  ;;  %v3679_v43 = vmul.f32 0.00048828125, %v3663_v17  ;;  %v3796_v47 = vmul.f32 %v3761_v7, %v3700_v63 }
 0x5a0   :  { %v3765_v28 = vmul.f32 0.5, %v3764_v32  ;;  %v10937_v32 = vld [vmem:[#allocation16_spill] sm:$0xff] }
 0x5a1   :  { %v3695_v26 = vsub.f32 %v3679_v43, %v3687_v46  ;;  %v3812_v1 = vmul.f32 %v3796_v47, %v9320_v6  ;;  %v10938_v46 = vld [vmem:[#allocation20_spill] sm:$0xff] }
 0x5a2   :  { %v3766_v23 = vsub.f32 1.5, %v3765_v28 }
 0x5a3   :  { %v5363_v33 = vpop.eup %5362  ;;  %v3711_v60 = vadd.f32 1e-05, %v3695_v26  ;;  %v3820_v45 = vsub.f32 %v3804_v11, %v3812_v1  ;;  %v10940_v11 = vld [vmem:[#allocation87_spill] sm:$0xff]  ;;  %v10941_v1 = vld [vmem:[#allocation105_spill] sm:$0xff] }
 0x5a4   :  { %v3773_v51 = vmul.f32 %v5363_v33, %v3710_v31  ;;  %v3767_v24 = vmul.f32 %v5361_v25, %v3766_v23  ;;  %vm3779_vm2 = vweird.f32 %v5363_v33  ;;  %v10932_v31 = vld [vmem:[#allocation118_spill] sm:$0xff] }
 0x5a5   :  { %5364 = vrsqrt.f32 %v3711_v60  ;;  %3846 = vperm.xlu2 %5348, %v3796_v47   ;;  %4014 = vperm.xlu0 %5349, %v3820_v45   ;;  %vm3780_vm4 = vmor %vm3778_vm3, %vm3779_vm2  ;;  %vm3788_vm6 = vweird.f32 %v3711_v60  ;;  %v10939_v47 = vld [vmem:[#allocation94_spill] sm:$0xff]  ;;  %v10943_v45 = vld [vmem:[#allocation121_spill] sm:$0xff] }
 0x5a6   :  { %v3774_v35 = vmul.f32 %v5363_v33, %v3773_v51  ;;  %v3771_v52 = vsel %vm3770_vm1, %v5361_v25, %v3767_v24 }
 0x5a7   :  { %v3797_v6 = vmul.f32 %v3771_v52, %v3701_v57  ;;  %v10944_v57 = vld [vmem:[#allocation122_spill] sm:$0xff] }
 0x5a8   :  { %v3775_v42 = vmul.f32 0.5, %v3774_v35  ;;  %v10945_v35 = vld [vmem:[#allocation56_spill] sm:$0xff] }
 0x5a9   :  { %3851 = vperm.xlu1 %5347, %v3797_v6   ;;  %v3813_v15 = vmul.f32 %v3797_v6, %v9342_v59  ;;  %v10946_v6 = vld [vmem:[#allocation70_spill] sm:$0xff] }
 0x5aa   :  { %v3776_v61 = vsub.f32 1.5, %v3775_v42 }
 0x5ab   :  { %v5365_v56 = vpop.eup %5364  ;;  %v3821_v62 = vsub.f32 %v3805_v44, %v3813_v15 }
 0x5ac   :  { %v3783_v13 = vmul.f32 %v5365_v56, %v3711_v60  ;;  %v3777_v19 = vmul.f32 %v5363_v33, %v3776_v61  ;;  %vm3789_vm5 = vweird.f32 %v5365_v56 }
 0x5ad   :  { %vm3790_vm7 = vmor %vm3788_vm6, %vm3789_vm5 }
 0x5ae   :  { %v3784_v27 = vmul.f32 %v5365_v56, %v3783_v13  ;;  %v3781_v48 = vsel %vm3780_vm4, %v5363_v33, %v3777_v19  ;;  %v10942_v33 = vld [vmem:[#allocation18_spill] sm:$0xff] }
 0x5af   :  { %v3798_v55 = vmul.f32 %v3781_v48, %v3702_v12 }
 0x5b0   :  { %v3785_v40 = vmul.f32 0.5, %v3784_v27 }
 0x5b1   :  { %3856 = vperm.xlu2 %5348, %v3798_v55   ;;  %4019 = vperm.xlu1 %5347, %v3821_v62   ;;  %v3814_v34 = vmul.f32 %v3798_v55, %v9365_v58  ;;  %v10947_v62 = vld [vmem:[#allocation11_spill] sm:$0xff] }
 0x5b2   :  { %v3786_v59 = vsub.f32 1.5, %v3785_v40 }
 0x5b3   :  { %v3822_v10 = vsub.f32 %v3806_v22, %v3814_v34 }
 0x5b4   :  { %v3787_v14 = vmul.f32 %v5365_v56, %v3786_v59  ;;  %v10948_v59 = vld [vmem:[#allocation107_spill] sm:$0xff] }
 0x5b6   :  { %v3791_v38 = vsel %vm3790_vm7, %v5365_v56, %v3787_v14  ;;  %v10949_v14 = vld [vmem:[#allocation31_spill] sm:$0xff] }
 0x5b7   :  { %v3799_v36 = vmul.f32 %v3791_v38, %v3703_v16 }
 0x5b9   :  { %4024 = vperm.xlu2 %5348, %v3822_v10   ;;  %3861 = vperm.xlu1 %5347, %v3799_v36   ;;  %v3815_v58 = vmul.f32 %v3799_v36, %v9384_v20  ;;  %v10950_v10 = vld [vmem:[#allocation23_spill] sm:$0xff] }
 0x5bb   :  { %v3823_v41 = vsub.f32 %v3807_v54, %v3815_v58  ;;  %v10951_v54 = vld [vmem:[#allocation45_spill] sm:$0xff] }
 0x5bd   :  { %4029 = vperm.xlu0 %5349, %v3823_v41   ;;  %v10952_v41 = vld [vmem:[#allocation34_spill] sm:$0xff] }
 0x5df   :  { %v3995_v21 = vpop.permute.xlu2 %3994 }
 0x5e7   :  { %v3832_v18 = vpop.permute.xlu2 %3831 }
 0x5e8   :  { %v3868_v2 = vmul.f32 %v3832_v18, %v10777_v30  ;;  %v3869_v53 = vmul.f32 %v3832_v18, %v10776_v37  ;;  %v3900_v8 = vmul.f32 %v3832_v18, %v10929_v0  ;;  %v3901_v9 = vmul.f32 %v3832_v18, %v10930_v50  ;;  %v10935_v30 = vld [vmem:[#allocation81_spill] sm:$0xff]  ;;  %v10953_v50 = vld [vmem:[#allocation78_spill] sm:$0xff] }
 0x5e9   :  { %v9420_v25 = vmul.f32 %v3832_v18, %v10931_v5  ;;  %v9423_v29 = vmul.f32 %v3832_v18, %v10932_v31  ;;  %v9426_v3 = vmul.f32 %v3832_v18, %v10933_v39  ;;  %v9429_v63 = vmul.f32 %v3832_v18, %v10934_v4  ;;  %v10936_v37 = vld [vmem:[#allocation97_spill] sm:$0xff] }
 0x5ea   :  { %v9432_v20 = vmul.f32 %v3832_v18, %v10935_v30  ;;  %v9435_v17 = vmul.f32 %v3832_v18, %v10936_v37  ;;  %v9438_v7 = vmul.f32 %v3832_v18, %v10937_v32  ;;  %v9441_v43 = vmul.f32 %v3832_v18, %v10938_v46  ;;  %v10954_v31 = vld [vmem:[#allocation49_spill] sm:$0xff] }
 0x5f3   :  { %v3827_v49 = vpop.permute.xlu1 %3826 }
 0x5f4   :  { %v3866_v28 = vmul.f32 %v3827_v49, %v10939_v47  ;;  %v3867_v26 = vmul.f32 %v3827_v49, %v10940_v11  ;;  %v3898_v23 = vmul.f32 %v3827_v49, %v10941_v1  ;;  %v3899_v60 = vmul.f32 %v3827_v49, %v10942_v33 }
 0x5f5   :  { %v3930_v51 = vmul.f32 %v3827_v49, %v10943_v45  ;;  %v3931_v24 = vmul.f32 %v3827_v49, %v10944_v57  ;;  %v3962_v52 = vmul.f32 %v3827_v49, %v10945_v35  ;;  %v3963_v42 = vmul.f32 %v3827_v49, %v10946_v6 }
 0x5f6   :  { %v4034_v61 = vadd.f32 %v3995_v21, %v3866_v28  ;;  %v4035_v56 = vadd.f32 %v3995_v21, %v3867_v26  ;;  %v4066_v15 = vadd.f32 %v3995_v21, %v3898_v23  ;;  %v4067_v13 = vadd.f32 %v3995_v21, %v3899_v60  ;;  %v10955_v23 = vld [vmem:[#allocation123_spill] sm:$0xff] }
 0x5f7   :  { %v4098_v12 = vadd.f32 %v3995_v21, %v3930_v51  ;;  %v4099_v19 = vadd.f32 %v3995_v21, %v3931_v24  ;;  %v4130_v44 = vadd.f32 %v3995_v21, %v3962_v52  ;;  %v4131_v27 = vadd.f32 %v3995_v21, %v3963_v42  ;;  %v10956_v51 = vld [vmem:[#allocation124_spill] sm:$0xff]  ;;  %v10957_v52 = vld [vmem:[#allocation46_spill] sm:$0xff]  ;;  %v10958_v42 = vld [vmem:[#allocation57_spill] sm:$0xff] }
 0x5f8   :  { %v4162_v48 = vmax.f32 %v4034_v61, %v4066_v15  ;;  %v4163_v55 = vmax.f32 %v4035_v56, %v4067_v13  ;;  %v3864_v40 = vmul.f32 %v3827_v49, %v10947_v62  ;;  %v3865_v34 = vmul.f32 %v3827_v49, %v10948_v59 }
 0x5f9   :  { %v4194_v22 = vmax.f32 %v4098_v12, %v4130_v44  ;;  %v4195_v16 = vmax.f32 %v4099_v19, %v4131_v27  ;;  %v3896_v38 = vmul.f32 %v3827_v49, %v10949_v14  ;;  %v3897_v36 = vmul.f32 %v3827_v49, %v10950_v10 }
 0x5fa   :  { %v3928_v58 = vmul.f32 %v3827_v49, %v10951_v54  ;;  %v3929_v0 = vmul.f32 %v3827_v49, %v10952_v41  ;;  %v3960_v5 = vmul.f32 %v3827_v49, %v10953_v50  ;;  %v3961_v39 = vmul.f32 %v3827_v49, %v10954_v31  ;;  %v10960_v50 = vld [vmem:[#allocation9_spill] sm:$0xff] }
 0x5fb   :  { %v4226_v4 = vmax.f32 %v4162_v48, %v4194_v22  ;;  %v4227_v30 = vmax.f32 %v4163_v55, %v4195_v16  ;;  %v4032_v37 = vadd.f32 %v3995_v21, %v3864_v40  ;;  %v4033_v32 = vadd.f32 %v3995_v21, %v3865_v34 }
 0x5fc   :  { %v4064_v46 = vadd.f32 %v3995_v21, %v3896_v38  ;;  %v4065_v47 = vadd.f32 %v3995_v21, %v3897_v36  ;;  %v4096_v28 = vadd.f32 %v3995_v21, %v3928_v58  ;;  %v4097_v11 = vadd.f32 %v3995_v21, %v3929_v0  ;;  %v10959_v0 = vld [vmem:[#allocation15_spill] sm:$0xff] }
 0x5fd   :  { %5366 = vtanh.f32 %v4226_v4  ;;  %v4128_v26 = vadd.f32 %v3995_v21, %v3960_v5  ;;  %v4129_v1 = vadd.f32 %v3995_v21, %v3961_v39  ;;  %v3934_v33 = vmul.f32 %v3832_v18, %v10955_v23  ;;  %v10961_v4 = vld [vmem:[#allocation37_spill] sm:$0xff] }
 0x5fe   :  { %5368 = vtanh.f32 %v4227_v30  ;;  %v4160_v60 = vmax.f32 %v4032_v37, %v4064_v46  ;;  %v4161_v45 = vmax.f32 %v4033_v32, %v4065_v47  ;;  %v3935_v57 = vmul.f32 %v3832_v18, %v10956_v51  ;;  %v10962_v37 = vld [vmem:[#allocation29_spill] sm:$0xff]  ;;  %v10965_v51 = vld [vmem:[#allocation88_spill] sm:$0xff] }
 0x5ff   :  { %v4000_v24 = vpop.permute.xlu0 %3999  ;;  %v4192_v49 = vmax.f32 %v4096_v28, %v4128_v26  ;;  %v4193_v35 = vmax.f32 %v4097_v11, %v4129_v1  ;;  %v3966_v6 = vmul.f32 %v3832_v18, %v10957_v52  ;;  %v3967_v61 = vmul.f32 %v3832_v18, %v10958_v42  ;;  %v10963_v11 = vld [vmem:[#allocation51_spill] sm:$0xff]  ;;  %v10964_v1 = vld [vmem:[#allocation120_spill] sm:$0xff] }
 0x600   :  { %v4036_v56 = vadd.f32 %v4000_v24, %v3868_v2  ;;  %v4037_v15 = vadd.f32 %v4000_v24, %v3869_v53  ;;  %v4068_v13 = vadd.f32 %v4000_v24, %v3900_v8  ;;  %v4069_v12 = vadd.f32 %v4000_v24, %v3901_v9 }
 0x601   :  { %v4224_v19 = vmax.f32 %v4160_v60, %v4192_v49  ;;  %v4225_v21 = vmax.f32 %v4161_v45, %v4193_v35  ;;  %v4100_v44 = vadd.f32 %v4000_v24, %v9420_v25  ;;  %v4101_v27 = vadd.f32 %v4000_v24, %v9423_v29 }
 0x602   :  { %v4132_v48 = vadd.f32 %v4000_v24, %v9426_v3  ;;  %v4133_v55 = vadd.f32 %v4000_v24, %v9429_v63  ;;  %v4164_v62 = vmax.f32 %v4036_v56, %v4068_v13  ;;  %v4165_v40 = vmax.f32 %v4037_v15, %v4069_v12 }
 0x603   :  { %v9467_v59 = vpop.eup %5366  ;;  %5370 = vtanh.f32 %v4224_v19  ;;  %v4038_v18 = vadd.f32 %v4000_v24, %v9432_v20  ;;  %v4039_v2 = vadd.f32 %v4000_v24, %v9435_v17  ;;  %v4070_v53 = vadd.f32 %v4000_v24, %v9438_v7 }
 0x604   :  { %v9472_v8 = vpop.eup %5368  ;;  %5372 = vtanh.f32 %v4225_v21  ;;  %v4196_v9 = vmax.f32 %v4100_v44, %v4132_v48  ;;  %v4197_v25 = vmax.f32 %v4101_v27, %v4133_v55  ;;  %v4649_v29 = vmul.f32 %v9467_v59, %v9467_v59 }
 0x605   :  { %v4636_v3 = vadd.f32 %v9472_v8, %v9467_v59  ;;  %v4650_v63 = vmul.f32 %v9472_v8, %v9472_v8  ;;  %v4071_v20 = vadd.f32 %v4000_v24, %v9441_v43  ;;  %v4102_v34 = vadd.f32 %v4000_v24, %v3934_v33 }
 0x606   :  { %v4228_v17 = vmax.f32 %v4164_v62, %v4196_v9  ;;  %v4229_v22 = vmax.f32 %v4165_v40, %v4197_v25  ;;  %v4103_v7 = vadd.f32 %v4000_v24, %v3935_v57  ;;  %v4134_v16 = vadd.f32 %v4000_v24, %v3966_v6  ;;  %v10967_v62 = vld [vmem:[#allocation92_spill] sm:$0xff]  ;;  %v9535_v25 = vpop.permute.xlu2 %4009 }
 0x607   :  { %4637 = vadd.xlane.f32.xlu2 %v4636_v3  ;;  %v9481_v14 = vpop.permute.xlu0 %3836  ;;  %v9483_v38 = vpop.permute.xlu1 %4004  ;;  %v9485_v10 = vadd.f32 %v4650_v63, %v4649_v29  ;;  %v4135_v36 = vadd.f32 %v4000_v24, %v3967_v61  ;;  %v4166_v54 = vmax.f32 %v4038_v18, %v4070_v53  ;;  %v4167_v58 = vmax.f32 %v4039_v2, %v4071_v20  ;;  %v10966_v24 = vld [vmem:[#allocation89_spill] sm:$0xff]  ;;  %v10968_v29 = vld [vmem:[#allocation19_spill] sm:$0xff]  ;;  %v10969_v63 = vld [vmem:[#allocation10_spill] sm:$0xff] }
 0x608   :  { %5374 = vtanh.f32 %v4228_v17  ;;  %v4198_v41 = vmax.f32 %v4102_v34, %v4134_v16  ;;  %v3872_v43 = vmul.f32 %v9481_v14, %v10959_v0  ;;  %v3873_v5 = vmul.f32 %v9481_v14, %v10960_v50  ;;  %v10970_v34 = vld [vmem:[#allocation8_spill] sm:$0xff] }
 0x609   :  { %v9491_v31 = vpop.eup %5370  ;;  %5376 = vtanh.f32 %v4229_v22  ;;  %v4199_v39 = vmax.f32 %v4103_v7, %v4135_v36  ;;  %v3904_v30 = vmul.f32 %v9481_v14, %v10961_v4  ;;  %v3905_v32 = vmul.f32 %v9481_v14, %v10962_v37  ;;  %v10971_v22 = vld [vmem:[#allocation5_spill] sm:$0xff]  ;;  %v10975_v37 = vld [vmem:[#allocation75_spill] sm:$0xff] }
 0x60a   :  { %v9497_v46 = vpop.eup %5372  ;;  %v4317_v47 = vmul.f32 %v9491_v31, %v9491_v31  ;;  %v4230_v28 = vmax.f32 %v4166_v54, %v4198_v41  ;;  %v3936_v26 = vmul.f32 %v9481_v14, %v10963_v11  ;;  %v3937_v23 = vmul.f32 %v9481_v14, %v10964_v1  ;;  %v10972_v41 = vld [vmem:[#allocation55_spill] sm:$0xff]  ;;  %v10974_v4 = vld [vmem:[#allocation93_spill] sm:$0xff] }
 0x60b   :  { %v4304_v33 = vadd.f32 %v9497_v46, %v9491_v31  ;;  %v4318_v60 = vmul.f32 %v9497_v46, %v9497_v46  ;;  %v4231_v45 = vmax.f32 %v4167_v58, %v4199_v39  ;;  %v3968_v57 = vmul.f32 %v9481_v14, %v10965_v51 }
 0x60c   :  { %5378 = vtanh.f32 %v4230_v28  ;;  %v3969_v49 = vmul.f32 %v9481_v14, %v10966_v24  ;;  %v4040_v35 = vadd.f32 %v9483_v38, %v3872_v43  ;;  %v4041_v52 = vadd.f32 %v9483_v38, %v3873_v5  ;;  %v10973_v5 = vld [vmem:[#allocation44_spill] sm:$0xff] }
 0x60d   :  { %4305 = vadd.xlane.f32.xlu1 %v4304_v33  ;;  %v4321_v6 = vadd.f32 %v4318_v60, %v4317_v47  ;;  %5380 = vtanh.f32 %v4231_v45  ;;  %v4072_v42 = vadd.f32 %v9483_v38, %v3904_v30  ;;  %v4073_v61 = vadd.f32 %v9483_v38, %v3905_v32 }
 0x60e   :  { %v9517_v56 = vpop.eup %5374  ;;  %v4104_v15 = vadd.f32 %v9483_v38, %v3936_v26  ;;  %v4105_v13 = vadd.f32 %v9483_v38, %v3937_v23  ;;  %v4136_v12 = vadd.f32 %v9483_v38, %v3968_v57  ;;  %v4137_v19 = vadd.f32 %v9483_v38, %v3969_v49 }
 0x60f   :  { %v9523_v21 = vpop.eup %5376  ;;  %4322 = vadd.xlane.f32.xlu0 %v4321_v6  ;;  %v9525_v44 = vpop.permute.xlu1 %3841  ;;  %v4319_v27 = vmul.f32 %v9517_v56, %v9517_v56  ;;  %v4168_v48 = vmax.f32 %v4040_v35, %v4072_v42  ;;  %v4169_v55 = vmax.f32 %v4041_v52, %v4073_v61  ;;  %v3874_v40 = vmul.f32 %v9481_v14, %v10967_v62  ;;  %v10976_v35 = vld [vmem:[#allocation86_spill] sm:$0xff]  ;;  %v10977_v42 = vld [vmem:[#allocation113_spill] sm:$0xff] }
 0x610   :  { %v4307_v18 = vadd.f32 %v9523_v21, %v9517_v56  ;;  %v4320_v2 = vmul.f32 %v9523_v21, %v9523_v21  ;;  %v4200_v53 = vmax.f32 %v4104_v15, %v4136_v12  ;;  %v4201_v9 = vmax.f32 %v4105_v13, %v4137_v19  ;;  %v10978_v15 = vld [vmem:[#allocation109_spill] sm:$0xff] }
 0x611   :  { %v3876_v3 = vmul.f32 %v9525_v44, %v10968_v29  ;;  %v3877_v20 = vmul.f32 %v9525_v44, %v10969_v63  ;;  %v3908_v17 = vmul.f32 %v9525_v44, %v10970_v34  ;;  %v3909_v7 = vmul.f32 %v9525_v44, %v10971_v22  ;;  %v10979_v12 = vld [vmem:[#allocation125_spill] sm:$0xff]  ;;  %v9593_v34 = vpop.permute.xlu2 %3846 }
 0x612   :  { %v9545_v16 = vpop.eup %5378  ;;  %4308 = vadd.xlane.f32.xlu2 %v4307_v18  ;;  %v4324_v36 = vadd.f32 %v4320_v2, %v4319_v27  ;;  %v4232_v54 = vmax.f32 %v4168_v48, %v4200_v53  ;;  %v4233_v58 = vmax.f32 %v4169_v55, %v4201_v9  ;;  %v3940_v0 = vmul.f32 %v9525_v44, %v10972_v41  ;;  %v10980_v48 = vld [vmem:[#allocation126_spill] sm:$0xff]  ;;  %v10982_v18 = vld [vmem:[#allocation61_spill] sm:$0xff] }
 0x613   :  { %v9549_v43 = vpop.eup %5380  ;;  %v4651_v50 = vmul.f32 %v9545_v16, %v9545_v16  ;;  %v3941_v39 = vmul.f32 %v9525_v44, %v10973_v5  ;;  %v3972_v30 = vmul.f32 %v9525_v44, %v10974_v4  ;;  %v3973_v32 = vmul.f32 %v9525_v44, %v10975_v37  ;;  %v10981_v55 = vld [vmem:[#allocation54_spill] sm:$0xff] }
 0x614   :  { %v4639_v47 = vadd.f32 %v9549_v43, %v9545_v16  ;;  %v4652_v28 = vmul.f32 %v9549_v43, %v9549_v43  ;;  %5382 = vtanh.f32 %v4232_v54  ;;  %v4044_v11 = vadd.f32 %v9535_v25, %v3876_v3  ;;  %v10983_v37 = vld [vmem:[#allocation22_spill] sm:$0xff] }
 0x615   :  { %5384 = vtanh.f32 %v4233_v58  ;;  %v4045_v26 = vadd.f32 %v9535_v25, %v3877_v20  ;;  %v4076_v1 = vadd.f32 %v9535_v25, %v3908_v17  ;;  %v4077_v23 = vadd.f32 %v9535_v25, %v3909_v7 }
 0x616   :  { %4640 = vadd.xlane.f32.xlu1 %v4639_v47  ;;  %v4656_v33 = vadd.f32 %v4652_v28, %v4651_v50  ;;  %v4108_v60 = vadd.f32 %v9535_v25, %v3940_v0  ;;  %v4109_v45 = vadd.f32 %v9535_v25, %v3941_v39  ;;  %v4140_v51 = vadd.f32 %v9535_v25, %v3972_v30  ;;  %v10984_v47 = vld [vmem:[#allocation12_spill] sm:$0xff] }
 0x617   :  { %4654 = vadd.xlane.f32.xlu0 %v9485_v10  ;;  %v4141_v57 = vadd.f32 %v9535_v25, %v3973_v32  ;;  %v4172_v24 = vmax.f32 %v4044_v11, %v4076_v1  ;;  %v4173_v49 = vmax.f32 %v4045_v26, %v4077_v23  ;;  %v3875_v52 = vmul.f32 %v9481_v14, %v10976_v35  ;;  %v9608_v39 = vpop.permute.xlu0 %4014  ;;  %v10985_v1 = vld [vmem:[#allocation38_spill] sm:$0xff] }
 0x618   :  { %v4204_v6 = vmax.f32 %v4108_v60, %v4140_v51  ;;  %v3906_v61 = vmul.f32 %v9481_v14, %v10977_v42  ;;  %v3907_v13 = vmul.f32 %v9481_v14, %v10978_v15  ;;  %v3938_v19 = vmul.f32 %v9481_v14, %v10979_v12  ;;  %v10987_v60 = vld [vmem:[#allocation59_spill] sm:$0xff] }
 0x619   :  { %v4205_v27 = vmax.f32 %v4109_v45, %v4141_v57  ;;  %v3939_v10 = vmul.f32 %v9481_v14, %v10980_v48  ;;  %v3970_v62 = vmul.f32 %v9481_v14, %v10981_v55  ;;  %v3971_v2 = vmul.f32 %v9481_v14, %v10982_v18  ;;  %v10988_v45 = vld [vmem:[#allocation52_spill] sm:$0xff] }
 0x61a   :  { %v9586_v53 = vpop.eup %5382  ;;  %4657 = vadd.xlane.f32.xlu2 %v4656_v33  ;;  %v4236_v9 = vmax.f32 %v4172_v24, %v4204_v6  ;;  %v4042_v29 = vadd.f32 %v9483_v38, %v3874_v40  ;;  %v4043_v3 = vadd.f32 %v9483_v38, %v3875_v52  ;;  %v4074_v63 = vadd.f32 %v9483_v38, %v3906_v61  ;;  %v10986_v33 = vld [vmem:[#allocation33_spill] sm:$0xff]  ;;  %v10989_v57 = vld [vmem:[#allocation96_spill] sm:$0xff] }
 0x61b   :  { %v9591_v20 = vpop.eup %5384  ;;  %v4400_v17 = vmul.f32 %v9586_v53, %v9586_v53  ;;  %v9597_v22 = vpop.permute.xlu1 %3851  ;;  %v4237_v14 = vmax.f32 %v4173_v49, %v4205_v27  ;;  %v4075_v7 = vadd.f32 %v9483_v38, %v3907_v13  ;;  %v4106_v54 = vadd.f32 %v9483_v38, %v3938_v19  ;;  %v10990_v49 = vld [vmem:[#allocation80_spill] sm:$0xff] }
 0x61c   :  { %v4401_v40 = vmul.f32 %v9591_v20, %v9591_v20  ;;  %v4387_v58 = vadd.f32 %v9591_v20, %v9586_v53  ;;  %5386 = vtanh.f32 %v4236_v9  ;;  %v4107_v41 = vadd.f32 %v9483_v38, %v3939_v10 }
 0x61d   :  { %5388 = vtanh.f32 %v4237_v14  ;;  %v4138_v0 = vadd.f32 %v9483_v38, %v3970_v62  ;;  %v4139_v50 = vadd.f32 %v9483_v38, %v3971_v2  ;;  %v4170_v5 = vmax.f32 %v4042_v29, %v4074_v63  ;;  %v10991_v62 = vld [vmem:[#allocation102_spill] sm:$0xff]  ;;  %v10992_v14 = vld [vmem:[#allocation108_spill] sm:$0xff] }
 0x61e   :  { %4325 = vadd.xlane.f32.xlu1 %v4324_v36  ;;  %v4404_v4 = vadd.f32 %v4401_v40, %v4400_v17  ;;  %v4171_v30 = vmax.f32 %v4043_v3, %v4075_v7  ;;  %v3880_v32 = vmul.f32 %v9593_v34, %v10983_v37  ;;  %v3881_v28 = vmul.f32 %v9593_v34, %v10984_v47 }
 0x61f   :  { %v4202_v11 = vmax.f32 %v4106_v54, %v4138_v0  ;;  %v4203_v26 = vmax.f32 %v4107_v41, %v4139_v50  ;;  %v3912_v23 = vmul.f32 %v9593_v34, %v10985_v1  ;;  %v3913_v38 = vmul.f32 %v9593_v34, %v10986_v33  ;;  %v10993_v54 = vld [vmem:[#allocation112_spill] sm:$0xff] }
 0x620   :  { %4405 = vadd.xlane.f32.xlu0 %v4404_v4  ;;  %v3944_v36 = vmul.f32 %v9593_v34, %v10987_v60  ;;  %v3945_v51 = vmul.f32 %v9593_v34, %v10988_v45  ;;  %v3976_v24 = vmul.f32 %v9593_v34, %v10989_v57  ;;  %v3977_v35 = vmul.f32 %v9593_v34, %v10990_v49  ;;  %v10995_v0 = vld [vmem:[#allocation64_spill] sm:$0xff] }
 0x621   :  { %v4234_v52 = vmax.f32 %v4170_v5, %v4202_v11  ;;  %v4235_v6 = vmax.f32 %v4171_v30, %v4203_v26  ;;  %v4048_v42 = vadd.f32 %v9608_v39, %v3880_v32  ;;  %v4049_v61 = vadd.f32 %v9608_v39, %v3881_v28  ;;  %v10996_v5 = vld [vmem:[#allocation60_spill] sm:$0xff]  ;;  %v10997_v30 = vld [vmem:[#allocation62_spill] sm:$0xff] }
 0x622   :  { %v9628_v15 = vpop.eup %5386  ;;  %4388 = vadd.xlane.f32.xlu2 %v4387_v58  ;;  %v4080_v13 = vadd.f32 %v9608_v39, %v3912_v23  ;;  %v4081_v12 = vadd.f32 %v9608_v39, %v3913_v38  ;;  %v4112_v19 = vadd.f32 %v9608_v39, %v3944_v36  ;;  %v4113_v27 = vadd.f32 %v9608_v39, %v3945_v51  ;;  %v10994_v58 = vld [vmem:[#allocation32_spill] sm:$0xff]  ;;  %v10998_v28 = vld [vmem:[#allocation90_spill] sm:$0xff] }
 0x623   :  { %v9634_v48 = vpop.eup %5388  ;;  %5390 = vtanh.f32 %v4234_v52  ;;  %v4144_v10 = vadd.f32 %v9608_v39, %v3976_v24  ;;  %v4145_v55 = vadd.f32 %v9608_v39, %v3977_v35  ;;  %v3886_v18 = vmul.f32 %v9597_v22, %v10991_v62  ;;  %v4020_v9 = vpop.permute.xlu1 %4019  ;;  %v11002_v62 = vld [vmem:[#allocation7_spill] sm:$0xff] }
 0x624   :  { %v4390_v2 = vadd.f32 %v9634_v48, %v9628_v15  ;;  %5392 = vtanh.f32 %v4235_v6  ;;  %v4176_v29 = vmax.f32 %v4048_v42, %v4080_v13  ;;  %v4177_v3 = vmax.f32 %v4049_v61, %v4081_v12  ;;  %v10999_v13 = vld [vmem:[#allocation25_spill] sm:$0xff] }
 0x625   :  { %v4208_v63 = vmax.f32 %v4112_v19, %v4144_v10  ;;  %v4209_v17 = vmax.f32 %v4113_v27, %v4145_v55  ;;  %v3887_v7 = vmul.f32 %v9597_v22, %v10992_v14  ;;  %v3918_v40 = vmul.f32 %v9597_v22, %v10993_v54  ;;  %v11000_v19 = vld [vmem:[#allocation14_spill] sm:$0xff]  ;;  %v11001_v10 = vld [vmem:[#allocation39_spill] sm:$0xff]  ;;  %v9676_v14 = vpop.permute.xlu2 %3856 }
 0x626   :  { %4391 = vadd.xlane.f32.xlu1 %v4390_v2  ;;  %v3919_v41 = vmul.f32 %v9597_v22, %v10994_v58  ;;  %v3950_v50 = vmul.f32 %v9597_v22, %v10995_v0  ;;  %v3951_v4 = vmul.f32 %v9597_v22, %v10996_v5  ;;  %v3982_v37 = vmul.f32 %v9597_v22, %v10997_v30 }
 0x627   :  { %v4240_v32 = vmax.f32 %v4176_v29, %v4208_v63  ;;  %v4241_v47 = vmax.f32 %v4177_v3, %v4209_v17  ;;  %v3983_v11 = vmul.f32 %v9597_v22, %v10998_v28  ;;  %v4054_v26 = vadd.f32 %v4020_v9, %v3886_v18  ;;  %v11003_v63 = vld [vmem:[#allocation63_spill] sm:$0xff] }
 0x628   :  { %v4055_v1 = vadd.f32 %v4020_v9, %v3887_v7  ;;  %v4086_v23 = vadd.f32 %v4020_v9, %v3918_v40  ;;  %v4087_v33 = vadd.f32 %v4020_v9, %v3919_v41  ;;  %v4118_v38 = vadd.f32 %v4020_v9, %v3950_v50  ;;  %v11004_v7 = vld [vmem:[#allocation43_spill] sm:$0xff]  ;;  %v11006_v41 = vld [vmem:[#allocation85_spill] sm:$0xff] }
 0x629   :  { %v9656_v60 = vpop.eup %5390  ;;  %5394 = vtanh.f32 %v4240_v32  ;;  %v4119_v36 = vadd.f32 %v4020_v9, %v3951_v4  ;;  %v4150_v45 = vadd.f32 %v4020_v9, %v3982_v37  ;;  %v4151_v51 = vadd.f32 %v4020_v9, %v3983_v11  ;;  %v11005_v40 = vld [vmem:[#allocation99_spill] sm:$0xff] }
 0x62a   :  { %v9658_v57 = vpop.eup %5392  ;;  %5396 = vtanh.f32 %v4241_v47  ;;  %v4722_v24 = vmul.f32 %v9656_v60, %v9656_v60  ;;  %v4182_v49 = vmax.f32 %v4054_v26, %v4086_v23  ;;  %v4183_v35 = vmax.f32 %v4055_v1, %v4087_v33 }
 0x62b   :  { %v4709_v52 = vadd.f32 %v9658_v57, %v9656_v60  ;;  %v4723_v6 = vmul.f32 %v9658_v57, %v9658_v57  ;;  %v4214_v42 = vmax.f32 %v4118_v38, %v4150_v45  ;;  %v4215_v61 = vmax.f32 %v4119_v36, %v4151_v51  ;;  %v11007_v36 = vld [vmem:[#allocation100_spill] sm:$0xff]  ;;  %v11008_v51 = vld [vmem:[#allocation95_spill] sm:$0xff] }
 0x62c   :  { %v3884_v12 = vmul.f32 %v9597_v22, %v10999_v13  ;;  %v3885_v27 = vmul.f32 %v9597_v22, %v11000_v19  ;;  %v3916_v55 = vmul.f32 %v9597_v22, %v11001_v10  ;;  %v3917_v18 = vmul.f32 %v9597_v22, %v11002_v62  ;;  %v11012_v19 = vld [vmem:[#allocation47_spill] sm:$0xff]  ;;  %v11013_v10 = vld [vmem:[#allocation65_spill] sm:$0xff] }
 0x62d   :  { %4710 = vadd.xlane.f32.xlu2 %v4709_v52  ;;  %v4726_v2 = vadd.f32 %v4723_v6, %v4722_v24  ;;  %v4246_v29 = vmax.f32 %v4182_v49, %v4214_v42  ;;  %v4247_v3 = vmax.f32 %v4183_v35, %v4215_v61  ;;  %v3948_v17 = vmul.f32 %v9597_v22, %v11003_v63  ;;  %v11009_v6 = vld [vmem:[#allocation114_spill] sm:$0xff] }
 0x62e   :  { %v3949_v54 = vmul.f32 %v9597_v22, %v11004_v7  ;;  %v3980_v58 = vmul.f32 %v9597_v22, %v11005_v40  ;;  %v3981_v0 = vmul.f32 %v9597_v22, %v11006_v41  ;;  %v4052_v50 = vadd.f32 %v4020_v9, %v3884_v12  ;;  %v11010_v61 = vld [vmem:[#allocation110_spill] sm:$0xff]  ;;  %v11011_v12 = vld [vmem:[#allocation127_spill] sm:$0xff] }
 0x62f   :  { %v9684_v5 = vpop.eup %5394  ;;  %5398 = vtanh.f32 %v4246_v29  ;;  %v4053_v4 = vadd.f32 %v4020_v9, %v3885_v27  ;;  %v4084_v30 = vadd.f32 %v4020_v9, %v3916_v55  ;;  %v4085_v37 = vadd.f32 %v4020_v9, %v3917_v18 }
 0x630   :  { %v9686_v32 = vpop.eup %5396  ;;  %v4483_v47 = vmul.f32 %v9684_v5, %v9684_v5  ;;  %5400 = vtanh.f32 %v4247_v3  ;;  %v4116_v28 = vadd.f32 %v4020_v9, %v3948_v17  ;;  %v4117_v11 = vadd.f32 %v4020_v9, %v3949_v54  ;;  %v11015_v3 = vld [vmem:[#allocation66_spill] sm:$0xff] }
 0x631   :  { %v4484_v26 = vmul.f32 %v9686_v32, %v9686_v32  ;;  %v4470_v22 = vadd.f32 %v9686_v32, %v9684_v5  ;;  %v4148_v1 = vadd.f32 %v4020_v9, %v3980_v58  ;;  %v4149_v23 = vadd.f32 %v4020_v9, %v3981_v0 }
 0x632   :  { %v4180_v33 = vmax.f32 %v4052_v50, %v4084_v30  ;;  %v4181_v38 = vmax.f32 %v4053_v4, %v4085_v37  ;;  %v3878_v45 = vmul.f32 %v9525_v44, %v11007_v36  ;;  %v3879_v24 = vmul.f32 %v9525_v44, %v11008_v51  ;;  %v9722_v50 = vpop.permute.xlu2 %4024 }
 0x633   :  { %v4487_v49 = vadd.f32 %v4484_v26, %v4483_v47  ;;  %4471 = vadd.xlane.f32.xlu1 %v4470_v22  ;;  %v4212_v35 = vmax.f32 %v4116_v28, %v4148_v1  ;;  %v4213_v52 = vmax.f32 %v4117_v11, %v4149_v23  ;;  %v3910_v42 = vmul.f32 %v9525_v44, %v11009_v6  ;;  %v11017_v47 = vld [vmem:[#allocation101_spill] sm:$0xff]  ;;  %v11018_v11 = vld [vmem:[#allocation104_spill] sm:$0xff]  ;;  %v11019_v22 = vld [vmem:[#allocation115_spill] sm:$0xff] }
 0x634   :  { %v3911_v13 = vmul.f32 %v9525_v44, %v11010_v61  ;;  %v3942_v9 = vmul.f32 %v9525_v44, %v11011_v12  ;;  %v3943_v27 = vmul.f32 %v9525_v44, %v11012_v19  ;;  %v3974_v55 = vmul.f32 %v9525_v44, %v11013_v10 }
 0x635   :  { %v9708_v62 = vpop.eup %5398  ;;  %4488 = vadd.xlane.f32.xlu0 %v4487_v49  ;;  %4727 = vadd.xlane.f32.xlu2 %v4726_v2  ;;  %v4244_v18 = vmax.f32 %v4180_v33, %v4212_v35  ;;  %v4245_v29 = vmax.f32 %v4181_v38, %v4213_v52  ;;  %v3975_v63 = vmul.f32 %v9525_v44, %v11015_v3  ;;  %v11020_v38 = vld [vmem:[#allocation117_spill] sm:$0xff]  ;;  %v11023_v49 = vld [vmem:[#allocation67_spill] sm:$0xff]  ;;  %v11024_v52 = vld [vmem:[#allocation76_spill] sm:$0xff]  ;;  %v9753_v3 = vpop.permute.xlu1 %3861 }
 0x636   :  { %11014 = vst [vmem:[#allocation35_spill] sm:$0xff] %v9708_v62  ;;  %v9712_v17 = vpop.eup %5400  ;;  %v4046_v7 = vadd.f32 %v9535_v25, %v3878_v45  ;;  %v4047_v54 = vadd.f32 %v9535_v25, %v3879_v24  ;;  %v4078_v40 = vadd.f32 %v9535_v25, %v3910_v42  ;;  %v4079_v58 = vadd.f32 %v9535_v25, %v3911_v13  ;;  %v11021_v45 = vld [vmem:[#allocation41_spill] sm:$0xff] }
 0x637   :  { %11016 = vst [vmem:[#allocation26_spill] sm:$0xff] %v9712_v17  ;;  %v4785_v41 = vadd.f32 %v9712_v17, %v9708_v62  ;;  %5402 = vtanh.f32 %v4244_v18  ;;  %v4110_v2 = vadd.f32 %v9535_v25, %v3942_v9  ;;  %v4111_v0 = vadd.f32 %v9535_v25, %v3943_v27 }
 0x638   :  { %5404 = vtanh.f32 %v4245_v29  ;;  %v4142_v44 = vadd.f32 %v9535_v25, %v3974_v55  ;;  %v4143_v4 = vadd.f32 %v9535_v25, %v3975_v63  ;;  %v4174_v30 = vmax.f32 %v4046_v7, %v4078_v40  ;;  %v11022_v25 = vld [vmem:[#allocation69_spill] sm:$0xff] }
 0x639   :  { %v4175_v37 = vmax.f32 %v4047_v54, %v4079_v58  ;;  %v3890_v28 = vmul.f32 %v9676_v14, %v11017_v47  ;;  %v3891_v26 = vmul.f32 %v9676_v14, %v11018_v11  ;;  %v3922_v1 = vmul.f32 %v9676_v14, %v11019_v22  ;;  %v11025_v47 = vld [vmem:[#allocation6_spill] sm:$0xff]  ;;  %v11026_v11 = vld [vmem:[#allocation21_spill] sm:$0xff] }
 0x63a   :  { %v4206_v23 = vmax.f32 %v4110_v2, %v4142_v44  ;;  %v4207_v33 = vmax.f32 %v4111_v0, %v4143_v4  ;;  %v3923_v36 = vmul.f32 %v9676_v14, %v11020_v38  ;;  %v3954_v51 = vmul.f32 %v9676_v14, %v11021_v45  ;;  %v9764_v4 = vpop.permute.xlu0 %4029 }
 0x63b   :  { %v3955_v24 = vmul.f32 %v9676_v14, %v11022_v25  ;;  %v3986_v35 = vmul.f32 %v9676_v14, %v11023_v49  ;;  %v3987_v6 = vmul.f32 %v9676_v14, %v11024_v52  ;;  %v4058_v42 = vadd.f32 %v9722_v50, %v3890_v28 }
 0x63c   :  { %v4238_v61 = vmax.f32 %v4174_v30, %v4206_v23  ;;  %v4239_v13 = vmax.f32 %v4175_v37, %v4207_v33  ;;  %v4059_v12 = vadd.f32 %v9722_v50, %v3891_v26  ;;  %v4090_v9 = vadd.f32 %v9722_v50, %v3922_v1  ;;  %v11027_v1 = vld [vmem:[#allocation42_spill] sm:$0xff] }
 0x63d   :  { %v9745_v19 = vpop.eup %5402  ;;  %4786 = vadd.xlane.f32.xlu0 %v4785_v41  ;;  %v4091_v27 = vadd.f32 %v9722_v50, %v3923_v36  ;;  %v4122_v10 = vadd.f32 %v9722_v50, %v3954_v51  ;;  %v4123_v55 = vadd.f32 %v9722_v50, %v3955_v24  ;;  %v4154_v18 = vadd.f32 %v9722_v50, %v3986_v35  ;;  %v11028_v33 = vld [vmem:[#allocation30_spill] sm:$0xff]  ;;  %v11029_v36 = vld [vmem:[#allocation73_spill] sm:$0xff]  ;;  %v11030_v51 = vld [vmem:[#allocation79_spill] sm:$0xff] }
 0x63e   :  { %v9751_v29 = vpop.eup %5404  ;;  %v4485_v63 = vmul.f32 %v9745_v19, %v9745_v19  ;;  %5406 = vtanh.f32 %v4238_v61  ;;  %v4155_v7 = vadd.f32 %v9722_v50, %v3987_v6  ;;  %v4186_v54 = vmax.f32 %v4058_v42, %v4090_v9  ;;  %v11031_v24 = vld [vmem:[#allocation106_spill] sm:$0xff] }
 0x63f   :  { %v4486_v40 = vmul.f32 %v9751_v29, %v9751_v29  ;;  %5408 = vtanh.f32 %v4239_v13  ;;  %v4187_v58 = vmax.f32 %v4059_v12, %v4091_v27  ;;  %v4218_v41 = vmax.f32 %v4122_v10, %v4154_v18  ;;  %v11032_v35 = vld [vmem:[#allocation82_spill] sm:$0xff] }
 0x640   :  { %v4219_v2 = vmax.f32 %v4123_v55, %v4155_v7  ;;  %v4402_v0 = vmul.f32 %v9628_v15, %v9628_v15  ;;  %v4403_v44 = vmul.f32 %v9634_v48, %v9634_v48  ;;  %v3892_v28 = vmul.f32 %v9753_v3, %v11025_v47 }
 0x641   :  { %v4490_v30 = vadd.f32 %v4486_v40, %v4485_v63  ;;  %v4250_v37 = vmax.f32 %v4186_v54, %v4218_v41  ;;  %v3893_v26 = vmul.f32 %v9753_v3, %v11026_v11  ;;  %v3924_v23 = vmul.f32 %v9753_v3, %v11027_v1  ;;  %v11033_v54 = vld [vmem:[#allocation28_spill] sm:$0xff] }
 0x642   :  { %v4251_v22 = vmax.f32 %v4187_v58, %v4219_v2  ;;  %v3925_v38 = vmul.f32 %v9753_v3, %v11028_v33  ;;  %v3956_v45 = vmul.f32 %v9753_v3, %v11029_v36  ;;  %v3957_v25 = vmul.f32 %v9753_v3, %v11030_v51  ;;  %v11034_v2 = vld [vmem:[#allocation17_spill] sm:$0xff]  ;;  %v11036_v11 = vld [vmem:[#allocation36_spill] sm:$0xff] }
 0x643   :  { %4491 = vadd.xlane.f32.xlu1 %v4490_v30  ;;  %5410 = vtanh.f32 %v4250_v37  ;;  %v3988_v49 = vmul.f32 %v9753_v3, %v11031_v24  ;;  %v3989_v52 = vmul.f32 %v9753_v3, %v11032_v35  ;;  %v4060_v42 = vadd.f32 %v9764_v4, %v3892_v28  ;;  %v11035_v37 = vld [vmem:[#allocation40_spill] sm:$0xff] }
 0x644   :  { %v9782_v6 = vpop.eup %5406  ;;  %5412 = vtanh.f32 %v4251_v22  ;;  %v4061_v61 = vadd.f32 %v9764_v4, %v3893_v26  ;;  %v4092_v13 = vadd.f32 %v9764_v4, %v3924_v23  ;;  %v4093_v9 = vadd.f32 %v9764_v4, %v3925_v38  ;;  %v11037_v22 = vld [vmem:[#allocation68_spill] sm:$0xff]  ;;  %v11038_v23 = vld [vmem:[#allocation50_spill] sm:$0xff] }
 0x645   :  { %v9787_v12 = vpop.eup %5408  ;;  %v4124_v27 = vadd.f32 %v9764_v4, %v3956_v45  ;;  %v4125_v10 = vadd.f32 %v9764_v4, %v3957_v25  ;;  %v4156_v55 = vadd.f32 %v9764_v4, %v3988_v49  ;;  %v4157_v63 = vadd.f32 %v9764_v4, %v3989_v52  ;;  %v11040_v45 = vld [vmem:[#allocation103_spill] sm:$0xff] }
 0x646   :  { %v4712_v18 = vadd.f32 %v9787_v12, %v9782_v6  ;;  %v4188_v7 = vmax.f32 %v4060_v42, %v4092_v13  ;;  %v3888_v40 = vmul.f32 %v9676_v14, %v11033_v54  ;;  %v4189_v58 = vmax.f32 %v4061_v61, %v4093_v9  ;;  %v11041_v25 = vld [vmem:[#allocation71_spill] sm:$0xff] }
 0x647   :  { %v4220_v41 = vmax.f32 %v4124_v27, %v4156_v55  ;;  %v3889_v30 = vmul.f32 %v9676_v14, %v11034_v2  ;;  %v3920_v47 = vmul.f32 %v9676_v14, %v11035_v37  ;;  %v4221_v28 = vmax.f32 %v4125_v10, %v4157_v63 }
 0x648   :  { %4713 = vadd.xlane.f32.xlu2 %v4712_v18  ;;  %v3921_v26 = vmul.f32 %v9676_v14, %v11036_v11  ;;  %v3952_v1 = vmul.f32 %v9676_v14, %v11037_v22  ;;  %v3953_v33 = vmul.f32 %v9676_v14, %v11038_v23  ;;  %v3984_v51 = vmul.f32 %v9676_v14, %v11040_v45 }
 0x649   :  { %v9808_v38 = vpop.eup %5410  ;;  %v4252_v36 = vmax.f32 %v4188_v7, %v4220_v41  ;;  %v3985_v24 = vmul.f32 %v9676_v14, %v11041_v25  ;;  %v4056_v49 = vadd.f32 %v9722_v50, %v3888_v40  ;;  %v4253_v52 = vmax.f32 %v4189_v58, %v4221_v28  ;;  %v11045_v28 = vld [vmem:[#allocation24_spill] sm:$0xff] }
 0x64a   :  { %11039 = vst [vmem:[#allocation48_spill] sm:$0xff] %v9808_v38  ;;  %v9815_v35 = vpop.eup %5412  ;;  %v4057_v42 = vadd.f32 %v9722_v50, %v3889_v30  ;;  %v4088_v61 = vadd.f32 %v9722_v50, %v3920_v47  ;;  %v4089_v13 = vadd.f32 %v9722_v50, %v3921_v26  ;;  %v4120_v27 = vadd.f32 %v9722_v50, %v3952_v1  ;;  %v11046_v1 = vld [vmem:[#allocation27_spill] sm:$0xff] }
 0x64b   :  { %11042 = vst [vmem:[#allocation118_spill] sm:$0xff] %v9815_v35  ;;  %v4855_v9 = vadd.f32 %v9815_v35, %v9808_v38  ;;  %5414 = vtanh.f32 %v4252_v36  ;;  %v4121_v10 = vadd.f32 %v9722_v50, %v3953_v33  ;;  %v4152_v14 = vadd.f32 %v9722_v50, %v3984_v51  ;;  %v11047_v33 = vld [vmem:[#allocation128_spill] sm:$0xff] }
 0x64c   :  { %5416 = vtanh.f32 %v4253_v52  ;;  %v4153_v55 = vadd.f32 %v9722_v50, %v3985_v24  ;;  %v4184_v18 = vmax.f32 %v4056_v49, %v4088_v61  ;;  %v4407_v63 = vadd.f32 %v4403_v44, %v4402_v0  ;;  %v11043_v50 = vld [vmem:[#allocation4_spill] sm:$0xff]  ;;  %v11044_v0 = vld [vmem:[#allocation13_spill] sm:$0xff]  ;;  %v11051_v52 = vld [vmem:[#allocation130_spill] sm:$0xff] }
 0x64d   :  { %4856 = vadd.xlane.f32.xlu1 %v4855_v9  ;;  %v4185_v7 = vmax.f32 %v4057_v42, %v4089_v13  ;;  %v4724_v54 = vmul.f32 %v9782_v6, %v9782_v6  ;;  %v4725_v40 = vmul.f32 %v9787_v12, %v9787_v12  ;;  %v4216_v58 = vmax.f32 %v4120_v27, %v4152_v14  ;;  %v11049_v51 = vld [vmem:[#allocation84_spill] sm:$0xff] }
 0x64e   :  { %v4217_v41 = vmax.f32 %v4121_v10, %v4153_v55  ;;  %v4868_v2 = vmul.f32 %v9808_v38, %v9808_v38  ;;  %v4869_v30 = vmul.f32 %v9815_v35, %v9815_v35  ;;  %v3894_v47 = vmul.f32 %v9753_v3, %v11043_v50  ;;  %v11050_v24 = vld [vmem:[#allocation72_spill] sm:$0xff] }
 0x64f   :  { %v4729_v37 = vadd.f32 %v4725_v40, %v4724_v54  ;;  %v3895_v44 = vmul.f32 %v9753_v3, %v11044_v0  ;;  %v3926_v11 = vmul.f32 %v9753_v3, %v11045_v28  ;;  %v4248_v26 = vmax.f32 %v4184_v18, %v4216_v58  ;;  %v11053_v40 = vld [vmem:[#allocation91_spill] sm:$0xff] }
 0x650   :  { %4408 = vadd.xlane.f32.xlu2 %v4407_v63  ;;  %v4249_v22 = vmax.f32 %v4185_v7, %v4217_v41  ;;  %v3927_v23 = vmul.f32 %v9753_v3, %v11046_v1  ;;  %v3958_v36 = vmul.f32 %v9753_v3, %v11047_v33  ;;  %v3959_v25 = vmul.f32 %v9753_v3, %v11049_v51  ;;  %v11054_v41 = vld [vmem:[#allocation98_spill] sm:$0xff]  ;;  %v11059_v33 = vld [vmem:[#allocation53_spill] sm:$0xff] }
 0x651   :  { %v9844_v45 = vpop.eup %5414  ;;  %v3990_v49 = vmul.f32 %v9753_v3, %v11050_v24  ;;  %v3991_v42 = vmul.f32 %v9753_v3, %v11051_v52  ;;  %v4062_v61 = vadd.f32 %v9764_v4, %v3894_v47  ;;  %5418 = vtanh.f32 %v4248_v26  ;;  %v11055_v47 = vld [vmem:[#allocation116_spill] sm:$0xff]  ;;  %v11058_v1 = vld [vmem:[#allocation74_spill] sm:$0xff]  ;;  %v11060_v51 = vld [vmem:[#allocation77_spill] sm:$0xff] }
 0x652   :  { %11048 = vst [vmem:[#allocation83_spill] sm:$0xff] %v9844_v45  ;;  %v9853_v13 = vpop.eup %5416  ;;  %v4063_v9 = vadd.f32 %v9764_v4, %v3895_v44  ;;  %v4094_v27 = vadd.f32 %v9764_v4, %v3926_v11  ;;  %v4095_v10 = vadd.f32 %v9764_v4, %v3927_v23  ;;  %5420 = vtanh.f32 %v4249_v22  ;;  %v11056_v44 = vld [vmem:[#allocation111_spill] sm:$0xff] }
 0x653   :  { %11052 = vst [vmem:[#allocation58_spill] sm:$0xff] %v9853_v13  ;;  %v4556_v14 = vadd.f32 %v9853_v13, %v9844_v45  ;;  %v4126_v55 = vadd.f32 %v9764_v4, %v3958_v36  ;;  %v4127_v18 = vadd.f32 %v9764_v4, %v3959_v25  ;;  %v4158_v3 = vadd.f32 %v9764_v4, %v3990_v49  ;;  %v11057_v22 = vld [vmem:[#allocation119_spill] sm:$0xff] }
 0x654   :  { %v4159_v63 = vadd.f32 %v9764_v4, %v3991_v42  ;;  %v4190_v7 = vmax.f32 %v4062_v61, %v4094_v27  ;;  %v4191_v54 = vmax.f32 %v4063_v9, %v4095_v10  ;;  %v3882_v58 = vmul.f32 %v9593_v34, %v11053_v40 }
 0x655   :  { %4557 = vadd.xlane.f32.xlu0 %v4556_v14  ;;  %v3883_v50 = vmul.f32 %v9593_v34, %v11054_v41  ;;  %v3914_v0 = vmul.f32 %v9593_v34, %v11055_v47  ;;  %v3915_v28 = vmul.f32 %v9593_v34, %v11056_v44  ;;  %v4222_v11 = vmax.f32 %v4126_v55, %v4158_v3 }
 0x656   :  { %v4223_v26 = vmax.f32 %v4127_v18, %v4159_v63  ;;  %v3946_v4 = vmul.f32 %v9593_v34, %v11057_v22  ;;  %v3947_v23 = vmul.f32 %v9593_v34, %v11058_v1  ;;  %v3978_v36 = vmul.f32 %v9593_v34, %v11059_v33  ;;  %v4297_v1 = vld [vmem:[%s10219_s5 + $0x8] sm:$0xff]  ;;  %v4299_v33 = vld [vmem:[%s10219_s5 + $0x18] sm:$0xff] }
 0x657   :  { %v3979_v25 = vmul.f32 %v9593_v34, %v11060_v51  ;;  %v4050_v24 = vadd.f32 %v9608_v39, %v3882_v58  ;;  %v4051_v49 = vadd.f32 %v9608_v39, %v3883_v50  ;;  %v9882_v52 = vpop.eup %5418  ;;  %v4254_v42 = vmax.f32 %v4190_v7, %v4222_v11 }
 0x658   :  { %4730 = vadd.xlane.f32.xlu2 %v4729_v37  ;;  %v4255_v61 = vmax.f32 %v4191_v54, %v4223_v26  ;;  %v4082_v9 = vadd.f32 %v9608_v39, %v3914_v0  ;;  %v4083_v27 = vadd.f32 %v9608_v39, %v3915_v28  ;;  %v9886_v10 = vpop.eup %5420  ;;  %v4566_v14 = vmul.f32 %v9882_v52, %v9882_v52 }
 0x659   :  { %v4114_v34 = vadd.f32 %v9608_v39, %v3946_v4  ;;  %v4115_v55 = vadd.f32 %v9608_v39, %v3947_v23  ;;  %v4146_v18 = vadd.f32 %v9608_v39, %v3978_v36  ;;  %v4567_v37 = vmul.f32 %v9886_v10, %v9886_v10 }
 0x65a   :  { %5422 = vtanh.f32 %v4254_v42  ;;  %v4147_v3 = vadd.f32 %v9608_v39, %v3979_v25  ;;  %v4178_v63 = vmax.f32 %v4050_v24, %v4082_v9  ;;  %v4872_v7 = vadd.f32 %v4869_v30, %v4868_v2  ;;  %v4300_v24 = vld [vmem:[%s10219_s5 + $0x20] sm:$0xff]  ;;  %v4301_v42 = vld [vmem:[%s10219_s5 + $0x28] sm:$0xff] }
 0x65b   :  { %5424 = vtanh.f32 %v4255_v61  ;;  %v4179_v54 = vmax.f32 %v4051_v49, %v4083_v27  ;;  %v4210_v40 = vmax.f32 %v4114_v34, %v4146_v18  ;;  %v4570_v58 = vadd.f32 %v4567_v37, %v4566_v14  ;;  %v4302_v14 = vld [vmem:[%s10219_s5 + $0x30] sm:$0xff] }
 0x65c   :  { %v4211_v41 = vmax.f32 %v4115_v55, %v4147_v3  ;;  %v4473_v36 = vadd.f32 %v9751_v29, %v9745_v19  ;;  %v4797_v51 = vmul.f32 %v9708_v62, %v9708_v62  ;;  %v4798_v25 = vmul.f32 %v9712_v17, %v9712_v17  ;;  %v4303_v55 = vld [vmem:[%s10219_s5 + $0x38] sm:$0xff] }
 0x65d   :  { %4873 = vadd.xlane.f32.xlu0 %v4872_v7  ;;  %v4242_v50 = vmax.f32 %v4178_v63, %v4210_v40  ;;  %4571 = vadd.xlane.f32.xlu1 %v4570_v58  ;;  %v4553_v18 = vadd.f32 %v9886_v10, %v9882_v52 }
 0x65e   :  { %v4243_v47 = vmax.f32 %v4179_v54, %v4211_v41  ;;  %v4802_v61 = vadd.f32 %v4798_v25, %v4797_v51 }
 0x65f   :  { %5426 = vtanh.f32 %v4242_v50 }
 0x660   :  { %v9896_v0 = vpop.eup %5422  ;;  %5428 = vtanh.f32 %v4243_v47 }
 0x661   :  { %11061 = vst [vmem:[#allocation81_spill] sm:$0xff] %v9896_v0  ;;  %v9898_v44 = vpop.eup %5424  ;;  %v4870_v39 = vmul.f32 %v9896_v0, %v9896_v0 }
 0x662   :  { %11062 = vst [vmem:[#allocation97_spill] sm:$0xff] %v9898_v44  ;;  %v4871_v2 = vmul.f32 %v9898_v44, %v9898_v44  ;;  %v4858_v50 = vadd.f32 %v9898_v44, %v9896_v0 }
 0x664   :  { %v4875_v30 = vadd.f32 %v4871_v2, %v4870_v39 }
 0x665   :  { %v9904_v28 = vpop.eup %5426 }
 0x666   :  { %v9906_v11 = vpop.eup %5428  ;;  %4876 = vadd.xlane.f32.xlu1 %v4875_v30  ;;  %v4795_v22 = vmul.f32 %v9904_v28, %v9904_v28 }
 0x667   :  { %v4782_v26 = vadd.f32 %v9906_v11, %v9904_v28  ;;  %v4796_v4 = vmul.f32 %v9906_v11, %v9906_v11 }
 0x669   :  { %4783 = vadd.xlane.f32.xlu2 %v4782_v26  ;;  %v4799_v23 = vadd.f32 %v4796_v4, %v4795_v22  ;;  %v4568_v4 = vmul.f32 %v9844_v45, %v9844_v45 }
 0x671   :  { %4800 = vadd.xlane.f32.xlu2 %v4799_v23  ;;  %4376 = vperm.xlu0 %5349, %v4297_v1   ;;  %v4569_v1 = vmul.f32 %v9853_v13, %v9853_v13 }
 0x679   :  { %4474 = vadd.xlane.f32.xlu2 %v4473_v36  ;;  %4459 = vperm.xlu0 %5349, %v4299_v33  }
 0x67a   :  { %v4638_v49 = vpop.xlane.xlu2 %4637 }
 0x67f   :  { %4537 = vperm.xlu1 %5347, %v4300_v24   ;;  %v4573_v24 = vadd.f32 %v4569_v1, %v4568_v4  ;;  %v4298_v4 = vld [vmem:[%s10219_s5 + $0x10] sm:$0xff] }
 0x680   :  { %v4306_v9 = vpop.xlane.xlu1 %4305 }
 0x681   :  { %4803 = vadd.xlane.f32.xlu2 %v4802_v61  ;;  %4542 = vperm.xlu0 %5349, %v4301_v42  }
 0x682   :  { %v4323_v27 = vpop.xlane.xlu0 %4322 }
 0x685   :  { %v4309_v34 = vpop.xlane.xlu2 %4308 }
 0x686   :  { %v4310_v37 = vadd.f32 %v4309_v34, %v4306_v9 }
 0x687   :  { %4620 = vperm.xlu1 %5347, %v4302_v14  }
 0x688   :  { %v4311_v54 = vrot.slane %v4310_v37, 4 }
 0x689   :  { %4554 = vadd.xlane.f32.xlu2 %v4553_v18  ;;  %4625 = vperm.xlu0 %5349, %v4303_v55   ;;  %v4641_v3 = vpop.xlane.xlu1 %4640 }
 0x68a   :  { %v4642_v63 = vadd.f32 %v4641_v3, %v4638_v49  ;;  %v4655_v40 = vpop.xlane.xlu0 %4654  ;;  %v4312_v2 = vadd.f32 %v4311_v54, %v4310_v37 }
 0x68c   :  { %v4643_v7 = vrot.slane %v4642_v63, 4  ;;  %v4313_v36 = vrot.slane %v4312_v2, 2 }
 0x68d   :  { %v4658_v58 = vpop.xlane.xlu2 %4657 }
 0x68e   :  { %v4659_v41 = vadd.f32 %v4658_v58, %v4655_v40  ;;  %v4644_v47 = vadd.f32 %v4643_v7, %v4642_v63  ;;  %v4314_v61 = vadd.f32 %v4313_v36, %v4312_v2 }
 0x690   :  { %v4660_v39 = vrot.slane %v4659_v41, 4  ;;  %v4645_v23 = vrot.slane %v4644_v47, 2 }
 0x691   :  { %4859 = vadd.xlane.f32.xlu2 %v4858_v50  ;;  %v4326_v30 = vpop.xlane.xlu1 %4325 }
 0x692   :  { %v4661_v26 = vadd.f32 %v4660_v39, %v4659_v41  ;;  %v4327_v22 = vadd.f32 %v4326_v30, %v4323_v27  ;;  %v4646_v49 = vadd.f32 %v4645_v23, %v4644_v47  ;;  %v4315_v27 = vrot.slane %v4314_v61, 1 }
 0x694   :  { %v4328_v33 = vrot.slane %v4327_v22, 4  ;;  %v4662_v51 = vrot.slane %v4661_v26, 2  ;;  %v4647_v34 = vrot.slane %v4646_v49, 1  ;;  %v4316_v63 = vadd.f32 %v4315_v27, %v4314_v61 }
 0x695   :  { %v4389_v55 = vpop.xlane.xlu2 %4388 }
 0x696   :  { %v4329_v25 = vadd.f32 %v4328_v33, %v4327_v22  ;;  %v4663_v9 = vadd.f32 %v4662_v51, %v4661_v26  ;;  %v4648_v3 = vadd.f32 %v4647_v34, %v4646_v49  ;;  %v9948_v58 = vmul.f32 0.00024414063, %v4316_v63 }
 0x698   :  { %v4330_v42 = vrot.slane %v4329_v25, 2  ;;  %v4664_v18 = vrot.slane %v4663_v9, 1  ;;  %v9946_v40 = vmul.f32 0.00024414063, %v4648_v3  ;;  %v4336_v2 = vmul.f32 %v9948_v58, %v9948_v58 }
 0x699   :  { %4574 = vadd.xlane.f32.xlu2 %v4573_v24  ;;  %v4392_v33 = vpop.xlane.xlu1 %4391 }
 0x69a   :  { %v4331_v14 = vadd.f32 %v4330_v42, %v4329_v25  ;;  %v4665_v7 = vadd.f32 %v4664_v18, %v4663_v9  ;;  %v4668_v39 = vmul.f32 %v9946_v40, %v9946_v40  ;;  %v4393_v51 = vadd.f32 %v4392_v33, %v4389_v55 }
 0x69c   :  { %v4332_v37 = vrot.slane %v4331_v14, 1  ;;  %v4667_v41 = vmul.f32 0.00024414063, %v4665_v7  ;;  %v4394_v61 = vrot.slane %v4393_v51, 4  ;;  %v4406_v7 = vpop.xlane.xlu0 %4405 }
 0x69e   :  { %v4333_v54 = vadd.f32 %v4332_v37, %v4331_v14  ;;  %v4669_v30 = vsub.f32 %v4667_v41, %v4668_v39  ;;  %v4395_v27 = vadd.f32 %v4394_v61, %v4393_v51 }
 0x6a0   :  { %v4335_v50 = vmul.f32 0.00024414063, %v4333_v54  ;;  %v4711_v47 = vpop.xlane.xlu2 %4710  ;;  %v4670_v22 = vadd.f32 1e-05, %v4669_v30 }
 0x6a2   :  { %v4337_v26 = vsub.f32 %v4335_v50, %v4336_v2  ;;  %5430 = vrsqrt.f32 %v4670_v22  ;;  %v4396_v50 = vrot.slane %v4395_v27, 2  ;;  %v4288_v2 = vld [vmem:[%s10222_s4] sm:$0xff]  ;;  %vm4677_vm10 = vweird.f32 %v4670_v22 }
 0x6a4   :  { %v4338_v1 = vadd.f32 1e-05, %v4337_v26 }
 0x6a6   :  { %5432 = vrsqrt.f32 %v4338_v1  ;;  %vm4345_vm12 = vweird.f32 %v4338_v1 }
 0x6a8   :  { %v4728_v23 = vpop.xlane.xlu2 %4727  ;;  %v5431_v36 = vpop.eup %5430 }
 0x6a9   :  { %v4672_v24 = vmul.f32 %v5431_v36, %v4670_v22  ;;  %vm4678_vm8 = vweird.f32 %v5431_v36 }
 0x6aa   :  { %vm4679_vm11 = vmor %vm4677_vm10, %vm4678_vm8 }
 0x6ab   :  { %v4673_v34 = vmul.f32 %v5431_v36, %v4672_v24  ;;  %v4397_v24 = vadd.f32 %v4396_v50, %v4395_v27 }
 0x6ac   :  { %v5433_v25 = vpop.eup %5432 }
 0x6ad   :  { %v4340_v42 = vmul.f32 %v5433_v25, %v4338_v1  ;;  %v4674_v37 = vmul.f32 0.5, %v4673_v34  ;;  %vm4346_vm9 = vweird.f32 %v5433_v25 }
 0x6ae   :  { %vm4347_vm13 = vmor %vm4345_vm12, %vm4346_vm9 }
 0x6af   :  { %v4341_v18 = vmul.f32 %v5433_v25, %v4340_v42  ;;  %v4675_v41 = vsub.f32 1.5, %v4674_v37  ;;  %v4398_v37 = vrot.slane %v4397_v24, 1 }
 0x6b1   :  { %4454 = vperm.xlu2 %5348, %v4298_v4   ;;  %v4342_v63 = vmul.f32 0.5, %v4341_v18  ;;  %v4289_v4 = vld [vmem:[%s10222_s4 + $0x8] sm:$0xff] }
 0x6b3   :  { %v4343_v55 = vsub.f32 1.5, %v4342_v63 }
 0x6b5   :  { %v4344_v33 = vmul.f32 %v5433_v25, %v4343_v55  ;;  %v4472_v55 = vpop.xlane.xlu1 %4471 }
 0x6b7   :  { %v4348_v61 = vsel %vm4347_vm13, %v5433_v25, %v4344_v33 }
 0x6bb   :  { %v4714_v49 = vpop.xlane.xlu2 %4713 }
 0x6bc   :  { %v4715_v9 = vadd.f32 %v4714_v49, %v4711_v47  ;;  %v4676_v47 = vmul.f32 %v5431_v36, %v4675_v41 }
 0x6be   :  { %v4716_v14 = vrot.slane %v4715_v9, 4  ;;  %v4680_v51 = vsel %vm4679_vm11, %v5431_v36, %v4676_v47  ;;  %v4399_v36 = vadd.f32 %v4398_v37, %v4397_v24  ;;  %v4489_v24 = vpop.xlane.xlu0 %4488 }
 0x6bf   :  { %v4685_v42 = vmul.f32 %v4680_v51, %v4288_v2  ;;  %v4686_v50 = vmul.f32 %v4680_v51, %v4289_v4 }
 0x6c0   :  { %v4717_v3 = vadd.f32 %v4716_v14, %v4715_v9  ;;  %v4354_v9 = vmul.f32 %v4348_v61, %v4289_v4  ;;  %v4353_v14 = vmul.f32 %v4348_v61, %v4288_v2 }
 0x6c1   :  { %4689 = vperm.xlu1 %5347, %v4685_v42  }
 0x6c2   :  { %v4718_v30 = vrot.slane %v4717_v3, 2  ;;  %4362 = vperm.xlu0 %5349, %v4354_v9   ;;  %4357 = vperm.xlu2 %5348, %v4353_v14  }
 0x6c3   :  { %v4409_v54 = vpop.xlane.xlu2 %4408 }
 0x6c4   :  { %v4410_v39 = vadd.f32 %v4409_v54, %v4406_v7  ;;  %v4719_v34 = vadd.f32 %v4718_v30, %v4717_v3  ;;  %v9963_v3 = vmul.f32 0.00024414063, %v4399_v36 }
 0x6c6   :  { %v4411_v26 = vrot.slane %v4410_v39, 4  ;;  %v4720_v54 = vrot.slane %v4719_v34, 1 }
 0x6c8   :  { %v4412_v49 = vadd.f32 %v4411_v26, %v4410_v39  ;;  %v4721_v39 = vadd.f32 %v4720_v54, %v4719_v34 }
 0x6ca   :  { %v4413_v18 = vrot.slane %v4412_v49, 2  ;;  %4694 = vperm.xlu0 %5349, %v4686_v50   ;;  %v9965_v30 = vmul.f32 0.00024414063, %v4721_v39 }
 0x6cb   :  { %v4731_v22 = vpop.xlane.xlu2 %4730 }
 0x6cc   :  { %v4414_v63 = vadd.f32 %v4413_v18, %v4412_v49  ;;  %v4732_v7 = vadd.f32 %v4731_v22, %v4728_v23  ;;  %v4492_v49 = vpop.xlane.xlu1 %4491  ;;  %v4419_v23 = vmul.f32 %v9963_v3, %v9963_v3  ;;  %v4741_v4 = vmul.f32 %v9965_v30, %v9965_v30  ;;  %v4787_v22 = vpop.xlane.xlu0 %4786 }
 0x6cd   :  { %v4493_v36 = vadd.f32 %v4492_v49, %v4489_v24 }
 0x6ce   :  { %v4415_v41 = vrot.slane %v4414_v63, 1  ;;  %v4733_v1 = vrot.slane %v4732_v7, 4 }
 0x6d0   :  { %v4734_v27 = vadd.f32 %v4733_v1, %v4732_v7  ;;  %v4416_v25 = vadd.f32 %v4415_v41, %v4414_v63 }
 0x6d2   :  { %v4735_v47 = vrot.slane %v4734_v27, 2  ;;  %v4418_v26 = vmul.f32 0.00024414063, %v4416_v25 }
 0x6d4   :  { %v4736_v2 = vadd.f32 %v4735_v47, %v4734_v27  ;;  %v4420_v61 = vsub.f32 %v4418_v26, %v4419_v23  ;;  %v9971_v37 = vpop.xlane.xlu1 %4856  ;;  %v4558_v26 = vpop.xlane.xlu0 %4557 }
 0x6d6   :  { %v4737_v33 = vrot.slane %v4736_v2, 1  ;;  %v4421_v34 = vadd.f32 1e-05, %v4420_v61 }
 0x6d8   :  { %v4738_v42 = vadd.f32 %v4737_v33, %v4736_v2  ;;  %5434 = vrsqrt.f32 %v4421_v34  ;;  %v4494_v33 = vrot.slane %v4493_v36, 4  ;;  %vm4428_vm0 = vweird.f32 %v4421_v34 }
 0x6da   :  { %v4740_v51 = vmul.f32 0.00024414063, %v4738_v42 }
 0x6dc   :  { %v4742_v9 = vsub.f32 %v4740_v51, %v4741_v4  ;;  %v4784_v14 = vpop.xlane.xlu2 %4783  ;;  %v9973_v39 = vpop.xlane.xlu1 %4571 }
 0x6dd   :  { %v4788_v63 = vadd.f32 %v4787_v22, %v4784_v14  ;;  %v4495_v22 = vadd.f32 %v4494_v33, %v4493_v36  ;;  %v4290_v36 = vld [vmem:[%s10222_s4 + $0x10] sm:$0xff] }
 0x6de   :  { %v4743_v18 = vadd.f32 1e-05, %v4742_v9  ;;  %v5435_v41 = vpop.eup %5434 }
 0x6df   :  { %v4789_v54 = vrot.slane %v4788_v63, 4  ;;  %v4423_v50 = vmul.f32 %v5435_v41, %v4421_v34  ;;  %vm4429_vm14 = vweird.f32 %v5435_v41  ;;  %v4496_v33 = vrot.slane %v4495_v22, 2 }
 0x6e0   :  { %5436 = vrsqrt.f32 %v4743_v18  ;;  %vm4430_vm1 = vmor %vm4428_vm0, %vm4429_vm14  ;;  %vm4750_vm2 = vweird.f32 %v4743_v18 }
 0x6e1   :  { %v4790_v27 = vadd.f32 %v4789_v54, %v4788_v63  ;;  %v4424_v61 = vmul.f32 %v5435_v41, %v4423_v50  ;;  %v4497_v45 = vadd.f32 %v4496_v33, %v4495_v22 }
 0x6e3   :  { %v4791_v23 = vrot.slane %v4790_v27, 2  ;;  %v4425_v9 = vmul.f32 0.5, %v4424_v61 }
 0x6e4   :  { %v4801_v7 = vpop.xlane.xlu2 %4800 }
 0x6e5   :  { %v4792_v17 = vadd.f32 %v4791_v23, %v4790_v27  ;;  %v4426_v63 = vsub.f32 1.5, %v4425_v9  ;;  %v4874_v23 = vpop.xlane.xlu0 %4873 }
 0x6e6   :  { %v5437_v1 = vpop.eup %5436 }
 0x6e7   :  { %v4745_v25 = vmul.f32 %v5437_v1, %v4743_v18  ;;  %vm4751_vm15 = vweird.f32 %v5437_v1  ;;  %v4427_v50 = vmul.f32 %v5435_v41, %v4426_v63 }
 0x6e8   :  { %vm4752_vm3 = vmor %vm4750_vm2, %vm4751_vm15 }
 0x6e9   :  { %v4746_v4 = vmul.f32 %v5437_v1, %v4745_v25  ;;  %v4793_v25 = vrot.slane %v4792_v17, 1  ;;  %v4431_v34 = vsel %vm4430_vm1, %v5435_v41, %v4427_v50 }
 0x6eb   :  { %v4747_v14 = vmul.f32 0.5, %v4746_v4  ;;  %v4794_v63 = vadd.f32 %v4793_v25, %v4792_v17 }
 0x6ec   :  { %v4475_v47 = vpop.xlane.xlu2 %4474 }
 0x6ed   :  { %v4476_v2 = vadd.f32 %v4475_v47, %v4472_v55  ;;  %v4748_v54 = vsub.f32 1.5, %v4747_v14  ;;  %v4877_v55 = vpop.xlane.xlu1 %4876  ;;  %v4291_v47 = vld [vmem:[%s10222_s4 + $0x18] sm:$0xff]  ;;  %v4436_v14 = vmul.f32 %v4431_v34, %v4290_v36  ;;  %v9981_v38 = vmul.f32 0.00024414063, %v4794_v63 }
 0x6ee   :  { %v4878_v61 = vadd.f32 %v4877_v55, %v4874_v23  ;;  %v4437_v9 = vmul.f32 %v4431_v34, %v4291_v47 }
 0x6ef   :  { %v4477_v42 = vrot.slane %v4476_v2, 4  ;;  %v4749_v27 = vmul.f32 %v5437_v1, %v4748_v54  ;;  %4440 = vperm.xlu1 %5347, %v4436_v14  }
 0x6f0   :  { %4445 = vperm.xlu0 %5349, %v4437_v9   ;;  %v4879_v44 = vrot.slane %v4878_v61, 4 }
 0x6f1   :  { %v4478_v51 = vadd.f32 %v4477_v42, %v4476_v2  ;;  %v4753_v42 = vsel %vm4752_vm3, %v5437_v1, %v4749_v27 }
 0x6f2   :  { %v4880_v55 = vadd.f32 %v4879_v44, %v4878_v61 }
 0x6f3   :  { %v4479_v49 = vrot.slane %v4478_v51, 2 }
 0x6f4   :  { %v4804_v24 = vpop.xlane.xlu2 %4803 }
 0x6f5   :  { %v4805_v62 = vadd.f32 %v4804_v24, %v4801_v7  ;;  %v4480_v7 = vadd.f32 %v4479_v49, %v4478_v51  ;;  %v4758_v24 = vmul.f32 %v4753_v42, %v4290_v36  ;;  %v4759_v51 = vmul.f32 %v4753_v42, %v4291_v47 }
 0x6f6   :  { %v4814_v36 = vmul.f32 %v9981_v38, %v9981_v38 }
 0x6f7   :  { %v4806_v2 = vrot.slane %v4805_v62, 4  ;;  %v4481_v54 = vrot.slane %v4480_v7, 1  ;;  %4762 = vperm.xlu2 %5348, %v4758_v24  }
 0x6f8   :  { %4767 = vperm.xlu0 %5349, %v4759_v51  }
 0x6f9   :  { %v4807_v4 = vadd.f32 %v4806_v2, %v4805_v62  ;;  %v4498_v62 = vrot.slane %v4497_v45, 1  ;;  %v4482_v49 = vadd.f32 %v4481_v54, %v4480_v7 }
 0x6fb   :  { %v4808_v13 = vrot.slane %v4807_v4, 2  ;;  %v4499_v27 = vadd.f32 %v4498_v62, %v4497_v45  ;;  %v9985_v25 = vmul.f32 0.00024414063, %v4482_v49 }
 0x6fc   :  { %v4555_v18 = vpop.xlane.xlu2 %4554 }
 0x6fd   :  { %v4809_v0 = vadd.f32 %v4808_v13, %v4807_v4  ;;  %v4559_v35 = vadd.f32 %v4558_v26, %v4555_v18  ;;  %v4881_v26 = vrot.slane %v4880_v55, 2  ;;  %v4501_v7 = vmul.f32 0.00024414063, %v4499_v27 }
 0x6ff   :  { %v4810_v41 = vrot.slane %v4809_v0, 1  ;;  %v4560_v1 = vrot.slane %v4559_v35, 4 }
 0x701   :  { %v4811_v50 = vadd.f32 %v4810_v41, %v4809_v0  ;;  %v4561_v17 = vadd.f32 %v4560_v1, %v4559_v35  ;;  %v4502_v35 = vmul.f32 %v9985_v25, %v9985_v25  ;;  %v4882_v0 = vadd.f32 %v4881_v26, %v4880_v55 }
 0x703   :  { %v4813_v22 = vmul.f32 0.00024414063, %v4811_v50  ;;  %v4562_v23 = vrot.slane %v4561_v17, 2  ;;  %v4503_v61 = vsub.f32 %v4501_v7, %v4502_v35  ;;  %v4883_v14 = vrot.slane %v4882_v0, 1 }
 0x704   :  { %v4860_v13 = vpop.xlane.xlu2 %4859 }
 0x705   :  { %v4815_v2 = vsub.f32 %v4813_v22, %v4814_v36  ;;  %v4861_v33 = vadd.f32 %v4860_v13, %v9971_v37  ;;  %v4563_v42 = vadd.f32 %v4562_v23, %v4561_v17  ;;  %v4504_v9 = vadd.f32 1e-05, %v4503_v61 }
 0x706   :  { %v4884_v51 = vadd.f32 %v4883_v14, %v4882_v0  ;;  %v4292_v14 = vld [vmem:[%s10222_s4 + $0x20] sm:$0xff] }
 0x707   :  { %v4816_v47 = vadd.f32 1e-05, %v4815_v2  ;;  %v4862_v34 = vrot.slane %v4861_v33, 4  ;;  %v4564_v37 = vrot.slane %v4563_v42, 1  ;;  %vm4511_vm8 = vweird.f32 %v4504_v9 }
 0x708   :  { %v4886_v13 = vmul.f32 0.00024414063, %v4884_v51 }
 0x709   :  { %5438 = vrsqrt.f32 %v4816_v47  ;;  %v4863_v44 = vadd.f32 %v4862_v34, %v4861_v33  ;;  %v4565_v55 = vadd.f32 %v4564_v37, %v4563_v42  ;;  %v9997_v34 = vpop.permute.xlu0 %4376  ;;  %vm4823_vm5 = vweird.f32 %v4816_v47 }
 0x70a   :  { %5440 = vrsqrt.f32 %v4504_v9 }
 0x70b   :  { %v4864_v45 = vrot.slane %v4863_v44, 2  ;;  %v9995_v33 = vmul.f32 0.00024414063, %v4565_v55 }
 0x70c   :  { %v4575_v4 = vpop.xlane.xlu2 %4574 }
 0x70d   :  { %v4865_v24 = vadd.f32 %v4864_v45, %v4863_v44  ;;  %v4576_v63 = vadd.f32 %v4575_v4, %v9973_v39  ;;  %v4585_v4 = vmul.f32 %v9995_v33, %v9995_v33 }
 0x70f   :  { %v5439_v54 = vpop.eup %5438  ;;  %v4866_v18 = vrot.slane %v4865_v24, 1  ;;  %v4577_v41 = vrot.slane %v4576_v63, 4 }
 0x710   :  { %v4818_v1 = vmul.f32 %v5439_v54, %v4816_v47  ;;  %v5441_v22 = vpop.eup %5440  ;;  %vm4824_vm4 = vweird.f32 %v5439_v54  ;;  %v4293_v47 = vld [vmem:[%s10222_s4 + $0x28] sm:$0xff] }
 0x711   :  { %v4867_v62 = vadd.f32 %v4866_v18, %v4865_v24  ;;  %v4578_v49 = vadd.f32 %v4577_v41, %v4576_v63  ;;  %v4506_v2 = vmul.f32 %v5441_v22, %v4504_v9  ;;  %vm4825_vm6 = vmor %vm4823_vm5, %vm4824_vm4  ;;  %vm4512_vm7 = vweird.f32 %v5441_v22 }
 0x712   :  { %v4819_v50 = vmul.f32 %v5439_v54, %v4818_v1  ;;  %vm4513_vm9 = vmor %vm4511_vm8, %vm4512_vm7 }
 0x713   :  { %v9991_v17 = vmul.f32 0.00024414063, %v4867_v62  ;;  %v4579_v36 = vrot.slane %v4578_v49, 2  ;;  %v4507_v35 = vmul.f32 %v5441_v22, %v4506_v2 }
 0x714   :  { %v4820_v27 = vmul.f32 0.5, %v4819_v50  ;;  %v10004_v1 = vpop.permute.xlu2 %4454 }
 0x715   :  { %v4580_v26 = vadd.f32 %v4579_v36, %v4578_v49  ;;  %v4887_v39 = vmul.f32 %v9991_v17, %v9991_v17  ;;  %v4508_v61 = vmul.f32 0.5, %v4507_v35  ;;  %v10009_v36 = vpop.permute.xlu0 %4459 }
 0x716   :  { %v4821_v23 = vsub.f32 1.5, %v4820_v27 }
 0x717   :  { %v4581_v7 = vrot.slane %v4580_v26, 1  ;;  %v4888_v0 = vsub.f32 %v4886_v13, %v4887_v39  ;;  %v4509_v37 = vsub.f32 1.5, %v4508_v61  ;;  %v4349_v13 = vsub.f32 %v9491_v31, %v9948_v58  ;;  %v4295_v31 = vld [vmem:[%s10222_s4 + $0x38] sm:$0xff] }
 0x718   :  { %v4822_v44 = vmul.f32 %v5439_v54, %v4821_v23 }
 0x719   :  { %v4582_v42 = vadd.f32 %v4581_v7, %v4580_v26  ;;  %v4889_v45 = vadd.f32 1e-05, %v4888_v0  ;;  %v4510_v51 = vmul.f32 %v5441_v22, %v4509_v37  ;;  %v4350_v26 = vsub.f32 %v9497_v46, %v9948_v58  ;;  %v11063_v0 = vld [vmem:[#allocation129_spill] sm:$0xff] }
 0x71a   :  { %v4826_v24 = vsel %vm4825_vm6, %v5439_v54, %v4822_v44 }
 0x71b   :  { %v4584_v63 = vmul.f32 0.00024414063, %v4582_v42  ;;  %v4831_v18 = vmul.f32 %v4826_v24, %v4292_v14  ;;  %5442 = vrsqrt.f32 %v4889_v45  ;;  %v4514_v49 = vsel %vm4513_vm9, %v5441_v22, %v4510_v51 }
 0x71c   :  { %v4520_v55 = vmul.f32 %v4514_v49, %v4293_v47  ;;  %v4519_v50 = vmul.f32 %v4514_v49, %v4292_v14  ;;  %v4358_v2 = vpop.permute.xlu2 %4357  ;;  %vm4896_vm11 = vweird.f32 %v4889_v45 }
 0x71d   :  { %v4586_v41 = vsub.f32 %v4584_v63, %v4585_v4  ;;  %4835 = vperm.xlu1 %5347, %v4831_v18   ;;  %v4365_v39 = vmul.f32 %v4358_v2, %v4349_v13  ;;  %v4366_v23 = vmul.f32 %v4358_v2, %v4350_v26  ;;  %v10017_v4 = vpop.permute.xlu1 %4537  ;;  %v10025_v63 = vpop.permute.xlu0 %4542  ;;  %v4681_v2 = vsub.f32 %v9467_v59, %v9946_v40 }
 0x71e   :  { %4528 = vperm.xlu0 %5349, %v4520_v55   ;;  %4523 = vperm.xlu2 %5348, %v4519_v50  }
 0x71f   :  { %v4587_v62 = vadd.f32 1e-05, %v4586_v41  ;;  %v4379_v44 = vadd.f32 %v11063_v0, %v4365_v39  ;;  %v4380_v42 = vadd.f32 %v11063_v0, %v4366_v23  ;;  %v4351_v39 = vsub.f32 %v9517_v56, %v9948_v58 }
 0x720   :  { %v4352_v23 = vsub.f32 %v9523_v21, %v9948_v58  ;;  %v4683_v56 = vsub.f32 %v9545_v16, %v9946_v40  ;;  %v4684_v21 = vsub.f32 %v9549_v43, %v9946_v40  ;;  %v4754_v16 = vsub.f32 %v9656_v60, %v9965_v30 }
 0x721   :  { %v5443_v54 = vpop.eup %5442  ;;  %5444 = vrsqrt.f32 %v4587_v62  ;;  %4383 = vst [vmem:[%s10223_s6] sm:$0xff] %v4379_v44  ;;  %vm4594_vm14 = vweird.f32 %v4587_v62  ;;  %v4755_v43 = vsub.f32 %v9658_v57, %v9965_v30  ;;  %v4434_v60 = vsub.f32 %v9628_v15, %v9963_v3 }
 0x722   :  { %v4891_v27 = vmul.f32 %v5443_v54, %v4889_v45  ;;  %vm4897_vm10 = vweird.f32 %v5443_v54  ;;  %4384 = vst [vmem:[%s10223_s6 + $0x8] sm:$0xff] %v4380_v42  ;;  %v4294_v45 = vld [vmem:[%s10222_s4 + $0x30] sm:$0xff]  ;;  %v4435_v57 = vsub.f32 %v9634_v48, %v9963_v3 }
 0x723   :  { %vm4898_vm12 = vmor %vm4896_vm11, %vm4897_vm10 }
 0x724   :  { %v4892_v9 = vmul.f32 %v5443_v54, %v4891_v27 }
 0x725   :  { %v10033_v13 = vpop.permute.xlu1 %4620  ;;  %v10035_v26 = vpop.permute.xlu0 %4625 }
 0x726   :  { %v4893_v22 = vmul.f32 0.5, %v4892_v9 }
 0x727   :  { %v5445_v7 = vpop.eup %5444 }
 0x728   :  { %v4589_v35 = vmul.f32 %v5445_v7, %v4587_v62  ;;  %v4894_v61 = vsub.f32 1.5, %v4893_v22  ;;  %vm4595_vm13 = vweird.f32 %v5445_v7  ;;  %v4682_v62 = vsub.f32 %v9472_v8, %v9946_v40 }
 0x729   :  { %vm4596_vm15 = vmor %vm4594_vm14, %vm4595_vm13 }
 0x72a   :  { %v4895_v46 = vmul.f32 %v5443_v54, %v4894_v61  ;;  %v4590_v14 = vmul.f32 %v5445_v7, %v4589_v35 }
 0x72c   :  { %v4899_v37 = vsel %vm4898_vm12, %v5443_v54, %v4895_v46  ;;  %v4591_v18 = vmul.f32 0.5, %v4590_v14  ;;  %v4832_v54 = vmul.f32 %v4826_v24, %v4293_v47 }
 0x72d   :  { %v4905_v41 = vmul.f32 %v4899_v37, %v4295_v31  ;;  %v4904_v9 = vmul.f32 %v4899_v37, %v4294_v45 }
 0x72e   :  { %v4592_v51 = vsub.f32 1.5, %v4591_v18 }
 0x72f   :  { %4913 = vperm.xlu1 %5347, %v4905_v41  }
 0x730   :  { %v4593_v49 = vmul.f32 %v5445_v7, %v4592_v51  ;;  %v4432_v51 = vsub.f32 %v9586_v53, %v9963_v3  ;;  %v4756_v53 = vsub.f32 %v9782_v6, %v9965_v30  ;;  %v4515_v6 = vsub.f32 %v9684_v5, %v9985_v25 }
 0x731   :  { %v4598_v5 = vsub.f32 %v9882_v52, %v9995_v33 }
 0x732   :  { %v4597_v55 = vsel %vm4596_vm15, %v5445_v7, %v4593_v49  ;;  %v4433_v49 = vsub.f32 %v9591_v20, %v9963_v3  ;;  %v4757_v20 = vsub.f32 %v9787_v12, %v9965_v30  ;;  %v4516_v12 = vsub.f32 %v9686_v32, %v9985_v25 }
 0x733   :  { %v4603_v50 = vmul.f32 %v4597_v55, %v4295_v31  ;;  %v4602_v27 = vmul.f32 %v4597_v55, %v4294_v45  ;;  %v4690_v22 = vpop.permute.xlu1 %4689  ;;  %v4599_v32 = vsub.f32 %v9886_v10, %v9995_v33  ;;  %v4517_v10 = vsub.f32 %v9745_v19, %v9985_v25  ;;  %v11064_v19 = vld [vmem:[#allocation48_spill] sm:$0xff] }
 0x734   :  { %v4363_v7 = vpop.permute.xlu0 %4362  ;;  %v4697_v35 = vmul.f32 %v4690_v22, %v4681_v2  ;;  %v4698_v44 = vmul.f32 %v4690_v22, %v4682_v62 }
 0x735   :  { %4611 = vperm.xlu0 %5349, %v4603_v50   ;;  %4606 = vperm.xlu2 %5348, %v4602_v27   ;;  %v4367_v24 = vmul.f32 %v4363_v7, %v4351_v39  ;;  %v4368_v47 = vmul.f32 %v4363_v7, %v4352_v23 }
 0x736   :  { %v4701_v42 = vadd.f32 %v4697_v35, %v11063_v0  ;;  %v4702_v61 = vadd.f32 %v4698_v44, %v11063_v0 }
 0x737   :  { %v4381_v59 = vadd.f32 %v9997_v34, %v4367_v24  ;;  %v4382_v8 = vadd.f32 %v9997_v34, %v4368_v47  ;;  %v4827_v24 = vsub.f32 %v9904_v28, %v9981_v38  ;;  %v4828_v47 = vsub.f32 %v9906_v11, %v9981_v38 }
 0x738   :  { %4705 = vst [vmem:[%s10223_s6 + $0x80] sm:$0xff] %v4701_v42  ;;  %v4518_v28 = vsub.f32 %v9751_v29, %v9985_v25  ;;  %v4900_v29 = vsub.f32 %v11064_v19, %v9991_v17  ;;  %v11065_v25 = vld [vmem:[#allocation118_spill] sm:$0xff] }
 0x739   :  { %4385 = vst [vmem:[%s10223_s6 + $0x10] sm:$0xff] %v4381_v59 }
 0x73a   :  { %4386 = vst [vmem:[%s10223_s6 + $0x18] sm:$0xff] %v4382_v8 }
 0x73b   :  { %4706 = vst [vmem:[%s10223_s6 + $0x88] sm:$0xff] %v4702_v61 }
 0x73c   :  { %v4695_v58 = vpop.permute.xlu0 %4694 }
 0x73d   :  { %4840 = vperm.xlu0 %5349, %v4832_v54   ;;  %4908 = vperm.xlu2 %5348, %v4904_v9   ;;  %v4699_v0 = vmul.f32 %v4695_v58, %v4683_v56  ;;  %v4700_v31 = vmul.f32 %v4695_v58, %v4684_v21 }
 0x73f   :  { %v4703_v46 = vadd.f32 %v4699_v0, %v9997_v34  ;;  %v4704_v14 = vadd.f32 %v4700_v31, %v9997_v34 }
 0x741   :  { %4707 = vst [vmem:[%s10223_s6 + $0x90] sm:$0xff] %v4703_v46 }
 0x742   :  { %4708 = vst [vmem:[%s10223_s6 + $0x98] sm:$0xff] %v4704_v14 }
 0x751   :  { %v4763_v40 = vpop.permute.xlu2 %4762 }
 0x752   :  { %v4770_v37 = vmul.f32 %v4763_v40, %v4754_v16  ;;  %v4771_v18 = vmul.f32 %v4763_v40, %v4755_v43 }
 0x754   :  { %v4774_v41 = vadd.f32 %v4770_v37, %v10004_v1  ;;  %v4775_v34 = vadd.f32 %v4771_v18, %v10004_v1 }
 0x756   :  { %4778 = vst [vmem:[%s10223_s6 + $0xa0] sm:$0xff] %v4774_v41 }
 0x757   :  { %4779 = vst [vmem:[%s10223_s6 + $0xa8] sm:$0xff] %v4775_v34 }
 0x761   :  { %v4441_v45 = vpop.permute.xlu1 %4440 }
 0x762   :  { %v4446_v55 = vpop.permute.xlu0 %4445  ;;  %v4448_v54 = vmul.f32 %v4441_v45, %v4432_v51  ;;  %v4449_v9 = vmul.f32 %v4441_v45, %v4433_v49  ;;  %v11067_v51 = vld [vmem:[#allocation97_spill] sm:$0xff] }
 0x763   :  { %v4450_v50 = vmul.f32 %v4446_v55, %v4434_v60  ;;  %v4451_v27 = vmul.f32 %v4446_v55, %v4435_v57  ;;  %v11066_v60 = vld [vmem:[#allocation81_spill] sm:$0xff]  ;;  %v4903_v49 = vsub.f32 %v11067_v51, %v9991_v17 }
 0x764   :  { %v4462_v15 = vadd.f32 %v10004_v1, %v4448_v54  ;;  %v4463_v48 = vadd.f32 %v10004_v1, %v4449_v9  ;;  %v4902_v57 = vsub.f32 %v11066_v60, %v9991_v17  ;;  %v11068_v54 = vld [vmem:[#allocation83_spill] sm:$0xff] }
 0x765   :  { %v4464_v2 = vadd.f32 %v10009_v36, %v4450_v50  ;;  %v4465_v62 = vadd.f32 %v10009_v36, %v4451_v27  ;;  %v4600_v9 = vsub.f32 %v11068_v54, %v9995_v33 }
 0x766   :  { %4466 = vst [vmem:[%s10223_s6 + $0x20] sm:$0xff] %v4462_v15 }
 0x767   :  { %4468 = vst [vmem:[%s10223_s6 + $0x30] sm:$0xff] %v4464_v2  ;;  %v11069_v2 = vld [vmem:[#allocation58_spill] sm:$0xff] }
 0x768   :  { %4469 = vst [vmem:[%s10223_s6 + $0x38] sm:$0xff] %v4465_v62  ;;  %v4601_v62 = vsub.f32 %v11069_v2, %v9995_v33  ;;  %v11070_v33 = vld [vmem:[#allocation35_spill] sm:$0xff] }
 0x769   :  { %4467 = vst [vmem:[%s10223_s6 + $0x28] sm:$0xff] %v4463_v48 }
 0x76a   :  { %v4768_v3 = vpop.permute.xlu0 %4767 }
 0x76b   :  { %v4772_v1 = vmul.f32 %v4768_v3, %v4756_v53  ;;  %v4773_v39 = vmul.f32 %v4768_v3, %v4757_v20  ;;  %v4829_v3 = vsub.f32 %v11070_v33, %v9981_v38 }
 0x76d   :  { %v4776_v23 = vadd.f32 %v4772_v1, %v10009_v36  ;;  %v4777_v22 = vadd.f32 %v4773_v39, %v10009_v36  ;;  %v11071_v1 = vld [vmem:[#allocation26_spill] sm:$0xff] }
 0x76e   :  { %v4830_v39 = vsub.f32 %v11071_v1, %v9981_v38 }
 0x76f   :  { %4780 = vst [vmem:[%s10223_s6 + $0xb0] sm:$0xff] %v4776_v23 }
 0x770   :  { %4781 = vst [vmem:[%s10223_s6 + $0xb8] sm:$0xff] %v4777_v22 }
 0x778   :  { %v4524_v30 = vpop.permute.xlu2 %4523 }
 0x779   :  { %v4531_v7 = vmul.f32 %v4524_v30, %v4515_v6  ;;  %v4532_v35 = vmul.f32 %v4524_v30, %v4516_v12 }
 0x77b   :  { %v4545_v44 = vadd.f32 %v10017_v4, %v4531_v7  ;;  %v4546_v36 = vadd.f32 %v10017_v4, %v4532_v35 }
 0x77d   :  { %4549 = vst [vmem:[%s10223_s6 + $0x40] sm:$0xff] %v4545_v44 }
 0x77e   :  { %4550 = vst [vmem:[%s10223_s6 + $0x48] sm:$0xff] %v4546_v36 }
 0x78f   :  { %v4607_v42 = vpop.permute.xlu2 %4606  ;;  %v4836_v59 = vpop.permute.xlu1 %4835 }
 0x790   :  { %v4614_v8 = vmul.f32 %v4607_v42, %v4598_v5  ;;  %v4615_v61 = vmul.f32 %v4607_v42, %v4599_v32  ;;  %v4843_v56 = vmul.f32 %v4836_v59, %v4827_v24  ;;  %v4844_v21 = vmul.f32 %v4836_v59, %v4828_v47  ;;  %v4529_v31 = vpop.permute.xlu0 %4528 }
 0x791   :  { %v4533_v46 = vmul.f32 %v4529_v31, %v4517_v10  ;;  %v4534_v14 = vmul.f32 %v4529_v31, %v4518_v28 }
 0x792   :  { %v4628_v58 = vadd.f32 %v10033_v13, %v4614_v8  ;;  %v4629_v0 = vadd.f32 %v10033_v13, %v4615_v61  ;;  %v4847_v52 = vadd.f32 %v4843_v56, %v10017_v4  ;;  %v4848_v11 = vadd.f32 %v4844_v21, %v10017_v4 }
 0x793   :  { %v4901_v4 = vsub.f32 %v11065_v25, %v9991_v17  ;;  %v4547_v16 = vadd.f32 %v10025_v63, %v4533_v46  ;;  %v4548_v43 = vadd.f32 %v10025_v63, %v4534_v14 }
 0x794   :  { %4632 = vst [vmem:[%s10223_s6 + $0x60] sm:$0xff] %v4628_v58 }
 0x795   :  { %4633 = vst [vmem:[%s10223_s6 + $0x68] sm:$0xff] %v4629_v0 }
 0x796   :  { %4851 = vst [vmem:[%s10223_s6 + $0xc0] sm:$0xff] %v4847_v52 }
 0x797   :  { %4852 = vst [vmem:[%s10223_s6 + $0xc8] sm:$0xff] %v4848_v11  ;;  %v4909_v40 = vpop.permute.xlu2 %4908 }
 0x798   :  { %v4916_v37 = vmul.f32 %v4909_v40, %v4900_v29  ;;  %v4917_v18 = vmul.f32 %v4909_v40, %v4901_v4  ;;  %4551 = vst [vmem:[%s10223_s6 + $0x50] sm:$0xff] %v4547_v16 }
 0x799   :  { %4552 = vst [vmem:[%s10223_s6 + $0x58] sm:$0xff] %v4548_v43 }
 0x79a   :  { %v4920_v41 = vadd.f32 %v4916_v37, %v10033_v13  ;;  %v4921_v34 = vadd.f32 %v4917_v18, %v10033_v13 }
 0x79c   :  { %4924 = vst [vmem:[%s10223_s6 + $0xe0] sm:$0xff] %v4920_v41 }
 0x79d   :  { %4925 = vst [vmem:[%s10223_s6 + $0xe8] sm:$0xff] %v4921_v34 }
 0x7a1   :  { %v4914_v55 = vpop.permute.xlu1 %4913 }
 0x7a2   :  { %v4918_v45 = vmul.f32 %v4914_v55, %v4902_v57  ;;  %v4919_v50 = vmul.f32 %v4914_v55, %v4903_v49 }
 0x7a4   :  { %v4922_v27 = vadd.f32 %v4918_v45, %v10035_v26  ;;  %v4923_v13 = vadd.f32 %v4919_v50, %v10035_v26 }
 0x7a6   :  { %4926 = vst [vmem:[%s10223_s6 + $0xf0] sm:$0xff] %v4922_v27 }
 0x7a7   :  { %4927 = vst [vmem:[%s10223_s6 + $0xf8] sm:$0xff] %v4923_v13  ;;  %v4612_v17 = vpop.permute.xlu0 %4611 }
 0x7a8   :  { %v4616_v15 = vmul.f32 %v4612_v17, %v4600_v9  ;;  %v4617_v48 = vmul.f32 %v4612_v17, %v4601_v62 }
 0x7aa   :  { %v4630_v53 = vadd.f32 %v10035_v26, %v4616_v15  ;;  %v4631_v20 = vadd.f32 %v10035_v26, %v4617_v48 }
 0x7ac   :  { %4634 = vst [vmem:[%s10223_s6 + $0x70] sm:$0xff] %v4630_v53 }
 0x7ad   :  { %4635 = vst [vmem:[%s10223_s6 + $0x78] sm:$0xff] %v4631_v20 }
 0x7af   :  { %v4841_v23 = vpop.permute.xlu0 %4840 }
 0x7b0   :  { %v4845_v22 = vmul.f32 %v4841_v23, %v4829_v3  ;;  %v4846_v6 = vmul.f32 %v4841_v23, %v4830_v39 }
 0x7b2   :  { %v4849_v12 = vadd.f32 %v4845_v22, %v10025_v63  ;;  %v4850_v26 = vadd.f32 %v4846_v6, %v10025_v63 }
 0x7b4   :  { %4853 = vst [vmem:[%s10223_s6 + $0xd0] sm:$0xff] %v4849_v12 }
 0x7b5   :  { %4854 = vst [vmem:[%s10223_s6 + $0xd8] sm:$0xff] %v4850_v26 }

</bundles_post_ra>
